<compile_context>
chip_gen: v6e
topology: v6e:2x2x1
jax: 0.10.0
libtpu: 0.0.40
codegen_flags: <defaults>
</compile_context>

<pallas_src>
import functools

import jax
import jax.numpy as jnp
from jax.experimental import pallas as pl
from jax.experimental.pallas import tpu as pltpu


# ----------------------------------------------------------------------------
# Tile-size helpers (static, Python ints).  Budget keeps one input block well
# under the default scoped-VMEM limit on every generation (v7x has 64 MiB
# physical / 32 MiB default scoped; v5e scoped default is 16 MiB).
# ----------------------------------------------------------------------------
_TILE_BUDGET_BYTES = 4 << 20


def _choose_row_tile(m, row_bytes, budget_bytes=_TILE_BUDGET_BYTES):
    """Largest power-of-two row tile (multiple of 8) dividing m within budget."""
    cap = max(1, budget_bytes // max(int(row_bytes), 1))
    if m <= cap:
        return m
    tm = 1 << (cap.bit_length() - 1)
    tm = max(tm, 8)
    while tm >= 8 and m % tm != 0:
        tm //= 2
    return tm if (tm >= 8 and m % tm == 0) else m


def _choose_col_tile(l, col_bytes, budget_bytes=_TILE_BUDGET_BYTES):
    """Largest power-of-two column tile (multiple of 128) dividing l within budget."""
    cap = max(1, budget_bytes // max(int(col_bytes), 1))
    if l <= cap:
        return l
    tl = 1 << (cap.bit_length() - 1)
    tl = max(tl, 128)
    while tl >= 128 and l % tl != 0:
        tl //= 2
    return tl if (tl >= 128 and l % tl == 0) else l


# ----------------------------------------------------------------------------
# Pallas kernels
# ----------------------------------------------------------------------------
def _matmul_rows_kernel(x_ref, m_ref, o_ref):
    """o = x @ m  (no bias).  Used for the W-axis resize pass."""
    o_ref[...] = jnp.dot(x_ref[...], m_ref[...],
                         preferred_element_type=jnp.float32)


def _left_matmul_kernel(m_ref, x_ref, o_ref):
    """o = m @ x  (contract the leading axis of the block).  H/D resize passes."""
    o_ref[...] = jnp.dot(m_ref[...], x_ref[...],
                         preferred_element_type=jnp.float32)


def _embed_ln_kernel(x_ref, w_ref, b_ref, g_ref, be_ref, o_ref):
    """Fused patch-embed projection (K = C_in*8, memory bound) + LayerNorm."""
    y = jnp.dot(x_ref[...], w_ref[...],
                preferred_element_type=jnp.float32) + b_ref[...]
    mean = jnp.mean(y, axis=-1, keepdims=True)
    var = jnp.mean((y - mean) ** 2, axis=-1, keepdims=True)
    yn = (y - mean) * jax.lax.rsqrt(var + 1e-5)
    o_ref[...] = (yn * g_ref[...] + be_ref[...]).astype(o_ref.dtype)


def _merge_ln_linear_kernel(x_ref, g_ref, b_ref, w_ref, o_ref):
    """Fused PatchMergingV2: LayerNorm(8C) (f32) + Linear(8C->2C, no bias, bf16 MXU)."""
    x = x_ref[...].astype(jnp.float32)
    mean = jnp.mean(x, axis=-1, keepdims=True)
    var = jnp.mean((x - mean) ** 2, axis=-1, keepdims=True)
    y = (x - mean) * jax.lax.rsqrt(var + 1e-5)
    y = y * g_ref[...] + b_ref[...]
    acc = jnp.dot(y.astype(jnp.bfloat16), w_ref[...],
                  preferred_element_type=jnp.float32)
    o_ref[...] = acc.astype(o_ref.dtype)


# ----------------------------------------------------------------------------
# Pallas wrappers
# ----------------------------------------------------------------------------
def pallas_matmul_rows(x, m):
    """x:(M,K) f32, m:(K,N) f32 -> (M,N) f32, tiled over M rows."""
    x = x.astype(jnp.float32)
    m = m.astype(jnp.float32)
    M, K = x.shape
    K2, N = m.shape
    assert K == K2
    tm = _choose_row_tile(M, (K + N) * 4)
    return pl.pallas_call(
        _matmul_rows_kernel,
        grid=(M // tm,),
        in_specs=[
            pl.BlockSpec((tm, K), lambda i: (i, 0)),
            pl.BlockSpec((K, N), lambda i: (0, 0)),
        ],
        out_specs=pl.BlockSpec((tm, N), lambda i: (i, 0)),
        out_shape=jax.ShapeDtypeStruct((M, N), jnp.float32),
        compiler_params=pltpu.CompilerParams(
            dimension_semantics=("parallel",)),
    )(x, m)


def pallas_left_matmul_batched(m, x):
    """x:(B, A, L) f32, m:(Ao, A) f32 -> (B, Ao, L).  Contract A without transposes."""
    x = x.astype(jnp.float32)
    m = m.astype(jnp.float32)
    B, A, L = x.shape
    Ao, A2 = m.shape
    assert A == A2
    tl = _choose_col_tile(L, (A + Ao) * 4)
    return pl.pallas_call(
        _left_matmul_kernel,
        grid=(B, L // tl),
        in_specs=[
            pl.BlockSpec((Ao, A), lambda b, j: (0, 0)),
            pl.BlockSpec((None, A, tl), lambda b, j: (b, 0, j)),
        ],
        out_specs=pl.BlockSpec((None, Ao, tl), lambda b, j: (b, 0, j)),
        out_shape=jax.ShapeDtypeStruct((B, Ao, L), jnp.float32),
        compiler_params=pltpu.CompilerParams(
            dimension_semantics=("parallel", "parallel")),
    )(m, x)


def pallas_patch_embed_ln(tok, w, b, gamma, beta):
    """Fused (tok @ w + b) -> LayerNorm.  tok:(M, K), w:(K, E)."""
    tok = tok.astype(jnp.float32)
    M, K = tok.shape
    K2, E = w.shape
    assert K == K2
    tm = _choose_row_tile(M, (K + E) * 4)
    return pl.pallas_call(
        _embed_ln_kernel,
        grid=(M // tm,),
        in_specs=[
            pl.BlockSpec((tm, K), lambda i: (i, 0)),
            pl.BlockSpec((K, E), lambda i: (0, 0)),
            pl.BlockSpec((1, E), lambda i: (0, 0)),
            pl.BlockSpec((1, E), lambda i: (0, 0)),
            pl.BlockSpec((1, E), lambda i: (0, 0)),
        ],
        out_specs=pl.BlockSpec((tm, E), lambda i: (i, 0)),
        out_shape=jax.ShapeDtypeStruct((M, E), jnp.float32),
        compiler_params=pltpu.CompilerParams(
            dimension_semantics=("parallel",)),
    )(tok, w.astype(jnp.float32), b.reshape(1, E).astype(jnp.float32),
      gamma.reshape(1, E).astype(jnp.float32),
      beta.reshape(1, E).astype(jnp.float32))


def pallas_merge_ln_linear(x, gamma, beta, w_bf16):
    """Fused LayerNorm(8C) + Linear(8C->2C, no bias).  x:(M, 8C), w:(8C, 2C) bf16."""
    x = x.astype(jnp.float32)
    M, C8 = x.shape
    C8b, C2 = w_bf16.shape
    assert C8 == C8b
    tm = _choose_row_tile(M, (C8 + C2) * 4)
    return pl.pallas_call(
        _merge_ln_linear_kernel,
        grid=(M // tm,),
        in_specs=[
            pl.BlockSpec((tm, C8), lambda i: (i, 0)),
            pl.BlockSpec((1, C8), lambda i: (0, 0)),
            pl.BlockSpec((1, C8), lambda i: (0, 0)),
            pl.BlockSpec((C8, C2), lambda i: (0, 0)),
        ],
        out_specs=pl.BlockSpec((tm, C2), lambda i: (i, 0)),
        out_shape=jax.ShapeDtypeStruct((M, C2), jnp.float32),
        compiler_params=pltpu.CompilerParams(
            dimension_semantics=("parallel",)),
    )(x, gamma.reshape(1, C8).astype(jnp.float32),
      beta.reshape(1, C8).astype(jnp.float32),
      w_bf16.astype(jnp.bfloat16))


# ----------------------------------------------------------------------------
# Trilinear interpolation (align_corners=False, no antialias), separable.
# Three Pallas passes, zero XLA transposes: between passes only contiguous
# trailing-dim reshapes (free bitcasts).
# ----------------------------------------------------------------------------
def _interp_matrix(in_size, out_size):
    """PyTorch F.interpolate(mode='trilinear', align_corners=False) weights."""
    scale = in_size / out_size
    i = jnp.arange(out_size, dtype=jnp.float32)
    src = (i + 0.5) * scale - 0.5
    src = jnp.maximum(src, 0.0)                       # PyTorch clamps negatives
    i0 = jnp.floor(src).astype(jnp.int32)
    i0 = jnp.minimum(i0, in_size - 1)
    i1 = jnp.minimum(i0 + 1, in_size - 1)
    frac = src - i0.astype(jnp.float32)
    rows = jnp.arange(out_size)
    W = jnp.zeros((out_size, in_size), jnp.float32)
    W = W.at[rows, i0].add(1.0 - frac)
    W = W.at[rows, i1].add(frac)
    return W  # (out, in)


def trilinear_resize(x, out_dhw):
    """x: [N, C, D, H, W] -> [N, C, D', H', W'] (align_corners=False)."""
    N, C, D, H, W = x.shape
    Do, Ho, Wo = out_dhw
    Mw = _interp_matrix(W, Wo)                        # (Wo, W)
    Mh = _interp_matrix(H, Ho)                        # (Ho, H)
    Md = _interp_matrix(D, Do)                        # (Do, D)

    # W axis: row matmul on the contiguous last axis.
    y = pallas_matmul_rows(x.reshape(N * C * D * H, W), Mw.T)   # (NCDH, Wo)
    y = y.reshape(N * C * D, H, Wo)
    # H axis: left-matmul per (n, c, d) slab — contracts H in-kernel.
    y = pallas_left_matmul_batched(Mh, y)                       # (NCD, Ho, Wo)
    y = y.reshape(N * C, D, Ho * Wo)
    # D axis: left-matmul per (n, c) slab — contracts D in-kernel.
    y = pallas_left_matmul_batched(Md, y)                       # (NC, Do, Ho*Wo)
    return y.reshape(N, C, Do, Ho, Wo)


# ----------------------------------------------------------------------------
# Simplified SwinUNETR encoder feature pyramid (synthetic weights)
# ----------------------------------------------------------------------------
def init_params(key, in_channels, embed_dim, num_merge_stages):
    params = {}
    k = key
    k, sub = jax.random.split(k)
    params["patch_embed_w"] = (
        0.02 * jax.random.normal(sub, (in_channels * 8, embed_dim), jnp.float32))
    k, sub = jax.random.split(k)
    params["patch_embed_b"] = (
        0.02 * jax.random.normal(sub, (embed_dim,), jnp.float32))
    params["patch_norm_g"] = jnp.ones((embed_dim,), jnp.float32)
    params["patch_norm_b"] = jnp.zeros((embed_dim,), jnp.float32)
    c = embed_dim
    params["merges"] = []
    for _ in range(num_merge_stages):
        k, sub = jax.random.split(k)
        m = {
            "norm_g": jnp.ones((8 * c,), jnp.float32),
            "norm_b": jnp.zeros((8 * c,), jnp.float32),
            # Stored bf16 once at init (halves weight HBM traffic, bf16 MXU).
            "reduce_w": (0.02 * jax.random.normal(
                sub, (8 * c, 2 * c), jnp.float32)).astype(jnp.bfloat16),
        }
        params["merges"].append(m)
        c = 2 * c
    return params


def _space_to_patch(x_cl, patch):
    """x_cl: [N, D, H, W, C] -> [N, D/p, H/p, W/p, C*p^3] (channels-last)."""
    # NOTE: with a real checkpoint the 8C concat order must match MONAI's
    # PatchMergingV2 enumeration (see correctness notes); synthetic weights here.
    N, D, H, W, C = x_cl.shape
    p = patch
    x = x_cl.reshape(N, D // p, p, H // p, p, W // p, p, C)
    x = x.transpose(0, 1, 3, 5, 2, 4, 6, 7)           # N, D', H', W', pd, ph, pw, C
    return x.reshape(N, D // p, H // p, W // p, C * p * p * p)


def swin_unetr_forward(x, params, *, target_size, n_stages, embed_dim):
    """Forward pass: trilinear resize + hierarchical encoder features.

    x: [N, C, D, H, W] float32 (NCDHW, like PyTorch).
    Returns a list of n_stages features, each NCDHW.
    """
    # 1) trilinear interpolation (align_corners=False)
    x = trilinear_resize(x, target_size)              # [N, C, Dt, Ht, Wt]

    # 2) patch embedding: Conv3d(C_in, embed_dim, kernel=2, stride=2)
    #    == space-to-patch + fused linear projection + LayerNorm.
    #    (Weight flattening assumes (c, kd, kh, kw) order.)
    x_cl = jnp.transpose(x, (0, 2, 3, 4, 1))          # [N, D, H, W, C]
    Nb, D, H, W, C = x_cl.shape
    xp = x_cl.reshape(Nb, D // 2, 2, H // 2, 2, W // 2, 2, C)
    xp = xp.transpose(0, 1, 3, 5, 7, 2, 4, 6)         # N, D', H', W', C, kd, kh, kw
    xp = xp.reshape(Nb * (D // 2) * (H // 2) * (W // 2), C * 8)
    tok = pallas_patch_embed_ln(
        xp, params["patch_embed_w"], params["patch_embed_b"],
        params["patch_norm_g"], params["patch_norm_b"])
    feat_cl = tok.reshape(Nb, D // 2, H // 2, W // 2, embed_dim)

    features = [jnp.transpose(feat_cl, (0, 4, 1, 2, 3))]  # stage 0, NCDHW

    # 3) successive patch-merging stages (PatchMergingV2 semantics):
    #    concat 2x2x2 neighbours -> LayerNorm(8C) -> Linear(8C, 2C, bias=False)
    #    LN + Linear are fused in one Pallas kernel per stage.
    # TODO(synk): Swin window-attention blocks between merges are omitted
    #             (no reference source for UniversalUNETR internals).
    cur = feat_cl
    for s in range(1, n_stages):
        m = params["merges"][s - 1]
        merged = _space_to_patch(cur, 2)              # [N, D/2, H/2, W/2, 8C]
        Nb_, Ds, Hs, Ws, C8 = merged.shape
        flat = merged.reshape(-1, C8)
        flat = pallas_merge_ln_linear(flat, m["norm_g"], m["norm_b"], m["reduce_w"])
        cur = flat.reshape(Nb_, Ds, Hs, Ws, C8 // 4)  # 2C channels
        features.append(jnp.transpose(cur, (0, 4, 1, 2, 3)))
    return features


# ----------------------------------------------------------------------------
# Main
# ----------------------------------------------------------------------------
if __name__ == "__main__":
    key = jax.random.PRNGKey(0)

    # Small test shapes (real module: img_size=256 volumes resized to 128^3).
    N, C_in = 2, 1
    D_in = H_in = W_in = 12
    TARGET = (16, 16, 16)          # scaled-down stand-in for (128, 128, 128)
    EMBED_DIM = 48                 # SwinUNETR feature_size
    N_STAGES = 4                   # 0 < stages < 7 (module default is 5)

    key, kx, kp = jax.random.split(key, 3)
    x = jax.random.normal(kx, (N, C_in, D_in, H_in, W_in), jnp.float32)
    params = init_params(kp, C_in, EMBED_DIM, N_STAGES - 1)

    fwd = functools.partial(
        swin_unetr_forward,
        target_size=TARGET, n_stages=N_STAGES, embed_dim=EMBED_DIM)

    feats = jax.jit(lambda xx: fwd(xx, params))(x)
    feats = jax.block_until_ready(feats)

    expected = [
        (N, 48, 8, 8, 8),
        (N, 96, 4, 4, 4),
        (N, 192, 2, 2, 2),
        (N, 384, 1, 1, 1),
    ]
    for f, e in zip(feats, expected):
        assert f.shape == e, (f.shape, e)
        assert bool(jnp.all(jnp.isfinite(f)))

    print("KERNEL_OK")
</pallas_src>

<mosaic_0001>
module attributes {stable_mosaic.version = 11 : i64} {
  func.func private @main(%arg0: i32) attributes {dimension_semantics = [#tpu.dimension_semantics<core_parallel>], iteration_bounds = array<i64: 2>, tpu.core_type = #tpu.core_type<sc_scalar_subcore>, window_params = []} {
    return
  }
}

module attributes {stable_mosaic.version = 11 : i64} {
  func.func private @main(%arg0: i32) attributes {dimension_semantics = [#tpu.dimension_semantics<core_parallel>], iteration_bounds = array<i64: 2>, tpu.core_type = #tpu.core_type<sc_scalar_subcore>, window_params = []} {
    return
  }
}

module attributes {stable_mosaic.version = 11 : i64} {
  func.func @_matmul_rows_kernel(%arg0: i32, %arg1: memref<288x12xf32, #tpu.memory_space<vmem>>, %arg2: memref<12x16xf32, #tpu.memory_space<vmem>>, %arg3: memref<288x16xf32, #tpu.memory_space<vmem>>) attributes {dimension_semantics = [#tpu.dimension_semantics<parallel>], iteration_bounds = array<i64: 1>, scalar_prefetch = 0 : i64, scratch_operands = 0 : i64, tpu.core_type = #tpu.core_type<tc>, window_params = [{transform_indices = @transform_0, window_bounds = array<i64: 288, 12>}, {pipeline_mode = #tpu.pipeline_mode<synchronous>, transform_indices = @transform_1, window_bounds = array<i64: 12, 16>}, {transform_indices = @transform_2, window_bounds = array<i64: 288, 16>}]} {
    %c0 = arith.constant 0 : index
    %c0_0 = arith.constant 0 : index
    %0 = vector.load %arg1[%c0, %c0_0] : memref<288x12xf32, #tpu.memory_space<vmem>>, vector<288x12xf32>
    %c0_1 = arith.constant 0 : index
    %c0_2 = arith.constant 0 : index
    %1 = vector.load %arg2[%c0_1, %c0_2] : memref<12x16xf32, #tpu.memory_space<vmem>>, vector<12x16xf32>
    %cst = arith.constant dense<0.000000e+00> : vector<288x16xf32>
    %2 = tpu.matmul %0, %1, %cst {dimension_numbers = #tpu.dot_dimension_numbers<[1], [0], [0], [1], [0, 0, 1, 1], [], []>} : vector<288x12xf32>, vector<12x16xf32>, vector<288x16xf32> -> vector<288x16xf32>
    %c0_3 = arith.constant 0 : index
    %c0_4 = arith.constant 0 : index
    %3 = vector.load %arg3[%c0_3, %c0_4] : memref<288x16xf32, #tpu.memory_space<vmem>>, vector<288x16xf32>
    tpu.vector_store %arg3[%c0_3, %c0_4], %2 {strides = array<i32>} : memref<288x16xf32, #tpu.memory_space<vmem>>, vector<288x16xf32>,
    return
  }
  func.func @transform_0(%arg0: i32) -> (i32, i32) {
    %c0_i32 = arith.constant 0 : i32
    %c0_i32_0 = arith.constant 0 : i32
    return %arg0, %c0_i32 : i32, i32
  }
  func.func @transform_1(%arg0: i32) -> (i32, i32) {
    %c0_i32 = arith.constant 0 : i32
    %c0_i32_0 = arith.constant 0 : i32
    %c0_i32_1 = arith.constant 0 : i32
    return %c0_i32, %c0_i32_0 : i32, i32
  }
  func.func @transform_2(%arg0: i32) -> (i32, i32) {
    %c0_i32 = arith.constant 0 : i32
    %c0_i32_0 = arith.constant 0 : i32
    return %arg0, %c0_i32 : i32, i32
  }
}

module attributes {stable_mosaic.version = 11 : i64} {
  func.func @_left_matmul_kernel(%arg0: i32, %arg1: i32, %arg2: memref<16x12xf32, #tpu.memory_space<vmem>>, %arg3: memref<1x12x16xf32, #tpu.memory_space<vmem>>, %arg4: memref<1x16x16xf32, #tpu.memory_space<vmem>>) attributes {dimension_semantics = [#tpu.dimension_semantics<parallel>, #tpu.dimension_semantics<parallel>], iteration_bounds = array<i64: 24, 1>, scalar_prefetch = 0 : i64, scratch_operands = 0 : i64, tpu.core_type = #tpu.core_type<tc>, window_params = [{pipeline_mode = #tpu.pipeline_mode<synchronous>, transform_indices = @transform_0, window_bounds = array<i64: 16, 12>}, {transform_indices = @transform_1, window_bounds = array<i64: 1, 12, 16>}, {transform_indices = @transform_2, window_bounds = array<i64: 1, 16, 16>}]} {
    %c0 = arith.constant 0 : index
    %c0_0 = arith.constant 0 : index
    %0 = vector.load %arg2[%c0, %c0_0] : memref<16x12xf32, #tpu.memory_space<vmem>>, vector<16x12xf32>
    %c0_1 = arith.constant 0 : index
    %c0_2 = arith.constant 0 : index
    %c0_3 = arith.constant 0 : index
    %1 = vector.load %arg3[%c0_1, %c0_2, %c0_3] : memref<1x12x16xf32, #tpu.memory_space<vmem>>, vector<1x12x16xf32>
    %2 = vector.shape_cast %1 : vector<1x12x16xf32> to vector<12x16xf32>
    %cst = arith.constant dense<0.000000e+00> : vector<16x16xf32>
    %3 = tpu.matmul %0, %2, %cst {dimension_numbers = #tpu.dot_dimension_numbers<[1], [0], [0], [1], [0, 0, 1, 1], [], []>} : vector<16x12xf32>, vector<12x16xf32>, vector<16x16xf32> -> vector<16x16xf32>
    %c0_4 = arith.constant 0 : index
    %c0_5 = arith.constant 0 : index
    %c0_6 = arith.constant 0 : index
    %4 = vector.load %arg4[%c0_4, %c0_5, %c0_6] : memref<1x16x16xf32, #tpu.memory_space<vmem>>, vector<1x16x16xf32>
    %5 = vector.shape_cast %4 : vector<1x16x16xf32> to vector<16x16xf32>
    %6 = vector.shape_cast %3 : vector<16x16xf32> to vector<1x16x16xf32>
    tpu.vector_store %arg4[%c0_4, %c0_5, %c0_6], %6 {strides = array<i32>} : memref<1x16x16xf32, #tpu.memory_space<vmem>>, vector<1x16x16xf32>,
    return
  }
  func.func @transform_0(%arg0: i32, %arg1: i32) -> (i32, i32) {
    %c0_i32 = arith.constant 0 : i32
    %c0_i32_0 = arith.constant 0 : i32
    %c0_i32_1 = arith.constant 0 : i32
    return %c0_i32, %c0_i32_0 : i32, i32
  }
  func.func @transform_1(%arg0: i32, %arg1: i32) -> (i32, i32, i32) {
    %c0_i32 = arith.constant 0 : i32
    %c0_i32_0 = arith.constant 0 : i32
    return %arg0, %c0_i32, %arg1 : i32, i32, i32
  }
  func.func @transform_2(%arg0: i32, %arg1: i32) -> (i32, i32, i32) {
    %c0_i32 = arith.constant 0 : i32
    %c0_i32_0 = arith.constant 0 : i32
    return %arg0, %c0_i32, %arg1 : i32, i32, i32
  }
}

module attributes {stable_mosaic.version = 11 : i64} {
  func.func @_left_matmul_kernel(%arg0: i32, %arg1: i32, %arg2: memref<16x12xf32, #tpu.memory_space<vmem>>, %arg3: memref<1x12x256xf32, #tpu.memory_space<vmem>>, %arg4: memref<1x16x256xf32, #tpu.memory_space<vmem>>) attributes {dimension_semantics = [#tpu.dimension_semantics<parallel>, #tpu.dimension_semantics<parallel>], iteration_bounds = array<i64: 2, 1>, scalar_prefetch = 0 : i64, scratch_operands = 0 : i64, tpu.core_type = #tpu.core_type<tc>, window_params = [{pipeline_mode = #tpu.pipeline_mode<synchronous>, transform_indices = @transform_0, window_bounds = array<i64: 16, 12>}, {transform_indices = @transform_1, window_bounds = array<i64: 1, 12, 256>}, {transform_indices = @transform_2, window_bounds = array<i64: 1, 16, 256>}]} {
    %c0 = arith.constant 0 : index
    %c0_0 = arith.constant 0 : index
    %0 = vector.load %arg2[%c0, %c0_0] : memref<16x12xf32, #tpu.memory_space<vmem>>, vector<16x12xf32>
    %c0_1 = arith.constant 0 : index
    %c0_2 = arith.constant 0 : index
    %c0_3 = arith.constant 0 : index
    %1 = vector.load %arg3[%c0_1, %c0_2, %c0_3] : memref<1x12x256xf32, #tpu.memory_space<vmem>>, vector<1x12x256xf32>
    %2 = vector.shape_cast %1 : vector<1x12x256xf32> to vector<12x256xf32>
    %cst = arith.constant dense<0.000000e+00> : vector<16x256xf32>
    %3 = tpu.matmul %0, %2, %cst {dimension_numbers = #tpu.dot_dimension_numbers<[1], [0], [0], [1], [0, 0, 1, 1], [], []>} : vector<16x12xf32>, vector<12x256xf32>, vector<16x256xf32> -> vector<16x256xf32>
    %c0_4 = arith.constant 0 : index
    %c0_5 = arith.constant 0 : index
    %c0_6 = arith.constant 0 : index
    %4 = vector.load %arg4[%c0_4, %c0_5, %c0_6] : memref<1x16x256xf32, #tpu.memory_space<vmem>>, vector<1x16x256xf32>
    %5 = vector.shape_cast %4 : vector<1x16x256xf32> to vector<16x256xf32>
    %6 = vector.shape_cast %3 : vector<16x256xf32> to vector<1x16x256xf32>
    tpu.vector_store %arg4[%c0_4, %c0_5, %c0_6], %6 {strides = array<i32>} : memref<1x16x256xf32, #tpu.memory_space<vmem>>, vector<1x16x256xf32>,
    return
  }
  func.func @transform_0(%arg0: i32, %arg1: i32) -> (i32, i32) {
    %c0_i32 = arith.constant 0 : i32
    %c0_i32_0 = arith.constant 0 : i32
    %c0_i32_1 = arith.constant 0 : i32
    return %c0_i32, %c0_i32_0 : i32, i32
  }
  func.func @transform_1(%arg0: i32, %arg1: i32) -> (i32, i32, i32) {
    %c0_i32 = arith.constant 0 : i32
    %c0_i32_0 = arith.constant 0 : i32
    return %arg0, %c0_i32, %arg1 : i32, i32, i32
  }
  func.func @transform_2(%arg0: i32, %arg1: i32) -> (i32, i32, i32) {
    %c0_i32 = arith.constant 0 : i32
    %c0_i32_0 = arith.constant 0 : i32
    return %arg0, %c0_i32, %arg1 : i32, i32, i32
  }
}

module attributes {stable_mosaic.version = 11 : i64} {
  func.func @_embed_ln_kernel(%arg0: i32, %arg1: memref<1024x8xf32, #tpu.memory_space<vmem>>, %arg2: memref<8x48xf32, #tpu.memory_space<vmem>>, %arg3: memref<1x48xf32, #tpu.memory_space<vmem>>, %arg4: memref<1x48xf32, #tpu.memory_space<vmem>>, %arg5: memref<1x48xf32, #tpu.memory_space<vmem>>, %arg6: memref<1024x48xf32, #tpu.memory_space<vmem>>) attributes {dimension_semantics = [#tpu.dimension_semantics<parallel>], iteration_bounds = array<i64: 1>, scalar_prefetch = 0 : i64, scratch_operands = 0 : i64, tpu.core_type = #tpu.core_type<tc>, window_params = [{transform_indices = @transform_0, window_bounds = array<i64: 1024, 8>}, {pipeline_mode = #tpu.pipeline_mode<synchronous>, transform_indices = @transform_1, window_bounds = array<i64: 8, 48>}, {pipeline_mode = #tpu.pipeline_mode<synchronous>, transform_indices = @transform_2, window_bounds = array<i64: 1, 48>}, {pipeline_mode = #tpu.pipeline_mode<synchronous>, transform_indices = @transform_3, window_bounds = array<i64: 1, 48>}, {pipeline_mode = #tpu.pipeline_mode<synchronous>, transform_indices = @transform_4, window_bounds = array<i64: 1, 48>}, {transform_indices = @transform_5, window_bounds = array<i64: 1024, 48>}]} {
    %c0 = arith.constant 0 : index
    %c0_0 = arith.constant 0 : index
    %0 = vector.load %arg1[%c0, %c0_0] : memref<1024x8xf32, #tpu.memory_space<vmem>>, vector<1024x8xf32>
    %c0_1 = arith.constant 0 : index
    %c0_2 = arith.constant 0 : index
    %1 = vector.load %arg2[%c0_1, %c0_2] : memref<8x48xf32, #tpu.memory_space<vmem>>, vector<8x48xf32>
    %cst = arith.constant dense<0.000000e+00> : vector<1024x48xf32>
    %2 = tpu.matmul %0, %1, %cst {dimension_numbers = #tpu.dot_dimension_numbers<[1], [0], [0], [1], [0, 0, 1, 1], [], []>} : vector<1024x8xf32>, vector<8x48xf32>, vector<1024x48xf32> -> vector<1024x48xf32>
    %c0_3 = arith.constant 0 : index
    %c0_4 = arith.constant 0 : index
    %3 = vector.load %arg3[%c0_3, %c0_4] : memref<1x48xf32, #tpu.memory_space<vmem>>, vector<1x48xf32>
    %4 = vector.broadcast %3 : vector<1x48xf32> to vector<1024x48xf32>
    %5 = arith.addf %2, %4 : vector<1024x48xf32>
    %cst_5 = arith.constant dense<0.000000e+00> : vector<1024xf32>
    %6 = vector.multi_reduction <add>, %5, %cst_5 [1] : vector<1024x48xf32> to vector<1024xf32>
    %7 = vector.shape_cast %6 : vector<1024xf32> to vector<1024x1xf32>
    %cst_6 = arith.constant 4.800000e+01 : f32
    %8 = vector.broadcast %cst_6 : f32 to vector<1024x1xf32>
    %9 = arith.divf %7, %8 : vector<1024x1xf32>
    %10 = vector.broadcast %9 : vector<1024x1xf32> to vector<1024x48xf32>
    %11 = arith.subf %5, %10 : vector<1024x48xf32>
    %12 = arith.mulf %11, %11 : vector<1024x48xf32>
    %cst_7 = arith.constant dense<0.000000e+00> : vector<1024xf32>
    %13 = vector.multi_reduction <add>, %12, %cst_7 [1] : vector<1024x48xf32> to vector<1024xf32>
    %14 = vector.shape_cast %13 : vector<1024xf32> to vector<1024x1xf32>
    %cst_8 = arith.constant 4.800000e+01 : f32
    %15 = vector.broadcast %cst_8 : f32 to vector<1024x1xf32>
    %16 = arith.divf %14, %15 : vector<1024x1xf32>
    %17 = vector.broadcast %9 : vector<1024x1xf32> to vector<1024x48xf32>
    %18 = arith.subf %5, %17 : vector<1024x48xf32>
    %cst_9 = arith.constant 9.99999974E-6 : f32
    %19 = vector.broadcast %cst_9 : f32 to vector<1024x1xf32>
    %20 = arith.addf %16, %19 : vector<1024x1xf32>
    %21 = math.rsqrt %20 : vector<1024x1xf32>
    %22 = vector.broadcast %21 : vector<1024x1xf32> to vector<1024x48xf32>
    %23 = arith.mulf %18, %22 : vector<1024x48xf32>
    %c0_10 = arith.constant 0 : index
    %c0_11 = arith.constant 0 : index
    %24 = vector.load %arg4[%c0_10, %c0_11] : memref<1x48xf32, #tpu.memory_space<vmem>>, vector<1x48xf32>
    %25 = vector.broadcast %24 : vector<1x48xf32> to vector<1024x48xf32>
    %26 = arith.mulf %23, %25 : vector<1024x48xf32>
    %c0_12 = arith.constant 0 : index
    %c0_13 = arith.constant 0 : index
    %27 = vector.load %arg5[%c0_12, %c0_13] : memref<1x48xf32, #tpu.memory_space<vmem>>, vector<1x48xf32>
    %28 = vector.broadcast %27 : vector<1x48xf32> to vector<1024x48xf32>
    %29 = arith.addf %26, %28 : vector<1024x48xf32>
    %c0_14 = arith.constant 0 : index
    %c0_15 = arith.constant 0 : index
    %30 = vector.load %arg6[%c0_14, %c0_15] : memref<1024x48xf32, #tpu.memory_space<vmem>>, vector<1024x48xf32>
    tpu.vector_store %arg6[%c0_14, %c0_15], %29 {strides = array<i32>} : memref<1024x48xf32, #tpu.memory_space<vmem>>, vector<1024x48xf32>,
    return
  }
  func.func @transform_0(%arg0: i32) -> (i32, i32) {
    %c0_i32 = arith.constant 0 : i32
    %c0_i32_0 = arith.constant 0 : i32
    return %arg0, %c0_i32 : i32, i32
  }
  func.func @transform_1(%arg0: i32) -> (i32, i32) {
    %c0_i32 = arith.constant 0 : i32
    %c0_i32_0 = arith.constant 0 : i32
    %c0_i32_1 = arith.constant 0 : i32
    return %c0_i32, %c0_i32_0 : i32, i32
  }
  func.func @transform_2(%arg0: i32) -> (i32, i32) {
    %c0_i32 = arith.constant 0 : i32
    %c0_i32_0 = arith.constant 0 : i32
    %c0_i32_1 = arith.constant 0 : i32
    return %c0_i32, %c0_i32_0 : i32, i32
  }
  func.func @transform_3(%arg0: i32) -> (i32, i32) {
    %c0_i32 = arith.constant 0 : i32
    %c0_i32_0 = arith.constant 0 : i32
    %c0_i32_1 = arith.constant 0 : i32
    return %c0_i32, %c0_i32_0 : i32, i32
  }
  func.func @transform_4(%arg0: i32) -> (i32, i32) {
    %c0_i32 = arith.constant 0 : i32
    %c0_i32_0 = arith.constant 0 : i32
    %c0_i32_1 = arith.constant 0 : i32
    return %c0_i32, %c0_i32_0 : i32, i32
  }
  func.func @transform_5(%arg0: i32) -> (i32, i32) {
    %c0_i32 = arith.constant 0 : i32
    %c0_i32_0 = arith.constant 0 : i32
    return %arg0, %c0_i32 : i32, i32
  }
}

module attributes {stable_mosaic.version = 11 : i64} {
  func.func @_merge_ln_linear_kernel(%arg0: i32, %arg1: memref<128x384xf32, #tpu.memory_space<vmem>>, %arg2: memref<1x384xf32, #tpu.memory_space<vmem>>, %arg3: memref<1x384xf32, #tpu.memory_space<vmem>>, %arg4: memref<384x96xbf16, #tpu.memory_space<vmem>>, %arg5: memref<128x96xf32, #tpu.memory_space<vmem>>) attributes {dimension_semantics = [#tpu.dimension_semantics<parallel>], iteration_bounds = array<i64: 1>, scalar_prefetch = 0 : i64, scratch_operands = 0 : i64, tpu.core_type = #tpu.core_type<tc>, window_params = [{transform_indices = @transform_0, window_bounds = array<i64: 128, 384>}, {pipeline_mode = #tpu.pipeline_mode<synchronous>, transform_indices = @transform_1, window_bounds = array<i64: 1, 384>}, {pipeline_mode = #tpu.pipeline_mode<synchronous>, transform_indices = @transform_2, window_bounds = array<i64: 1, 384>}, {pipeline_mode = #tpu.pipeline_mode<synchronous>, transform_indices = @transform_3, window_bounds = array<i64: 384, 96>}, {transform_indices = @transform_4, window_bounds = array<i64: 128, 96>}]} {
    %c0 = arith.constant 0 : index
    %c0_0 = arith.constant 0 : index
    %0 = vector.load %arg1[%c0, %c0_0] : memref<128x384xf32, #tpu.memory_space<vmem>>, vector<128x384xf32>
    %cst = arith.constant dense<0.000000e+00> : vector<128xf32>
    %1 = vector.multi_reduction <add>, %0, %cst [1] : vector<128x384xf32> to vector<128xf32>
    %2 = vector.shape_cast %1 : vector<128xf32> to vector<128x1xf32>
    %cst_1 = arith.constant 3.840000e+02 : f32
    %3 = vector.broadcast %cst_1 : f32 to vector<128x1xf32>
    %4 = arith.divf %2, %3 : vector<128x1xf32>
    %5 = vector.broadcast %4 : vector<128x1xf32> to vector<128x384xf32>
    %6 = arith.subf %0, %5 : vector<128x384xf32>
    %7 = arith.mulf %6, %6 : vector<128x384xf32>
    %cst_2 = arith.constant dense<0.000000e+00> : vector<128xf32>
    %8 = vector.multi_reduction <add>, %7, %cst_2 [1] : vector<128x384xf32> to vector<128xf32>
    %9 = vector.shape_cast %8 : vector<128xf32> to vector<128x1xf32>
    %cst_3 = arith.constant 3.840000e+02 : f32
    %10 = vector.broadcast %cst_3 : f32 to vector<128x1xf32>
    %11 = arith.divf %9, %10 : vector<128x1xf32>
    %12 = vector.broadcast %4 : vector<128x1xf32> to vector<128x384xf32>
    %13 = arith.subf %0, %12 : vector<128x384xf32>
    %cst_4 = arith.constant 9.99999974E-6 : f32
    %14 = vector.broadcast %cst_4 : f32 to vector<128x1xf32>
    %15 = arith.addf %11, %14 : vector<128x1xf32>
    %16 = math.rsqrt %15 : vector<128x1xf32>
    %17 = vector.broadcast %16 : vector<128x1xf32> to vector<128x384xf32>
    %18 = arith.mulf %13, %17 : vector<128x384xf32>
    %c0_5 = arith.constant 0 : index
    %c0_6 = arith.constant 0 : index
    %19 = vector.load %arg2[%c0_5, %c0_6] : memref<1x384xf32, #tpu.memory_space<vmem>>, vector<1x384xf32>
    %20 = vector.broadcast %19 : vector<1x384xf32> to vector<128x384xf32>
    %21 = arith.mulf %18, %20 : vector<128x384xf32>
    %c0_7 = arith.constant 0 : index
    %c0_8 = arith.constant 0 : index
    %22 = vector.load %arg3[%c0_7, %c0_8] : memref<1x384xf32, #tpu.memory_space<vmem>>, vector<1x384xf32>
    %23 = vector.broadcast %22 : vector<1x384xf32> to vector<128x384xf32>
    %24 = arith.addf %21, %23 : vector<128x384xf32>
    %25 = arith.truncf %24 : vector<128x384xf32> to vector<128x384xbf16>
    %c0_9 = arith.constant 0 : index
    %c0_10 = arith.constant 0 : index
    %26 = vector.load %arg4[%c0_9, %c0_10] : memref<384x96xbf16, #tpu.memory_space<vmem>>, vector<384x96xbf16>
    %cst_11 = arith.constant dense<0.000000e+00> : vector<128x96xf32>
    %27 = tpu.matmul %25, %26, %cst_11 {dimension_numbers = #tpu.dot_dimension_numbers<[1], [0], [0], [1], [0, 0, 1, 1], [], []>} : vector<128x384xbf16>, vector<384x96xbf16>, vector<128x96xf32> -> vector<128x96xf32>
    %c0_12 = arith.constant 0 : index
    %c0_13 = arith.constant 0 : index
    %28 = vector.load %arg5[%c0_12, %c0_13] : memref<128x96xf32, #tpu.memory_space<vmem>>, vector<128x96xf32>
    tpu.vector_store %arg5[%c0_12, %c0_13], %27 {strides = array<i32>} : memref<128x96xf32, #tpu.memory_space<vmem>>, vector<128x96xf32>,
    return
  }
  func.func @transform_0(%arg0: i32) -> (i32, i32) {
    %c0_i32 = arith.constant 0 : i32
    %c0_i32_0 = arith.constant 0 : i32
    return %arg0, %c0_i32 : i32, i32
  }
  func.func @transform_1(%arg0: i32) -> (i32, i32) {
    %c0_i32 = arith.constant 0 : i32
    %c0_i32_0 = arith.constant 0 : i32
    %c0_i32_1 = arith.constant 0 : i32
    return %c0_i32, %c0_i32_0 : i32, i32
  }
  func.func @transform_2(%arg0: i32) -> (i32, i32) {
    %c0_i32 = arith.constant 0 : i32
    %c0_i32_0 = arith.constant 0 : i32
    %c0_i32_1 = arith.constant 0 : i32
    return %c0_i32, %c0_i32_0 : i32, i32
  }
  func.func @transform_3(%arg0: i32) -> (i32, i32) {
    %c0_i32 = arith.constant 0 : i32
    %c0_i32_0 = arith.constant 0 : i32
    %c0_i32_1 = arith.constant 0 : i32
    return %c0_i32, %c0_i32_0 : i32, i32
  }
  func.func @transform_4(%arg0: i32) -> (i32, i32) {
    %c0_i32 = arith.constant 0 : i32
    %c0_i32_0 = arith.constant 0 : i32
    return %arg0, %c0_i32 : i32, i32
  }
}

module attributes {stable_mosaic.version = 11 : i64} {
  func.func @_merge_ln_linear_kernel(%arg0: i32, %arg1: memref<16x768xf32, #tpu.memory_space<vmem>>, %arg2: memref<1x768xf32, #tpu.memory_space<vmem>>, %arg3: memref<1x768xf32, #tpu.memory_space<vmem>>, %arg4: memref<768x192xbf16, #tpu.memory_space<vmem>>, %arg5: memref<16x192xf32, #tpu.memory_space<vmem>>) attributes {dimension_semantics = [#tpu.dimension_semantics<parallel>], iteration_bounds = array<i64: 1>, scalar_prefetch = 0 : i64, scratch_operands = 0 : i64, tpu.core_type = #tpu.core_type<tc>, window_params = [{transform_indices = @transform_0, window_bounds = array<i64: 16, 768>}, {pipeline_mode = #tpu.pipeline_mode<synchronous>, transform_indices = @transform_1, window_bounds = array<i64: 1, 768>}, {pipeline_mode = #tpu.pipeline_mode<synchronous>, transform_indices = @transform_2, window_bounds = array<i64: 1, 768>}, {pipeline_mode = #tpu.pipeline_mode<synchronous>, transform_indices = @transform_3, window_bounds = array<i64: 768, 192>}, {transform_indices = @transform_4, window_bounds = array<i64: 16, 192>}]} {
    %c0 = arith.constant 0 : index
    %c0_0 = arith.constant 0 : index
    %0 = vector.load %arg1[%c0, %c0_0] : memref<16x768xf32, #tpu.memory_space<vmem>>, vector<16x768xf32>
    %cst = arith.constant dense<0.000000e+00> : vector<16xf32>
    %1 = vector.multi_reduction <add>, %0, %cst [1] : vector<16x768xf32> to vector<16xf32>
    %2 = vector.shape_cast %1 : vector<16xf32> to vector<16x1xf32>
    %cst_1 = arith.constant 7.680000e+02 : f32
    %3 = vector.broadcast %cst_1 : f32 to vector<16x1xf32>
    %4 = arith.divf %2, %3 : vector<16x1xf32>
    %5 = vector.broadcast %4 : vector<16x1xf32> to vector<16x768xf32>
    %6 = arith.subf %0, %5 : vector<16x768xf32>
    %7 = arith.mulf %6, %6 : vector<16x768xf32>
    %cst_2 = arith.constant dense<0.000000e+00> : vector<16xf32>
    %8 = vector.multi_reduction <add>, %7, %cst_2 [1] : vector<16x768xf32> to vector<16xf32>
    %9 = vector.shape_cast %8 : vector<16xf32> to vector<16x1xf32>
    %cst_3 = arith.constant 7.680000e+02 : f32
    %10 = vector.broadcast %cst_3 : f32 to vector<16x1xf32>
    %11 = arith.divf %9, %10 : vector<16x1xf32>
    %12 = vector.broadcast %4 : vector<16x1xf32> to vector<16x768xf32>
    %13 = arith.subf %0, %12 : vector<16x768xf32>
    %cst_4 = arith.constant 9.99999974E-6 : f32
    %14 = vector.broadcast %cst_4 : f32 to vector<16x1xf32>
    %15 = arith.addf %11, %14 : vector<16x1xf32>
    %16 = math.rsqrt %15 : vector<16x1xf32>
    %17 = vector.broadcast %16 : vector<16x1xf32> to vector<16x768xf32>
    %18 = arith.mulf %13, %17 : vector<16x768xf32>
    %c0_5 = arith.constant 0 : index
    %c0_6 = arith.constant 0 : index
    %19 = vector.load %arg2[%c0_5, %c0_6] : memref<1x768xf32, #tpu.memory_space<vmem>>, vector<1x768xf32>
    %20 = vector.broadcast %19 : vector<1x768xf32> to vector<16x768xf32>
    %21 = arith.mulf %18, %20 : vector<16x768xf32>
    %c0_7 = arith.constant 0 : index
    %c0_8 = arith.constant 0 : index
    %22 = vector.load %arg3[%c0_7, %c0_8] : memref<1x768xf32, #tpu.memory_space<vmem>>, vector<1x768xf32>
    %23 = vector.broadcast %22 : vector<1x768xf32> to vector<16x768xf32>
    %24 = arith.addf %21, %23 : vector<16x768xf32>
    %25 = arith.truncf %24 : vector<16x768xf32> to vector<16x768xbf16>
    %c0_9 = arith.constant 0 : index
    %c0_10 = arith.constant 0 : index
    %26 = vector.load %arg4[%c0_9, %c0_10] : memref<768x192xbf16, #tpu.memory_space<vmem>>, vector<768x192xbf16>
    %cst_11 = arith.constant dense<0.000000e+00> : vector<16x192xf32>
    %27 = tpu.matmul %25, %26, %cst_11 {dimension_numbers = #tpu.dot_dimension_numbers<[1], [0], [0], [1], [0, 0, 1, 1], [], []>} : vector<16x768xbf16>, vector<768x192xbf16>, vector<16x192xf32> -> vector<16x192xf32>
    %c0_12 = arith.constant 0 : index
    %c0_13 = arith.constant 0 : index
    %28 = vector.load %arg5[%c0_12, %c0_13] : memref<16x192xf32, #tpu.memory_space<vmem>>, vector<16x192xf32>
    tpu.vector_store %arg5[%c0_12, %c0_13], %27 {strides = array<i32>} : memref<16x192xf32, #tpu.memory_space<vmem>>, vector<16x192xf32>,
    return
  }
  func.func @transform_0(%arg0: i32) -> (i32, i32) {
    %c0_i32 = arith.constant 0 : i32
    %c0_i32_0 = arith.constant 0 : i32
    return %arg0, %c0_i32 : i32, i32
  }
  func.func @transform_1(%arg0: i32) -> (i32, i32) {
    %c0_i32 = arith.constant 0 : i32
    %c0_i32_0 = arith.constant 0 : i32
    %c0_i32_1 = arith.constant 0 : i32
    return %c0_i32, %c0_i32_0 : i32, i32
  }
  func.func @transform_2(%arg0: i32) -> (i32, i32) {
    %c0_i32 = arith.constant 0 : i32
    %c0_i32_0 = arith.constant 0 : i32
    %c0_i32_1 = arith.constant 0 : i32
    return %c0_i32, %c0_i32_0 : i32, i32
  }
  func.func @transform_3(%arg0: i32) -> (i32, i32) {
    %c0_i32 = arith.constant 0 : i32
    %c0_i32_0 = arith.constant 0 : i32
    %c0_i32_1 = arith.constant 0 : i32
    return %c0_i32, %c0_i32_0 : i32, i32
  }
  func.func @transform_4(%arg0: i32) -> (i32, i32) {
    %c0_i32 = arith.constant 0 : i32
    %c0_i32_0 = arith.constant 0 : i32
    return %arg0, %c0_i32 : i32, i32
  }
}

module attributes {stable_mosaic.version = 11 : i64} {
  func.func @_merge_ln_linear_kernel(%arg0: i32, %arg1: memref<2x1536xf32, #tpu.memory_space<vmem>>, %arg2: memref<1x1536xf32, #tpu.memory_space<vmem>>, %arg3: memref<1x1536xf32, #tpu.memory_space<vmem>>, %arg4: memref<1536x384xbf16, #tpu.memory_space<vmem>>, %arg5: memref<2x384xf32, #tpu.memory_space<vmem>>) attributes {dimension_semantics = [#tpu.dimension_semantics<parallel>], iteration_bounds = array<i64: 1>, scalar_prefetch = 0 : i64, scratch_operands = 0 : i64, tpu.core_type = #tpu.core_type<tc>, window_params = [{transform_indices = @transform_0, window_bounds = array<i64: 2, 1536>}, {pipeline_mode = #tpu.pipeline_mode<synchronous>, transform_indices = @transform_1, window_bounds = array<i64: 1, 1536>}, {pipeline_mode = #tpu.pipeline_mode<synchronous>, transform_indices = @transform_2, window_bounds = array<i64: 1, 1536>}, {pipeline_mode = #tpu.pipeline_mode<synchronous>, transform_indices = @transform_3, window_bounds = array<i64: 1536, 384>}, {transform_indices = @transform_4, window_bounds = array<i64: 2, 384>}]} {
    %c0 = arith.constant 0 : index
    %c0_0 = arith.constant 0 : index
    %0 = vector.load %arg1[%c0, %c0_0] : memref<2x1536xf32, #tpu.memory_space<vmem>>, vector<2x1536xf32>
    %cst = arith.constant dense<0.000000e+00> : vector<2xf32>
    %1 = vector.multi_reduction <add>, %0, %cst [1] : vector<2x1536xf32> to vector<2xf32>
    %2 = vector.shape_cast %1 : vector<2xf32> to vector<2x1xf32>
    %cst_1 = arith.constant 1.536000e+03 : f32
    %3 = vector.broadcast %cst_1 : f32 to vector<2x1xf32>
    %4 = arith.divf %2, %3 : vector<2x1xf32>
    %5 = vector.broadcast %4 : vector<2x1xf32> to vector<2x1536xf32>
    %6 = arith.subf %0, %5 : vector<2x1536xf32>
    %7 = arith.mulf %6, %6 : vector<2x1536xf32>
    %cst_2 = arith.constant dense<0.000000e+00> : vector<2xf32>
    %8 = vector.multi_reduction <add>, %7, %cst_2 [1] : vector<2x1536xf32> to vector<2xf32>
    %9 = vector.shape_cast %8 : vector<2xf32> to vector<2x1xf32>
    %cst_3 = arith.constant 1.536000e+03 : f32
    %10 = vector.broadcast %cst_3 : f32 to vector<2x1xf32>
    %11 = arith.divf %9, %10 : vector<2x1xf32>
    %12 = vector.broadcast %4 : vector<2x1xf32> to vector<2x1536xf32>
    %13 = arith.subf %0, %12 : vector<2x1536xf32>
    %cst_4 = arith.constant 9.99999974E-6 : f32
    %14 = vector.broadcast %cst_4 : f32 to vector<2x1xf32>
    %15 = arith.addf %11, %14 : vector<2x1xf32>
    %16 = math.rsqrt %15 : vector<2x1xf32>
    %17 = vector.broadcast %16 : vector<2x1xf32> to vector<2x1536xf32>
    %18 = arith.mulf %13, %17 : vector<2x1536xf32>
    %c0_5 = arith.constant 0 : index
    %c0_6 = arith.constant 0 : index
    %19 = vector.load %arg2[%c0_5, %c0_6] : memref<1x1536xf32, #tpu.memory_space<vmem>>, vector<1x1536xf32>
    %20 = vector.broadcast %19 : vector<1x1536xf32> to vector<2x1536xf32>
    %21 = arith.mulf %18, %20 : vector<2x1536xf32>
    %c0_7 = arith.constant 0 : index
    %c0_8 = arith.constant 0 : index
    %22 = vector.load %arg3[%c0_7, %c0_8] : memref<1x1536xf32, #tpu.memory_space<vmem>>, vector<1x1536xf32>
    %23 = vector.broadcast %22 : vector<1x1536xf32> to vector<2x1536xf32>
    %24 = arith.addf %21, %23 : vector<2x1536xf32>
    %25 = arith.truncf %24 : vector<2x1536xf32> to vector<2x1536xbf16>
    %c0_9 = arith.constant 0 : index
    %c0_10 = arith.constant 0 : index
    %26 = vector.load %arg4[%c0_9, %c0_10] : memref<1536x384xbf16, #tpu.memory_space<vmem>>, vector<1536x384xbf16>
    %cst_11 = arith.constant dense<0.000000e+00> : vector<2x384xf32>
    %27 = tpu.matmul %25, %26, %cst_11 {dimension_numbers = #tpu.dot_dimension_numbers<[1], [0], [0], [1], [0, 0, 1, 1], [], []>} : vector<2x1536xbf16>, vector<1536x384xbf16>, vector<2x384xf32> -> vector<2x384xf32>
    %c0_12 = arith.constant 0 : index
    %c0_13 = arith.constant 0 : index
    %28 = vector.load %arg5[%c0_12, %c0_13] : memref<2x384xf32, #tpu.memory_space<vmem>>, vector<2x384xf32>
    tpu.vector_store %arg5[%c0_12, %c0_13], %27 {strides = array<i32>} : memref<2x384xf32, #tpu.memory_space<vmem>>, vector<2x384xf32>,
    return
  }
  func.func @transform_0(%arg0: i32) -> (i32, i32) {
    %c0_i32 = arith.constant 0 : i32
    %c0_i32_0 = arith.constant 0 : i32
    return %arg0, %c0_i32 : i32, i32
  }
  func.func @transform_1(%arg0: i32) -> (i32, i32) {
    %c0_i32 = arith.constant 0 : i32
    %c0_i32_0 = arith.constant 0 : i32
    %c0_i32_1 = arith.constant 0 : i32
    return %c0_i32, %c0_i32_0 : i32, i32
  }
  func.func @transform_2(%arg0: i32) -> (i32, i32) {
    %c0_i32 = arith.constant 0 : i32
    %c0_i32_0 = arith.constant 0 : i32
    %c0_i32_1 = arith.constant 0 : i32
    return %c0_i32, %c0_i32_0 : i32, i32
  }
  func.func @transform_3(%arg0: i32) -> (i32, i32) {
    %c0_i32 = arith.constant 0 : i32
    %c0_i32_0 = arith.constant 0 : i32
    %c0_i32_1 = arith.constant 0 : i32
    return %c0_i32, %c0_i32_0 : i32, i32
  }
  func.func @transform_4(%arg0: i32) -> (i32, i32) {
    %c0_i32 = arith.constant 0 : i32
    %c0_i32_0 = arith.constant 0 : i32
    return %arg0, %c0_i32 : i32, i32
  }
}

</mosaic_0001>

<bundles_post_ra>
// kernel: _lambda_.8
= control target key start
LH: loop header
LB: loop body
LE: loop exit
PB: predicated region body
PF: predicated region fallthrough
CT: control target
= control target key end

     0   :  { %7 = vsyncpa [#allocation3], 0  ;;  %s517_s9 = smov 0   ;;  %s519_s10 = smov 0   ;;  %s576_s0 = inlined_call_operand.hbm [shape: f32[16,12], index: 0, kind: input, shape index: {}]   ;;  %s577_s1 = inlined_call_operand.vmem [shape: f32[24,12,16], index: 1, kind: input, shape index: {}]   ;;  %s578_s2 = inlined_call_operand.vmem [shape: f32[24,16,16], index: 2, kind: output, shape index: {}]  }
   0x1   :  { %s521_s11 = smov 0  }
   0x2 LB: > { %s379_s12 = sadd.s32 4294967295, %s497_s11   ;;  %s25_s13 = sadd.s32 1, %s493_s10  ;;  %s497_s11 = sphi %s521_s11, %s13_s11   ;;  %s493_s10 = sphi %s519_s10, %s582_s10   ;;  %s489_s9 = sphi %s517_s9, %s581_s9  }
   0x3   : > { %p27_p0 = scmp.ge.s32.totalorder %s25_s13, 24  ;;  %p381_p1 = scmp.ge.s32.totalorder %s497_s11, 1 }
   0x4   : > { %p107_p2 = scmp.lt.s32.totalorder %s497_s11, 25  ;;  %p542_p4 = scmp.eq.s32.totalorder %s379_s12, 0 }
   0x5   : > { %s584_s13 = smov (%p27_p0, %s25_s13), 0  ;;  %s499_s16 = smov [#allocation2]  }
   0x6   : > { %p538_p3 = pnand %p381_p1, %p107_p2  ;;  %s119_s17 = sshll.u32 %s499_s16, 4  ;;  %s120_s17 = int_to_ptr.vmem [resolvable:$true] %s119_s17 }
   0x7   : > { %s456_s18 = scalar_lea.vmem %s120_s17, 256  ;;  %p464_p11 = scmp.lt.s32.totalorder %s120_s17, %s120_s17 }
   0x8   : > { %p412_p5 = pneg %p538_p3  ;;  %p457_p8 = scmp.ne.s32.totalorder %s120_s17, %s456_s18 }
   0x9   : > { %p465_p12 = scmp.lt.s32.totalorder %s456_s18, %s456_s18 }
   0xa   : > { %p413_p6 = pnand %p542_p4, %p412_p5 }
   0xb   : > { %p466_p13 = por %p465_p12, %p464_p11 }
   0xc   : > { %p447_p7 = pneg %p413_p6 }
   0xe   : > { %p459_p9 = pnand %p457_p8, %p447_p7 }
  0x10   : > { %p460_p10 = pneg %p459_p9 }
  0x12   : > { %p467_p0 = pnand %p466_p13, %p460_p10 }
  0x14   : > { %470 = shalt.err (!%p467_p0)
}
  0x15   : > { %s500_s19 = smov 128   ;;  %s501_s20 = smov 8  }
  0x16   : > { %415 = dma.hbm_to_vmem [thread:$0]  (!%p413_p6), %s576_s0, 256, %s120_s17, [#allocation3], %s500_s19, %s500_s19, %s501_s20  }
  0x17   : > { %146 = sbr.rel (%p538_p3) target bundleno = 235 (0xeb), region = 28 }
  0x1c   : > { %484 = dma.done.wait (%p542_p4), [#allocation3], 256  }
  0x1d   : > { %486 = vsyncadd (%p542_p4), [#allocation3], 4294967040  ;;  %p174_p1 = scmp.lt.s32.totalorder %s489_s9, 23  ;;  %vm201_vm0 = vcmask 1043456   ;;  %vm194_vm1 = vcmask 97280   ;;  %v190_v2 = vld [vmem:[#allocation2] sm:$0xff] }
  0x1e   : > { %405 = vmatprep.mubr.msk.f32.mxu0 %vm194_vm1, %v190_v2  ;;  %v191_v3 = vld [vmem:[#allocation2 + $0x8] sm:$0xff]  ;;  %vm280_vm2 = vcmask 130048  }
  0x1f   : > { %s586_s9 = smov (!%p174_p1, %s489_s9), 23 }
  0x20   : > { %s395_s23 = sshll.u32 %s586_s9, 4 }
  0x21   : > { %s181_s26 = scalar_lea.vmem %s577_s1, %s395_s23  ;;  %s189_s29 = scalar_lea.vmem %s578_s2, %s395_s23 }
  0x22   : > { %v193_v0 = vld [vmem:[%s181_s26 + $0x8] sm:$0xf]  ;;  %v192_v1 = vld [vmem:[%s181_s26] sm:$0xff] }
  0x23   : > { %401 = vmatprep.subr.msk.mxu0 %vm201_vm0, %v193_v0 }
  0x24   : > { %402 = vmatpush3.msk.msra.mxu0 %vm201_vm0, %v193_v0 }
  0x25   : > { %403 = vmatprep.subr.mxu0 %v192_v1 }
  0x26   : > { %404 = vmatpush3.msra.mxu0 %v192_v1 }
  0x27   : > { %406 = vmatmul.mubr.msk.f32.vlgmr.msra.gmra.mxu0 %vm194_vm1, %v191_v3 }
  0xe7   : > { %v407_v4 = vpop.f32.mrf.mxu0 }
  0xe8   : > { %282 = vst.msk [vmem:[%s189_s29 + $0x8] sm:$0xff] %vm280_vm2, %v407_v4 }
  0xe9   : > { %v271_v5 = vpop.f32.mrf.mxu0 }
  0xea   : > { %281 = vst.msk [vmem:[%s189_s29] sm:$0xff] %vm280_vm2, %v271_v5 }
  0xeb PF: > { %s13_s11 = sadd.s32 1, %s497_s11   ;;  %s581_s9 = smov %s493_s10 }
  0xec   : > { %p10_p2 = scmp.ge.s32.totalorder %s13_s11, 26   ;;  %s582_s10 = smov %s584_s13 }
  0xee   :  { %12 = sbr.rel (!%p10_p2) target bundleno = 2 (0x2), region = 63 }
  0xf3   :  { %310 = vsyncpa [#allocation3], 1 }
  0xf4   :  { %312 = vsyncpa [#allocation3 + $0x1], 1 }

// kernel: _lambda_.9
= control target key start
LH: loop header
LB: loop body
LE: loop exit
PB: predicated region body
PF: predicated region fallthrough
CT: control target
= control target key end

     0   :  { %7 = vsyncpa [#allocation3], 0  ;;  %s532_s9 = smov 0   ;;  %s534_s10 = smov 0   ;;  %s591_s0 = inlined_call_operand.hbm [shape: f32[16,12], index: 0, kind: input, shape index: {}]   ;;  %s592_s1 = inlined_call_operand.vmem [shape: f32[2,12,256], index: 1, kind: input, shape index: {}]   ;;  %s593_s2 = inlined_call_operand.vmem [shape: f32[2,16,256], index: 2, kind: output, shape index: {}]  }
   0x1   :  { %s536_s11 = smov 0  }
   0x2 LB: > { %s398_s12 = sadd.s32 4294967295, %s511_s11   ;;  %s25_s13 = sadd.s32 1, %s507_s10  ;;  %s511_s11 = sphi %s536_s11, %s13_s11   ;;  %s507_s10 = sphi %s534_s10, %s597_s10   ;;  %s503_s9 = sphi %s532_s9, %s596_s9  }
   0x3   : > { %p27_p0 = scmp.ge.s32.totalorder %s25_s13, 2  ;;  %p400_p1 = scmp.ge.s32.totalorder %s511_s11, 1 }
   0x4   : > { %p107_p2 = scmp.lt.s32.totalorder %s511_s11, 3  ;;  %p557_p4 = scmp.eq.s32.totalorder %s398_s12, 0 }
   0x5   : > { %s599_s13 = smov (%p27_p0, %s25_s13), 0  ;;  %s513_s16 = smov [#allocation2]  }
   0x6   : > { %p553_p3 = pnand %p400_p1, %p107_p2  ;;  %s119_s17 = sshll.u32 %s513_s16, 4  ;;  %s120_s17 = int_to_ptr.vmem [resolvable:$true] %s119_s17 }
   0x7   : > { %s470_s18 = scalar_lea.vmem %s120_s17, 256  ;;  %p478_p11 = scmp.lt.s32.totalorder %s120_s17, %s120_s17 }
   0x8   : > { %p425_p5 = pneg %p553_p3  ;;  %p471_p8 = scmp.ne.s32.totalorder %s120_s17, %s470_s18 }
   0x9   : > { %p479_p12 = scmp.lt.s32.totalorder %s470_s18, %s470_s18 }
   0xa   : > { %p426_p6 = pnand %p557_p4, %p425_p5 }
   0xb   : > { %p480_p13 = por %p479_p12, %p478_p11 }
   0xc   : > { %p461_p7 = pneg %p426_p6 }
   0xe   : > { %p473_p9 = pnand %p471_p8, %p461_p7 }
  0x10   : > { %p474_p10 = pneg %p473_p9 }
  0x12   : > { %p481_p0 = pnand %p480_p13, %p474_p10 }
  0x14   : > { %484 = shalt.err (!%p481_p0)
}
  0x15   : > { %s514_s19 = smov 128   ;;  %s515_s20 = smov 8  }
  0x16   : > { %428 = dma.hbm_to_vmem [thread:$0]  (!%p426_p6), %s591_s0, 256, %s120_s17, [#allocation3], %s514_s19, %s514_s19, %s515_s20  }
  0x17   : > { %148 = sbr.rel (%p553_p3) target bundleno = 235 (0xeb), region = 28 }
  0x1c   : > { %498 = dma.done.wait (%p557_p4), [#allocation3], 256  }
  0x1d   : > { %500 = vsyncadd (%p557_p4), [#allocation3], 4294967040  ;;  %p179_p1 = scmp.lt.s32.totalorder %s503_s9, 1  ;;  %v516_v0 = vmov 0.0   ;;  %vm211_vm0 = vcmask 1043456   ;;  %v198_v5 = vld [vmem:[#allocation2] sm:$0xff] }
  0x1e   : > { %282 = vmatprep.mubr.f32.mxu0 %v516_v0  ;;  %288 = vmatprep.mubr.f32.mxu1 %v516_v0  ;;  %vm204_vm1 = vcmask 97280   ;;  %v199_v6 = vld [vmem:[#allocation2 + $0x8] sm:$0xff] }
  0x1f   : > { %s601_s9 = smov (!%p179_p1, %s503_s9), 1 }
  0x20   : > { %s415_s23 = sshll.u32 %s601_s9, 5 }
  0x21   : > { %s186_s26 = scalar_lea.vmem %s592_s1, %s415_s23  ;;  %s196_s29 = scalar_lea.vmem %s593_s2, %s415_s23 }
  0x22   : > { %v203_v1 = vld [vmem:[%s186_s26 + $0x18] sm:$0xf]  ;;  %v202_v2 = vld [vmem:[%s186_s26 + $0x10] sm:$0xf]  ;;  %v201_v3 = vld [vmem:[%s186_s26 + $0x8] sm:$0xff] }
  0x23   : > { %409 = vmatprep.subr.msk.mxu0 %vm211_vm0, %v203_v1  ;;  %417 = vmatprep.subr.msk.mxu1 %vm211_vm0, %v203_v1  ;;  %v200_v4 = vld [vmem:[%s186_s26] sm:$0xff] }
  0x24   : > { %410 = vmatpush1.msk.msra.mxu0 %vm211_vm0, %v202_v2  ;;  %419 = vmatpush1.msk.msra.mxu1 %vm211_vm0, %v202_v2 }
  0x25   : > { %248 = vmatprep.subr.mxu0 %v201_v3  ;;  %418 = vmatprep.subr.mxu1 %v201_v3 }
  0x26   : > { %249 = vmatpush1.msra.mxu0 %v200_v4  ;;  %420 = vmatpush1.msra.mxu1 %v200_v4 }
  0x27   : > { %411 = vmatmul.mubr.msk.f32.vlgmr.msra.gmra.mxu0 %vm204_vm1, %v198_v5  ;;  %412 = vmatmul.mubr.msk.f32.vlgmr.msra.gmra.mxu1 %vm204_vm1, %v199_v6 }
  0xe7   : > { %v284_v7 = vpop.f32.mrf.mxu0  ;;  %v290_v8 = vpop.f32.mrf.mxu1 }
  0xe8   : > { %295 = vst [vmem:[%s196_s29] sm:$0xff] %v284_v7  ;;  %297 = vst [vmem:[%s196_s29 + $0x10] sm:$0xff] %v290_v8 }
  0xe9   : > { %v286_v9 = vpop.f32.mrf.mxu0  ;;  %v292_v10 = vpop.f32.mrf.mxu1 }
  0xea   : > { %296 = vst [vmem:[%s196_s29 + $0x8] sm:$0xff] %v286_v9  ;;  %298 = vst [vmem:[%s196_s29 + $0x18] sm:$0xff] %v292_v10 }
  0xeb PF: > { %s13_s11 = sadd.s32 1, %s511_s11   ;;  %s596_s9 = smov %s507_s10 }
  0xec   : > { %p10_p2 = scmp.ge.s32.totalorder %s13_s11, 4   ;;  %s597_s10 = smov %s599_s13 }
  0xee   :  { %12 = sbr.rel (!%p10_p2) target bundleno = 2 (0x2), region = 63 }
  0xf3   :  { %329 = vsyncpa [#allocation3], 1 }
  0xf4   :  { %331 = vsyncpa [#allocation3 + $0x1], 1 }

// kernel: _lambda_.7
= control target key start
LH: loop header
LB: loop body
LE: loop exit
PB: predicated region body
PF: predicated region fallthrough
CT: control target
= control target key end

     0   :  { %vm158_vm0 = vcmask 1043456   ;;  %vm49_vm1 = vcmask 97280   ;;  %vm407_vm2 = vcmask 130048   ;;  %s894_s1 = inlined_call_operand.vmem [shape: f32[12,16], index: 1, kind: input, shape index: {}]   ;;  %s895_s0 = inlined_call_operand.vmem [shape: f32[288,12], index: 0, kind: input, shape index: {}]   ;;  %s896_s2 = inlined_call_operand.vmem [shape: f32[288,16], index: 2, kind: output, shape index: {}]  }
   0x1   :  { %v48_v0 = vld [vmem:[%s894_s1 + $0x8] sm:$0xf]  ;;  %v47_v1 = vld [vmem:[%s894_s1] sm:$0xff]  ;;  %v29_v3 = vld [vmem:[%s895_s0 + $0x90] sm:$0xff] }
   0x2   :  { %523 = vmatprep.subr.msk.mxu0 %vm158_vm0, %v48_v0  ;;  %581 = vmatprep.subr.msk.mxu1 %vm158_vm0, %v48_v0  ;;  %v11_v2 = vld [vmem:[%s895_s0] sm:$0xff]  ;;  %v12_v4 = vld [vmem:[%s895_s0 + $0x8] sm:$0xff]  ;;  %v30_v5 = vld [vmem:[%s895_s0 + $0x98] sm:$0xff] }
   0x3   :  { %524 = vmatpush3.msk.msra.mxu0 %vm158_vm0, %v48_v0  ;;  %583 = vmatpush3.msk.msra.mxu1 %vm158_vm0, %v48_v0  ;;  %v13_v6 = vld [vmem:[%s895_s0 + $0x10] sm:$0xff]  ;;  %v31_v7 = vld [vmem:[%s895_s0 + $0xa0] sm:$0xff]  ;;  %v14_v8 = vld [vmem:[%s895_s0 + $0x18] sm:$0xff] }
   0x4   :  { %525 = vmatprep.subr.mxu0 %v47_v1  ;;  %582 = vmatprep.subr.mxu1 %v47_v1  ;;  %v32_v9 = vld [vmem:[%s895_s0 + $0xa8] sm:$0xff]  ;;  %v15_v10 = vld [vmem:[%s895_s0 + $0x20] sm:$0xff]  ;;  %v33_v11 = vld [vmem:[%s895_s0 + $0xb0] sm:$0xff] }
   0x5   :  { %526 = vmatpush3.msra.mxu0 %v47_v1  ;;  %584 = vmatpush3.msra.mxu1 %v47_v1  ;;  %v16_v12 = vld [vmem:[%s895_s0 + $0x28] sm:$0xff]  ;;  %v34_v13 = vld [vmem:[%s895_s0 + $0xb8] sm:$0xff]  ;;  %v17_v14 = vld [vmem:[%s895_s0 + $0x30] sm:$0xff] }
   0x6   :  { %527 = vmatprep.mubr.msk.f32.mxu0 %vm49_vm1, %v11_v2  ;;  %554 = vmatprep.mubr.msk.f32.mxu1 %vm49_vm1, %v29_v3  ;;  %v35_v15 = vld [vmem:[%s895_s0 + $0xc0] sm:$0xff]  ;;  %v18_v16 = vld [vmem:[%s895_s0 + $0x38] sm:$0xff]  ;;  %v36_v17 = vld [vmem:[%s895_s0 + $0xc8] sm:$0xff] }
   0x7   :  { %528 = vmatmul.mubr.msk.f32.vlgmr.msra.gmra.mxu0 %vm49_vm1, %v12_v4  ;;  %555 = vmatmul.mubr.msk.f32.vlgmr.msra.gmra.mxu1 %vm49_vm1, %v30_v5  ;;  %v19_v18 = vld [vmem:[%s895_s0 + $0x40] sm:$0xff]  ;;  %v37_v19 = vld [vmem:[%s895_s0 + $0xd0] sm:$0xff]  ;;  %v20_v20 = vld [vmem:[%s895_s0 + $0x48] sm:$0xff] }
   0x8   :  { %530 = vmatprep.mubr.msk.f32.mxu0 %vm49_vm1, %v13_v6  ;;  %557 = vmatprep.mubr.msk.f32.mxu1 %vm49_vm1, %v31_v7  ;;  %v38_v21 = vld [vmem:[%s895_s0 + $0xd8] sm:$0xff]  ;;  %v21_v22 = vld [vmem:[%s895_s0 + $0x50] sm:$0xff]  ;;  %v39_v23 = vld [vmem:[%s895_s0 + $0xe0] sm:$0xff] }
   0x9   :  { %v22_v24 = vld [vmem:[%s895_s0 + $0x58] sm:$0xff]  ;;  %v40_v25 = vld [vmem:[%s895_s0 + $0xe8] sm:$0xff]  ;;  %v23_v26 = vld [vmem:[%s895_s0 + $0x60] sm:$0xff] }
   0xa   :  { %v41_v27 = vld [vmem:[%s895_s0 + $0xf0] sm:$0xff]  ;;  %v24_v28 = vld [vmem:[%s895_s0 + $0x68] sm:$0xff]  ;;  %v42_v29 = vld [vmem:[%s895_s0 + $0xf8] sm:$0xff] }
   0xb   :  { %531 = vmatmul.mubr.msk.f32.gmra.mxu0 %vm49_vm1, %v14_v8  ;;  %558 = vmatmul.mubr.msk.f32.gmra.mxu1 %vm49_vm1, %v32_v9  ;;  %v25_v30 = vld [vmem:[%s895_s0 + $0x70] sm:$0xff]  ;;  %v43_v31 = vld [vmem:[%s895_s0 + $0x100] sm:$0xff]  ;;  %v26_v32 = vld [vmem:[%s895_s0 + $0x78] sm:$0xff] }
   0xc   :  { %533 = vmatprep.mubr.msk.f32.mxu0 %vm49_vm1, %v15_v10  ;;  %560 = vmatprep.mubr.msk.f32.mxu1 %vm49_vm1, %v33_v11  ;;  %v44_v33 = vld [vmem:[%s895_s0 + $0x108] sm:$0xff]  ;;  %v27_v34 = vld [vmem:[%s895_s0 + $0x80] sm:$0xff]  ;;  %v45_v35 = vld [vmem:[%s895_s0 + $0x110] sm:$0xff] }
   0xd   :  { %v28_v36 = vld [vmem:[%s895_s0 + $0x88] sm:$0xff]  ;;  %v46_v37 = vld [vmem:[%s895_s0 + $0x118] sm:$0xff] }
   0xf   :  { %534 = vmatmul.mubr.msk.f32.gmra.mxu0 %vm49_vm1, %v16_v12  ;;  %561 = vmatmul.mubr.msk.f32.gmra.mxu1 %vm49_vm1, %v34_v13 }
  0x10   :  { %536 = vmatprep.mubr.msk.f32.mxu0 %vm49_vm1, %v17_v14  ;;  %563 = vmatprep.mubr.msk.f32.mxu1 %vm49_vm1, %v35_v15 }
  0x13   :  { %537 = vmatmul.mubr.msk.f32.gmra.mxu0 %vm49_vm1, %v18_v16  ;;  %564 = vmatmul.mubr.msk.f32.gmra.mxu1 %vm49_vm1, %v36_v17 }
  0x14   :  { %539 = vmatprep.mubr.msk.f32.mxu0 %vm49_vm1, %v19_v18  ;;  %566 = vmatprep.mubr.msk.f32.mxu1 %vm49_vm1, %v37_v19 }
  0x17   :  { %540 = vmatmul.mubr.msk.f32.gmra.mxu0 %vm49_vm1, %v20_v20  ;;  %567 = vmatmul.mubr.msk.f32.gmra.mxu1 %vm49_vm1, %v38_v21 }
  0x18   :  { %542 = vmatprep.mubr.msk.f32.mxu0 %vm49_vm1, %v21_v22  ;;  %569 = vmatprep.mubr.msk.f32.mxu1 %vm49_vm1, %v39_v23 }
  0x1b   :  { %543 = vmatmul.mubr.msk.f32.gmra.mxu0 %vm49_vm1, %v22_v24  ;;  %570 = vmatmul.mubr.msk.f32.gmra.mxu1 %vm49_vm1, %v40_v25 }
  0x1c   :  { %545 = vmatprep.mubr.msk.f32.mxu0 %vm49_vm1, %v23_v26  ;;  %572 = vmatprep.mubr.msk.f32.mxu1 %vm49_vm1, %v41_v27 }
  0x1f   :  { %546 = vmatmul.mubr.msk.f32.gmra.mxu0 %vm49_vm1, %v24_v28  ;;  %573 = vmatmul.mubr.msk.f32.gmra.mxu1 %vm49_vm1, %v42_v29 }
  0x20   :  { %548 = vmatprep.mubr.msk.f32.mxu0 %vm49_vm1, %v25_v30  ;;  %575 = vmatprep.mubr.msk.f32.mxu1 %vm49_vm1, %v43_v31 }
  0x23   :  { %549 = vmatmul.mubr.msk.f32.gmra.mxu0 %vm49_vm1, %v26_v32  ;;  %576 = vmatmul.mubr.msk.f32.gmra.mxu1 %vm49_vm1, %v44_v33 }
  0x24   :  { %551 = vmatprep.mubr.msk.f32.mxu0 %vm49_vm1, %v27_v34  ;;  %578 = vmatprep.mubr.msk.f32.mxu1 %vm49_vm1, %v45_v35 }
  0x27   :  { %552 = vmatmul.mubr.msk.f32.gmra.mxu0 %vm49_vm1, %v28_v36  ;;  %579 = vmatmul.mubr.msk.f32.gmra.mxu1 %vm49_vm1, %v46_v37 }
  0xc7   :  { %v529_v38 = vpop.f32.mrf.mxu0  ;;  %v556_v39 = vpop.f32.mrf.mxu1 }
  0xc8   :  { %409 = vst.msk [vmem:[%s896_s2 + $0x8] sm:$0xff] %vm407_vm2, %v529_v38  ;;  %427 = vst.msk [vmem:[%s896_s2 + $0x98] sm:$0xff] %vm407_vm2, %v556_v39 }
  0xc9   :  { %v228_v40 = vpop.f32.mrf.mxu0  ;;  %v318_v41 = vpop.f32.mrf.mxu1 }
  0xca   :  { %408 = vst.msk [vmem:[%s896_s2] sm:$0xff] %vm407_vm2, %v228_v40  ;;  %426 = vst.msk [vmem:[%s896_s2 + $0x90] sm:$0xff] %vm407_vm2, %v318_v41 }
  0xcb   :  { %v532_v42 = vpop.f32.mrf.mxu0  ;;  %v559_v43 = vpop.f32.mrf.mxu1 }
  0xcc   :  { %411 = vst.msk [vmem:[%s896_s2 + $0x18] sm:$0xff] %vm407_vm2, %v532_v42  ;;  %429 = vst.msk [vmem:[%s896_s2 + $0xa8] sm:$0xff] %vm407_vm2, %v559_v43 }
  0xcd   :  { %v238_v44 = vpop.f32.mrf.mxu0  ;;  %v328_v45 = vpop.f32.mrf.mxu1 }
  0xce   :  { %410 = vst.msk [vmem:[%s896_s2 + $0x10] sm:$0xff] %vm407_vm2, %v238_v44  ;;  %428 = vst.msk [vmem:[%s896_s2 + $0xa0] sm:$0xff] %vm407_vm2, %v328_v45 }
  0xcf   :  { %v535_v46 = vpop.f32.mrf.mxu0  ;;  %v562_v47 = vpop.f32.mrf.mxu1 }
  0xd0   :  { %413 = vst.msk [vmem:[%s896_s2 + $0x28] sm:$0xff] %vm407_vm2, %v535_v46  ;;  %431 = vst.msk [vmem:[%s896_s2 + $0xb8] sm:$0xff] %vm407_vm2, %v562_v47 }
  0xd1   :  { %v248_v48 = vpop.f32.mrf.mxu0  ;;  %v338_v49 = vpop.f32.mrf.mxu1 }
  0xd2   :  { %412 = vst.msk [vmem:[%s896_s2 + $0x20] sm:$0xff] %vm407_vm2, %v248_v48  ;;  %430 = vst.msk [vmem:[%s896_s2 + $0xb0] sm:$0xff] %vm407_vm2, %v338_v49 }
  0xd3   :  { %v538_v50 = vpop.f32.mrf.mxu0  ;;  %v565_v51 = vpop.f32.mrf.mxu1 }
  0xd4   :  { %415 = vst.msk [vmem:[%s896_s2 + $0x38] sm:$0xff] %vm407_vm2, %v538_v50  ;;  %433 = vst.msk [vmem:[%s896_s2 + $0xc8] sm:$0xff] %vm407_vm2, %v565_v51 }
  0xd5   :  { %v258_v52 = vpop.f32.mrf.mxu0  ;;  %v348_v53 = vpop.f32.mrf.mxu1 }
  0xd6   :  { %414 = vst.msk [vmem:[%s896_s2 + $0x30] sm:$0xff] %vm407_vm2, %v258_v52  ;;  %432 = vst.msk [vmem:[%s896_s2 + $0xc0] sm:$0xff] %vm407_vm2, %v348_v53 }
  0xd7   :  { %v541_v54 = vpop.f32.mrf.mxu0  ;;  %v568_v55 = vpop.f32.mrf.mxu1 }
  0xd8   :  { %417 = vst.msk [vmem:[%s896_s2 + $0x48] sm:$0xff] %vm407_vm2, %v541_v54  ;;  %435 = vst.msk [vmem:[%s896_s2 + $0xd8] sm:$0xff] %vm407_vm2, %v568_v55 }
  0xd9   :  { %v268_v56 = vpop.f32.mrf.mxu0  ;;  %v358_v57 = vpop.f32.mrf.mxu1 }
  0xda   :  { %416 = vst.msk [vmem:[%s896_s2 + $0x40] sm:$0xff] %vm407_vm2, %v268_v56  ;;  %434 = vst.msk [vmem:[%s896_s2 + $0xd0] sm:$0xff] %vm407_vm2, %v358_v57 }
  0xdb   :  { %v544_v58 = vpop.f32.mrf.mxu0  ;;  %v571_v59 = vpop.f32.mrf.mxu1 }
  0xdc   :  { %419 = vst.msk [vmem:[%s896_s2 + $0x58] sm:$0xff] %vm407_vm2, %v544_v58  ;;  %437 = vst.msk [vmem:[%s896_s2 + $0xe8] sm:$0xff] %vm407_vm2, %v571_v59 }
  0xdd   :  { %v278_v60 = vpop.f32.mrf.mxu0  ;;  %v368_v61 = vpop.f32.mrf.mxu1 }
  0xde   :  { %418 = vst.msk [vmem:[%s896_s2 + $0x50] sm:$0xff] %vm407_vm2, %v278_v60  ;;  %436 = vst.msk [vmem:[%s896_s2 + $0xe0] sm:$0xff] %vm407_vm2, %v368_v61 }
  0xdf   :  { %v547_v62 = vpop.f32.mrf.mxu0  ;;  %v574_v63 = vpop.f32.mrf.mxu1 }
  0xe0   :  { %421 = vst.msk [vmem:[%s896_s2 + $0x68] sm:$0xff] %vm407_vm2, %v547_v62  ;;  %439 = vst.msk [vmem:[%s896_s2 + $0xf8] sm:$0xff] %vm407_vm2, %v574_v63 }
  0xe1   :  { %v288_v0 = vpop.f32.mrf.mxu0  ;;  %v378_v1 = vpop.f32.mrf.mxu1 }
  0xe2   :  { %420 = vst.msk [vmem:[%s896_s2 + $0x60] sm:$0xff] %vm407_vm2, %v288_v0  ;;  %438 = vst.msk [vmem:[%s896_s2 + $0xf0] sm:$0xff] %vm407_vm2, %v378_v1 }
  0xe3   :  { %v550_v2 = vpop.f32.mrf.mxu0  ;;  %v577_v3 = vpop.f32.mrf.mxu1 }
  0xe4   :  { %423 = vst.msk [vmem:[%s896_s2 + $0x78] sm:$0xff] %vm407_vm2, %v550_v2  ;;  %441 = vst.msk [vmem:[%s896_s2 + $0x108] sm:$0xff] %vm407_vm2, %v577_v3 }
  0xe5   :  { %v298_v4 = vpop.f32.mrf.mxu0  ;;  %v388_v5 = vpop.f32.mrf.mxu1 }
  0xe6   :  { %422 = vst.msk [vmem:[%s896_s2 + $0x70] sm:$0xff] %vm407_vm2, %v298_v4  ;;  %440 = vst.msk [vmem:[%s896_s2 + $0x100] sm:$0xff] %vm407_vm2, %v388_v5 }
  0xe7   :  { %v553_v6 = vpop.f32.mrf.mxu0  ;;  %v580_v7 = vpop.f32.mrf.mxu1 }
  0xe8   :  { %425 = vst.msk [vmem:[%s896_s2 + $0x88] sm:$0xff] %vm407_vm2, %v553_v6  ;;  %443 = vst.msk [vmem:[%s896_s2 + $0x118] sm:$0xff] %vm407_vm2, %v580_v7 }
  0xe9   :  { %v308_v8 = vpop.f32.mrf.mxu0  ;;  %v398_v9 = vpop.f32.mrf.mxu1 }
  0xea   :  { %424 = vst.msk [vmem:[%s896_s2 + $0x80] sm:$0xff] %vm407_vm2, %v308_v8  ;;  %442 = vst.msk [vmem:[%s896_s2 + $0x110] sm:$0xff] %vm407_vm2, %v398_v9 }

// kernel: _lambda_.10
= control target key start
LH: loop header
LB: loop body
LE: loop exit
PB: predicated region body
PF: predicated region fallthrough
CT: control target
= control target key end

     0   :  { %vm156_vm0 = vcmask 64512   ;;  %vm1246_vm1 = vcmask 392192   ;;  %s7450_s1 = inlined_call_operand.vmem [shape: f32[8,48], index: 1, kind: input, shape index: {}]   ;;  %s7451_s0 = inlined_call_operand.vmem [shape: f32[1024,8], index: 0, kind: input, shape index: {}]   ;;  %s7452_s2 = inlined_call_operand.vmem [shape: f32[1,48], index: 2, kind: input, shape index: {}]   ;;  %s7453_s3 = inlined_call_operand.vmem [shape: f32[1,48], index: 3, kind: input, shape index: {}]   ;;  %s7454_s4 = inlined_call_operand.vmem [shape: f32[1,48], index: 4, kind: input, shape index: {}]   ;;  %s7455_s5 = inlined_call_operand.vmem [shape: f32[1024,48], index: 5, kind: output, shape index: {}]  }
   0x1   :  { %v148_v0 = vld [vmem:[%s7450_s1] sm:$0xff]  ;;  %v21_v3 = vld [vmem:[%s7451_s0 + $0x8] sm:$0xff]  ;;  %v22_v5 = vld [vmem:[%s7451_s0 + $0x10] sm:$0xff] }
   0x2   :  { %v20_v1 = vld [vmem:[%s7451_s0] sm:$0xff]  ;;  %3574 = vmatprep.subr.mxu0 %v148_v0  ;;  %3768 = vmatprep.subr.mxu1 %v148_v0  ;;  %v85_v4 = vld [vmem:[%s7451_s0 + $0x208] sm:$0xff]  ;;  %v86_v6 = vld [vmem:[%s7451_s0 + $0x210] sm:$0xff] }
   0x3   :  { %v84_v2 = vld [vmem:[%s7451_s0 + $0x200] sm:$0xff]  ;;  %3575 = vmatpush3.msra.mxu0 %v148_v0  ;;  %3769 = vmatpush3.msra.mxu1 %v148_v0  ;;  %v23_v7 = vld [vmem:[%s7451_s0 + $0x18] sm:$0xff]  ;;  %v25_v11 = vld [vmem:[%s7451_s0 + $0x28] sm:$0xff] }
   0x4   :  { %3576 = vmatprep.mubr.msk.f32.mxu0 %vm156_vm0, %v20_v1  ;;  %3672 = vmatprep.mubr.msk.f32.mxu1 %vm156_vm0, %v84_v2  ;;  %v87_v8 = vld [vmem:[%s7451_s0 + $0x218] sm:$0xff]  ;;  %v24_v9 = vld [vmem:[%s7451_s0 + $0x20] sm:$0xff]  ;;  %v89_v12 = vld [vmem:[%s7451_s0 + $0x228] sm:$0xff] }
   0x5   :  { %3577 = vmatmul.mubr.msk.f32.vlgmr.msra.gmra.mxu0 %vm156_vm0, %v21_v3  ;;  %3673 = vmatmul.mubr.msk.f32.vlgmr.msra.gmra.mxu1 %vm156_vm0, %v85_v4  ;;  %v88_v10 = vld [vmem:[%s7451_s0 + $0x220] sm:$0xff]  ;;  %v26_v13 = vld [vmem:[%s7451_s0 + $0x30] sm:$0xff]  ;;  %v27_v15 = vld [vmem:[%s7451_s0 + $0x38] sm:$0xff] }
   0x6   :  { %3579 = vmatprep.mubr.msk.f32.mxu0 %vm156_vm0, %v22_v5  ;;  %3675 = vmatprep.mubr.msk.f32.mxu1 %vm156_vm0, %v86_v6  ;;  %v90_v14 = vld [vmem:[%s7451_s0 + $0x230] sm:$0xff]  ;;  %v91_v16 = vld [vmem:[%s7451_s0 + $0x238] sm:$0xff]  ;;  %v28_v17 = vld [vmem:[%s7451_s0 + $0x40] sm:$0xff] }
   0x7   :  { %v92_v18 = vld [vmem:[%s7451_s0 + $0x240] sm:$0xff]  ;;  %v29_v19 = vld [vmem:[%s7451_s0 + $0x48] sm:$0xff]  ;;  %v30_v21 = vld [vmem:[%s7451_s0 + $0x50] sm:$0xff] }
   0x8   :  { %v93_v20 = vld [vmem:[%s7451_s0 + $0x248] sm:$0xff]  ;;  %v94_v22 = vld [vmem:[%s7451_s0 + $0x250] sm:$0xff]  ;;  %v31_v23 = vld [vmem:[%s7451_s0 + $0x58] sm:$0xff] }
   0x9   :  { %3580 = vmatmul.mubr.msk.f32.gmra.mxu0 %vm156_vm0, %v23_v7  ;;  %3676 = vmatmul.mubr.msk.f32.gmra.mxu1 %vm156_vm0, %v87_v8  ;;  %v95_v24 = vld [vmem:[%s7451_s0 + $0x258] sm:$0xff]  ;;  %v32_v25 = vld [vmem:[%s7451_s0 + $0x60] sm:$0xff]  ;;  %v33_v27 = vld [vmem:[%s7451_s0 + $0x68] sm:$0xff] }
   0xa   :  { %3582 = vmatprep.mubr.msk.f32.mxu0 %vm156_vm0, %v24_v9  ;;  %3678 = vmatprep.mubr.msk.f32.mxu1 %vm156_vm0, %v88_v10  ;;  %v96_v26 = vld [vmem:[%s7451_s0 + $0x260] sm:$0xff]  ;;  %v97_v28 = vld [vmem:[%s7451_s0 + $0x268] sm:$0xff]  ;;  %v34_v29 = vld [vmem:[%s7451_s0 + $0x70] sm:$0xff] }
   0xb   :  { %v98_v30 = vld [vmem:[%s7451_s0 + $0x270] sm:$0xff]  ;;  %v35_v31 = vld [vmem:[%s7451_s0 + $0x78] sm:$0xff]  ;;  %v36_v33 = vld [vmem:[%s7451_s0 + $0x80] sm:$0xff] }
   0xc   :  { %v99_v32 = vld [vmem:[%s7451_s0 + $0x278] sm:$0xff]  ;;  %v100_v34 = vld [vmem:[%s7451_s0 + $0x280] sm:$0xff]  ;;  %v37_v35 = vld [vmem:[%s7451_s0 + $0x88] sm:$0xff] }
   0xd   :  { %3583 = vmatmul.mubr.msk.f32.gmra.mxu0 %vm156_vm0, %v25_v11  ;;  %3679 = vmatmul.mubr.msk.f32.gmra.mxu1 %vm156_vm0, %v89_v12  ;;  %v101_v36 = vld [vmem:[%s7451_s0 + $0x288] sm:$0xff]  ;;  %v38_v37 = vld [vmem:[%s7451_s0 + $0x90] sm:$0xff]  ;;  %v39_v39 = vld [vmem:[%s7451_s0 + $0x98] sm:$0xff] }
   0xe   :  { %3585 = vmatprep.mubr.msk.f32.mxu0 %vm156_vm0, %v26_v13  ;;  %3681 = vmatprep.mubr.msk.f32.mxu1 %vm156_vm0, %v90_v14  ;;  %v102_v38 = vld [vmem:[%s7451_s0 + $0x290] sm:$0xff]  ;;  %v103_v40 = vld [vmem:[%s7451_s0 + $0x298] sm:$0xff]  ;;  %v40_v41 = vld [vmem:[%s7451_s0 + $0xa0] sm:$0xff] }
   0xf   :  { %v104_v42 = vld [vmem:[%s7451_s0 + $0x2a0] sm:$0xff]  ;;  %v41_v43 = vld [vmem:[%s7451_s0 + $0xa8] sm:$0xff]  ;;  %v42_v45 = vld [vmem:[%s7451_s0 + $0xb0] sm:$0xff] }
  0x10   :  { %v105_v44 = vld [vmem:[%s7451_s0 + $0x2a8] sm:$0xff]  ;;  %v106_v46 = vld [vmem:[%s7451_s0 + $0x2b0] sm:$0xff]  ;;  %v43_v47 = vld [vmem:[%s7451_s0 + $0xb8] sm:$0xff] }
  0x11   :  { %3586 = vmatmul.mubr.msk.f32.gmra.mxu0 %vm156_vm0, %v27_v15  ;;  %3682 = vmatmul.mubr.msk.f32.gmra.mxu1 %vm156_vm0, %v91_v16  ;;  %v107_v48 = vld [vmem:[%s7451_s0 + $0x2b8] sm:$0xff]  ;;  %v44_v49 = vld [vmem:[%s7451_s0 + $0xc0] sm:$0xff]  ;;  %v45_v51 = vld [vmem:[%s7451_s0 + $0xc8] sm:$0xff] }
  0x12   :  { %3588 = vmatprep.mubr.msk.f32.mxu0 %vm156_vm0, %v28_v17  ;;  %3684 = vmatprep.mubr.msk.f32.mxu1 %vm156_vm0, %v92_v18  ;;  %v108_v50 = vld [vmem:[%s7451_s0 + $0x2c0] sm:$0xff]  ;;  %v109_v52 = vld [vmem:[%s7451_s0 + $0x2c8] sm:$0xff]  ;;  %v46_v53 = vld [vmem:[%s7451_s0 + $0xd0] sm:$0xff] }
  0x13   :  { %v110_v54 = vld [vmem:[%s7451_s0 + $0x2d0] sm:$0xff]  ;;  %v47_v55 = vld [vmem:[%s7451_s0 + $0xd8] sm:$0xff]  ;;  %v48_v57 = vld [vmem:[%s7451_s0 + $0xe0] sm:$0xff] }
  0x14   :  { %v111_v56 = vld [vmem:[%s7451_s0 + $0x2d8] sm:$0xff]  ;;  %v112_v58 = vld [vmem:[%s7451_s0 + $0x2e0] sm:$0xff]  ;;  %v49_v59 = vld [vmem:[%s7451_s0 + $0xe8] sm:$0xff] }
  0x15   :  { %3589 = vmatmul.mubr.msk.f32.gmra.mxu0 %vm156_vm0, %v29_v19  ;;  %3685 = vmatmul.mubr.msk.f32.gmra.mxu1 %vm156_vm0, %v93_v20  ;;  %v113_v60 = vld [vmem:[%s7451_s0 + $0x2e8] sm:$0xff]  ;;  %v50_v61 = vld [vmem:[%s7451_s0 + $0xf0] sm:$0xff]  ;;  %v51_v63 = vld [vmem:[%s7451_s0 + $0xf8] sm:$0xff] }
  0x16   :  { %3591 = vmatprep.mubr.msk.f32.mxu0 %vm156_vm0, %v30_v21  ;;  %3687 = vmatprep.mubr.msk.f32.mxu1 %vm156_vm0, %v94_v22  ;;  %v114_v62 = vld [vmem:[%s7451_s0 + $0x2f0] sm:$0xff]  ;;  %v115_v0 = vld [vmem:[%s7451_s0 + $0x2f8] sm:$0xff]  ;;  %v52_v1 = vld [vmem:[%s7451_s0 + $0x100] sm:$0xff] }
  0x17   :  { %v116_v2 = vld [vmem:[%s7451_s0 + $0x300] sm:$0xff]  ;;  %v53_v3 = vld [vmem:[%s7451_s0 + $0x108] sm:$0xff]  ;;  %v54_v5 = vld [vmem:[%s7451_s0 + $0x110] sm:$0xff] }
  0x18   :  { %v117_v4 = vld [vmem:[%s7451_s0 + $0x308] sm:$0xff]  ;;  %v118_v6 = vld [vmem:[%s7451_s0 + $0x310] sm:$0xff]  ;;  %v55_v7 = vld [vmem:[%s7451_s0 + $0x118] sm:$0xff] }
  0x19   :  { %3592 = vmatmul.mubr.msk.f32.gmra.mxu0 %vm156_vm0, %v31_v23  ;;  %3688 = vmatmul.mubr.msk.f32.gmra.mxu1 %vm156_vm0, %v95_v24  ;;  %v119_v8 = vld [vmem:[%s7451_s0 + $0x318] sm:$0xff]  ;;  %v56_v9 = vld [vmem:[%s7451_s0 + $0x120] sm:$0xff]  ;;  %v57_v11 = vld [vmem:[%s7451_s0 + $0x128] sm:$0xff] }
  0x1a   :  { %3594 = vmatprep.mubr.msk.f32.mxu0 %vm156_vm0, %v32_v25  ;;  %3690 = vmatprep.mubr.msk.f32.mxu1 %vm156_vm0, %v96_v26  ;;  %v120_v10 = vld [vmem:[%s7451_s0 + $0x320] sm:$0xff]  ;;  %v121_v12 = vld [vmem:[%s7451_s0 + $0x328] sm:$0xff]  ;;  %v58_v13 = vld [vmem:[%s7451_s0 + $0x130] sm:$0xff] }
  0x1b   :  { %v122_v14 = vld [vmem:[%s7451_s0 + $0x330] sm:$0xff]  ;;  %v59_v15 = vld [vmem:[%s7451_s0 + $0x138] sm:$0xff]  ;;  %v60_v17 = vld [vmem:[%s7451_s0 + $0x140] sm:$0xff] }
  0x1c   :  { %v123_v16 = vld [vmem:[%s7451_s0 + $0x338] sm:$0xff]  ;;  %v124_v18 = vld [vmem:[%s7451_s0 + $0x340] sm:$0xff]  ;;  %v61_v19 = vld [vmem:[%s7451_s0 + $0x148] sm:$0xff] }
  0x1d   :  { %3595 = vmatmul.mubr.msk.f32.gmra.mxu0 %vm156_vm0, %v33_v27  ;;  %3691 = vmatmul.mubr.msk.f32.gmra.mxu1 %vm156_vm0, %v97_v28  ;;  %v125_v20 = vld [vmem:[%s7451_s0 + $0x348] sm:$0xff]  ;;  %v62_v21 = vld [vmem:[%s7451_s0 + $0x150] sm:$0xff]  ;;  %v63_v23 = vld [vmem:[%s7451_s0 + $0x158] sm:$0xff] }
  0x1e   :  { %3597 = vmatprep.mubr.msk.f32.mxu0 %vm156_vm0, %v34_v29  ;;  %3693 = vmatprep.mubr.msk.f32.mxu1 %vm156_vm0, %v98_v30  ;;  %v126_v22 = vld [vmem:[%s7451_s0 + $0x350] sm:$0xff]  ;;  %v127_v24 = vld [vmem:[%s7451_s0 + $0x358] sm:$0xff]  ;;  %v64_v25 = vld [vmem:[%s7451_s0 + $0x160] sm:$0xff] }
  0x1f   :  { %v128_v26 = vld [vmem:[%s7451_s0 + $0x360] sm:$0xff]  ;;  %v65_v27 = vld [vmem:[%s7451_s0 + $0x168] sm:$0xff]  ;;  %v66_v29 = vld [vmem:[%s7451_s0 + $0x170] sm:$0xff] }
  0x20   :  { %v129_v28 = vld [vmem:[%s7451_s0 + $0x368] sm:$0xff]  ;;  %v130_v30 = vld [vmem:[%s7451_s0 + $0x370] sm:$0xff] }
  0x21   :  { %3598 = vmatmul.mubr.msk.f32.gmra.mxu0 %vm156_vm0, %v35_v31  ;;  %3694 = vmatmul.mubr.msk.f32.gmra.mxu1 %vm156_vm0, %v99_v32  ;;  %v67_v31 = vld [vmem:[%s7451_s0 + $0x178] sm:$0xff] }
  0x22   :  { %3600 = vmatprep.mubr.msk.f32.mxu0 %vm156_vm0, %v36_v33  ;;  %3696 = vmatprep.mubr.msk.f32.mxu1 %vm156_vm0, %v100_v34  ;;  %v131_v32 = vld [vmem:[%s7451_s0 + $0x378] sm:$0xff]  ;;  %v68_v33 = vld [vmem:[%s7451_s0 + $0x180] sm:$0xff] }
  0x23   :  { %v132_v34 = vld [vmem:[%s7451_s0 + $0x380] sm:$0xff] }
  0x25   :  { %3601 = vmatmul.mubr.msk.f32.gmra.mxu0 %vm156_vm0, %v37_v35  ;;  %3697 = vmatmul.mubr.msk.f32.gmra.mxu1 %vm156_vm0, %v101_v36  ;;  %v69_v35 = vld [vmem:[%s7451_s0 + $0x188] sm:$0xff] }
  0x26   :  { %3603 = vmatprep.mubr.msk.f32.mxu0 %vm156_vm0, %v38_v37  ;;  %3699 = vmatprep.mubr.msk.f32.mxu1 %vm156_vm0, %v102_v38  ;;  %v133_v36 = vld [vmem:[%s7451_s0 + $0x388] sm:$0xff]  ;;  %v70_v37 = vld [vmem:[%s7451_s0 + $0x190] sm:$0xff] }
  0x27   :  { %v134_v38 = vld [vmem:[%s7451_s0 + $0x390] sm:$0xff] }
  0x29   :  { %3604 = vmatmul.mubr.msk.f32.gmra.mxu0 %vm156_vm0, %v39_v39  ;;  %3700 = vmatmul.mubr.msk.f32.gmra.mxu1 %vm156_vm0, %v103_v40  ;;  %v71_v39 = vld [vmem:[%s7451_s0 + $0x198] sm:$0xff] }
  0x2a   :  { %3606 = vmatprep.mubr.msk.f32.mxu0 %vm156_vm0, %v40_v41  ;;  %3702 = vmatprep.mubr.msk.f32.mxu1 %vm156_vm0, %v104_v42  ;;  %v135_v40 = vld [vmem:[%s7451_s0 + $0x398] sm:$0xff]  ;;  %v72_v41 = vld [vmem:[%s7451_s0 + $0x1a0] sm:$0xff] }
  0x2b   :  { %v136_v42 = vld [vmem:[%s7451_s0 + $0x3a0] sm:$0xff] }
  0x2d   :  { %3607 = vmatmul.mubr.msk.f32.gmra.mxu0 %vm156_vm0, %v41_v43  ;;  %3703 = vmatmul.mubr.msk.f32.gmra.mxu1 %vm156_vm0, %v105_v44  ;;  %v73_v43 = vld [vmem:[%s7451_s0 + $0x1a8] sm:$0xff] }
  0x2e   :  { %3609 = vmatprep.mubr.msk.f32.mxu0 %vm156_vm0, %v42_v45  ;;  %3705 = vmatprep.mubr.msk.f32.mxu1 %vm156_vm0, %v106_v46  ;;  %v137_v44 = vld [vmem:[%s7451_s0 + $0x3a8] sm:$0xff]  ;;  %v74_v45 = vld [vmem:[%s7451_s0 + $0x1b0] sm:$0xff] }
  0x2f   :  { %v138_v46 = vld [vmem:[%s7451_s0 + $0x3b0] sm:$0xff] }
  0x31   :  { %3610 = vmatmul.mubr.msk.f32.gmra.mxu0 %vm156_vm0, %v43_v47  ;;  %3706 = vmatmul.mubr.msk.f32.gmra.mxu1 %vm156_vm0, %v107_v48  ;;  %v75_v47 = vld [vmem:[%s7451_s0 + $0x1b8] sm:$0xff] }
  0x32   :  { %3612 = vmatprep.mubr.msk.f32.mxu0 %vm156_vm0, %v44_v49  ;;  %3708 = vmatprep.mubr.msk.f32.mxu1 %vm156_vm0, %v108_v50  ;;  %v139_v48 = vld [vmem:[%s7451_s0 + $0x3b8] sm:$0xff]  ;;  %v76_v49 = vld [vmem:[%s7451_s0 + $0x1c0] sm:$0xff] }
  0x33   :  { %v140_v50 = vld [vmem:[%s7451_s0 + $0x3c0] sm:$0xff] }
  0x35   :  { %3613 = vmatmul.mubr.msk.f32.gmra.mxu0 %vm156_vm0, %v45_v51  ;;  %3709 = vmatmul.mubr.msk.f32.gmra.mxu1 %vm156_vm0, %v109_v52  ;;  %v77_v51 = vld [vmem:[%s7451_s0 + $0x1c8] sm:$0xff] }
  0x36   :  { %3615 = vmatprep.mubr.msk.f32.mxu0 %vm156_vm0, %v46_v53  ;;  %3711 = vmatprep.mubr.msk.f32.mxu1 %vm156_vm0, %v110_v54  ;;  %v141_v52 = vld [vmem:[%s7451_s0 + $0x3c8] sm:$0xff]  ;;  %v78_v53 = vld [vmem:[%s7451_s0 + $0x1d0] sm:$0xff] }
  0x37   :  { %v142_v54 = vld [vmem:[%s7451_s0 + $0x3d0] sm:$0xff] }
  0x39   :  { %3616 = vmatmul.mubr.msk.f32.gmra.mxu0 %vm156_vm0, %v47_v55  ;;  %3712 = vmatmul.mubr.msk.f32.gmra.mxu1 %vm156_vm0, %v111_v56  ;;  %v79_v55 = vld [vmem:[%s7451_s0 + $0x1d8] sm:$0xff] }
  0x3a   :  { %3618 = vmatprep.mubr.msk.f32.mxu0 %vm156_vm0, %v48_v57  ;;  %3714 = vmatprep.mubr.msk.f32.mxu1 %vm156_vm0, %v112_v58  ;;  %v143_v56 = vld [vmem:[%s7451_s0 + $0x3d8] sm:$0xff]  ;;  %v80_v57 = vld [vmem:[%s7451_s0 + $0x1e0] sm:$0xff] }
  0x3b   :  { %v144_v58 = vld [vmem:[%s7451_s0 + $0x3e0] sm:$0xff] }
  0x3d   :  { %3619 = vmatmul.mubr.msk.f32.gmra.mxu0 %vm156_vm0, %v49_v59  ;;  %3715 = vmatmul.mubr.msk.f32.gmra.mxu1 %vm156_vm0, %v113_v60  ;;  %v81_v59 = vld [vmem:[%s7451_s0 + $0x1e8] sm:$0xff] }
  0x3e   :  { %3621 = vmatprep.mubr.msk.f32.mxu0 %vm156_vm0, %v50_v61  ;;  %3717 = vmatprep.mubr.msk.f32.mxu1 %vm156_vm0, %v114_v62  ;;  %v145_v60 = vld [vmem:[%s7451_s0 + $0x3e8] sm:$0xff]  ;;  %v82_v61 = vld [vmem:[%s7451_s0 + $0x1f0] sm:$0xff] }
  0x3f   :  { %v146_v62 = vld [vmem:[%s7451_s0 + $0x3f0] sm:$0xff] }
  0x41   :  { %3622 = vmatmul.mubr.msk.f32.gmra.mxu0 %vm156_vm0, %v51_v63  ;;  %3718 = vmatmul.mubr.msk.f32.gmra.mxu1 %vm156_vm0, %v115_v0  ;;  %v83_v63 = vld [vmem:[%s7451_s0 + $0x1f8] sm:$0xff] }
  0x42   :  { %3624 = vmatprep.mubr.msk.f32.mxu0 %vm156_vm0, %v52_v1  ;;  %3720 = vmatprep.mubr.msk.f32.mxu1 %vm156_vm0, %v116_v2  ;;  %v147_v0 = vld [vmem:[%s7451_s0 + $0x3f8] sm:$0xff]  ;;  %v4579_v1 = vld [vmem:[%s7452_s2] ss:$0 sm:$0xff] }
  0x45   :  { %3625 = vmatmul.mubr.msk.f32.gmra.mxu0 %vm156_vm0, %v53_v3  ;;  %3721 = vmatmul.mubr.msk.f32.gmra.mxu1 %vm156_vm0, %v117_v4 }
  0x46   :  { %3627 = vmatprep.mubr.msk.f32.mxu0 %vm156_vm0, %v54_v5  ;;  %3723 = vmatprep.mubr.msk.f32.mxu1 %vm156_vm0, %v118_v6 }
  0x49   :  { %3628 = vmatmul.mubr.msk.f32.gmra.mxu0 %vm156_vm0, %v55_v7  ;;  %3724 = vmatmul.mubr.msk.f32.gmra.mxu1 %vm156_vm0, %v119_v8 }
  0x4a   :  { %3630 = vmatprep.mubr.msk.f32.mxu0 %vm156_vm0, %v56_v9  ;;  %3726 = vmatprep.mubr.msk.f32.mxu1 %vm156_vm0, %v120_v10 }
  0x4d   :  { %3631 = vmatmul.mubr.msk.f32.gmra.mxu0 %vm156_vm0, %v57_v11  ;;  %3727 = vmatmul.mubr.msk.f32.gmra.mxu1 %vm156_vm0, %v121_v12 }
  0x4e   :  { %3633 = vmatprep.mubr.msk.f32.mxu0 %vm156_vm0, %v58_v13  ;;  %3729 = vmatprep.mubr.msk.f32.mxu1 %vm156_vm0, %v122_v14 }
  0x51   :  { %3634 = vmatmul.mubr.msk.f32.gmra.mxu0 %vm156_vm0, %v59_v15  ;;  %3730 = vmatmul.mubr.msk.f32.gmra.mxu1 %vm156_vm0, %v123_v16 }
  0x52   :  { %3636 = vmatprep.mubr.msk.f32.mxu0 %vm156_vm0, %v60_v17  ;;  %3732 = vmatprep.mubr.msk.f32.mxu1 %vm156_vm0, %v124_v18 }
  0x55   :  { %3637 = vmatmul.mubr.msk.f32.gmra.mxu0 %vm156_vm0, %v61_v19  ;;  %3733 = vmatmul.mubr.msk.f32.gmra.mxu1 %vm156_vm0, %v125_v20 }
  0x56   :  { %3639 = vmatprep.mubr.msk.f32.mxu0 %vm156_vm0, %v62_v21  ;;  %3735 = vmatprep.mubr.msk.f32.mxu1 %vm156_vm0, %v126_v22 }
  0x59   :  { %3640 = vmatmul.mubr.msk.f32.gmra.mxu0 %vm156_vm0, %v63_v23  ;;  %3736 = vmatmul.mubr.msk.f32.gmra.mxu1 %vm156_vm0, %v127_v24 }
  0x5a   :  { %3642 = vmatprep.mubr.msk.f32.mxu0 %vm156_vm0, %v64_v25  ;;  %3738 = vmatprep.mubr.msk.f32.mxu1 %vm156_vm0, %v128_v26 }
  0x5d   :  { %3643 = vmatmul.mubr.msk.f32.gmra.mxu0 %vm156_vm0, %v65_v27  ;;  %3739 = vmatmul.mubr.msk.f32.gmra.mxu1 %vm156_vm0, %v129_v28 }
  0x5e   :  { %3645 = vmatprep.mubr.msk.f32.mxu0 %vm156_vm0, %v66_v29  ;;  %3741 = vmatprep.mubr.msk.f32.mxu1 %vm156_vm0, %v130_v30 }
  0x61   :  { %3646 = vmatmul.mubr.msk.f32.gmra.mxu0 %vm156_vm0, %v67_v31  ;;  %3742 = vmatmul.mubr.msk.f32.gmra.mxu1 %vm156_vm0, %v131_v32 }
  0x62   :  { %3648 = vmatprep.mubr.msk.f32.mxu0 %vm156_vm0, %v68_v33  ;;  %3744 = vmatprep.mubr.msk.f32.mxu1 %vm156_vm0, %v132_v34 }
  0x65   :  { %3649 = vmatmul.mubr.msk.f32.gmra.mxu0 %vm156_vm0, %v69_v35  ;;  %3745 = vmatmul.mubr.msk.f32.gmra.mxu1 %vm156_vm0, %v133_v36 }
  0x66   :  { %3651 = vmatprep.mubr.msk.f32.mxu0 %vm156_vm0, %v70_v37  ;;  %3747 = vmatprep.mubr.msk.f32.mxu1 %vm156_vm0, %v134_v38 }
  0x69   :  { %3652 = vmatmul.mubr.msk.f32.gmra.mxu0 %vm156_vm0, %v71_v39  ;;  %3748 = vmatmul.mubr.msk.f32.gmra.mxu1 %vm156_vm0, %v135_v40 }
  0x6a   :  { %3654 = vmatprep.mubr.msk.f32.mxu0 %vm156_vm0, %v72_v41  ;;  %3750 = vmatprep.mubr.msk.f32.mxu1 %vm156_vm0, %v136_v42 }
  0x6d   :  { %3655 = vmatmul.mubr.msk.f32.gmra.mxu0 %vm156_vm0, %v73_v43  ;;  %3751 = vmatmul.mubr.msk.f32.gmra.mxu1 %vm156_vm0, %v137_v44 }
  0x6e   :  { %3657 = vmatprep.mubr.msk.f32.mxu0 %vm156_vm0, %v74_v45  ;;  %3753 = vmatprep.mubr.msk.f32.mxu1 %vm156_vm0, %v138_v46 }
  0x71   :  { %3658 = vmatmul.mubr.msk.f32.gmra.mxu0 %vm156_vm0, %v75_v47  ;;  %3754 = vmatmul.mubr.msk.f32.gmra.mxu1 %vm156_vm0, %v139_v48 }
  0x72   :  { %3660 = vmatprep.mubr.msk.f32.mxu0 %vm156_vm0, %v76_v49  ;;  %3756 = vmatprep.mubr.msk.f32.mxu1 %vm156_vm0, %v140_v50 }
  0x75   :  { %3661 = vmatmul.mubr.msk.f32.gmra.mxu0 %vm156_vm0, %v77_v51  ;;  %3757 = vmatmul.mubr.msk.f32.gmra.mxu1 %vm156_vm0, %v141_v52 }
  0x76   :  { %3663 = vmatprep.mubr.msk.f32.mxu0 %vm156_vm0, %v78_v53  ;;  %3759 = vmatprep.mubr.msk.f32.mxu1 %vm156_vm0, %v142_v54 }
  0x79   :  { %3664 = vmatmul.mubr.msk.f32.gmra.mxu0 %vm156_vm0, %v79_v55  ;;  %3760 = vmatmul.mubr.msk.f32.gmra.mxu1 %vm156_vm0, %v143_v56 }
  0x7a   :  { %3666 = vmatprep.mubr.msk.f32.mxu0 %vm156_vm0, %v80_v57  ;;  %3762 = vmatprep.mubr.msk.f32.mxu1 %vm156_vm0, %v144_v58 }
  0x7d   :  { %3667 = vmatmul.mubr.msk.f32.gmra.mxu0 %vm156_vm0, %v81_v59  ;;  %3763 = vmatmul.mubr.msk.f32.gmra.mxu1 %vm156_vm0, %v145_v60 }
  0x7e   :  { %3669 = vmatprep.mubr.msk.f32.mxu0 %vm156_vm0, %v82_v61  ;;  %3765 = vmatprep.mubr.msk.f32.mxu1 %vm156_vm0, %v146_v62 }
  0x81   :  { %3670 = vmatmul.mubr.msk.f32.gmra.mxu0 %vm156_vm0, %v83_v63  ;;  %3766 = vmatmul.mubr.msk.f32.gmra.mxu1 %vm156_vm0, %v147_v0 }
  0xc5   :  { %v3578_v2 = vpop.f32.mrf.mxu0  ;;  %v3674_v3 = vpop.f32.mrf.mxu1 }
  0xc6   :  { %v4582_v4 = vadd.f32 %v3578_v2, %v4579_v1  ;;  %v4585_v5 = vadd.f32 %v3674_v3, %v4579_v1 }
  0xc7   :  { %v607_v6 = vpop.f32.mrf.mxu0  ;;  %v927_v7 = vpop.f32.mrf.mxu1 }
  0xc8   :  { %v4588_v8 = vadd.f32 %v4579_v1, %v607_v6  ;;  %v1442_v9 = vsel %vm1246_vm1, %v4585_v5, 0.0  ;;  %v1250_v10 = vsel %vm1246_vm1, %v4582_v4, 0.0  ;;  %v4601_v16 = vadd.f32 %v4579_v1, %v927_v7 }
  0xc9   :  { %1443 = vadd.xlane.f32.xlu1 %v1442_v9  ;;  %1251 = vadd.xlane.f32.xlu0 %v1250_v10  ;;  %v3581_v11 = vpop.f32.mrf.mxu0  ;;  %v3677_v12 = vpop.f32.mrf.mxu1 }
  0xca   :  { %v4595_v13 = vadd.f32 %v3581_v11, %v4579_v1  ;;  %v4598_v14 = vadd.f32 %v3677_v12, %v4579_v1  ;;  %v1247_v18 = vsel %vm1246_vm1, %v4588_v8, 0.0  ;;  %v1439_v24 = vsel %vm1246_vm1, %v4601_v16, 0.0 }
  0xcb   :  { %v617_v15 = vpop.f32.mrf.mxu0  ;;  %v937_v19 = vpop.f32.mrf.mxu1 }
  0xcc   :  { %v1256_v17 = vsel %vm1246_vm1, %v4595_v13, 0.0  ;;  %v1448_v21 = vsel %vm1246_vm1, %v4598_v14, 0.0  ;;  %v4610_v22 = vadd.f32 %v4579_v1, %v617_v15  ;;  %v4613_v23 = vadd.f32 %v4579_v1, %v937_v19 }
  0xcd   :  { %1257 = vadd.xlane.f32.xlu1 %v1256_v17  ;;  %1248 = vadd.xlane.f32.xlu0 %v1247_v18  ;;  %v3584_v20 = vpop.f32.mrf.mxu0  ;;  %v3680_v26 = vpop.f32.mrf.mxu1 }
  0xce   :  { %v4618_v27 = vadd.f32 %v3584_v20, %v4579_v1  ;;  %v1253_v29 = vsel %vm1246_vm1, %v4610_v22, 0.0  ;;  %v1445_v30 = vsel %vm1246_vm1, %v4613_v23, 0.0  ;;  %v4628_v33 = vadd.f32 %v3680_v26, %v4579_v1 }
  0xcf   :  { %v627_v25 = vpop.f32.mrf.mxu0  ;;  %v947_v31 = vpop.f32.mrf.mxu1 }
  0xd0   :  { %v4621_v28 = vadd.f32 %v4579_v1, %v627_v25  ;;  %v4631_v34 = vadd.f32 %v4579_v1, %v947_v31  ;;  %v1262_v35 = vsel %vm1246_vm1, %v4618_v27, 0.0  ;;  %v1454_v41 = vsel %vm1246_vm1, %v4628_v33, 0.0 }
  0xd1   :  { %1449 = vadd.xlane.f32.xlu1 %v1448_v21  ;;  %1440 = vadd.xlane.f32.xlu0 %v1439_v24  ;;  %v3587_v32 = vpop.f32.mrf.mxu0  ;;  %v3683_v38 = vpop.f32.mrf.mxu1 }
  0xd2   :  { %v1259_v36 = vsel %vm1246_vm1, %v4621_v28, 0.0  ;;  %v4638_v39 = vadd.f32 %v3587_v32, %v4579_v1  ;;  %v1451_v42 = vsel %vm1246_vm1, %v4631_v34, 0.0  ;;  %v4648_v45 = vadd.f32 %v3683_v38, %v4579_v1 }
  0xd3   :  { %v637_v37 = vpop.f32.mrf.mxu0  ;;  %v957_v43 = vpop.f32.mrf.mxu1 }
  0xd4   :  { %v4641_v40 = vadd.f32 %v4579_v1, %v637_v37  ;;  %v4651_v46 = vadd.f32 %v4579_v1, %v957_v43  ;;  %v1268_v47 = vsel %vm1246_vm1, %v4638_v39, 0.0  ;;  %v1460_v53 = vsel %vm1246_vm1, %v4648_v45, 0.0 }
  0xd5   :  { %1254 = vadd.xlane.f32.xlu1 %v1253_v29  ;;  %1446 = vadd.xlane.f32.xlu0 %v1445_v30  ;;  %v3590_v44 = vpop.f32.mrf.mxu0  ;;  %v3686_v50 = vpop.f32.mrf.mxu1 }
  0xd6   :  { %v1265_v48 = vsel %vm1246_vm1, %v4641_v40, 0.0  ;;  %v4658_v51 = vadd.f32 %v3590_v44, %v4579_v1  ;;  %v1457_v54 = vsel %vm1246_vm1, %v4651_v46, 0.0  ;;  %v4668_v57 = vadd.f32 %v3686_v50, %v4579_v1 }
  0xd7   :  { %v647_v49 = vpop.f32.mrf.mxu0  ;;  %v967_v55 = vpop.f32.mrf.mxu1 }
  0xd8   :  { %v4661_v52 = vadd.f32 %v4579_v1, %v647_v49  ;;  %v4671_v58 = vadd.f32 %v4579_v1, %v967_v55  ;;  %v1274_v59 = vsel %vm1246_vm1, %v4658_v51, 0.0  ;;  %v1466_v2 = vsel %vm1246_vm1, %v4668_v57, 0.0 }
  0xd9   :  { %1263 = vadd.xlane.f32.xlu1 %v1262_v35  ;;  %1260 = vadd.xlane.f32.xlu0 %v1259_v36  ;;  %v3593_v56 = vpop.f32.mrf.mxu0  ;;  %v3689_v62 = vpop.f32.mrf.mxu1 }
  0xda   :  { %v1271_v60 = vsel %vm1246_vm1, %v4661_v52, 0.0  ;;  %v4678_v63 = vadd.f32 %v3593_v56, %v4579_v1  ;;  %v1463_v3 = vsel %vm1246_vm1, %v4671_v58, 0.0  ;;  %v4688_v9 = vadd.f32 %v3689_v62, %v4579_v1 }
  0xdb   :  { %v657_v61 = vpop.f32.mrf.mxu0  ;;  %v977_v6 = vpop.f32.mrf.mxu1 }
  0xdc   :  { %v4681_v0 = vadd.f32 %v4579_v1, %v657_v61  ;;  %7666 = vst [vmem:[#allocation2_spill] sm:$0xff] %v4688_v9  ;;  %v4691_v10 = vadd.f32 %v4579_v1, %v977_v6  ;;  %v1280_v11 = vsel %vm1246_vm1, %v4678_v63, 0.0  ;;  %v1472_v20 = vsel %vm1246_vm1, %v4688_v9, 0.0 }
  0xdd   :  { %1455 = vadd.xlane.f32.xlu1 %v1454_v41  ;;  %1452 = vadd.xlane.f32.xlu0 %v1451_v42  ;;  %v3596_v7 = vpop.f32.mrf.mxu0  ;;  %v3692_v17 = vpop.f32.mrf.mxu1 }
  0xde   :  { %7667 = vst [vmem:[#allocation3_spill] sm:$0xff] %v4691_v10  ;;  %v1277_v12 = vsel %vm1246_vm1, %v4681_v0, 0.0  ;;  %v4698_v18 = vadd.f32 %v3596_v7, %v4579_v1  ;;  %v1469_v21 = vsel %vm1246_vm1, %v4691_v10, 0.0  ;;  %v4708_v26 = vadd.f32 %v3692_v17, %v4579_v1 }
  0xdf   :  { %v667_v15 = vpop.f32.mrf.mxu0  ;;  %v987_v24 = vpop.f32.mrf.mxu1 }
  0xe0   :  { %7668 = vst [vmem:[#allocation4_spill] sm:$0xff] %v4698_v18  ;;  %v4701_v19 = vadd.f32 %v4579_v1, %v667_v15  ;;  %7670 = vst [vmem:[#allocation6_spill] sm:$0xff] %v4708_v26  ;;  %v4711_v29 = vadd.f32 %v4579_v1, %v987_v24  ;;  %v1286_v30 = vsel %vm1246_vm1, %v4698_v18, 0.0  ;;  %v1478_v38 = vsel %vm1246_vm1, %v4708_v26, 0.0 }
  0xe1   :  { %1269 = vadd.xlane.f32.xlu1 %v1268_v47  ;;  %1266 = vadd.xlane.f32.xlu0 %v1265_v48  ;;  %v3599_v25 = vpop.f32.mrf.mxu0  ;;  %v3695_v35 = vpop.f32.mrf.mxu1 }
  0xe2   :  { %7669 = vst [vmem:[#allocation5_spill] sm:$0xff] %v4701_v19  ;;  %7671 = vst [vmem:[#allocation7_spill] sm:$0xff] %v4711_v29  ;;  %v1283_v31 = vsel %vm1246_vm1, %v4701_v19, 0.0  ;;  %v4718_v36 = vadd.f32 %v3599_v25, %v4579_v1  ;;  %v1475_v41 = vsel %vm1246_vm1, %v4711_v29, 0.0  ;;  %v4728_v44 = vadd.f32 %v3695_v35, %v4579_v1 }
  0xe3   :  { %v677_v32 = vpop.f32.mrf.mxu0  ;;  %v997_v42 = vpop.f32.mrf.mxu1 }
  0xe4   :  { %7672 = vst [vmem:[#allocation8_spill] sm:$0xff] %v4718_v36  ;;  %v4721_v37 = vadd.f32 %v4579_v1, %v677_v32  ;;  %7674 = vst [vmem:[#allocation10_spill] sm:$0xff] %v4728_v44  ;;  %v4731_v47 = vadd.f32 %v4579_v1, %v997_v42  ;;  %v1292_v48 = vsel %vm1246_vm1, %v4718_v36, 0.0  ;;  %v1484_v56 = vsel %vm1246_vm1, %v4728_v44, 0.0 }
  0xe5   :  { %1461 = vadd.xlane.f32.xlu1 %v1460_v53  ;;  %1458 = vadd.xlane.f32.xlu0 %v1457_v54  ;;  %v3602_v43 = vpop.f32.mrf.mxu0  ;;  %v3698_v53 = vpop.f32.mrf.mxu1 }
  0xe6   :  { %7673 = vst [vmem:[#allocation9_spill] sm:$0xff] %v4721_v37  ;;  %7675 = vst [vmem:[#allocation11_spill] sm:$0xff] %v4731_v47  ;;  %v1289_v49 = vsel %vm1246_vm1, %v4721_v37, 0.0  ;;  %v4738_v54 = vadd.f32 %v3602_v43, %v4579_v1  ;;  %v4748_v62 = vadd.f32 %v3698_v53, %v4579_v1 }
  0xe7   :  { %v687_v50 = vpop.f32.mrf.mxu0 }
  0xe8   :  { %7676 = vst [vmem:[#allocation12_spill] sm:$0xff] %v4738_v54  ;;  %v4741_v55 = vadd.f32 %v4579_v1, %v687_v50  ;;  %7678 = vst [vmem:[#allocation14_spill] sm:$0xff] %v4748_v62  ;;  %v1490_v17 = vsel %vm1246_vm1, %v4748_v62, 0.0 }
  0xe9   :  { %1275 = vadd.xlane.f32.xlu1 %v1274_v59  ;;  %1272 = vadd.xlane.f32.xlu0 %v1271_v60  ;;  %v1481_v59 = vsel %vm1246_vm1, %v4731_v47, 0.0  ;;  %v1007_v60 = vpop.f32.mrf.mxu1  ;;  %v3605_v61 = vpop.f32.mrf.mxu0 }
  0xea   :  { %7677 = vst [vmem:[#allocation13_spill] sm:$0xff] %v4741_v55  ;;  %v1295_v6 = vsel %vm1246_vm1, %v4741_v55, 0.0 }
  0xeb   :  { %v697_v7 = vpop.f32.mrf.mxu0 }
  0xec   :  { %v4761_v15 = vadd.f32 %v4579_v1, %v697_v7 }
  0xed   :  { %1467 = vadd.xlane.f32.xlu1 %v1466_v2  ;;  %1464 = vadd.xlane.f32.xlu0 %v1463_v3  ;;  %v4751_v2 = vadd.f32 %v4579_v1, %v1007_v60  ;;  %v1298_v3 = vsel %vm1246_vm1, %v4738_v54, 0.0  ;;  %v3608_v24 = vpop.f32.mrf.mxu0 }
  0xee   :  { %7681 = vst [vmem:[#allocation17_spill] sm:$0xff] %v4761_v15  ;;  %v1301_v32 = vsel %vm1246_vm1, %v4761_v15, 0.0 }
  0xef   :  { %7679 = vst [vmem:[#allocation15_spill] sm:$0xff] %v4751_v2  ;;  %v707_v35 = vpop.f32.mrf.mxu0 }
  0xf0   :  { %v4781_v42 = vadd.f32 %v4579_v1, %v707_v35 }
  0xf1   :  { %1281 = vadd.xlane.f32.xlu1 %v1280_v11  ;;  %1278 = vadd.xlane.f32.xlu0 %v1277_v12  ;;  %v3701_v11 = vpop.f32.mrf.mxu1  ;;  %v4758_v12 = vadd.f32 %v3605_v61, %v4579_v1  ;;  %v3611_v50 = vpop.f32.mrf.mxu0 }
  0xf2   :  { %v4768_v25 = vadd.f32 %v3701_v11, %v4579_v1  ;;  %7685 = vst [vmem:[#allocation21_spill] sm:$0xff] %v4781_v42  ;;  %v1307_v60 = vsel %vm1246_vm1, %v4781_v42, 0.0 }
  0xf3   :  { %7680 = vst [vmem:[#allocation16_spill] sm:$0xff] %v4758_v12  ;;  %v717_v61 = vpop.f32.mrf.mxu0 }
  0xf4   :  { %7682 = vst [vmem:[#allocation18_spill] sm:$0xff] %v4768_v25  ;;  %v1496_v43 = vsel %vm1246_vm1, %v4768_v25, 0.0  ;;  %v4801_v7 = vadd.f32 %v4579_v1, %v717_v61 }
  0xf5   :  { %1473 = vadd.xlane.f32.xlu1 %v1472_v20  ;;  %1470 = vadd.xlane.f32.xlu0 %v1469_v21  ;;  %v1487_v20 = vsel %vm1246_vm1, %v4751_v2, 0.0  ;;  %v1017_v21 = vpop.f32.mrf.mxu1 }
  0xf6   :  { %7689 = vst [vmem:[#allocation25_spill] sm:$0xff] %v4801_v7  ;;  %v1313_v35 = vsel %vm1246_vm1, %v4801_v7, 0.0 }
  0xf9   :  { %1287 = vadd.xlane.f32.xlu1 %v1286_v30  ;;  %1284 = vadd.xlane.f32.xlu0 %v1283_v31  ;;  %v4771_v30 = vadd.f32 %v4579_v1, %v1017_v21  ;;  %v1304_v31 = vsel %vm1246_vm1, %v4758_v12, 0.0  ;;  %v3614_v21 = vpop.f32.mrf.mxu0 }
  0xfb   :  { %7683 = vst [vmem:[#allocation19_spill] sm:$0xff] %v4771_v30 }
  0xfd   :  { %1479 = vadd.xlane.f32.xlu1 %v1478_v38  ;;  %1476 = vadd.xlane.f32.xlu0 %v1475_v41  ;;  %v3704_v38 = vpop.f32.mrf.mxu1  ;;  %v4778_v41 = vadd.f32 %v3608_v24, %v4579_v1 }
  0xfe   :  { %v4788_v53 = vadd.f32 %v3704_v38, %v4579_v1  ;;  %v727_v38 = vpop.f32.mrf.mxu0 }
  0xff   :  { %7684 = vst [vmem:[#allocation20_spill] sm:$0xff] %v4778_v41 }
 0x100   :  { %7686 = vst [vmem:[#allocation22_spill] sm:$0xff] %v4788_v53  ;;  %v1502_v11 = vsel %vm1246_vm1, %v4788_v53, 0.0  ;;  %v3617_v61 = vpop.f32.mrf.mxu0 }
 0x101   :  { %1293 = vadd.xlane.f32.xlu1 %v1292_v48  ;;  %1290 = vadd.xlane.f32.xlu0 %v1289_v49  ;;  %v1493_v48 = vsel %vm1246_vm1, %v4771_v30, 0.0  ;;  %v1027_v49 = vpop.f32.mrf.mxu1 }
 0x105   :  { %1485 = vadd.xlane.f32.xlu1 %v1484_v56  ;;  %1482 = vadd.xlane.f32.xlu0 %v1481_v59  ;;  %v4791_v56 = vadd.f32 %v4579_v1, %v1027_v49  ;;  %v1310_v59 = vsel %vm1246_vm1, %v4778_v41, 0.0  ;;  %v4821_v49 = vadd.f32 %v4579_v1, %v727_v38 }
 0x107   :  { %7687 = vst [vmem:[#allocation23_spill] sm:$0xff] %v4791_v56  ;;  %7693 = vst [vmem:[#allocation29_spill] sm:$0xff] %v4821_v49 }
 0x109   :  { %1299 = vadd.xlane.f32.xlu1 %v1298_v3  ;;  %1296 = vadd.xlane.f32.xlu0 %v1295_v6  ;;  %v3707_v3 = vpop.f32.mrf.mxu1  ;;  %v4798_v6 = vadd.f32 %v3611_v50, %v4579_v1 }
 0x10a   :  { %v4808_v24 = vadd.f32 %v3707_v3, %v4579_v1 }
 0x10b   :  { %7688 = vst [vmem:[#allocation24_spill] sm:$0xff] %v4798_v6 }
 0x10c   :  { %7690 = vst [vmem:[#allocation26_spill] sm:$0xff] %v4808_v24  ;;  %v1508_v50 = vsel %vm1246_vm1, %v4808_v24, 0.0 }
 0x10d   :  { %1491 = vadd.xlane.f32.xlu1 %v1490_v17  ;;  %1488 = vadd.xlane.f32.xlu0 %v1487_v20  ;;  %v1499_v17 = vsel %vm1246_vm1, %v4791_v56, 0.0  ;;  %v1037_v20 = vpop.f32.mrf.mxu1 }
 0x111   :  { %1305 = vadd.xlane.f32.xlu1 %v1304_v31  ;;  %1302 = vadd.xlane.f32.xlu0 %v1301_v32  ;;  %v4811_v31 = vadd.f32 %v4579_v1, %v1037_v20  ;;  %v1316_v32 = vsel %vm1246_vm1, %v4798_v6, 0.0  ;;  %v1319_v20 = vsel %vm1246_vm1, %v4821_v49, 0.0 }
 0x113   :  { %7691 = vst [vmem:[#allocation27_spill] sm:$0xff] %v4811_v31 }
 0x115   :  { %1497 = vadd.xlane.f32.xlu1 %v1496_v43  ;;  %1494 = vadd.xlane.f32.xlu0 %v1493_v48  ;;  %v3710_v43 = vpop.f32.mrf.mxu1  ;;  %v4818_v48 = vadd.f32 %v3614_v21, %v4579_v1  ;;  %v737_v21 = vpop.f32.mrf.mxu0 }
 0x116   :  { %v4828_v3 = vadd.f32 %v3710_v43, %v4579_v1  ;;  %v4841_v38 = vadd.f32 %v4579_v1, %v737_v21 }
 0x117   :  { %7692 = vst [vmem:[#allocation28_spill] sm:$0xff] %v4818_v48 }
 0x118   :  { %7694 = vst [vmem:[#allocation30_spill] sm:$0xff] %v4828_v3  ;;  %7697 = vst [vmem:[#allocation33_spill] sm:$0xff] %v4841_v38  ;;  %v1514_v43 = vsel %vm1246_vm1, %v4828_v3, 0.0  ;;  %v1325_v21 = vsel %vm1246_vm1, %v4841_v38, 0.0 }
 0x119   :  { %1311 = vadd.xlane.f32.xlu1 %v1310_v59  ;;  %1308 = vadd.xlane.f32.xlu0 %v1307_v60  ;;  %v1505_v59 = vsel %vm1246_vm1, %v4811_v31, 0.0  ;;  %v1047_v60 = vpop.f32.mrf.mxu1 }
 0x11d   :  { %1503 = vadd.xlane.f32.xlu1 %v1502_v11  ;;  %1500 = vadd.xlane.f32.xlu0 %v1499_v17  ;;  %v4831_v11 = vadd.f32 %v4579_v1, %v1047_v60  ;;  %v1322_v17 = vsel %vm1246_vm1, %v4818_v48, 0.0  ;;  %v3620_v60 = vpop.f32.mrf.mxu0 }
 0x11f   :  { %7695 = vst [vmem:[#allocation31_spill] sm:$0xff] %v4831_v11  ;;  %v747_v3 = vpop.f32.mrf.mxu0 }
 0x121   :  { %1317 = vadd.xlane.f32.xlu1 %v1316_v32  ;;  %1314 = vadd.xlane.f32.xlu0 %v1313_v35  ;;  %v3713_v32 = vpop.f32.mrf.mxu1  ;;  %v4838_v35 = vadd.f32 %v3617_v61, %v4579_v1  ;;  %v3623_v38 = vpop.f32.mrf.mxu0 }
 0x123   :  { %7696 = vst [vmem:[#allocation32_spill] sm:$0xff] %v4838_v35  ;;  %v1328_v61 = vsel %vm1246_vm1, %v4838_v35, 0.0 }
 0x125   :  { %1509 = vadd.xlane.f32.xlu1 %v1508_v50  ;;  %1506 = vadd.xlane.f32.xlu0 %v1505_v59  ;;  %v1511_v50 = vsel %vm1246_vm1, %v4831_v11, 0.0  ;;  %v1057_v59 = vpop.f32.mrf.mxu1 }
 0x127   :  { %v3716_v11 = vpop.f32.mrf.mxu1 }
 0x129   :  { %1323 = vadd.xlane.f32.xlu1 %v1322_v17  ;;  %1320 = vadd.xlane.f32.xlu0 %v1319_v20  ;;  %v4848_v17 = vadd.f32 %v3713_v32, %v4579_v1  ;;  %v4851_v20 = vadd.f32 %v4579_v1, %v1057_v59  ;;  %v1067_v35 = vpop.f32.mrf.mxu1 }
 0x12b   :  { %7698 = vst [vmem:[#allocation34_spill] sm:$0xff] %v4848_v17  ;;  %7699 = vst [vmem:[#allocation35_spill] sm:$0xff] %v4851_v20  ;;  %v1520_v32 = vsel %vm1246_vm1, %v4848_v17, 0.0  ;;  %v1517_v59 = vsel %vm1246_vm1, %v4851_v20, 0.0  ;;  %v757_v17 = vpop.f32.mrf.mxu0  ;;  %v3719_v20 = vpop.f32.mrf.mxu1 }
 0x12d   :  { %1515 = vadd.xlane.f32.xlu1 %v1514_v43  ;;  %1512 = vadd.xlane.f32.xlu0 %v1511_v50  ;;  %v4858_v43 = vadd.f32 %v3620_v60, %v4579_v1  ;;  %v4861_v50 = vadd.f32 %v4579_v1, %v747_v3 }
 0x12f   :  { %7700 = vst [vmem:[#allocation36_spill] sm:$0xff] %v4858_v43  ;;  %7701 = vst [vmem:[#allocation37_spill] sm:$0xff] %v4861_v50  ;;  %v1334_v3 = vsel %vm1246_vm1, %v4858_v43, 0.0  ;;  %v1331_v60 = vsel %vm1246_vm1, %v4861_v50, 0.0  ;;  %v1077_v43 = vpop.f32.mrf.mxu1  ;;  %v3626_v50 = vpop.f32.mrf.mxu0 }
 0x131   :  { %1329 = vadd.xlane.f32.xlu1 %v1328_v61  ;;  %1326 = vadd.xlane.f32.xlu0 %v1325_v21  ;;  %v4868_v61 = vadd.f32 %v3716_v11, %v4579_v1  ;;  %v4871_v21 = vadd.f32 %v4579_v1, %v1067_v35 }
 0x133   :  { %7702 = vst [vmem:[#allocation38_spill] sm:$0xff] %v4868_v61  ;;  %7703 = vst [vmem:[#allocation39_spill] sm:$0xff] %v4871_v21  ;;  %v1526_v11 = vsel %vm1246_vm1, %v4868_v61, 0.0  ;;  %v1523_v35 = vsel %vm1246_vm1, %v4871_v21, 0.0  ;;  %v767_v61 = vpop.f32.mrf.mxu0  ;;  %v3722_v21 = vpop.f32.mrf.mxu1 }
 0x135   :  { %1521 = vadd.xlane.f32.xlu1 %v1520_v32  ;;  %1518 = vadd.xlane.f32.xlu0 %v1517_v59  ;;  %v4878_v32 = vadd.f32 %v3623_v38, %v4579_v1  ;;  %v4881_v59 = vadd.f32 %v4579_v1, %v757_v17 }
 0x137   :  { %7704 = vst [vmem:[#allocation40_spill] sm:$0xff] %v4878_v32  ;;  %7705 = vst [vmem:[#allocation41_spill] sm:$0xff] %v4881_v59  ;;  %v1340_v38 = vsel %vm1246_vm1, %v4878_v32, 0.0  ;;  %v1337_v17 = vsel %vm1246_vm1, %v4881_v59, 0.0  ;;  %v1087_v32 = vpop.f32.mrf.mxu1  ;;  %v3629_v59 = vpop.f32.mrf.mxu0 }
 0x139   :  { %1335 = vadd.xlane.f32.xlu1 %v1334_v3  ;;  %1332 = vadd.xlane.f32.xlu0 %v1331_v60  ;;  %v4888_v3 = vadd.f32 %v3719_v20, %v4579_v1  ;;  %v4891_v60 = vadd.f32 %v4579_v1, %v1077_v43 }
 0x13b   :  { %7706 = vst [vmem:[#allocation42_spill] sm:$0xff] %v4888_v3  ;;  %7707 = vst [vmem:[#allocation43_spill] sm:$0xff] %v4891_v60  ;;  %v1532_v20 = vsel %vm1246_vm1, %v4888_v3, 0.0  ;;  %v1529_v43 = vsel %vm1246_vm1, %v4891_v60, 0.0  ;;  %v777_v3 = vpop.f32.mrf.mxu0  ;;  %v3725_v60 = vpop.f32.mrf.mxu1 }
 0x13d   :  { %1527 = vadd.xlane.f32.xlu1 %v1526_v11  ;;  %1524 = vadd.xlane.f32.xlu0 %v1523_v35  ;;  %v4898_v11 = vadd.f32 %v3626_v50, %v4579_v1  ;;  %v4901_v35 = vadd.f32 %v4579_v1, %v767_v61 }
 0x13f   :  { %7708 = vst [vmem:[#allocation44_spill] sm:$0xff] %v4898_v11  ;;  %7709 = vst [vmem:[#allocation45_spill] sm:$0xff] %v4901_v35  ;;  %v1346_v50 = vsel %vm1246_vm1, %v4898_v11, 0.0  ;;  %v1343_v61 = vsel %vm1246_vm1, %v4901_v35, 0.0  ;;  %v1097_v11 = vpop.f32.mrf.mxu1  ;;  %v3632_v35 = vpop.f32.mrf.mxu0 }
 0x141   :  { %1341 = vadd.xlane.f32.xlu1 %v1340_v38  ;;  %1338 = vadd.xlane.f32.xlu0 %v1337_v17  ;;  %v4908_v38 = vadd.f32 %v3722_v21, %v4579_v1  ;;  %v4911_v17 = vadd.f32 %v4579_v1, %v1087_v32 }
 0x143   :  { %7710 = vst [vmem:[#allocation46_spill] sm:$0xff] %v4908_v38  ;;  %7711 = vst [vmem:[#allocation47_spill] sm:$0xff] %v4911_v17  ;;  %v1538_v21 = vsel %vm1246_vm1, %v4908_v38, 0.0  ;;  %v1535_v32 = vsel %vm1246_vm1, %v4911_v17, 0.0  ;;  %v787_v38 = vpop.f32.mrf.mxu0  ;;  %v3728_v17 = vpop.f32.mrf.mxu1 }
 0x145   :  { %1533 = vadd.xlane.f32.xlu1 %v1532_v20  ;;  %1530 = vadd.xlane.f32.xlu0 %v1529_v43  ;;  %v4918_v20 = vadd.f32 %v3629_v59, %v4579_v1  ;;  %v4921_v43 = vadd.f32 %v4579_v1, %v777_v3 }
 0x147   :  { %7712 = vst [vmem:[#allocation48_spill] sm:$0xff] %v4918_v20  ;;  %7713 = vst [vmem:[#allocation49_spill] sm:$0xff] %v4921_v43  ;;  %v1352_v59 = vsel %vm1246_vm1, %v4918_v20, 0.0  ;;  %v1349_v3 = vsel %vm1246_vm1, %v4921_v43, 0.0 }
 0x149   :  { %1347 = vadd.xlane.f32.xlu1 %v1346_v50  ;;  %1344 = vadd.xlane.f32.xlu0 %v1343_v61  ;;  %v4928_v50 = vadd.f32 %v3725_v60, %v4579_v1  ;;  %v4931_v61 = vadd.f32 %v4579_v1, %v1097_v11  ;;  %v4942_v60 = vadd.f32 %v3632_v35, %v4579_v1 }
 0x14a   :  { %v4945_v11 = vadd.f32 %v4579_v1, %v787_v38  ;;  %v4956_v35 = vadd.f32 %v3728_v17, %v4579_v1 }
 0x14b   :  { %7714 = vst [vmem:[#allocation50_spill] sm:$0xff] %v4928_v50  ;;  %7715 = vst [vmem:[#allocation51_spill] sm:$0xff] %v4931_v61  ;;  %v1544_v20 = vsel %vm1246_vm1, %v4928_v50, 0.0  ;;  %v1541_v43 = vsel %vm1246_vm1, %v4931_v61, 0.0  ;;  %v1358_v50 = vsel %vm1246_vm1, %v4942_v60, 0.0 }
 0x14c   :  { %7716 = vst [vmem:[#allocation52_spill] sm:$0xff] %v4942_v60  ;;  %7717 = vst [vmem:[#allocation53_spill] sm:$0xff] %v4945_v11  ;;  %v1355_v61 = vsel %vm1246_vm1, %v4945_v11, 0.0  ;;  %v1550_v60 = vsel %vm1246_vm1, %v4956_v35, 0.0 }
 0x14d   :  { %1539 = vadd.xlane.f32.xlu1 %v1538_v21  ;;  %1536 = vadd.xlane.f32.xlu0 %v1535_v32  ;;  %7718 = vst [vmem:[#allocation54_spill] sm:$0xff] %v4956_v35 }
 0x151   :  { %1353 = vadd.xlane.f32.xlu1 %v1352_v59  ;;  %1350 = vadd.xlane.f32.xlu0 %v1349_v3  ;;  %v1107_v59 = vpop.f32.mrf.mxu1  ;;  %v3635_v3 = vpop.f32.mrf.mxu0 }
 0x152   :  { %v4937_v21 = vpop.xlane.xlu1 %1443  ;;  %v4939_v32 = vpop.xlane.xlu0 %1251  ;;  %v4959_v38 = vadd.f32 %v4579_v1, %v1107_v59  ;;  %v4970_v17 = vadd.f32 %v3635_v3, %v4579_v1 }
 0x154   :  { %7719 = vst [vmem:[#allocation55_spill] sm:$0xff] %v4959_v38  ;;  %7720 = vst [vmem:[#allocation56_spill] sm:$0xff] %v4970_v17  ;;  %v1547_v11 = vsel %vm1246_vm1, %v4959_v38, 0.0  ;;  %v1364_v35 = vsel %vm1246_vm1, %v4970_v17, 0.0 }
 0x155   :  { %1545 = vadd.xlane.f32.xlu1 %v1544_v20  ;;  %1542 = vadd.xlane.f32.xlu0 %v1541_v43  ;;  %v797_v20 = vpop.f32.mrf.mxu0  ;;  %v3731_v43 = vpop.f32.mrf.mxu1 }
 0x156   :  { %v4951_v49 = vpop.xlane.xlu1 %1257  ;;  %v4953_v48 = vpop.xlane.xlu0 %1248  ;;  %v4973_v59 = vadd.f32 %v4579_v1, %v797_v20  ;;  %v4984_v3 = vadd.f32 %v3731_v43, %v4579_v1 }
 0x158   :  { %7721 = vst [vmem:[#allocation57_spill] sm:$0xff] %v4973_v59  ;;  %7722 = vst [vmem:[#allocation58_spill] sm:$0xff] %v4984_v3  ;;  %v1361_v38 = vsel %vm1246_vm1, %v4973_v59, 0.0  ;;  %v1556_v17 = vsel %vm1246_vm1, %v4984_v3, 0.0 }
 0x159   :  { %1359 = vadd.xlane.f32.xlu1 %v1358_v50  ;;  %1356 = vadd.xlane.f32.xlu0 %v1355_v61  ;;  %v1117_v50 = vpop.f32.mrf.mxu1  ;;  %v3638_v61 = vpop.f32.mrf.mxu0 }
 0x15a   :  { %v4965_v31 = vpop.xlane.xlu1 %1449  ;;  %v4967_v24 = vpop.xlane.xlu0 %1440  ;;  %v4987_v20 = vadd.f32 %v4579_v1, %v1117_v50  ;;  %v4998_v43 = vadd.f32 %v3638_v61, %v4579_v1 }
 0x15c   :  { %7723 = vst [vmem:[#allocation59_spill] sm:$0xff] %v4987_v20  ;;  %7724 = vst [vmem:[#allocation60_spill] sm:$0xff] %v4998_v43  ;;  %v1553_v59 = vsel %vm1246_vm1, %v4987_v20, 0.0  ;;  %v1370_v3 = vsel %vm1246_vm1, %v4998_v43, 0.0 }
 0x15d   :  { %1551 = vadd.xlane.f32.xlu1 %v1550_v60  ;;  %1548 = vadd.xlane.f32.xlu0 %v1547_v11  ;;  %v807_v60 = vpop.f32.mrf.mxu0  ;;  %v3734_v11 = vpop.f32.mrf.mxu1 }
 0x15e   :  { %v4979_v7 = vpop.xlane.xlu1 %1254  ;;  %v4981_v6 = vpop.xlane.xlu0 %1446  ;;  %v5001_v50 = vadd.f32 %v4579_v1, %v807_v60  ;;  %v5012_v61 = vadd.f32 %v3734_v11, %v4579_v1 }
 0x160   :  { %7725 = vst [vmem:[#allocation61_spill] sm:$0xff] %v5001_v50  ;;  %7726 = vst [vmem:[#allocation62_spill] sm:$0xff] %v5012_v61  ;;  %v1367_v20 = vsel %vm1246_vm1, %v5001_v50, 0.0  ;;  %v1562_v43 = vsel %vm1246_vm1, %v5012_v61, 0.0 }
 0x161   :  { %1365 = vadd.xlane.f32.xlu1 %v1364_v35  ;;  %1362 = vadd.xlane.f32.xlu0 %v1361_v38  ;;  %v1127_v35 = vpop.f32.mrf.mxu1  ;;  %v3641_v38 = vpop.f32.mrf.mxu0 }
 0x162   :  { %v4993_v56 = vpop.xlane.xlu1 %1263  ;;  %v4995_v53 = vpop.xlane.xlu0 %1260  ;;  %v5015_v60 = vadd.f32 %v4579_v1, %v1127_v35  ;;  %v5026_v11 = vadd.f32 %v3641_v38, %v4579_v1 }
 0x164   :  { %7727 = vst [vmem:[#allocation63_spill] sm:$0xff] %v5015_v60  ;;  %7728 = vst [vmem:[#allocation64_spill] sm:$0xff] %v5026_v11  ;;  %v1559_v50 = vsel %vm1246_vm1, %v5015_v60, 0.0  ;;  %v1376_v61 = vsel %vm1246_vm1, %v5026_v11, 0.0 }
 0x165   :  { %1557 = vadd.xlane.f32.xlu1 %v1556_v17  ;;  %1554 = vadd.xlane.f32.xlu0 %v1553_v59  ;;  %v817_v17 = vpop.f32.mrf.mxu0  ;;  %v3737_v59 = vpop.f32.mrf.mxu1 }
 0x166   :  { %v5007_v42 = vpop.xlane.xlu1 %1455  ;;  %v5009_v41 = vpop.xlane.xlu0 %1452  ;;  %v5029_v35 = vadd.f32 %v4579_v1, %v817_v17  ;;  %v5040_v38 = vadd.f32 %v3737_v59, %v4579_v1 }
 0x168   :  { %7729 = vst [vmem:[#allocation65_spill] sm:$0xff] %v5029_v35  ;;  %7730 = vst [vmem:[#allocation66_spill] sm:$0xff] %v5040_v38  ;;  %v1373_v60 = vsel %vm1246_vm1, %v5029_v35, 0.0  ;;  %v1568_v11 = vsel %vm1246_vm1, %v5040_v38, 0.0 }
 0x169   :  { %1371 = vadd.xlane.f32.xlu1 %v1370_v3  ;;  %1368 = vadd.xlane.f32.xlu0 %v1367_v20  ;;  %v1137_v3 = vpop.f32.mrf.mxu1  ;;  %v3644_v20 = vpop.f32.mrf.mxu0 }
 0x16a   :  { %v5021_v30 = vpop.xlane.xlu1 %1269  ;;  %v5023_v25 = vpop.xlane.xlu0 %1266  ;;  %v5043_v17 = vadd.f32 %v4579_v1, %v1137_v3  ;;  %v5054_v59 = vadd.f32 %v3644_v20, %v4579_v1 }
 0x16c   :  { %7731 = vst [vmem:[#allocation67_spill] sm:$0xff] %v5043_v17  ;;  %7732 = vst [vmem:[#allocation68_spill] sm:$0xff] %v5054_v59  ;;  %v1565_v35 = vsel %vm1246_vm1, %v5043_v17, 0.0  ;;  %v1382_v38 = vsel %vm1246_vm1, %v5054_v59, 0.0 }
 0x16d   :  { %1563 = vadd.xlane.f32.xlu1 %v1562_v43  ;;  %1560 = vadd.xlane.f32.xlu0 %v1559_v50  ;;  %v827_v43 = vpop.f32.mrf.mxu0  ;;  %v3740_v50 = vpop.f32.mrf.mxu1 }
 0x16e   :  { %v5035_v15 = vpop.xlane.xlu1 %1461  ;;  %v5037_v12 = vpop.xlane.xlu0 %1458  ;;  %v5057_v3 = vadd.f32 %v4579_v1, %v827_v43  ;;  %v5068_v20 = vadd.f32 %v3740_v50, %v4579_v1 }
 0x170   :  { %7733 = vst [vmem:[#allocation69_spill] sm:$0xff] %v5057_v3  ;;  %7734 = vst [vmem:[#allocation70_spill] sm:$0xff] %v5068_v20  ;;  %v1379_v17 = vsel %vm1246_vm1, %v5057_v3, 0.0  ;;  %v1574_v59 = vsel %vm1246_vm1, %v5068_v20, 0.0 }
 0x171   :  { %1377 = vadd.xlane.f32.xlu1 %v1376_v61  ;;  %1374 = vadd.xlane.f32.xlu0 %v1373_v60  ;;  %v1147_v61 = vpop.f32.mrf.mxu1  ;;  %v3647_v60 = vpop.f32.mrf.mxu0 }
 0x172   :  { %v5049_v2 = vpop.xlane.xlu1 %1275  ;;  %v5051_v62 = vpop.xlane.xlu0 %1272  ;;  %v5071_v43 = vadd.f32 %v4579_v1, %v1147_v61  ;;  %v5082_v50 = vadd.f32 %v3647_v60, %v4579_v1 }
 0x174   :  { %7735 = vst [vmem:[#allocation71_spill] sm:$0xff] %v5071_v43  ;;  %7736 = vst [vmem:[#allocation72_spill] sm:$0xff] %v5082_v50  ;;  %v1571_v3 = vsel %vm1246_vm1, %v5071_v43, 0.0  ;;  %v1388_v20 = vsel %vm1246_vm1, %v5082_v50, 0.0 }
 0x175   :  { %1569 = vadd.xlane.f32.xlu1 %v1568_v11  ;;  %1566 = vadd.xlane.f32.xlu0 %v1565_v35  ;;  %v837_v11 = vpop.f32.mrf.mxu0  ;;  %v3743_v35 = vpop.f32.mrf.mxu1 }
 0x176   :  { %v5063_v55 = vpop.xlane.xlu1 %1467  ;;  %v5065_v54 = vpop.xlane.xlu0 %1464  ;;  %v5085_v61 = vadd.f32 %v4579_v1, %v837_v11  ;;  %v5096_v60 = vadd.f32 %v3743_v35, %v4579_v1 }
 0x178   :  { %7737 = vst [vmem:[#allocation73_spill] sm:$0xff] %v5085_v61  ;;  %7738 = vst [vmem:[#allocation74_spill] sm:$0xff] %v5096_v60  ;;  %v1385_v43 = vsel %vm1246_vm1, %v5085_v61, 0.0  ;;  %v1580_v50 = vsel %vm1246_vm1, %v5096_v60, 0.0 }
 0x179   :  { %1383 = vadd.xlane.f32.xlu1 %v1382_v38  ;;  %1380 = vadd.xlane.f32.xlu0 %v1379_v17  ;;  %v1157_v38 = vpop.f32.mrf.mxu1  ;;  %v3650_v17 = vpop.f32.mrf.mxu0 }
 0x17a   :  { %v5077_v47 = vpop.xlane.xlu1 %1281  ;;  %v5079_v44 = vpop.xlane.xlu0 %1278  ;;  %v5099_v11 = vadd.f32 %v4579_v1, %v1157_v38  ;;  %v5110_v35 = vadd.f32 %v3650_v17, %v4579_v1 }
 0x17c   :  { %7739 = vst [vmem:[#allocation75_spill] sm:$0xff] %v5099_v11  ;;  %7740 = vst [vmem:[#allocation76_spill] sm:$0xff] %v5110_v35  ;;  %v1577_v61 = vsel %vm1246_vm1, %v5099_v11, 0.0  ;;  %v1394_v60 = vsel %vm1246_vm1, %v5110_v35, 0.0 }
 0x17d   :  { %1575 = vadd.xlane.f32.xlu1 %v1574_v59  ;;  %1572 = vadd.xlane.f32.xlu0 %v1571_v3  ;;  %v847_v59 = vpop.f32.mrf.mxu0  ;;  %v3746_v3 = vpop.f32.mrf.mxu1 }
 0x17e   :  { %v5091_v37 = vpop.xlane.xlu1 %1473  ;;  %v5093_v36 = vpop.xlane.xlu0 %1470  ;;  %v5113_v38 = vadd.f32 %v4579_v1, %v847_v59  ;;  %v5124_v17 = vadd.f32 %v3746_v3, %v4579_v1 }
 0x180   :  { %7741 = vst [vmem:[#allocation77_spill] sm:$0xff] %v5113_v38  ;;  %7744 = vst [vmem:[#allocation80_spill] sm:$0xff] %v5124_v17  ;;  %v1391_v11 = vsel %vm1246_vm1, %v5113_v38, 0.0  ;;  %v1586_v35 = vsel %vm1246_vm1, %v5124_v17, 0.0 }
 0x181   :  { %1389 = vadd.xlane.f32.xlu1 %v1388_v20  ;;  %1386 = vadd.xlane.f32.xlu0 %v1385_v43  ;;  %v1167_v20 = vpop.f32.mrf.mxu1  ;;  %v3653_v43 = vpop.f32.mrf.mxu0 }
 0x182   :  { %v5105_v29 = vpop.xlane.xlu1 %1287  ;;  %v5107_v26 = vpop.xlane.xlu0 %1284  ;;  %v5127_v59 = vadd.f32 %v4579_v1, %v1167_v20  ;;  %v5138_v3 = vadd.f32 %v3653_v43, %v4579_v1 }
 0x184   :  { %7745 = vst [vmem:[#allocation81_spill] sm:$0xff] %v5127_v59  ;;  %7748 = vst [vmem:[#allocation84_spill] sm:$0xff] %v5138_v3  ;;  %v1583_v38 = vsel %vm1246_vm1, %v5127_v59, 0.0  ;;  %v1400_v17 = vsel %vm1246_vm1, %v5138_v3, 0.0 }
 0x185   :  { %1581 = vadd.xlane.f32.xlu1 %v1580_v50  ;;  %1578 = vadd.xlane.f32.xlu0 %v1577_v61  ;;  %v857_v50 = vpop.f32.mrf.mxu0  ;;  %v3749_v61 = vpop.f32.mrf.mxu1 }
 0x186   :  { %v5119_v19 = vpop.xlane.xlu1 %1479  ;;  %v5121_v18 = vpop.xlane.xlu0 %1476  ;;  %v5141_v20 = vadd.f32 %v4579_v1, %v857_v50  ;;  %v5152_v43 = vadd.f32 %v3749_v61, %v4579_v1 }
 0x187   :  { %7742 = vst [vmem:[#allocation78_spill] sm:$0xff] %v5119_v19  ;;  %7743 = vst [vmem:[#allocation79_spill] sm:$0xff] %v5121_v18 }
 0x188   :  { %7749 = vst [vmem:[#allocation85_spill] sm:$0xff] %v5141_v20  ;;  %7752 = vst [vmem:[#allocation88_spill] sm:$0xff] %v5152_v43  ;;  %v1397_v59 = vsel %vm1246_vm1, %v5141_v20, 0.0  ;;  %v1592_v3 = vsel %vm1246_vm1, %v5152_v43, 0.0 }
 0x189   :  { %1395 = vadd.xlane.f32.xlu1 %v1394_v60  ;;  %1392 = vadd.xlane.f32.xlu0 %v1391_v11  ;;  %v1177_v60 = vpop.f32.mrf.mxu1  ;;  %v3656_v11 = vpop.f32.mrf.mxu0 }
 0x18a   :  { %v5133_v10 = vpop.xlane.xlu1 %1293  ;;  %v5135_v19 = vpop.xlane.xlu0 %1290  ;;  %v5155_v50 = vadd.f32 %v4579_v1, %v1177_v60  ;;  %v5166_v61 = vadd.f32 %v3656_v11, %v4579_v1 }
 0x18b   :  { %7746 = vst [vmem:[#allocation82_spill] sm:$0xff] %v5133_v10  ;;  %7747 = vst [vmem:[#allocation83_spill] sm:$0xff] %v5135_v19 }
 0x18c   :  { %7753 = vst [vmem:[#allocation89_spill] sm:$0xff] %v5155_v50  ;;  %7756 = vst [vmem:[#allocation92_spill] sm:$0xff] %v5166_v61  ;;  %v1589_v20 = vsel %vm1246_vm1, %v5155_v50, 0.0  ;;  %v1406_v43 = vsel %vm1246_vm1, %v5166_v61, 0.0 }
 0x18d   :  { %1587 = vadd.xlane.f32.xlu1 %v1586_v35  ;;  %1584 = vadd.xlane.f32.xlu0 %v1583_v38  ;;  %v867_v35 = vpop.f32.mrf.mxu0  ;;  %v3752_v38 = vpop.f32.mrf.mxu1 }
 0x18e   :  { %v5147_v18 = vpop.xlane.xlu1 %1485  ;;  %v5149_v10 = vpop.xlane.xlu0 %1482  ;;  %v5169_v60 = vadd.f32 %v4579_v1, %v867_v35  ;;  %v5180_v11 = vadd.f32 %v3752_v38, %v4579_v1 }
 0x18f   :  { %7750 = vst [vmem:[#allocation86_spill] sm:$0xff] %v5147_v18  ;;  %7751 = vst [vmem:[#allocation87_spill] sm:$0xff] %v5149_v10 }
 0x190   :  { %7757 = vst [vmem:[#allocation93_spill] sm:$0xff] %v5169_v60  ;;  %7760 = vst [vmem:[#allocation96_spill] sm:$0xff] %v5180_v11  ;;  %v1403_v50 = vsel %vm1246_vm1, %v5169_v60, 0.0  ;;  %v1598_v61 = vsel %vm1246_vm1, %v5180_v11, 0.0 }
 0x191   :  { %1401 = vadd.xlane.f32.xlu1 %v1400_v17  ;;  %1398 = vadd.xlane.f32.xlu0 %v1397_v59  ;;  %v1187_v17 = vpop.f32.mrf.mxu1  ;;  %v3659_v59 = vpop.f32.mrf.mxu0 }
 0x192   :  { %v5161_v19 = vpop.xlane.xlu1 %1299  ;;  %v5163_v18 = vpop.xlane.xlu0 %1296  ;;  %v5183_v35 = vadd.f32 %v4579_v1, %v1187_v17  ;;  %v5194_v38 = vadd.f32 %v3659_v59, %v4579_v1 }
 0x193   :  { %7754 = vst [vmem:[#allocation90_spill] sm:$0xff] %v5161_v19  ;;  %7755 = vst [vmem:[#allocation91_spill] sm:$0xff] %v5163_v18 }
 0x194   :  { %7761 = vst [vmem:[#allocation97_spill] sm:$0xff] %v5183_v35  ;;  %7764 = vst [vmem:[#allocation100_spill] sm:$0xff] %v5194_v38  ;;  %v1595_v60 = vsel %vm1246_vm1, %v5183_v35, 0.0  ;;  %v1412_v11 = vsel %vm1246_vm1, %v5194_v38, 0.0 }
 0x195   :  { %1593 = vadd.xlane.f32.xlu1 %v1592_v3  ;;  %1590 = vadd.xlane.f32.xlu0 %v1589_v20  ;;  %v877_v3 = vpop.f32.mrf.mxu0  ;;  %v3755_v20 = vpop.f32.mrf.mxu1 }
 0x196   :  { %v5175_v10 = vpop.xlane.xlu1 %1491  ;;  %v5177_v19 = vpop.xlane.xlu0 %1488  ;;  %v5197_v17 = vadd.f32 %v4579_v1, %v877_v3  ;;  %v5208_v59 = vadd.f32 %v3755_v20, %v4579_v1 }
 0x197   :  { %7758 = vst [vmem:[#allocation94_spill] sm:$0xff] %v5175_v10  ;;  %7759 = vst [vmem:[#allocation95_spill] sm:$0xff] %v5177_v19 }
 0x198   :  { %7765 = vst [vmem:[#allocation101_spill] sm:$0xff] %v5197_v17  ;;  %7768 = vst [vmem:[#allocation104_spill] sm:$0xff] %v5208_v59  ;;  %v1409_v35 = vsel %vm1246_vm1, %v5197_v17, 0.0  ;;  %v1604_v38 = vsel %vm1246_vm1, %v5208_v59, 0.0 }
 0x199   :  { %1407 = vadd.xlane.f32.xlu1 %v1406_v43  ;;  %1404 = vadd.xlane.f32.xlu0 %v1403_v50  ;;  %v1197_v43 = vpop.f32.mrf.mxu1  ;;  %v3662_v50 = vpop.f32.mrf.mxu0 }
 0x19a   :  { %v5189_v18 = vpop.xlane.xlu1 %1305  ;;  %v5191_v10 = vpop.xlane.xlu0 %1302  ;;  %v5211_v3 = vadd.f32 %v4579_v1, %v1197_v43  ;;  %v5222_v20 = vadd.f32 %v3662_v50, %v4579_v1 }
 0x19b   :  { %7762 = vst [vmem:[#allocation98_spill] sm:$0xff] %v5189_v18  ;;  %7763 = vst [vmem:[#allocation99_spill] sm:$0xff] %v5191_v10 }
 0x19c   :  { %7769 = vst [vmem:[#allocation105_spill] sm:$0xff] %v5211_v3  ;;  %7772 = vst [vmem:[#allocation108_spill] sm:$0xff] %v5222_v20  ;;  %v1601_v17 = vsel %vm1246_vm1, %v5211_v3, 0.0  ;;  %v1418_v59 = vsel %vm1246_vm1, %v5222_v20, 0.0 }
 0x19d   :  { %1599 = vadd.xlane.f32.xlu1 %v1598_v61  ;;  %1596 = vadd.xlane.f32.xlu0 %v1595_v60  ;;  %v887_v61 = vpop.f32.mrf.mxu0  ;;  %v3758_v60 = vpop.f32.mrf.mxu1 }
 0x19e   :  { %v5203_v19 = vpop.xlane.xlu1 %1497  ;;  %v5205_v18 = vpop.xlane.xlu0 %1494  ;;  %v5225_v43 = vadd.f32 %v4579_v1, %v887_v61  ;;  %v5236_v50 = vadd.f32 %v3758_v60, %v4579_v1 }
 0x19f   :  { %7766 = vst [vmem:[#allocation102_spill] sm:$0xff] %v5203_v19  ;;  %7767 = vst [vmem:[#allocation103_spill] sm:$0xff] %v5205_v18 }
 0x1a0   :  { %7773 = vst [vmem:[#allocation109_spill] sm:$0xff] %v5225_v43  ;;  %7776 = vst [vmem:[#allocation112_spill] sm:$0xff] %v5236_v50  ;;  %v1415_v3 = vsel %vm1246_vm1, %v5225_v43, 0.0  ;;  %v1610_v43 = vsel %vm1246_vm1, %v5236_v50, 0.0 }
 0x1a1   :  { %1413 = vadd.xlane.f32.xlu1 %v1412_v11  ;;  %1410 = vadd.xlane.f32.xlu0 %v1409_v35  ;;  %v1207_v11 = vpop.f32.mrf.mxu1  ;;  %v3665_v35 = vpop.f32.mrf.mxu0 }
 0x1a2   :  { %v5217_v10 = vpop.xlane.xlu1 %1311  ;;  %v5219_v19 = vpop.xlane.xlu0 %1308  ;;  %v5239_v61 = vadd.f32 %v4579_v1, %v1207_v11  ;;  %v5250_v60 = vadd.f32 %v3665_v35, %v4579_v1  ;;  %v4026_v11 = vld [vmem:[%s7452_s2] ss:$0 sm:$0xff] }
 0x1a3   :  { %7770 = vst [vmem:[#allocation106_spill] sm:$0xff] %v5217_v10  ;;  %7771 = vst [vmem:[#allocation107_spill] sm:$0xff] %v5219_v19 }
 0x1a4   :  { %7777 = vst [vmem:[#allocation113_spill] sm:$0xff] %v5239_v61  ;;  %7780 = vst [vmem:[#allocation116_spill] sm:$0xff] %v5250_v60 }
 0x1a5   :  { %1605 = vadd.xlane.f32.xlu1 %v1604_v38  ;;  %1602 = vadd.xlane.f32.xlu0 %v1601_v17  ;;  %v897_v38 = vpop.f32.mrf.mxu0  ;;  %v3761_v17 = vpop.f32.mrf.mxu1 }
 0x1a6   :  { %v5231_v18 = vpop.xlane.xlu1 %1503  ;;  %v5233_v10 = vpop.xlane.xlu0 %1500  ;;  %v5265_v35 = vadd.f32 %v4026_v11, %v3761_v17 }
 0x1a7   :  { %7774 = vst [vmem:[#allocation110_spill] sm:$0xff] %v5231_v18  ;;  %7775 = vst [vmem:[#allocation111_spill] sm:$0xff] %v5233_v10  ;;  %v5255_v10 = vadd.f32 %v4026_v11, %v897_v38  ;;  %v3668_v20 = vpop.f32.mrf.mxu0  ;;  %v1424_v38 = vsel %vm1246_vm1, %v5250_v60, 0.0 }
 0x1a8   :  { %7784 = vst [vmem:[#allocation120_spill] sm:$0xff] %v5265_v35 }
 0x1a9   :  { %1419 = vadd.xlane.f32.xlu1 %v1418_v59  ;;  %1416 = vadd.xlane.f32.xlu0 %v1415_v3  ;;  %7781 = vst [vmem:[#allocation117_spill] sm:$0xff] %v5255_v10  ;;  %v1607_v59 = vsel %vm1246_vm1, %v5239_v61, 0.0  ;;  %v1217_v3 = vpop.f32.mrf.mxu1  ;;  %v1421_v50 = vsel %vm1246_vm1, %v5255_v10, 0.0 }
 0x1aa   :  { %v5245_v19 = vpop.xlane.xlu1 %1317  ;;  %v5247_v18 = vpop.xlane.xlu0 %1314 }
 0x1ab   :  { %7778 = vst [vmem:[#allocation114_spill] sm:$0xff] %v5245_v19  ;;  %7779 = vst [vmem:[#allocation115_spill] sm:$0xff] %v5247_v18  ;;  %v5267_v19 = vadd.f32 %v4026_v11, %v1217_v3  ;;  %v1616_v3 = vsel %vm1246_vm1, %v5265_v35, 0.0 }
 0x1ad   :  { %1611 = vadd.xlane.f32.xlu1 %v1610_v43  ;;  %1608 = vadd.xlane.f32.xlu0 %v1607_v59  ;;  %7785 = vst [vmem:[#allocation121_spill] sm:$0xff] %v5267_v19  ;;  %v907_v43 = vpop.f32.mrf.mxu0  ;;  %v3764_v59 = vpop.f32.mrf.mxu1  ;;  %v1613_v60 = vsel %vm1246_vm1, %v5267_v19, 0.0 }
 0x1ae   :  { %v5261_v18 = vpop.xlane.xlu1 %1509  ;;  %v5263_v1 = vpop.xlane.xlu0 %1506  ;;  %v5279_v17 = vadd.f32 %v4026_v11, %v907_v43 }
 0x1af   :  { %7782 = vst [vmem:[#allocation118_spill] sm:$0xff] %v5261_v18  ;;  %7783 = vst [vmem:[#allocation119_spill] sm:$0xff] %v5263_v1  ;;  %v5277_v18 = vadd.f32 %v4026_v11, %v3668_v20 }
 0x1b0   :  { %7789 = vst [vmem:[#allocation125_spill] sm:$0xff] %v5279_v17  ;;  %v1427_v35 = vsel %vm1246_vm1, %v5279_v17, 0.0 }
 0x1b1   :  { %1425 = vadd.xlane.f32.xlu1 %v1424_v38  ;;  %1422 = vadd.xlane.f32.xlu0 %v1421_v50  ;;  %7788 = vst [vmem:[#allocation124_spill] sm:$0xff] %v5277_v18  ;;  %v1227_v38 = vpop.f32.mrf.mxu1  ;;  %v3671_v50 = vpop.f32.mrf.mxu0  ;;  %v1430_v43 = vsel %vm1246_vm1, %v5277_v18, 0.0 }
 0x1b2   :  { %v5273_v61 = vpop.xlane.xlu1 %1323  ;;  %v5275_v9 = vpop.xlane.xlu0 %1320  ;;  %v5291_v20 = vadd.f32 %v4026_v11, %v1227_v38  ;;  %v1632_v38 = vmul.f32 0.020833334, %v4953_v48 }
 0x1b3   :  { %7786 = vst [vmem:[#allocation122_spill] sm:$0xff] %v5273_v61  ;;  %7787 = vst [vmem:[#allocation123_spill] sm:$0xff] %v5275_v9  ;;  %v5289_v61 = vadd.f32 %v4026_v11, %v3764_v59  ;;  %v3767_v9 = vpop.f32.mrf.mxu1 }
 0x1b4   :  { %7793 = vst [vmem:[#allocation129_spill] sm:$0xff] %v5291_v20  ;;  %v5319_v48 = vadd.f32 %v4026_v11, %v3767_v9 }
 0x1b5   :  { %1617 = vadd.xlane.f32.xlu1 %v1616_v3  ;;  %1614 = vadd.xlane.f32.xlu0 %v1613_v60  ;;  %7792 = vst [vmem:[#allocation128_spill] sm:$0xff] %v5289_v61  ;;  %v917_v60 = vpop.f32.mrf.mxu0  ;;  %v1622_v59 = vsel %vm1246_vm1, %v5289_v61, 0.0 }
 0x1b6   :  { %v5285_v10 = vpop.xlane.xlu1 %1515  ;;  %v5287_v1 = vpop.xlane.xlu0 %1512  ;;  %v5307_v18 = vadd.f32 %v4026_v11, %v917_v60  ;;  %7798 = vst [vmem:[#allocation134_spill] sm:$0xff] %v5319_v48  ;;  %v5324_v60 = vsub.f32 %v4588_v8, %v1632_v38  ;;  %v1635_v8 = vmul.f32 0.020833334, %v4951_v49  ;;  %v1634_v38 = vmul.f32 0.020833334, %v4979_v7 }
 0x1b7   :  { %7790 = vst [vmem:[#allocation126_spill] sm:$0xff] %v5285_v10  ;;  %7791 = vst [vmem:[#allocation127_spill] sm:$0xff] %v5287_v1  ;;  %v1633_v1 = vmul.f32 0.020833334, %v4939_v32  ;;  %v5305_v10 = vadd.f32 %v4026_v11, %v3671_v50  ;;  %v1697_v32 = vmul.f32 0.020833334, %v4937_v21 }
 0x1b8   :  { %7796 = vst [vmem:[#allocation132_spill] sm:$0xff] %v5307_v18  ;;  %7800 = vst [vmem:[#allocation136_spill] sm:$0xff] %v5324_v60 }
 0x1b9   :  { %1431 = vadd.xlane.f32.xlu1 %v1430_v43  ;;  %1428 = vadd.xlane.f32.xlu0 %v1427_v35  ;;  %7795 = vst [vmem:[#allocation131_spill] sm:$0xff] %v5305_v10  ;;  %v1619_v43 = vsel %vm1246_vm1, %v5291_v20, 0.0  ;;  %v1237_v35 = vpop.f32.mrf.mxu1  ;;  %v5317_v61 = vsub.f32 %v4582_v4, %v1633_v1  ;;  %v1696_v20 = vmul.f32 0.020833334, %v4967_v24  ;;  %v5336_v9 = vsub.f32 %v4585_v5, %v1697_v32 }
 0x1ba   :  { %v5297_v3 = vpop.xlane.xlu1 %1329  ;;  %v5299_v19 = vpop.xlane.xlu0 %1326  ;;  %v5321_v50 = vadd.f32 %v4026_v11, %v1237_v35  ;;  %v1628_v24 = vsel %vm1246_vm1, %v5319_v48, 0.0  ;;  %v1888_v5 = vmul.f32 %v5324_v60, %v5324_v60 }
 0x1bb   :  { %7794 = vst [vmem:[#allocation130_spill] sm:$0xff] %v5299_v19  ;;  %7797 = vst [vmem:[#allocation133_spill] sm:$0xff] %v5317_v61  ;;  %v1889_v11 = vmul.f32 %v5317_v61, %v5317_v61  ;;  %v5344_v1 = vsub.f32 %v4601_v16, %v1696_v20  ;;  %v1699_v16 = vmul.f32 0.020833334, %v4965_v31  ;;  %v1953_v7 = vmul.f32 %v5336_v9, %v5336_v9 }
 0x1bc   :  { %7799 = vst [vmem:[#allocation135_spill] sm:$0xff] %v5321_v50  ;;  %7801 = vst [vmem:[#allocation137_spill] sm:$0xff] %v5336_v9  ;;  %v1625_v35 = vsel %vm1246_vm1, %v5321_v50, 0.0 }
 0x1bd   :  { %1623 = vadd.xlane.f32.xlu1 %v1622_v59  ;;  %1620 = vadd.xlane.f32.xlu0 %v1619_v43  ;;  %v1436_v59 = vsel %vm1246_vm1, %v5305_v10, 0.0  ;;  %v1433_v43 = vsel %vm1246_vm1, %v5307_v18, 0.0  ;;  %7802 = vst [vmem:[#allocation138_spill] sm:$0xff] %v5344_v1  ;;  %v2019_v20 = vsel %vm1246_vm1, %v1889_v11, 0.0  ;;  %v1952_v50 = vmul.f32 %v5344_v1, %v5344_v1 }
 0x1be   :  { %v5311_v17 = vpop.xlane.xlu1 %1521  ;;  %v5313_v19 = vpop.xlane.xlu0 %1518  ;;  %v1636_v11 = vmul.f32 0.020833334, %v4995_v53 }
 0x1c1   :  { %1437 = vadd.xlane.f32.xlu1 %v1436_v59  ;;  %1434 = vadd.xlane.f32.xlu0 %v1433_v43  ;;  %v5356_v59 = vsub.f32 %v4595_v13, %v1635_v8  ;;  %v5363_v43 = vsub.f32 %v4610_v22, %v1634_v38  ;;  %v1637_v8 = vmul.f32 0.020833334, %v4993_v56  ;;  %v2211_v22 = vsel %vm1246_vm1, %v1953_v7, 0.0 }
 0x1c2   :  { %v5331_v21 = vpop.xlane.xlu1 %1335  ;;  %v5333_v4 = vpop.xlane.xlu0 %1332  ;;  %v5379_v38 = vsub.f32 %v4598_v14, %v1699_v16  ;;  %v5395_v14 = vsub.f32 %v4621_v28, %v1636_v11 }
 0x1c3   :  { %7803 = vst [vmem:[#allocation139_spill] sm:$0xff] %v5356_v59  ;;  %7804 = vst [vmem:[#allocation140_spill] sm:$0xff] %v5363_v43  ;;  %v5392_v7 = vsub.f32 %v4618_v27, %v1637_v8  ;;  %v1639_v8 = vmul.f32 0.020833334, %v5021_v30 }
 0x1c4   :  { %7805 = vst [vmem:[#allocation141_spill] sm:$0xff] %v5379_v38  ;;  %7808 = vst [vmem:[#allocation144_spill] sm:$0xff] %v5395_v14  ;;  %v1892_v11 = vmul.f32 %v5395_v14, %v5395_v14 }
 0x1c5   :  { %1629 = vadd.xlane.f32.xlu1 %v1628_v24  ;;  %1626 = vadd.xlane.f32.xlu0 %v1625_v35  ;;  %v1698_v24 = vmul.f32 0.020833334, %v4981_v6  ;;  %v2016_v35 = vsel %vm1246_vm1, %v1888_v5, 0.0  ;;  %v1891_v6 = vmul.f32 %v5356_v59, %v5356_v59  ;;  %7807 = vst [vmem:[#allocation143_spill] sm:$0xff] %v5392_v7 }
 0x1c6   :  { %v5351_v49 = vpop.xlane.xlu1 %1527  ;;  %v5353_v32 = vpop.xlane.xlu0 %1524 }
 0x1c7   :  { %v5382_v5 = vsub.f32 %v4613_v23, %v1698_v24  ;;  %v1701_v23 = vmul.f32 0.020833334, %v5007_v42  ;;  %v2025_v16 = vsel %vm1246_vm1, %v1891_v6, 0.0 }
 0x1c9   :  { %2020 = vadd.xlane.f32.xlu1 %v2019_v20  ;;  %2017 = vadd.xlane.f32.xlu0 %v2016_v35  ;;  %7806 = vst [vmem:[#allocation142_spill] sm:$0xff] %v5382_v5  ;;  %v2208_v20 = vsel %vm1246_vm1, %v1952_v50, 0.0  ;;  %v1890_v35 = vmul.f32 %v5363_v43, %v5363_v43  ;;  %v1700_v50 = vmul.f32 0.020833334, %v5009_v41  ;;  %v5410_v42 = vsub.f32 %v4628_v33, %v1701_v23  ;;  %v7871_v43 = vld [vmem:[#allocation19_spill] sm:$0xff] }
 0x1ca   :  { %v5369_v13 = vpop.xlane.xlu1 %1341  ;;  %v5371_v31 = vpop.xlane.xlu0 %1338  ;;  %v1893_v41 = vmul.f32 %v5392_v7, %v5392_v7  ;;  %v5428_v23 = vsub.f32 %v4638_v39, %v1639_v8 }
 0x1cb   :  { %v2022_v24 = vsel %vm1246_vm1, %v1890_v35, 0.0  ;;  %7809 = vst [vmem:[#allocation145_spill] sm:$0xff] %v5410_v42  ;;  %v5418_v6 = vsub.f32 %v4631_v34, %v1700_v50  ;;  %v1638_v35 = vmul.f32 0.020833334, %v5023_v25  ;;  %v2028_v34 = vsel %vm1246_vm1, %v1892_v11, 0.0 }
 0x1cc   :  { %7811 = vst [vmem:[#allocation147_spill] sm:$0xff] %v5428_v23  ;;  %v2031_v48 = vsel %vm1246_vm1, %v1893_v41, 0.0  ;;  %v1957_v25 = vmul.f32 %v5410_v42, %v5410_v42  ;;  %v1641_v41 = vmul.f32 0.020833334, %v5049_v2  ;;  %v1640_v11 = vmul.f32 0.020833334, %v5051_v62 }
 0x1cd   :  { %2212 = vadd.xlane.f32.xlu1 %v2211_v22  ;;  %2209 = vadd.xlane.f32.xlu0 %v2208_v20  ;;  %v1955_v22 = vmul.f32 %v5379_v38, %v5379_v38  ;;  %v1954_v20 = vmul.f32 %v5382_v5, %v5382_v5  ;;  %7810 = vst [vmem:[#allocation146_spill] sm:$0xff] %v5418_v6  ;;  %v7868_v38 = vld [vmem:[#allocation107_spill] sm:$0xff] }
 0x1ce   :  { %v5387_v56 = vpop.xlane.xlu1 %1533  ;;  %v5389_v53 = vpop.xlane.xlu0 %1530  ;;  %v5435_v50 = vsub.f32 %v4641_v40, %v1638_v35  ;;  %v2223_v40 = vsel %vm1246_vm1, %v1957_v25, 0.0 }
 0x1d0   :  { %7812 = vst [vmem:[#allocation148_spill] sm:$0xff] %v5435_v50 }
 0x1d1   :  { %2026 = vadd.xlane.f32.xlu1 %v2025_v16  ;;  %2023 = vadd.xlane.f32.xlu0 %v2022_v24  ;;  %v2217_v16 = vsel %vm1246_vm1, %v1955_v22, 0.0  ;;  %v2214_v24 = vsel %vm1246_vm1, %v1954_v20, 0.0  ;;  %v1703_v22 = vmul.f32 0.020833334, %v5035_v15  ;;  %v1702_v20 = vmul.f32 0.020833334, %v5037_v12 }
 0x1d2   :  { %v5405_v27 = vpop.xlane.xlu1 %1347  ;;  %v5407_v28 = vpop.xlane.xlu0 %1344  ;;  %v1895_v15 = vmul.f32 %v5428_v23, %v5428_v23 }
 0x1d3   :  { %v5451_v12 = vsub.f32 %v4648_v45, %v1703_v22  ;;  %v5454_v35 = vsub.f32 %v4651_v46, %v1702_v20  ;;  %v5467_v45 = vsub.f32 %v4661_v52, %v1640_v11  ;;  %v1705_v46 = vmul.f32 0.020833334, %v5063_v55 }
 0x1d4   :  { %v2037_v25 = vsel %vm1246_vm1, %v1895_v15, 0.0  ;;  %v1704_v22 = vmul.f32 0.020833334, %v5065_v54 }
 0x1d5   :  { %2218 = vadd.xlane.f32.xlu1 %v2217_v16  ;;  %2215 = vadd.xlane.f32.xlu0 %v2214_v24  ;;  %v1956_v16 = vmul.f32 %v5418_v6, %v5418_v6  ;;  %7813 = vst [vmem:[#allocation149_spill] sm:$0xff] %v5451_v12  ;;  %7814 = vst [vmem:[#allocation150_spill] sm:$0xff] %v5454_v35  ;;  %v1894_v24 = vmul.f32 %v5435_v50, %v5435_v50  ;;  %v7847_v50 = vld [vmem:[#allocation11_spill] sm:$0xff] }
 0x1d6   :  { %v5423_v33 = vpop.xlane.xlu1 %1539  ;;  %v5425_v30 = vpop.xlane.xlu0 %1536  ;;  %7816 = vst [vmem:[#allocation152_spill] sm:$0xff] %v5467_v45  ;;  %v5482_v55 = vsub.f32 %v4668_v57, %v1705_v46  ;;  %v1896_v11 = vmul.f32 %v5467_v45, %v5467_v45  ;;  %v5490_v15 = vsub.f32 %v4671_v58, %v1704_v22 }
 0x1d7   :  { %v2034_v20 = vsel %vm1246_vm1, %v1894_v24, 0.0 }
 0x1d8   :  { %7817 = vst [vmem:[#allocation153_spill] sm:$0xff] %v5482_v55  ;;  %7818 = vst [vmem:[#allocation154_spill] sm:$0xff] %v5490_v15  ;;  %v2040_v58 = vsel %vm1246_vm1, %v1896_v11, 0.0  ;;  %v1644_v11 = vmul.f32 0.020833334, %v5107_v26 }
 0x1d9   :  { %2032 = vadd.xlane.f32.xlu1 %v2031_v48  ;;  %2029 = vadd.xlane.f32.xlu0 %v2028_v34  ;;  %v2220_v48 = vsel %vm1246_vm1, %v1956_v16, 0.0  ;;  %v5464_v34 = vsub.f32 %v4658_v51, %v1641_v41  ;;  %v1959_v16 = vmul.f32 %v5451_v12, %v5451_v12  ;;  %v1643_v41 = vmul.f32 0.020833334, %v5077_v47  ;;  %v7844_v12 = vld [vmem:[#allocation91_spill] sm:$0xff] }
 0x1da   :  { %v5441_v39 = vpop.xlane.xlu1 %1353  ;;  %v5443_v8 = vpop.xlane.xlu0 %1350 }
 0x1db   :  { %7815 = vst [vmem:[#allocation151_spill] sm:$0xff] %v5464_v34  ;;  %v1897_v54 = vmul.f32 %v5464_v34, %v5464_v34  ;;  %v2229_v24 = vsel %vm1246_vm1, %v1959_v16, 0.0  ;;  %v5500_v46 = vsub.f32 %v4678_v63, %v1643_v41  ;;  %v1707_v16 = vmul.f32 0.020833334, %v5091_v37 }
 0x1dd   :  { %2224 = vadd.xlane.f32.xlu1 %v2223_v40  ;;  %2221 = vadd.xlane.f32.xlu0 %v2220_v48  ;;  %v1958_v40 = vmul.f32 %v5454_v35, %v5454_v35  ;;  %v1642_v48 = vmul.f32 0.020833334, %v5079_v44  ;;  %7819 = vst [vmem:[#allocation155_spill] sm:$0xff] %v5500_v46  ;;  %v1961_v44 = vmul.f32 %v5482_v55, %v5482_v55 }
 0x1de   :  { %v5459_v2 = vpop.xlane.xlu1 %1545  ;;  %v5461_v62 = vpop.xlane.xlu0 %1542  ;;  %v1899_v37 = vmul.f32 %v5500_v46, %v5500_v46  ;;  %v7827_v46 = vld [vmem:[#allocation5_spill] sm:$0xff] }
 0x1df   :  { %v5507_v22 = vsub.f32 %v4681_v0, %v1642_v48  ;;  %v2235_v0 = vsel %vm1246_vm1, %v1961_v44, 0.0  ;;  %v7821_v48 = vld [vmem:[#allocation2_spill] sm:$0xff]  ;;  %v7825_v44 = vld [vmem:[#allocation4_spill] sm:$0xff] }
 0x1e1   :  { %2038 = vadd.xlane.f32.xlu1 %v2037_v25  ;;  %2035 = vadd.xlane.f32.xlu0 %v2034_v20  ;;  %v2226_v25 = vsel %vm1246_vm1, %v1958_v40, 0.0  ;;  %v2043_v20 = vsel %vm1246_vm1, %v1897_v54, 0.0  ;;  %7820 = vst [vmem:[#allocation156_spill] sm:$0xff] %v5507_v22  ;;  %v1706_v40 = vmul.f32 0.020833334, %v5093_v36  ;;  %v5523_v36 = vsub.f32 %v7821_v48, %v1707_v16  ;;  %v7829_v48 = vld [vmem:[#allocation78_spill] sm:$0xff] }
 0x1e2   :  { %v5477_v51 = vpop.xlane.xlu1 %1359  ;;  %v5479_v52 = vpop.xlane.xlu0 %1356  ;;  %v1645_v54 = vmul.f32 0.020833334, %v5105_v29  ;;  %v5539_v16 = vsub.f32 %v7827_v46, %v1644_v11  ;;  %v7831_v11 = vld [vmem:[#allocation6_spill] sm:$0xff] }
 0x1e3   :  { %7822 = vst [vmem:[#allocation2_spill] sm:$0xff] %v5523_v36 }
 0x1e4   :  { %v5536_v10 = vsub.f32 %v7825_v44, %v1645_v54  ;;  %7828 = vst [vmem:[#allocation5_spill] sm:$0xff] %v5539_v16 }
 0x1e5   :  { %2230 = vadd.xlane.f32.xlu1 %v2229_v24  ;;  %2227 = vadd.xlane.f32.xlu0 %v2226_v25  ;;  %v1960_v24 = vmul.f32 %v5490_v15, %v5490_v15  ;;  %v7823_v25 = vld [vmem:[#allocation3_spill] sm:$0xff] }
 0x1e6   :  { %v5495_v57 = vpop.xlane.xlu1 %1551  ;;  %v5497_v47 = vpop.xlane.xlu0 %1548  ;;  %v5526_v18 = vsub.f32 %v7823_v25, %v1706_v40  ;;  %7826 = vst [vmem:[#allocation4_spill] sm:$0xff] %v5536_v10  ;;  %v1709_v40 = vmul.f32 0.020833334, %v7829_v48  ;;  %v2049_v25 = vsel %vm1246_vm1, %v1899_v37, 0.0  ;;  %v7833_v37 = vld [vmem:[#allocation82_spill] sm:$0xff] }
 0x1e7   :  { %v1647_v48 = vmul.f32 0.020833334, %v7833_v37  ;;  %v7837_v37 = vld [vmem:[#allocation8_spill] sm:$0xff] }
 0x1e8   :  { %7824 = vst [vmem:[#allocation3_spill] sm:$0xff] %v5526_v18  ;;  %v5554_v44 = vsub.f32 %v7831_v11, %v1709_v40 }
 0x1e9   :  { %2044 = vadd.xlane.f32.xlu1 %v2043_v20  ;;  %2041 = vadd.xlane.f32.xlu0 %v2040_v58  ;;  %v2232_v20 = vsel %vm1246_vm1, %v1960_v24, 0.0  ;;  %v1898_v58 = vmul.f32 %v5507_v22, %v5507_v22  ;;  %v7830_v24 = vld [vmem:[#allocation79_spill] sm:$0xff] }
 0x1ea   :  { %v5513_v63 = vpop.xlane.xlu1 %1365  ;;  %v5515_v41 = vpop.xlane.xlu0 %1362  ;;  %v1708_v15 = vmul.f32 0.020833334, %v7830_v24  ;;  %7832 = vst [vmem:[#allocation78_spill] sm:$0xff] %v5554_v44  ;;  %v1900_v24 = vmul.f32 %v5539_v16, %v5539_v16 }
 0x1eb   :  { %v2046_v22 = vsel %vm1246_vm1, %v1898_v58, 0.0  ;;  %v1901_v58 = vmul.f32 %v5536_v10, %v5536_v10  ;;  %v5572_v10 = vsub.f32 %v7837_v37, %v1647_v48 }
 0x1ed   :  { %2236 = vadd.xlane.f32.xlu1 %v2235_v0  ;;  %2233 = vadd.xlane.f32.xlu0 %v2232_v20  ;;  %v1963_v0 = vmul.f32 %v5523_v36, %v5523_v36  ;;  %v1962_v20 = vmul.f32 %v5526_v18, %v5526_v18  ;;  %v7834_v36 = vld [vmem:[#allocation7_spill] sm:$0xff]  ;;  %7838 = vst [vmem:[#allocation6_spill] sm:$0xff] %v5572_v10  ;;  %v2055_v16 = vsel %vm1246_vm1, %v1901_v58, 0.0 }
 0x1ee   :  { %v5531_v29 = vpop.xlane.xlu1 %1557  ;;  %v5533_v26 = vpop.xlane.xlu0 %1554  ;;  %v5562_v55 = vsub.f32 %v7834_v36, %v1708_v15  ;;  %v2052_v15 = vsel %vm1246_vm1, %v1900_v24, 0.0  ;;  %v1965_v36 = vmul.f32 %v5554_v44, %v5554_v44  ;;  %v7843_v24 = vld [vmem:[#allocation90_spill] sm:$0xff]  ;;  %v1648_v44 = vmul.f32 0.020833334, %v7844_v12 }
 0x1ef   :  { %v2241_v18 = vsel %vm1246_vm1, %v1963_v0, 0.0  ;;  %v2238_v45 = vsel %vm1246_vm1, %v1962_v20, 0.0  ;;  %v7841_v20 = vld [vmem:[#allocation86_spill] sm:$0xff]  ;;  %v1649_v37 = vmul.f32 0.020833334, %v7843_v24 }
 0x1f0   :  { %7835 = vst [vmem:[#allocation79_spill] sm:$0xff] %v5562_v55  ;;  %v1964_v35 = vmul.f32 %v5562_v55, %v5562_v55 }
 0x1f1   :  { %2050 = vadd.xlane.f32.xlu1 %v2049_v25  ;;  %2047 = vadd.xlane.f32.xlu0 %v2046_v22  ;;  %v7836_v25 = vld [vmem:[#allocation83_spill] sm:$0xff] }
 0x1f2   :  { %v5549_v54 = vpop.xlane.xlu1 %1371  ;;  %v5551_v46 = vpop.xlane.xlu0 %1368  ;;  %v1646_v22 = vmul.f32 0.020833334, %v7836_v25  ;;  %v7839_v25 = vld [vmem:[#allocation9_spill] sm:$0xff] }
 0x1f4   :  { %v5579_v0 = vsub.f32 %v7839_v25, %v1646_v22  ;;  %v2247_v22 = vsel %vm1246_vm1, %v1965_v36, 0.0  ;;  %v1903_v25 = vmul.f32 %v5572_v10, %v5572_v10  ;;  %v7849_v36 = vld [vmem:[#allocation12_spill] sm:$0xff]  ;;  %v7851_v10 = vld [vmem:[#allocation13_spill] sm:$0xff] }
 0x1f5   :  { %2242 = vadd.xlane.f32.xlu1 %v2241_v18  ;;  %2239 = vadd.xlane.f32.xlu0 %v2238_v45  ;;  %v1711_v18 = vmul.f32 0.020833334, %v7841_v20  ;;  %v7842_v45 = vld [vmem:[#allocation87_spill] sm:$0xff]  ;;  %v7845_v20 = vld [vmem:[#allocation10_spill] sm:$0xff]  ;;  %v5608_v23 = vsub.f32 %v7849_v36, %v1649_v37 }
 0x1f6   :  { %v5567_v40 = vpop.xlane.xlu1 %1563  ;;  %v5569_v11 = vpop.xlane.xlu0 %1560  ;;  %7840 = vst [vmem:[#allocation82_spill] sm:$0xff] %v5579_v0  ;;  %v1710_v34 = vmul.f32 0.020833334, %v7842_v45 }
 0x1f7   :  { %v5595_v45 = vsub.f32 %v7845_v20, %v1711_v18  ;;  %7850 = vst [vmem:[#allocation8_spill] sm:$0xff] %v5608_v23  ;;  %v5611_v18 = vsub.f32 %v7851_v10, %v1648_v44  ;;  %v7853_v20 = vld [vmem:[#allocation94_spill] sm:$0xff] }
 0x1f8   :  { %v5598_v55 = vsub.f32 %v7847_v50, %v1710_v34  ;;  %v1713_v50 = vmul.f32 0.020833334, %v7853_v20  ;;  %v2061_v34 = vsel %vm1246_vm1, %v1903_v25, 0.0  ;;  %v7855_v44 = vld [vmem:[#allocation14_spill] sm:$0xff] }
 0x1f9   :  { %2056 = vadd.xlane.f32.xlu1 %v2055_v16  ;;  %2053 = vadd.xlane.f32.xlu0 %v2052_v15  ;;  %7846 = vst [vmem:[#allocation7_spill] sm:$0xff] %v5595_v45  ;;  %v2244_v16 = vsel %vm1246_vm1, %v1964_v35, 0.0  ;;  %v1902_v15 = vmul.f32 %v5579_v0, %v5579_v0  ;;  %7852 = vst [vmem:[#allocation9_spill] sm:$0xff] %v5611_v18  ;;  %v7854_v35 = vld [vmem:[#allocation95_spill] sm:$0xff]  ;;  %v7857_v25 = vld [vmem:[#allocation98_spill] sm:$0xff] }
 0x1fa   :  { %v5585_v48 = vpop.xlane.xlu1 %1377  ;;  %v5587_v58 = vpop.xlane.xlu0 %1374  ;;  %7848 = vst [vmem:[#allocation83_spill] sm:$0xff] %v5598_v55  ;;  %v1712_v6 = vmul.f32 0.020833334, %v7854_v35  ;;  %v5626_v36 = vsub.f32 %v7855_v44, %v1713_v50  ;;  %v1651_v20 = vmul.f32 0.020833334, %v7857_v25  ;;  %v1904_v35 = vmul.f32 %v5611_v18, %v5611_v18  ;;  %v7861_v25 = vld [vmem:[#allocation16_spill] sm:$0xff] }
 0x1fb   :  { %v2058_v0 = vsel %vm1246_vm1, %v1902_v15, 0.0  ;;  %v1905_v15 = vmul.f32 %v5608_v23, %v5608_v23 }
 0x1fc   :  { %7856 = vst [vmem:[#allocation86_spill] sm:$0xff] %v5626_v36  ;;  %v5644_v23 = vsub.f32 %v7861_v25, %v1651_v20 }
 0x1fd   :  { %2248 = vadd.xlane.f32.xlu1 %v2247_v22  ;;  %2245 = vadd.xlane.f32.xlu0 %v2244_v16  ;;  %v1967_v22 = vmul.f32 %v5595_v45, %v5595_v45  ;;  %v1966_v16 = vmul.f32 %v5598_v55, %v5598_v55  ;;  %v7858_v45 = vld [vmem:[#allocation15_spill] sm:$0xff]  ;;  %v2067_v18 = vsel %vm1246_vm1, %v1905_v15, 0.0 }
 0x1fe   :  { %v5603_v24 = vpop.xlane.xlu1 %1569  ;;  %v5605_v12 = vpop.xlane.xlu0 %1566  ;;  %v5634_v42 = vsub.f32 %v7858_v45, %v1712_v6  ;;  %7862 = vst [vmem:[#allocation90_spill] sm:$0xff] %v5644_v23  ;;  %v2064_v6 = vsel %vm1246_vm1, %v1904_v35, 0.0  ;;  %v1969_v45 = vmul.f32 %v5626_v36, %v5626_v36  ;;  %v7867_v35 = vld [vmem:[#allocation106_spill] sm:$0xff]  ;;  %v1652_v36 = vmul.f32 0.020833334, %v7868_v38 }
 0x1ff   :  { %v2253_v55 = vsel %vm1246_vm1, %v1967_v22, 0.0  ;;  %v2250_v14 = vsel %vm1246_vm1, %v1966_v16, 0.0  ;;  %v7865_v16 = vld [vmem:[#allocation102_spill] sm:$0xff]  ;;  %v1653_v25 = vmul.f32 0.020833334, %v7867_v35 }
 0x200   :  { %7859 = vst [vmem:[#allocation87_spill] sm:$0xff] %v5634_v42  ;;  %v1968_v5 = vmul.f32 %v5634_v42, %v5634_v42 }
 0x201   :  { %2062 = vadd.xlane.f32.xlu1 %v2061_v34  ;;  %2059 = vadd.xlane.f32.xlu0 %v2058_v0  ;;  %v7860_v34 = vld [vmem:[#allocation99_spill] sm:$0xff] }
 0x202   :  { %v5621_v37 = vpop.xlane.xlu1 %1383  ;;  %v5623_v10 = vpop.xlane.xlu0 %1380  ;;  %v1650_v0 = vmul.f32 0.020833334, %v7860_v34  ;;  %v7863_v34 = vld [vmem:[#allocation17_spill] sm:$0xff] }
 0x204   :  { %v5651_v22 = vsub.f32 %v7863_v34, %v1650_v0  ;;  %v2259_v0 = vsel %vm1246_vm1, %v1969_v45, 0.0  ;;  %v1907_v34 = vmul.f32 %v5644_v23, %v5644_v23  ;;  %v7873_v45 = vld [vmem:[#allocation20_spill] sm:$0xff]  ;;  %v7875_v23 = vld [vmem:[#allocation21_spill] sm:$0xff] }
 0x205   :  { %2254 = vadd.xlane.f32.xlu1 %v2253_v55  ;;  %2251 = vadd.xlane.f32.xlu0 %v2250_v14  ;;  %v1715_v55 = vmul.f32 0.020833334, %v7865_v16  ;;  %v7866_v14 = vld [vmem:[#allocation103_spill] sm:$0xff]  ;;  %v7869_v16 = vld [vmem:[#allocation18_spill] sm:$0xff]  ;;  %v5680_v59 = vsub.f32 %v7873_v45, %v1653_v25 }
 0x206   :  { %v5639_v50 = vpop.xlane.xlu1 %1575  ;;  %v5641_v44 = vpop.xlane.xlu0 %1572  ;;  %7864 = vst [vmem:[#allocation91_spill] sm:$0xff] %v5651_v22  ;;  %v1714_v7 = vmul.f32 0.020833334, %v7866_v14 }
 0x207   :  { %v5667_v14 = vsub.f32 %v7869_v16, %v1715_v55  ;;  %7874 = vst [vmem:[#allocation12_spill] sm:$0xff] %v5680_v59  ;;  %v5683_v55 = vsub.f32 %v7875_v23, %v1652_v36  ;;  %v7877_v16 = vld [vmem:[#allocation110_spill] sm:$0xff] }
 0x208   :  { %v5670_v42 = vsub.f32 %v7871_v43, %v1714_v7  ;;  %v1717_v43 = vmul.f32 0.020833334, %v7877_v16  ;;  %v2073_v7 = vsel %vm1246_vm1, %v1907_v34, 0.0  ;;  %v7880_v36 = vld [vmem:[#allocation22_spill] sm:$0xff] }
 0x209   :  { %2068 = vadd.xlane.f32.xlu1 %v2067_v18  ;;  %2065 = vadd.xlane.f32.xlu0 %v2064_v6  ;;  %7870 = vst [vmem:[#allocation10_spill] sm:$0xff] %v5667_v14  ;;  %v2256_v18 = vsel %vm1246_vm1, %v1968_v5, 0.0  ;;  %v1906_v6 = vmul.f32 %v5651_v22, %v5651_v22  ;;  %7876 = vst [vmem:[#allocation13_spill] sm:$0xff] %v5683_v55  ;;  %v7878_v5 = vld [vmem:[#allocation111_spill] sm:$0xff]  ;;  %v7882_v34 = vld [vmem:[#allocation114_spill] sm:$0xff] }
 0x20a   :  { %v5657_v20 = vpop.xlane.xlu1 %1389  ;;  %v5659_v15 = vpop.xlane.xlu0 %1386  ;;  %7872 = vst [vmem:[#allocation11_spill] sm:$0xff] %v5670_v42  ;;  %v1716_v1 = vmul.f32 0.020833334, %v7878_v5  ;;  %v5698_v45 = vsub.f32 %v7880_v36, %v1717_v43  ;;  %v1655_v16 = vmul.f32 0.020833334, %v7882_v34  ;;  %v1908_v5 = vmul.f32 %v5683_v55, %v5683_v55  ;;  %v7888_v34 = vld [vmem:[#allocation24_spill] sm:$0xff] }
 0x20b   :  { %v2070_v22 = vsel %vm1246_vm1, %v1906_v6, 0.0  ;;  %v1909_v6 = vmul.f32 %v5680_v59, %v5680_v59 }
 0x20c   :  { %7881 = vst [vmem:[#allocation95_spill] sm:$0xff] %v5698_v45  ;;  %v5716_v59 = vsub.f32 %v7888_v34, %v1655_v16  ;;  %v7894_v16 = vld [vmem:[#allocation122_spill] sm:$0xff] }
 0x20d   :  { %2260 = vadd.xlane.f32.xlu1 %v2259_v0  ;;  %2257 = vadd.xlane.f32.xlu0 %v2256_v18  ;;  %v1971_v0 = vmul.f32 %v5667_v14, %v5667_v14  ;;  %v1970_v18 = vmul.f32 %v5670_v42, %v5670_v42  ;;  %v7883_v14 = vld [vmem:[#allocation23_spill] sm:$0xff]  ;;  %v2079_v55 = vsel %vm1246_vm1, %v1909_v6, 0.0  ;;  %v1657_v34 = vmul.f32 0.020833334, %v7894_v16  ;;  %v7902_v16 = vld [vmem:[#allocation28_spill] sm:$0xff] }
 0x20e   :  { %v5675_v35 = vpop.xlane.xlu1 %1581  ;;  %v5677_v38 = vpop.xlane.xlu0 %1578  ;;  %v5706_v9 = vsub.f32 %v7883_v14, %v1716_v1  ;;  %7889 = vst [vmem:[#allocation99_spill] sm:$0xff] %v5716_v59  ;;  %v2076_v1 = vsel %vm1246_vm1, %v1908_v5, 0.0  ;;  %v1973_v14 = vmul.f32 %v5698_v45, %v5698_v45  ;;  %v7895_v6 = vld [vmem:[#allocation123_spill] sm:$0xff] }
 0x20f   :  { %v2265_v42 = vsel %vm1246_vm1, %v1971_v0, 0.0  ;;  %v2262_v60 = vsel %vm1246_vm1, %v1970_v18, 0.0  ;;  %v7892_v18 = vld [vmem:[#allocation118_spill] sm:$0xff]  ;;  %v7900_v45 = vld [vmem:[#allocation27_spill] sm:$0xff] }
 0x210   :  { %7884 = vst [vmem:[#allocation14_spill] sm:$0xff] %v5706_v9 }
 0x211   :  { %2074 = vadd.xlane.f32.xlu1 %v2073_v7  ;;  %2071 = vadd.xlane.f32.xlu0 %v2070_v22  ;;  %v7885_v7 = vld [vmem:[#allocation115_spill] sm:$0xff] }
 0x212   :  { %v5693_v25 = vpop.xlane.xlu1 %1395  ;;  %v5695_v23 = vpop.xlane.xlu0 %1392  ;;  %v1654_v22 = vmul.f32 0.020833334, %v7885_v7  ;;  %v7890_v7 = vld [vmem:[#allocation25_spill] sm:$0xff] }
 0x213   :  { %7879 = vst [vmem:[#allocation94_spill] sm:$0xff] %v5695_v23 }
 0x214   :  { %v5723_v0 = vsub.f32 %v7890_v7, %v1654_v22  ;;  %v2271_v22 = vsel %vm1246_vm1, %v1973_v14, 0.0  ;;  %v1911_v7 = vmul.f32 %v5716_v59, %v5716_v59  ;;  %v7904_v14 = vld [vmem:[#allocation29_spill] sm:$0xff]  ;;  %v7906_v59 = vld [vmem:[#allocation126_spill] sm:$0xff] }
 0x215   :  { %2266 = vadd.xlane.f32.xlu1 %v2265_v42  ;;  %2263 = vadd.xlane.f32.xlu0 %v2262_v60  ;;  %v1719_v42 = vmul.f32 0.020833334, %v7892_v18  ;;  %v7893_v60 = vld [vmem:[#allocation119_spill] sm:$0xff]  ;;  %v7898_v18 = vld [vmem:[#allocation26_spill] sm:$0xff] }
 0x216   :  { %v5711_v43 = vpop.xlane.xlu1 %1587  ;;  %v5713_v36 = vpop.xlane.xlu0 %1584  ;;  %7891 = vst [vmem:[#allocation16_spill] sm:$0xff] %v5723_v0  ;;  %v1718_v61 = vmul.f32 0.020833334, %v7893_v60 }
 0x217   :  { %7886 = vst [vmem:[#allocation98_spill] sm:$0xff] %v5711_v43  ;;  %7887 = vst [vmem:[#allocation15_spill] sm:$0xff] %v5713_v36  ;;  %v1972_v36 = vmul.f32 %v5706_v9, %v5706_v9  ;;  %v1656_v43 = vmul.f32 0.020833334, %v7895_v6  ;;  %v5739_v60 = vsub.f32 %v7898_v18, %v1719_v42  ;;  %v5748_v6 = vsub.f32 %v7902_v16, %v1657_v34 }
 0x218   :  { %v5742_v9 = vsub.f32 %v7900_v45, %v1718_v61  ;;  %v2085_v61 = vsel %vm1246_vm1, %v1911_v7, 0.0  ;;  %v7907_v45 = vld [vmem:[#allocation127_spill] sm:$0xff] }
 0x219   :  { %2080 = vadd.xlane.f32.xlu1 %v2079_v55  ;;  %2077 = vadd.xlane.f32.xlu0 %v2076_v1  ;;  %7899 = vst [vmem:[#allocation103_spill] sm:$0xff] %v5739_v60  ;;  %v2268_v55 = vsel %vm1246_vm1, %v1972_v36, 0.0  ;;  %v1910_v1 = vmul.f32 %v5723_v0, %v5723_v0  ;;  %7903 = vst [vmem:[#allocation107_spill] sm:$0xff] %v5748_v6  ;;  %v1720_v36 = vmul.f32 0.020833334, %v7907_v45  ;;  %v7911_v45 = vld [vmem:[#allocation130_spill] sm:$0xff] }
 0x21a   :  { %v5731_v5 = vpop.xlane.xlu1 %1401  ;;  %v5733_v23 = vpop.xlane.xlu0 %1398  ;;  %7901 = vst [vmem:[#allocation106_spill] sm:$0xff] %v5742_v9  ;;  %v1974_v34 = vmul.f32 %v5742_v9, %v5742_v9  ;;  %v7912_v9 = vld [vmem:[#allocation31_spill] sm:$0xff] }
 0x21b   :  { %7896 = vst [vmem:[#allocation17_spill] sm:$0xff] %v5731_v5  ;;  %7897 = vst [vmem:[#allocation102_spill] sm:$0xff] %v5733_v23  ;;  %v5751_v23 = vsub.f32 %v7904_v14, %v1656_v43  ;;  %v1721_v5 = vmul.f32 0.020833334, %v7906_v59  ;;  %v2082_v0 = vsel %vm1246_vm1, %v1910_v1, 0.0  ;;  %v7908_v43 = vld [vmem:[#allocation30_spill] sm:$0xff]  ;;  %v1913_v1 = vmul.f32 %v5748_v6, %v5748_v6 }
 0x21d   :  { %2272 = vadd.xlane.f32.xlu1 %v2271_v22  ;;  %2269 = vadd.xlane.f32.xlu0 %v2268_v55  ;;  %7905 = vst [vmem:[#allocation18_spill] sm:$0xff] %v5751_v23  ;;  %v1975_v22 = vmul.f32 %v5739_v60, %v5739_v60  ;;  %v5766_v59 = vsub.f32 %v7908_v43, %v1721_v5  ;;  %v1659_v55 = vmul.f32 0.020833334, %v5297_v3  ;;  %v1658_v60 = vmul.f32 0.020833334, %v7911_v45  ;;  %v7914_v3 = vld [vmem:[#allocation32_spill] sm:$0xff] }
 0x21e   :  { %v5754_v42 = vpop.xlane.xlu1 %1593  ;;  %v5756_v18 = vpop.xlane.xlu0 %1590  ;;  %v1912_v14 = vmul.f32 %v5751_v23, %v5751_v23  ;;  %v2274_v5 = vsel %vm1246_vm1, %v1974_v34, 0.0  ;;  %v2091_v23 = vsel %vm1246_vm1, %v1913_v1, 0.0  ;;  %v1723_v34 = vmul.f32 0.020833334, %v5311_v17 }
 0x21f   :  { %7909 = vst [vmem:[#allocation19_spill] sm:$0xff] %v5766_v59  ;;  %v5784_v43 = vsub.f32 %v7914_v3, %v1659_v55  ;;  %v1661_v55 = vmul.f32 0.020833334, %v5331_v21  ;;  %v1725_v3 = vmul.f32 0.020833334, %v5351_v49 }
 0x220   :  { %v2088_v45 = vsel %vm1246_vm1, %v1912_v14, 0.0  ;;  %v1724_v1 = vmul.f32 0.020833334, %v5353_v32  ;;  %v7923_v32 = vld [vmem:[#allocation35_spill] sm:$0xff] }
 0x221   :  { %2086 = vadd.xlane.f32.xlu1 %v2085_v61  ;;  %2083 = vadd.xlane.f32.xlu0 %v2082_v0  ;;  %v5779_v61 = vsub.f32 %v7912_v9, %v1720_v36  ;;  %v2277_v0 = vsel %vm1246_vm1, %v1975_v22, 0.0  ;;  %7915 = vst [vmem:[#allocation110_spill] sm:$0xff] %v5784_v43  ;;  %v1977_v9 = vmul.f32 %v5766_v59, %v5766_v59  ;;  %v7917_v36 = vld [vmem:[#allocation33_spill] sm:$0xff] }
 0x222   :  { %v5769_v16 = vpop.xlane.xlu1 %1407  ;;  %v5771_v7 = vpop.xlane.xlu0 %1404  ;;  %v5795_v22 = vsub.f32 %v7917_v36, %v1658_v60  ;;  %v1663_v60 = vmul.f32 0.020833334, %v5369_v13  ;;  %v1915_v21 = vmul.f32 %v5784_v43, %v5784_v43 }
 0x223   :  { %7910 = vst [vmem:[#allocation20_spill] sm:$0xff] %v5771_v7  ;;  %7913 = vst [vmem:[#allocation21_spill] sm:$0xff] %v5779_v61  ;;  %v1976_v14 = vmul.f32 %v5779_v61, %v5779_v61  ;;  %v7925_v61 = vld [vmem:[#allocation36_spill] sm:$0xff] }
 0x224   :  { %7918 = vst [vmem:[#allocation22_spill] sm:$0xff] %v5795_v22  ;;  %v1914_v13 = vmul.f32 %v5795_v22, %v5795_v22  ;;  %v7963_v22 = vld [vmem:[#allocation55_spill] sm:$0xff] }
 0x225   :  { %2278 = vadd.xlane.f32.xlu1 %v2277_v0  ;;  %2275 = vadd.xlane.f32.xlu0 %v2274_v5  ;;  %v1722_v0 = vmul.f32 0.020833334, %v5313_v19  ;;  %v1660_v5 = vmul.f32 0.020833334, %v5333_v4  ;;  %v2283_v19 = vsel %vm1246_vm1, %v1977_v9, 0.0  ;;  %v7921_v4 = vld [vmem:[#allocation34_spill] sm:$0xff] }
 0x226   :  { %v5786_v7 = vpop.xlane.xlu1 %1599  ;;  %v5788_v6 = vpop.xlane.xlu0 %1596  ;;  %v5814_v49 = vsub.f32 %v7921_v4, %v1723_v34  ;;  %v2280_v34 = vsel %vm1246_vm1, %v1976_v14, 0.0  ;;  %v1727_v14 = vmul.f32 0.020833334, %v5387_v56  ;;  %v1664_v56 = vmul.f32 0.020833334, %v5407_v28 }
 0x227   :  { %7916 = vst [vmem:[#allocation111_spill] sm:$0xff] %v5788_v6  ;;  %v5817_v59 = vsub.f32 %v7923_v32, %v1722_v0  ;;  %v7931_v6 = vld [vmem:[#allocation39_spill] sm:$0xff]  ;;  %v1662_v0 = vmul.f32 0.020833334, %v5371_v31 }
 0x228   :  { %7922 = vst [vmem:[#allocation115_spill] sm:$0xff] %v5814_v49  ;;  %v5831_v43 = vsub.f32 %v7931_v6, %v1724_v1  ;;  %v1979_v6 = vmul.f32 %v5814_v49, %v5814_v49 }
 0x229   :  { %2092 = vadd.xlane.f32.xlu1 %v2091_v23  ;;  %2089 = vadd.xlane.f32.xlu0 %v2088_v45  ;;  %7924 = vst [vmem:[#allocation24_spill] sm:$0xff] %v5817_v59  ;;  %v5820_v23 = vsub.f32 %v7925_v61, %v1661_v55  ;;  %v7927_v45 = vld [vmem:[#allocation37_spill] sm:$0xff]  ;;  %v7933_v61 = vld [vmem:[#allocation40_spill] sm:$0xff]  ;;  %v1978_v1 = vmul.f32 %v5817_v59, %v5817_v59  ;;  %v7939_v59 = vld [vmem:[#allocation43_spill] sm:$0xff] }
 0x22a   :  { %v5806_v36 = vpop.xlane.xlu1 %1413  ;;  %v5808_v17 = vpop.xlane.xlu0 %1410  ;;  %7932 = vst [vmem:[#allocation122_spill] sm:$0xff] %v5831_v43  ;;  %v5836_v55 = vsub.f32 %v7933_v61, %v1663_v60 }
 0x22b   :  { %7919 = vst [vmem:[#allocation114_spill] sm:$0xff] %v5806_v36  ;;  %7920 = vst [vmem:[#allocation23_spill] sm:$0xff] %v5808_v17  ;;  %v5825_v36 = vsub.f32 %v7927_v45, %v1660_v5  ;;  %v7929_v17 = vld [vmem:[#allocation38_spill] sm:$0xff]  ;;  %v2097_v5 = vsel %vm1246_vm1, %v1915_v21, 0.0  ;;  %v1917_v31 = vmul.f32 %v5820_v23, %v5820_v23  ;;  %v7935_v21 = vld [vmem:[#allocation41_spill] sm:$0xff] }
 0x22c   :  { %7926 = vst [vmem:[#allocation25_spill] sm:$0xff] %v5820_v23  ;;  %v5828_v9 = vsub.f32 %v7929_v17, %v1725_v3  ;;  %7934 = vst [vmem:[#allocation123_spill] sm:$0xff] %v5836_v55  ;;  %v2094_v3 = vsel %vm1246_vm1, %v1914_v13, 0.0  ;;  %v5858_v13 = vsub.f32 %v7935_v21, %v1662_v0  ;;  %v1726_v45 = vmul.f32 0.020833334, %v5389_v53 }
 0x22d   :  { %7928 = vst [vmem:[#allocation118_spill] sm:$0xff] %v5825_v36  ;;  %2284 = vadd.xlane.f32.xlu1 %v2283_v19  ;;  %2281 = vadd.xlane.f32.xlu0 %v2280_v34  ;;  %v1916_v60 = vmul.f32 %v5825_v36, %v5825_v36  ;;  %v1980_v19 = vmul.f32 %v5831_v43, %v5831_v43  ;;  %v1665_v34 = vmul.f32 0.020833334, %v5405_v27  ;;  %v1729_v43 = vmul.f32 0.020833334, %v5423_v33 }
 0x22e   :  { %7930 = vst [vmem:[#allocation119_spill] sm:$0xff] %v5828_v9  ;;  %v5838_v4 = vpop.xlane.xlu1 %1605  ;;  %v5840_v32 = vpop.xlane.xlu0 %1602  ;;  %v1981_v17 = vmul.f32 %v5828_v9, %v5828_v9  ;;  %7936 = vst [vmem:[#allocation26_spill] sm:$0xff] %v5858_v13  ;;  %v1919_v9 = vmul.f32 %v5836_v55, %v5836_v55  ;;  %v2289_v0 = vsel %vm1246_vm1, %v1979_v6, 0.0  ;;  %v2286_v21 = vsel %vm1246_vm1, %v1978_v1, 0.0  ;;  %v7961_v55 = vld [vmem:[#allocation54_spill] sm:$0xff] }
 0x22f   :  { %v2103_v53 = vsel %vm1246_vm1, %v1917_v31, 0.0  ;;  %v2100_v27 = vsel %vm1246_vm1, %v1916_v60, 0.0  ;;  %v2292_v23 = vsel %vm1246_vm1, %v1980_v19, 0.0  ;;  %v5880_v49 = vsub.f32 %v7939_v59, %v1726_v45  ;;  %v7941_v31 = vld [vmem:[#allocation44_spill] sm:$0xff]  ;;  %v7943_v60 = vld [vmem:[#allocation45_spill] sm:$0xff] }
 0x230   :  { %v2295_v28 = vsel %vm1246_vm1, %v1981_v17, 0.0  ;;  %v1728_v33 = vmul.f32 0.020833334, %v5425_v30  ;;  %v1667_v6 = vmul.f32 0.020833334, %v5441_v39  ;;  %v1918_v1 = vmul.f32 %v5858_v13, %v5858_v13  ;;  %v7945_v39 = vld [vmem:[#allocation46_spill] sm:$0xff] }
 0x231   :  { %2098 = vadd.xlane.f32.xlu1 %v2097_v5  ;;  %2095 = vadd.xlane.f32.xlu0 %v2094_v3  ;;  %v7937_v5 = vld [vmem:[#allocation42_spill] sm:$0xff]  ;;  %7940 = vst [vmem:[#allocation28_spill] sm:$0xff] %v5880_v49  ;;  %v1666_v17 = vmul.f32 0.020833334, %v5443_v8  ;;  %v2109_v30 = vsel %vm1246_vm1, %v1919_v9, 0.0  ;;  %v5899_v45 = vsub.f32 %v7945_v39, %v1729_v43  ;;  %v7947_v13 = vld [vmem:[#allocation47_spill] sm:$0xff] }
 0x232   :  { %v5863_v61 = vpop.xlane.xlu1 %1419  ;;  %v5865_v36 = vpop.xlane.xlu0 %1416  ;;  %v5874_v3 = vsub.f32 %v7937_v5, %v1727_v14  ;;  %v5887_v14 = vsub.f32 %v7941_v31, %v1665_v34  ;;  %v5890_v5 = vsub.f32 %v7943_v60, %v1664_v56  ;;  %v1669_v34 = vmul.f32 0.020833334, %v5477_v51  ;;  %v7949_v43 = vld [vmem:[#allocation48_spill] sm:$0xff]  ;;  %v7951_v51 = vld [vmem:[#allocation49_spill] sm:$0xff] }
 0x233   :  { %7946 = vst [vmem:[#allocation127_spill] sm:$0xff] %v5899_v45  ;;  %v1668_v56 = vmul.f32 0.020833334, %v5479_v52  ;;  %v1733_v31 = vmul.f32 0.020833334, %v5495_v57  ;;  %v5910_v9 = vsub.f32 %v7947_v13, %v1728_v33  ;;  %v5913_v39 = vsub.f32 %v7949_v43, %v1667_v6  ;;  %v7955_v6 = vld [vmem:[#allocation51_spill] sm:$0xff] }
 0x234   :  { %7938 = vst [vmem:[#allocation27_spill] sm:$0xff] %v5874_v3  ;;  %7942 = vst [vmem:[#allocation29_spill] sm:$0xff] %v5887_v14  ;;  %v1732_v8 = vmul.f32 0.020833334, %v5497_v47  ;;  %v1983_v60 = vmul.f32 %v5874_v3, %v5874_v3  ;;  %v5919_v52 = vsub.f32 %v7951_v51, %v1666_v17  ;;  %v1671_v57 = vmul.f32 0.020833334, %v5513_v63 }
 0x235   :  { %2290 = vadd.xlane.f32.xlu1 %v2289_v0  ;;  %2287 = vadd.xlane.f32.xlu0 %v2286_v21  ;;  %7944 = vst [vmem:[#allocation126_spill] sm:$0xff] %v5890_v5  ;;  %v1731_v0 = vmul.f32 0.020833334, %v5459_v2  ;;  %v1730_v21 = vmul.f32 0.020833334, %v5461_v62  ;;  %7948 = vst [vmem:[#allocation30_spill] sm:$0xff] %v5910_v9  ;;  %v1982_v62 = vmul.f32 %v5880_v49, %v5880_v49 }
 0x236   :  { %v5893_v19 = vpop.xlane.xlu1 %1611  ;;  %v5895_v59 = vpop.xlane.xlu0 %1608  ;;  %7950 = vst [vmem:[#allocation130_spill] sm:$0xff] %v5913_v39  ;;  %v2106_v2 = vsel %vm1246_vm1, %v1918_v1, 0.0  ;;  %7952 = vst [vmem:[#allocation31_spill] sm:$0xff] %v5919_v52  ;;  %v1921_v13 = vmul.f32 %v5887_v14, %v5887_v14  ;;  %v7957_v17 = vld [vmem:[#allocation52_spill] sm:$0xff]  ;;  %v1985_v63 = vmul.f32 %v5899_v45, %v5899_v45  ;;  %v7959_v51 = vld [vmem:[#allocation53_spill] sm:$0xff]  ;;  %v5945_v14 = vsub.f32 %v7961_v55, %v1733_v31 }
 0x237   :  { %v5934_v1 = vsub.f32 %v7955_v6, %v1730_v21  ;;  %v5937_v43 = vsub.f32 %v7957_v17, %v1669_v34  ;;  %v5942_v49 = vsub.f32 %v7959_v51, %v1668_v56  ;;  %v1670_v21 = vmul.f32 0.020833334, %v5515_v41  ;;  %v7965_v6 = vld [vmem:[#allocation56_spill] sm:$0xff]  ;;  %v7967_v51 = vld [vmem:[#allocation57_spill] sm:$0xff] }
 0x238   :  { %7962 = vst [vmem:[#allocation36_spill] sm:$0xff] %v5945_v14  ;;  %v2298_v34 = vsel %vm1246_vm1, %v1982_v62, 0.0  ;;  %v1923_v56 = vmul.f32 %v5913_v39, %v5913_v39  ;;  %v5958_v55 = vsub.f32 %v7965_v6, %v1671_v57  ;;  %v1735_v17 = vmul.f32 0.020833334, %v5531_v29 }
 0x239   :  { %2104 = vadd.xlane.f32.xlu1 %v2103_v53  ;;  %2101 = vadd.xlane.f32.xlu0 %v2100_v27  ;;  %v1920_v53 = vmul.f32 %v5890_v5, %v5890_v5  ;;  %v7953_v27 = vld [vmem:[#allocation50_spill] sm:$0xff]  ;;  %7956 = vst [vmem:[#allocation33_spill] sm:$0xff] %v5934_v1  ;;  %7958 = vst [vmem:[#allocation34_spill] sm:$0xff] %v5937_v43  ;;  %v5948_v5 = vsub.f32 %v7963_v22, %v1732_v8  ;;  %v2115_v8 = vsel %vm1246_vm1, %v1921_v13, 0.0 }
 0x23a   :  { %v5922_v47 = vpop.xlane.xlu1 %1425  ;;  %v5924_v3 = vpop.xlane.xlu0 %1422  ;;  %v5931_v33 = vsub.f32 %v7953_v27, %v1731_v0  ;;  %7960 = vst [vmem:[#allocation35_spill] sm:$0xff] %v5942_v49  ;;  %v2301_v0 = vsel %vm1246_vm1, %v1983_v60, 0.0  ;;  %v1984_v27 = vmul.f32 %v5910_v9, %v5910_v9  ;;  %7966 = vst [vmem:[#allocation38_spill] sm:$0xff] %v5958_v55  ;;  %v1986_v62 = vmul.f32 %v5934_v1, %v5934_v1  ;;  %v7994_v9 = vld [vmem:[#allocation70_spill] sm:$0xff] }
 0x23b   :  { %7964 = vst [vmem:[#allocation37_spill] sm:$0xff] %v5948_v5  ;;  %v2112_v41 = vsel %vm1246_vm1, %v1920_v53, 0.0  ;;  %v1925_v57 = vmul.f32 %v5937_v43, %v5937_v43  ;;  %v1924_v13 = vmul.f32 %v5942_v49, %v5942_v49  ;;  %v1989_v53 = vmul.f32 %v5945_v14, %v5945_v14 }
 0x23c   :  { %7954 = vst [vmem:[#allocation32_spill] sm:$0xff] %v5931_v33  ;;  %v1987_v60 = vmul.f32 %v5931_v33, %v5931_v33  ;;  %v5985_v6 = vsub.f32 %v7967_v51, %v1670_v21  ;;  %v1734_v33 = vmul.f32 0.020833334, %v5533_v26  ;;  %v2304_v43 = vsel %vm1246_vm1, %v1984_v27, 0.0 }
 0x23d   :  { %2296 = vadd.xlane.f32.xlu1 %v2295_v28  ;;  %2293 = vadd.xlane.f32.xlu0 %v2292_v23  ;;  %v1922_v23 = vmul.f32 %v5919_v52, %v5919_v52  ;;  %v5969_v28 = vsel %vm1246_vm1, %v1985_v63, 0.0  ;;  %v1988_v63 = vmul.f32 %v5948_v5, %v5948_v5  ;;  %v5990_v29 = vsel %vm1246_vm1, %v1923_v56, 0.0 }
 0x23e   :  { %v5960_v31 = vpop.xlane.xlu1 %1617  ;;  %v5962_v22 = vpop.xlane.xlu0 %1614  ;;  %7968 = vst [vmem:[#allocation39_spill] sm:$0xff] %v5985_v6  ;;  %v1673_v49 = vmul.f32 0.020833334, %v5549_v54  ;;  %v1672_v1 = vmul.f32 0.020833334, %v5551_v46  ;;  %v1927_v26 = vmul.f32 %v5958_v55, %v5958_v55  ;;  %v6008_v27 = vsel %vm1246_vm1, %v1986_v62, 0.0 }
 0x23f   :  { %v5999_v21 = vsel %vm1246_vm1, %v1922_v23, 0.0  ;;  %v6011_v54 = vsel %vm1246_vm1, %v1925_v57, 0.0  ;;  %v7969_v46 = vld [vmem:[#allocation58_spill] sm:$0xff]  ;;  %v6017_v23 = vsel %vm1246_vm1, %v1924_v13, 0.0  ;;  %v6020_v51 = vsel %vm1246_vm1, %v1989_v53, 0.0  ;;  %v7973_v13 = vld [vmem:[#allocation60_spill] sm:$0xff] }
 0x240   :  { %v6014_v56 = vsub.f32 %v7969_v46, %v1735_v17  ;;  %v1736_v62 = vmul.f32 0.020833334, %v5569_v11  ;;  %v1675_v57 = vmul.f32 0.020833334, %v5585_v48  ;;  %v1926_v17 = vmul.f32 %v5985_v6, %v5985_v6  ;;  %v7975_v53 = vld [vmem:[#allocation61_spill] sm:$0xff]  ;;  %v7978_v48 = vld [vmem:[#allocation62_spill] sm:$0xff] }
 0x241   :  { %2110 = vadd.xlane.f32.xlu1 %v2109_v30  ;;  %2107 = vadd.xlane.f32.xlu0 %v2106_v2  ;;  %v1737_v30 = vmul.f32 0.020833334, %v5567_v40  ;;  %v6005_v2 = vsel %vm1246_vm1, %v1987_v60, 0.0  ;;  %v6023_v40 = vsel %vm1246_vm1, %v1988_v63, 0.0  ;;  %v7971_v60 = vld [vmem:[#allocation59_spill] sm:$0xff]  ;;  %v6033_v46 = vsub.f32 %v7973_v13, %v1673_v49 }
 0x242   :  { %v5994_v14 = vpop.xlane.xlu1 %1431  ;;  %v5996_v52 = vpop.xlane.xlu0 %1428  ;;  %7970 = vst [vmem:[#allocation40_spill] sm:$0xff] %v6014_v56  ;;  %v6026_v55 = vsub.f32 %v7971_v60, %v1734_v33  ;;  %v6036_v5 = vsub.f32 %v7975_v53, %v1672_v1  ;;  %v1674_v63 = vmul.f32 0.020833334, %v5587_v58  ;;  %v6044_v11 = vsel %vm1246_vm1, %v1927_v26, 0.0  ;;  %v7980_v26 = vld [vmem:[#allocation63_spill] sm:$0xff] }
 0x243   :  { %7974 = vst [vmem:[#allocation42_spill] sm:$0xff] %v6033_v46  ;;  %v1738_v49 = vmul.f32 0.020833334, %v5605_v12  ;;  %v1677_v60 = vmul.f32 0.020833334, %v5621_v37  ;;  %v1991_v53 = vmul.f32 %v6014_v56, %v6014_v56  ;;  %v6058_v6 = vsub.f32 %v7980_v26, %v1736_v62  ;;  %v7984_v37 = vld [vmem:[#allocation65_spill] sm:$0xff] }
 0x244   :  { %7972 = vst [vmem:[#allocation41_spill] sm:$0xff] %v6026_v55  ;;  %7976 = vst [vmem:[#allocation43_spill] sm:$0xff] %v6036_v5  ;;  %v1676_v1 = vmul.f32 0.020833334, %v5623_v10  ;;  %v1741_v58 = vmul.f32 0.020833334, %v5639_v50  ;;  %v1990_v12 = vmul.f32 %v6026_v55, %v6026_v55  ;;  %v6069_v10 = vsub.f32 %v7984_v37, %v1674_v63 }
 0x245   :  { %2302 = vadd.xlane.f32.xlu1 %v2301_v0  ;;  %2299 = vadd.xlane.f32.xlu0 %v2298_v34  ;;  %v6047_v0 = vsub.f32 %v7978_v48, %v1737_v30  ;;  %v1739_v34 = vmul.f32 0.020833334, %v5603_v24  ;;  %v1740_v13 = vmul.f32 0.020833334, %v5641_v44  ;;  %7981 = vst [vmem:[#allocation46_spill] sm:$0xff] %v6058_v6  ;;  %v7982_v30 = vld [vmem:[#allocation64_spill] sm:$0xff]  ;;  %v1928_v63 = vmul.f32 %v6036_v5, %v6036_v5 }
 0x246   :  { %v6039_v39 = vpop.xlane.xlu1 %1623  ;;  %v6041_v33 = vpop.xlane.xlu0 %1620  ;;  %v6061_v48 = vsub.f32 %v7982_v30, %v1675_v57  ;;  %v6064_v24 = vsel %vm1246_vm1, %v1926_v17, 0.0  ;;  %7985 = vst [vmem:[#allocation48_spill] sm:$0xff] %v6069_v10  ;;  %v1679_v50 = vmul.f32 0.020833334, %v5657_v20  ;;  %v1678_v44 = vmul.f32 0.020833334, %v5659_v15 }
 0x247   :  { %7977 = vst [vmem:[#allocation44_spill] sm:$0xff] %v6041_v33  ;;  %7979 = vst [vmem:[#allocation45_spill] sm:$0xff] %v6047_v0  ;;  %v7988_v17 = vld [vmem:[#allocation67_spill] sm:$0xff]  ;;  %v1993_v20 = vmul.f32 %v6047_v0, %v6047_v0  ;;  %v7990_v15 = vld [vmem:[#allocation68_spill] sm:$0xff] }
 0x248   :  { %7983 = vst [vmem:[#allocation47_spill] sm:$0xff] %v6061_v48  ;;  %v6083_v30 = vsub.f32 %v7988_v17, %v1738_v49  ;;  %v6090_v37 = vsub.f32 %v7990_v15, %v1677_v60  ;;  %v7992_v55 = vld [vmem:[#allocation69_spill] sm:$0xff]  ;;  %v6103_v49 = vsel %vm1246_vm1, %v1991_v53, 0.0  ;;  %v6106_v17 = vsel %vm1246_vm1, %v1990_v12, 0.0 }
 0x249   :  { %2116 = vadd.xlane.f32.xlu1 %v2115_v8  ;;  %2113 = vadd.xlane.f32.xlu0 %v2112_v41  ;;  %v1929_v8 = vmul.f32 %v6033_v46, %v6033_v46  ;;  %v7986_v41 = vld [vmem:[#allocation66_spill] sm:$0xff]  ;;  %v6093_v56 = vsub.f32 %v7992_v55, %v1676_v1  ;;  %v6096_v46 = vsub.f32 %v7994_v9, %v1741_v58  ;;  %v7998_v9 = vld [vmem:[#allocation72_spill] sm:$0xff]  ;;  %v8000_v58 = vld [vmem:[#allocation73_spill] sm:$0xff]  ;;  %v6128_v15 = vsel %vm1246_vm1, %v1928_v63, 0.0 }
 0x24a   :  { %v6073_v62 = vpop.xlane.xlu1 %1437  ;;  %v6075_v26 = vpop.xlane.xlu0 %1434  ;;  %v6080_v57 = vsub.f32 %v7986_v41, %v1739_v34  ;;  %7989 = vst [vmem:[#allocation50_spill] sm:$0xff] %v6083_v30  ;;  %7991 = vst [vmem:[#allocation51_spill] sm:$0xff] %v6090_v37  ;;  %v7996_v34 = vld [vmem:[#allocation71_spill] sm:$0xff]  ;;  %v1992_v60 = vmul.f32 %v6058_v6, %v6058_v6  ;;  %v1931_v55 = vmul.f32 %v6061_v48, %v6061_v48 }
 0x24b   :  { %7993 = vst [vmem:[#allocation52_spill] sm:$0xff] %v6093_v56  ;;  %7995 = vst [vmem:[#allocation53_spill] sm:$0xff] %v6096_v46  ;;  %v6099_v41 = vsub.f32 %v7996_v34, %v1740_v13  ;;  %v6113_v1 = vsub.f32 %v7998_v9, %v1679_v50  ;;  %v6116_v13 = vsub.f32 %v8000_v58, %v1678_v44  ;;  %v6123_v53 = vsel %vm1246_vm1, %v1929_v8, 0.0 }
 0x24c   :  { %7987 = vst [vmem:[#allocation49_spill] sm:$0xff] %v6080_v57  ;;  %v1930_v12 = vmul.f32 %v6069_v10, %v6069_v10  ;;  %v6131_v34 = vsel %vm1246_vm1, %v1993_v20, 0.0  ;;  %v1995_v50 = vmul.f32 %v6080_v57, %v6080_v57  ;;  %v1994_v44 = vmul.f32 %v6083_v30, %v6083_v30 }
 0x24d   :  { %7997 = vst [vmem:[#allocation54_spill] sm:$0xff] %v6099_v41  ;;  %2308 = vadd.xlane.f32.xlu1 %v5969_v28  ;;  %2305 = vadd.xlane.f32.xlu0 %v2304_v43  ;;  %7999 = vst [vmem:[#allocation55_spill] sm:$0xff] %v6113_v1  ;;  %v1933_v9 = vmul.f32 %v6090_v37, %v6090_v37  ;;  %v1932_v8 = vmul.f32 %v6093_v56, %v6093_v56  ;;  %v1743_v20 = vmul.f32 0.020833334, %v5675_v35 }
 0x24e   :  { %8001 = vst [vmem:[#allocation56_spill] sm:$0xff] %v6116_v13  ;;  %v6118_v28 = vpop.xlane.xlu1 %1629  ;;  %v6120_v43 = vpop.xlane.xlu0 %1626  ;;  %v1997_v58 = vmul.f32 %v6096_v46, %v6096_v46  ;;  %v1996_v63 = vmul.f32 %v6099_v41, %v6099_v41  ;;  %v1742_v10 = vmul.f32 0.020833334, %v5677_v38  ;;  %v6150_v30 = vsel %vm1246_vm1, %v1992_v60, 0.0 }
 0x24f   :  { %8002 = vst [vmem:[#allocation57_spill] sm:$0xff] %v6118_v28  ;;  %8003 = vst [vmem:[#allocation58_spill] sm:$0xff] %v6120_v43  ;;  %v6153_v37 = vsel %vm1246_vm1, %v1931_v55, 0.0  ;;  %v1681_v56 = vmul.f32 0.020833334, %v5693_v25  ;;  %v6157_v41 = vsel %vm1246_vm1, %v1930_v12, 0.0  ;;  %v1935_v35 = vmul.f32 %v6113_v1, %v6113_v1 }
 0x250   :  { %v1934_v38 = vmul.f32 %v6116_v13, %v6116_v13  ;;  %v6164_v60 = vsel %vm1246_vm1, %v1995_v50, 0.0  ;;  %v6167_v55 = vsel %vm1246_vm1, %v1994_v44, 0.0  ;;  %v6170_v25 = vsel %vm1246_vm1, %v1933_v9, 0.0  ;;  %v8006_v50 = vld [vmem:[#allocation75_spill] sm:$0xff]  ;;  %v8008_v9 = vld [vmem:[#allocation76_spill] sm:$0xff] }
 0x251   :  { %2122 = vadd.xlane.f32.xlu1 %v5990_v29  ;;  %2119 = vadd.xlane.f32.xlu0 %v5999_v21  ;;  %v6173_v12 = vsel %vm1246_vm1, %v1932_v8, 0.0  ;;  %v6176_v48 = vsel %vm1246_vm1, %v1997_v58, 0.0  ;;  %v6179_v1 = vsel %vm1246_vm1, %v1996_v63, 0.0  ;;  %v6185_v13 = vsub.f32 %v8006_v50, %v1742_v10  ;;  %v8010_v58 = vld [vmem:[#allocation94_spill] sm:$0xff]  ;;  %v8013_v50 = vld [vmem:[#allocation17_spill] sm:$0xff] }
 0x252   :  { %v2021_v46 = vpop.xlane.xlu1 %2020  ;;  %v2018_v57 = vpop.xlane.xlu0 %2017  ;;  %v6190_v8 = vsub.f32 %v8008_v9, %v1681_v56  ;;  %v1680_v0 = vmul.f32 0.020833334, %v8010_v58  ;;  %v6194_v45 = vsel %vm1246_vm1, %v1935_v35, 0.0  ;;  %v8011_v10 = vld [vmem:[#allocation98_spill] sm:$0xff]  ;;  %v1683_v56 = vmul.f32 0.020833334, %v8013_v50 }
 0x253   :  { %v2401_v29 = vmul.f32 0.020833334, %v2021_v46  ;;  %v2400_v21 = vmul.f32 0.020833334, %v2018_v57  ;;  %v8004_v46 = vld [vmem:[#allocation74_spill] sm:$0xff]  ;;  %8007 = vst [vmem:[#allocation60_spill] sm:$0xff] %v6185_v13 }
 0x254   :  { %v6182_v57 = vsub.f32 %v8004_v46, %v1743_v20  ;;  %8009 = vst [vmem:[#allocation61_spill] sm:$0xff] %v6190_v8  ;;  %v6197_v20 = vsel %vm1246_vm1, %v1934_v38, 0.0  ;;  %v8012_v46 = vld [vmem:[#allocation15_spill] sm:$0xff]  ;;  %v8014_v9 = vld [vmem:[#allocation102_spill] sm:$0xff]  ;;  %v8015_v38 = vld [vmem:[#allocation77_spill] sm:$0xff] }
 0x255   :  { %v2529_v44 = vadd.f32 1e-05, %v2401_v29  ;;  %v2528_v6 = vadd.f32 1e-05, %v2400_v21  ;;  %2314 = vadd.xlane.f32.xlu1 %v6005_v2  ;;  %2311 = vadd.xlane.f32.xlu0 %v6008_v27  ;;  %v1745_v29 = vmul.f32 0.020833334, %v8011_v10 }
 0x256   :  { %8005 = vst [vmem:[#allocation59_spill] sm:$0xff] %v6182_v57  ;;  %v2213_v5 = vpop.xlane.xlu1 %2212  ;;  %v2210_v63 = vpop.xlane.xlu0 %2209  ;;  %v1744_v27 = vmul.f32 0.020833334, %v8012_v46  ;;  %v1682_v43 = vmul.f32 0.020833334, %v8014_v9  ;;  %v1999_v35 = vmul.f32 %v6182_v57, %v6182_v57  ;;  %v8019_v9 = vld [vmem:[#allocation81_spill] sm:$0xff] }
 0x257   :  { %3770 = vrsqrt.f32 %v2529_v44  ;;  %v2465_v21 = vmul.f32 0.020833334, %v2213_v5  ;;  %v2464_v2 = vmul.f32 0.020833334, %v2210_v63  ;;  %v1998_v5 = vmul.f32 %v6185_v13, %v6185_v13 }
 0x258   :  { %3772 = vrsqrt.f32 %v2528_v6  ;;  %v6210_v44 = vsub.f32 %v8015_v38, %v1680_v0  ;;  %v1747_v63 = vmul.f32 0.020833334, %v5754_v42  ;;  %v1746_v10 = vmul.f32 0.020833334, %v5756_v18  ;;  %v8021_v0 = vld [vmem:[#allocation84_spill] sm:$0xff]  ;;  %v8023_v42 = vld [vmem:[#allocation85_spill] sm:$0xff] }
 0x259   :  { %v2593_v58 = vadd.f32 1e-05, %v2465_v21  ;;  %v2592_v28 = vadd.f32 1e-05, %v2464_v2  ;;  %2128 = vadd.xlane.f32.xlu1 %v6011_v54  ;;  %2125 = vadd.xlane.f32.xlu0 %v6017_v23  ;;  %v1937_v54 = vmul.f32 %v6190_v8, %v6190_v8  ;;  %v8017_v2 = vld [vmem:[#allocation80_spill] sm:$0xff]  ;;  %v6220_v13 = vsub.f32 %v8019_v9, %v1744_v27 }
 0x25a   :  { %8016 = vst [vmem:[#allocation62_spill] sm:$0xff] %v6210_v44  ;;  %v2027_v6 = vpop.xlane.xlu1 %2026  ;;  %v2024_v21 = vpop.xlane.xlu0 %2023  ;;  %v6217_v23 = vsub.f32 %v8017_v2, %v1745_v29  ;;  %v6223_v38 = vsub.f32 %v8021_v0, %v1683_v56  ;;  %v6226_v57 = vsub.f32 %v8023_v42, %v1682_v43  ;;  %v6231_v29 = vsel %vm1246_vm1, %v1999_v35, 0.0  ;;  %v8025_v27 = vld [vmem:[#allocation88_spill] sm:$0xff]  ;;  %v8027_v56 = vld [vmem:[#allocation89_spill] sm:$0xff] }
 0x25b   :  { %3774 = vrsqrt.f32 %v2593_v58  ;;  %v2403_v46 = vmul.f32 0.020833334, %v2027_v6  ;;  %v2402_v50 = vmul.f32 0.020833334, %v2024_v21  ;;  %8020 = vst [vmem:[#allocation64_spill] sm:$0xff] %v6220_v13  ;;  %v6234_v58 = vsel %vm1246_vm1, %v1998_v5, 0.0 }
 0x25c   :  { %8018 = vst [vmem:[#allocation63_spill] sm:$0xff] %v6217_v23  ;;  %8022 = vst [vmem:[#allocation65_spill] sm:$0xff] %v6223_v38  ;;  %3776 = vrsqrt.f32 %v2592_v28  ;;  %v6237_v6 = vsub.f32 %v8025_v27, %v1747_v63  ;;  %v6240_v21 = vsub.f32 %v8027_v56, %v1746_v10  ;;  %v6243_v2 = vsel %vm1246_vm1, %v1937_v54, 0.0  ;;  %v8029_v0 = vld [vmem:[#allocation20_spill] sm:$0xff] }
 0x25d   :  { %8024 = vst [vmem:[#allocation66_spill] sm:$0xff] %v6226_v57  ;;  %v2531_v18 = vadd.f32 1e-05, %v2403_v46  ;;  %v2530_v33 = vadd.f32 1e-05, %v2402_v50  ;;  %2320 = vadd.xlane.f32.xlu1 %v6020_v51  ;;  %2317 = vadd.xlane.f32.xlu0 %v6023_v40  ;;  %v1936_v51 = vmul.f32 %v6210_v44, %v6210_v44  ;;  %v2001_v5 = vmul.f32 %v6217_v23, %v6217_v23 }
 0x25e   :  { %8026 = vst [vmem:[#allocation67_spill] sm:$0xff] %v6237_v6  ;;  %8028 = vst [vmem:[#allocation68_spill] sm:$0xff] %v6240_v21  ;;  %v2219_v43 = vpop.xlane.xlu1 %2218  ;;  %v2216_v28 = vpop.xlane.xlu0 %2215  ;;  %v1939_v63 = vmul.f32 %v6223_v38, %v6223_v38  ;;  %v1938_v10 = vmul.f32 %v6226_v57, %v6226_v57  ;;  %v2000_v54 = vmul.f32 %v6220_v13, %v6220_v13  ;;  %v1685_v46 = vmul.f32 0.020833334, %v5769_v16  ;;  %v8035_v38 = vld [vmem:[#allocation137_spill] sm:$0xff] }
 0x25f   :  { %3778 = vrsqrt.f32 %v2531_v18  ;;  %v2467_v40 = vmul.f32 0.020833334, %v2219_v43  ;;  %v2466_v35 = vmul.f32 0.020833334, %v2216_v28  ;;  %v1684_v42 = vmul.f32 0.020833334, %v8029_v0 }
 0x260   :  { %3780 = vrsqrt.f32 %v2530_v33  ;;  %v6260_v27 = vsel %vm1246_vm1, %v1936_v51, 0.0  ;;  %v2003_v56 = vmul.f32 %v6237_v6, %v6237_v6  ;;  %v2002_v43 = vmul.f32 %v6240_v21, %v6240_v21 }
 0x261   :  { %v2595_v50 = vadd.f32 1e-05, %v2467_v40  ;;  %v2594_v9 = vadd.f32 1e-05, %v2466_v35  ;;  %2134 = vadd.xlane.f32.xlu1 %v6044_v11  ;;  %2131 = vadd.xlane.f32.xlu0 %v6064_v24  ;;  %v6267_v11 = vsel %vm1246_vm1, %v2001_v5, 0.0  ;;  %v6275_v51 = vsel %vm1246_vm1, %v1939_v63, 0.0 }
 0x262   :  { %v2033_v33 = vpop.xlane.xlu1 %2032  ;;  %v2030_v18 = vpop.xlane.xlu0 %2029  ;;  %v6272_v40 = vld [vmem:[%s7453_s3] ss:$0 sm:$0xff]  ;;  %v6278_v35 = vsel %vm1246_vm1, %v1938_v10, 0.0  ;;  %v8032_v63 = vld [vmem:[#allocation93_spill] sm:$0xff] }
 0x263   :  { %3782 = vrsqrt.f32 %v2595_v50  ;;  %v2405_v16 = vmul.f32 0.020833334, %v2033_v33  ;;  %v2404_v28 = vmul.f32 0.020833334, %v2030_v18  ;;  %v6281_v50 = vsel %vm1246_vm1, %v2000_v54, 0.0  ;;  %v8030_v33 = vld [vmem:[#allocation92_spill] sm:$0xff] }
 0x264   :  { %v3771_v24 = vpop.eup %3770  ;;  %3784 = vrsqrt.f32 %v2594_v9  ;;  %v6284_v5 = vsub.f32 %v8030_v33, %v1685_v46  ;;  %v8031_v18 = vld [vmem:[#allocation133_spill] sm:$0xff]  ;;  %v6290_v9 = vsub.f32 %v8032_v63, %v1684_v42  ;;  %v6295_v10 = vld [vmem:[%s7454_s4] ss:$0 sm:$0xff]  ;;  %v8033_v54 = vld [vmem:[#allocation136_spill] sm:$0xff] }
 0x265   :  { %v3773_v0 = vpop.eup %3772  ;;  %v2785_v21 = vmul.f32 %v3771_v24, %v8031_v18  ;;  %v2533_v6 = vadd.f32 1e-05, %v2405_v16  ;;  %v2532_v13 = vadd.f32 1e-05, %v2404_v28  ;;  %2326 = vadd.xlane.f32.xlu1 %v6103_v49  ;;  %2323 = vadd.xlane.f32.xlu0 %v6106_v17  ;;  %v6299_v24 = vsel %vm1246_vm1, %v2003_v56, 0.0  ;;  %v8034_v63 = vld [vmem:[#allocation111_spill] sm:$0xff] }
 0x266   :  { %v2784_v23 = vmul.f32 %v3773_v0, %v8033_v54  ;;  %v2225_v46 = vpop.xlane.xlu1 %2224  ;;  %v2222_v33 = vpop.xlane.xlu0 %2221  ;;  %v6302_v16 = vsel %vm1246_vm1, %v2002_v43, 0.0  ;;  %v1749_v18 = vmul.f32 0.020833334, %v5786_v7  ;;  %v1748_v57 = vmul.f32 0.020833334, %v8034_v63 }
 0x267   :  { %v2920_v49 = vmul.f32 %v6272_v40, %v2785_v21  ;;  %3786 = vrsqrt.f32 %v2533_v6  ;;  %v2469_v17 = vmul.f32 0.020833334, %v2225_v46  ;;  %v2468_v42 = vmul.f32 0.020833334, %v2222_v33  ;;  %v8036_v21 = vld [vmem:[#allocation138_spill] sm:$0xff] }
 0x268   :  { %v3775_v28 = vpop.eup %3774  ;;  %v2919_v0 = vmul.f32 %v6272_v40, %v2784_v23  ;;  %3788 = vrsqrt.f32 %v2532_v13  ;;  %v1941_v13 = vmul.f32 %v6284_v5, %v6284_v5  ;;  %v1940_v23 = vmul.f32 %v6290_v9, %v6290_v9 }
 0x269   :  { %v3777_v54 = vpop.eup %3776  ;;  %v3055_v56 = vadd.f32 %v6295_v10, %v2920_v49  ;;  %v2849_v44 = vmul.f32 %v3775_v28, %v8035_v38  ;;  %v2597_v43 = vadd.f32 1e-05, %v2469_v17  ;;  %v2596_v8 = vadd.f32 1e-05, %v2468_v42  ;;  %2140 = vadd.xlane.f32.xlu1 %v6123_v53  ;;  %2137 = vadd.xlane.f32.xlu0 %v6128_v15  ;;  %v8037_v17 = vld [vmem:[#allocation96_spill] sm:$0xff]  ;;  %v8038_v28 = vld [vmem:[#allocation97_spill] sm:$0xff] }
 0x26a   :  { %v3054_v6 = vadd.f32 %v6295_v10, %v2919_v0  ;;  %v2848_v7 = vmul.f32 %v3777_v54, %v8036_v21  ;;  %v2039_v46 = vpop.xlane.xlu1 %2038  ;;  %v2036_v33 = vpop.xlane.xlu0 %2035  ;;  %v6324_v42 = vsub.f32 %v8037_v17, %v1749_v18  ;;  %v6327_v63 = vsub.f32 %v8038_v28, %v1748_v57  ;;  %v8040_v18 = vld [vmem:[#allocation140_spill] sm:$0xff]  ;;  %v8042_v28 = vld [vmem:[#allocation23_spill] sm:$0xff] }
 0x26b   :  { %3183 = vst.msk [vmem:[%s7455_s5 + $0x8] sm:$0xff] %vm1246_vm1, %v3055_v56  ;;  %v2984_v53 = vmul.f32 %v6272_v40, %v2849_v44  ;;  %3790 = vrsqrt.f32 %v2597_v43  ;;  %v2407_v15 = vmul.f32 0.020833334, %v2039_v46  ;;  %v2406_v38 = vmul.f32 0.020833334, %v2036_v33  ;;  %v8039_v56 = vld [vmem:[#allocation139_spill] sm:$0xff] }
 0x26c   :  { %v3779_v49 = vpop.eup %3778  ;;  %3182 = vst.msk [vmem:[%s7455_s5] sm:$0xff] %vm1246_vm1, %v3054_v6  ;;  %v2983_v0 = vmul.f32 %v6272_v40, %v2848_v7  ;;  %3792 = vrsqrt.f32 %v2596_v8  ;;  %v6341_v7 = vsel %vm1246_vm1, %v1941_v13, 0.0  ;;  %v6344_v8 = vsel %vm1246_vm1, %v1940_v23, 0.0 }
 0x26d   :  { %v3781_v54 = vpop.eup %3780  ;;  %v3119_v44 = vadd.f32 %v6295_v10, %v2984_v53  ;;  %v2787_v43 = vmul.f32 %v3779_v49, %v8039_v56  ;;  %v2535_v21 = vadd.f32 1e-05, %v2407_v15  ;;  %v2534_v46 = vadd.f32 1e-05, %v2406_v38  ;;  %2332 = vadd.xlane.f32.xlu1 %v6131_v34  ;;  %2329 = vadd.xlane.f32.xlu0 %v6150_v30  ;;  %v8041_v38 = vld [vmem:[#allocation114_spill] sm:$0xff] }
 0x26e   :  { %v3118_v57 = vadd.f32 %v6295_v10, %v2983_v0  ;;  %v2786_v33 = vmul.f32 %v3781_v54, %v8040_v18  ;;  %v2231_v17 = vpop.xlane.xlu1 %2230  ;;  %v2228_v6 = vpop.xlane.xlu0 %2227  ;;  %v1687_v49 = vmul.f32 0.020833334, %v8041_v38  ;;  %v1686_v0 = vmul.f32 0.020833334, %v8042_v28  ;;  %v8046_v28 = vld [vmem:[#allocation101_spill] sm:$0xff] }
 0x26f   :  { %3247 = vst.msk [vmem:[%s7455_s5 + $0x208] sm:$0xff] %vm1246_vm1, %v3119_v44  ;;  %v2922_v34 = vmul.f32 %v6272_v40, %v2787_v43  ;;  %3794 = vrsqrt.f32 %v2535_v21  ;;  %v2471_v30 = vmul.f32 0.020833334, %v2231_v17  ;;  %v2470_v53 = vmul.f32 0.020833334, %v2228_v6  ;;  %v8043_v44 = vld [vmem:[#allocation141_spill] sm:$0xff] }
 0x270   :  { %v3783_v15 = vpop.eup %3782  ;;  %3246 = vst.msk [vmem:[%s7455_s5 + $0x200] sm:$0xff] %vm1246_vm1, %v3118_v57  ;;  %v2921_v13 = vmul.f32 %v6272_v40, %v2786_v33  ;;  %3796 = vrsqrt.f32 %v2534_v46  ;;  %v8044_v17 = vld [vmem:[#allocation142_spill] sm:$0xff]  ;;  %v6366_v46 = vmul.f32 %v6324_v42, %v6324_v42  ;;  %v6370_v33 = vmul.f32 %v6327_v63, %v6327_v63 }
 0x271   :  { %v3785_v23 = vpop.eup %3784  ;;  %v3057_v54 = vadd.f32 %v6295_v10, %v2922_v34  ;;  %v2851_v56 = vmul.f32 %v3783_v15, %v8043_v44  ;;  %v2599_v43 = vadd.f32 1e-05, %v2471_v30  ;;  %v2598_v21 = vadd.f32 1e-05, %v2470_v53  ;;  %2146 = vadd.xlane.f32.xlu1 %v6153_v37  ;;  %2143 = vadd.xlane.f32.xlu0 %v6157_v41  ;;  %v8045_v53 = vld [vmem:[#allocation100_spill] sm:$0xff] }
 0x272   :  { %v3056_v18 = vadd.f32 %v6295_v10, %v2921_v13  ;;  %v2850_v6 = vmul.f32 %v3785_v23, %v8044_v17  ;;  %v2045_v38 = vpop.xlane.xlu1 %2044  ;;  %v2042_v57 = vpop.xlane.xlu0 %2041  ;;  %v6378_v15 = vsub.f32 %v8045_v53, %v1687_v49  ;;  %v6381_v13 = vsub.f32 %v8046_v28, %v1686_v0 }
 0x273   :  { %3185 = vst.msk [vmem:[%s7455_s5 + $0x18] sm:$0xff] %vm1246_vm1, %v3057_v54  ;;  %v2986_v37 = vmul.f32 %v6272_v40, %v2851_v56  ;;  %3798 = vrsqrt.f32 %v2599_v43  ;;  %v2409_v41 = vmul.f32 0.020833334, %v2045_v38  ;;  %v2408_v34 = vmul.f32 0.020833334, %v2042_v57  ;;  %v8047_v56 = vld [vmem:[#allocation143_spill] sm:$0xff] }
 0x274   :  { %v3787_v30 = vpop.eup %3786  ;;  %3184 = vst.msk [vmem:[%s7455_s5 + $0x10] sm:$0xff] %vm1246_vm1, %v3056_v18  ;;  %v2985_v23 = vmul.f32 %v6272_v40, %v2850_v6  ;;  %3800 = vrsqrt.f32 %v2598_v21  ;;  %v6393_v49 = vmul.f32 0.020833334, %v5838_v4  ;;  %v6396_v0 = vmul.f32 0.020833334, %v5840_v32  ;;  %v8048_v21 = vld [vmem:[#allocation144_spill] sm:$0xff] }
 0x275   :  { %v3789_v54 = vpop.eup %3788  ;;  %v3121_v44 = vadd.f32 %v6295_v10, %v2986_v37  ;;  %v2789_v43 = vmul.f32 %v3787_v30, %v8047_v56  ;;  %v2537_v17 = vadd.f32 1e-05, %v2409_v41  ;;  %v2536_v38 = vadd.f32 1e-05, %v2408_v34  ;;  %2338 = vadd.xlane.f32.xlu1 %v6164_v60  ;;  %2335 = vadd.xlane.f32.xlu0 %v6167_v55 }
 0x276   :  { %v3120_v18 = vadd.f32 %v6295_v10, %v2985_v23  ;;  %v2788_v6 = vmul.f32 %v3789_v54, %v8048_v21  ;;  %v2237_v57 = vpop.xlane.xlu1 %2236  ;;  %v2234_v37 = vpop.xlane.xlu0 %2233  ;;  %v1943_v34 = vmul.f32 %v6378_v15, %v6378_v15  ;;  %v1942_v30 = vmul.f32 %v6381_v13, %v6381_v13  ;;  %v8049_v23 = vld [vmem:[#allocation145_spill] sm:$0xff] }
 0x277   :  { %3249 = vst.msk [vmem:[%s7455_s5 + $0x218] sm:$0xff] %vm1246_vm1, %v3121_v44  ;;  %v2924_v60 = vmul.f32 %v6272_v40, %v2789_v43  ;;  %3802 = vrsqrt.f32 %v2537_v17  ;;  %v2473_v55 = vmul.f32 0.020833334, %v2237_v57  ;;  %v2472_v4 = vmul.f32 0.020833334, %v2234_v37 }
 0x278   :  { %v3791_v41 = vpop.eup %3790  ;;  %3248 = vst.msk [vmem:[%s7455_s5 + $0x210] sm:$0xff] %vm1246_vm1, %v3120_v18  ;;  %v2923_v32 = vmul.f32 %v6272_v40, %v2788_v6  ;;  %3804 = vrsqrt.f32 %v2536_v38  ;;  %v1689_v43 = vmul.f32 0.020833334, %v5863_v61  ;;  %v1688_v17 = vmul.f32 0.020833334, %v5865_v36  ;;  %v8050_v18 = vld [vmem:[#allocation146_spill] sm:$0xff] }
 0x279   :  { %v3793_v53 = vpop.eup %3792  ;;  %v3059_v28 = vadd.f32 %v6295_v10, %v2924_v60  ;;  %v2853_v54 = vmul.f32 %v3791_v41, %v8049_v23  ;;  %v2601_v44 = vadd.f32 1e-05, %v2473_v55  ;;  %v2600_v56 = vadd.f32 1e-05, %v2472_v4  ;;  %2152 = vadd.xlane.f32.xlu1 %v6170_v25  ;;  %2149 = vadd.xlane.f32.xlu0 %v6173_v12 }
 0x27a   :  { %v3058_v38 = vadd.f32 %v6295_v10, %v2923_v32  ;;  %v2852_v21 = vmul.f32 %v3793_v53, %v8050_v18  ;;  %v2051_v6 = vpop.xlane.xlu1 %2050  ;;  %v2048_v57 = vpop.xlane.xlu0 %2047  ;;  %v6433_v61 = vsel %vm1246_vm1, %v1943_v34, 0.0  ;;  %v6436_v55 = vsel %vm1246_vm1, %v1942_v30, 0.0  ;;  %v8051_v32 = vld [vmem:[#allocation147_spill] sm:$0xff] }
 0x27b   :  { %3187 = vst.msk [vmem:[%s7455_s5 + $0x28] sm:$0xff] %vm1246_vm1, %v3059_v28  ;;  %v2988_v37 = vmul.f32 %v6272_v40, %v2853_v54  ;;  %3806 = vrsqrt.f32 %v2601_v44  ;;  %v2411_v25 = vmul.f32 0.020833334, %v2051_v6  ;;  %v2410_v12 = vmul.f32 0.020833334, %v2048_v57  ;;  %v8052_v54 = vld [vmem:[#allocation108_spill] sm:$0xff] }
 0x27c   :  { %v3795_v60 = vpop.eup %3794  ;;  %3186 = vst.msk [vmem:[%s7455_s5 + $0x20] sm:$0xff] %vm1246_vm1, %v3058_v38  ;;  %v2987_v36 = vmul.f32 %v6272_v40, %v2852_v21  ;;  %3808 = vrsqrt.f32 %v2600_v56  ;;  %v6443_v44 = vsub.f32 %v8052_v54, %v1689_v43  ;;  %v8053_v56 = vld [vmem:[#allocation109_spill] sm:$0xff]  ;;  %v8054_v38 = vld [vmem:[#allocation148_spill] sm:$0xff] }
 0x27d   :  { %v3797_v4 = vpop.eup %3796  ;;  %v3123_v41 = vadd.f32 %v6295_v10, %v2988_v37  ;;  %v2791_v53 = vmul.f32 %v3795_v60, %v8051_v32  ;;  %v2539_v28 = vadd.f32 1e-05, %v2411_v25  ;;  %v2538_v23 = vadd.f32 1e-05, %v2410_v12  ;;  %2158 = vadd.xlane.f32.xlu1 %v6194_v45  ;;  %2155 = vadd.xlane.f32.xlu0 %v6197_v20 }
 0x27e   :  { %v6446_v34 = vsub.f32 %v8053_v56, %v1688_v17  ;;  %v3122_v30 = vadd.f32 %v6295_v10, %v2987_v36  ;;  %v2790_v18 = vmul.f32 %v3797_v4, %v8054_v38  ;;  %v2243_v21 = vpop.xlane.xlu1 %2242  ;;  %v2240_v6 = vpop.xlane.xlu0 %2239  ;;  %v1691_v17 = vmul.f32 0.020833334, %v5922_v47  ;;  %v8055_v36 = vld [vmem:[#allocation149_spill] sm:$0xff]  ;;  %v8056_v47 = vld [vmem:[#allocation150_spill] sm:$0xff] }
 0x27f   :  { %3251 = vst.msk [vmem:[%s7455_s5 + $0x228] sm:$0xff] %vm1246_vm1, %v3123_v41  ;;  %v2926_v45 = vmul.f32 %v6272_v40, %v2791_v53  ;;  %3810 = vrsqrt.f32 %v2539_v28  ;;  %v2475_v20 = vmul.f32 0.020833334, %v2243_v21  ;;  %v2474_v43 = vmul.f32 0.020833334, %v2240_v6  ;;  %v8058_v6 = vld [vmem:[#allocation117_spill] sm:$0xff] }
 0x280   :  { %v3799_v57 = vpop.eup %3798  ;;  %v1690_v37 = vmul.f32 0.020833334, %v5924_v3  ;;  %3250 = vst.msk [vmem:[%s7455_s5 + $0x220] sm:$0xff] %vm1246_vm1, %v3122_v30  ;;  %v2925_v25 = vmul.f32 %v6272_v40, %v2790_v18  ;;  %3812 = vrsqrt.f32 %v2538_v23  ;;  %v1945_v23 = vmul.f32 %v6443_v44, %v6443_v44  ;;  %v8057_v18 = vld [vmem:[#allocation116_spill] sm:$0xff] }
 0x281   :  { %v3801_v12 = vpop.eup %3800  ;;  %v3061_v60 = vadd.f32 %v6295_v10, %v2926_v45  ;;  %v2855_v4 = vmul.f32 %v3799_v57, %v8055_v36  ;;  %v2603_v41 = vadd.f32 1e-05, %v2475_v20  ;;  %v2602_v32 = vadd.f32 1e-05, %v2474_v43  ;;  %2164 = vadd.xlane.f32.xlu1 %v6243_v2  ;;  %2161 = vadd.xlane.f32.xlu0 %v6260_v27 }
 0x282   :  { %v3060_v3 = vadd.f32 %v6295_v10, %v2925_v25  ;;  %v2854_v53 = vmul.f32 %v3801_v12, %v8056_v47  ;;  %v2057_v28 = vpop.xlane.xlu1 %2056  ;;  %v2054_v54 = vpop.xlane.xlu0 %2053  ;;  %v1944_v56 = vmul.f32 %v6446_v34, %v6446_v34  ;;  %v6478_v21 = vsub.f32 %v8057_v18, %v1691_v17  ;;  %v8059_v25 = vld [vmem:[#allocation151_spill] sm:$0xff] }
 0x283   :  { %3189 = vst.msk [vmem:[%s7455_s5 + $0x38] sm:$0xff] %vm1246_vm1, %v3061_v60  ;;  %v2990_v2 = vmul.f32 %v6272_v40, %v2855_v4  ;;  %3814 = vrsqrt.f32 %v2603_v41  ;;  %v2413_v27 = vmul.f32 0.020833334, %v2057_v28  ;;  %v2412_v30 = vmul.f32 0.020833334, %v2054_v54 }
 0x284   :  { %v3803_v38 = vpop.eup %3802  ;;  %v6481_v45 = vsub.f32 %v8058_v6, %v1690_v37  ;;  %3188 = vst.msk [vmem:[%s7455_s5 + $0x30] sm:$0xff] %vm1246_vm1, %v3060_v3  ;;  %v2989_v20 = vmul.f32 %v6272_v40, %v2854_v53  ;;  %3816 = vrsqrt.f32 %v2602_v32  ;;  %v8060_v37 = vld [vmem:[#allocation152_spill] sm:$0xff]  ;;  %v6495_v47 = vsel %vm1246_vm1, %v1945_v23, 0.0 }
 0x285   :  { %v3805_v43 = vpop.eup %3804  ;;  %v3125_v57 = vadd.f32 %v6295_v10, %v2990_v2  ;;  %v2793_v12 = vmul.f32 %v3803_v38, %v8059_v25  ;;  %v2541_v60 = vadd.f32 1e-05, %v2413_v27  ;;  %v2540_v36 = vadd.f32 1e-05, %v2412_v30  ;;  %2170 = vadd.xlane.f32.xlu1 %v6275_v51  ;;  %2167 = vadd.xlane.f32.xlu0 %v6278_v35  ;;  %v8061_v30 = vld [vmem:[#allocation153_spill] sm:$0xff]  ;;  %v8062_v25 = vld [vmem:[#allocation154_spill] sm:$0xff] }
 0x286   :  { %v3124_v17 = vadd.f32 %v6295_v10, %v2989_v20  ;;  %v2792_v4 = vmul.f32 %v3805_v43, %v8060_v37  ;;  %v2249_v41 = vpop.xlane.xlu1 %2248  ;;  %v2246_v3 = vpop.xlane.xlu0 %2245  ;;  %v6498_v32 = vsel %vm1246_vm1, %v1944_v56, 0.0  ;;  %v1947_v23 = vmul.f32 %v6478_v21, %v6478_v21 }
 0x287   :  { %3253 = vst.msk [vmem:[%s7455_s5 + $0x238] sm:$0xff] %vm1246_vm1, %v3125_v57  ;;  %v2928_v51 = vmul.f32 %v6272_v40, %v2793_v12  ;;  %3818 = vrsqrt.f32 %v2541_v60  ;;  %v2477_v35 = vmul.f32 0.020833334, %v2249_v41  ;;  %v2476_v53 = vmul.f32 0.020833334, %v2246_v3 }
 0x288   :  { %v3807_v28 = vpop.eup %3806  ;;  %3252 = vst.msk [vmem:[%s7455_s5 + $0x230] sm:$0xff] %vm1246_vm1, %v3124_v17  ;;  %v2927_v54 = vmul.f32 %v6272_v40, %v2792_v4  ;;  %3820 = vrsqrt.f32 %v2540_v36  ;;  %v1946_v56 = vmul.f32 %v6481_v45, %v6481_v45  ;;  %v1693_v20 = vmul.f32 0.020833334, %v5994_v14 }
 0x289   :  { %v3809_v2 = vpop.eup %3808  ;;  %v3063_v27 = vadd.f32 %v6295_v10, %v2928_v51  ;;  %v2857_v38 = vmul.f32 %v3807_v28, %v8061_v30  ;;  %v2605_v18 = vadd.f32 1e-05, %v2477_v35  ;;  %v2604_v6 = vadd.f32 1e-05, %v2476_v53  ;;  %2176 = vadd.xlane.f32.xlu1 %v6341_v7  ;;  %2173 = vadd.xlane.f32.xlu0 %v6344_v8  ;;  %v8063_v51 = vld [vmem:[#allocation155_spill] sm:$0xff] }
 0x28a   :  { %v1692_v43 = vmul.f32 0.020833334, %v5996_v52  ;;  %v3062_v57 = vadd.f32 %v6295_v10, %v2927_v54  ;;  %v2856_v12 = vmul.f32 %v3809_v2, %v8062_v25  ;;  %v2063_v60 = vpop.xlane.xlu1 %2062  ;;  %v2060_v36 = vpop.xlane.xlu0 %2059  ;;  %v2193_v52 = vsel %vm1246_vm1, %v1947_v23, 0.0  ;;  %v8064_v54 = vld [vmem:[#allocation124_spill] sm:$0xff] }
 0x28b   :  { %3191 = vst.msk [vmem:[%s7455_s5 + $0x48] sm:$0xff] %vm1246_vm1, %v3063_v27  ;;  %v2992_v17 = vmul.f32 %v6272_v40, %v2857_v38  ;;  %3822 = vrsqrt.f32 %v2605_v18  ;;  %v2415_v7 = vmul.f32 0.020833334, %v2063_v60  ;;  %v2414_v8 = vmul.f32 0.020833334, %v2060_v36  ;;  %v8065_v27 = vld [vmem:[#allocation125_spill] sm:$0xff] }
 0x28c   :  { %v3811_v37 = vpop.eup %3810  ;;  %3190 = vst.msk [vmem:[%s7455_s5 + $0x40] sm:$0xff] %vm1246_vm1, %v3062_v57  ;;  %v2991_v14 = vmul.f32 %v6272_v40, %v2856_v12  ;;  %3824 = vrsqrt.f32 %v2604_v6  ;;  %v2190_v4 = vsel %vm1246_vm1, %v1946_v56, 0.0  ;;  %v6539_v2 = vsub.f32 %v8064_v54, %v1693_v20  ;;  %v8066_v56 = vld [vmem:[#allocation156_spill] sm:$0xff]  ;;  %v8069_v54 = vld [vmem:[#allocation131_spill] sm:$0xff] }
 0x28d   :  { %v3813_v41 = vpop.eup %3812  ;;  %v3127_v3 = vadd.f32 %v6295_v10, %v2992_v17  ;;  %v2795_v35 = vmul.f32 %v3811_v37, %v8063_v51  ;;  %v2543_v53 = vadd.f32 1e-05, %v2415_v7  ;;  %v2542_v28 = vadd.f32 1e-05, %v2414_v8  ;;  %2182 = vadd.xlane.f32.xlu1 %v6433_v61  ;;  %2179 = vadd.xlane.f32.xlu0 %v6436_v55  ;;  %v8067_v17 = vld [vmem:[#allocation2_spill] sm:$0xff] }
 0x28e   :  { %v6542_v30 = vsub.f32 %v8065_v27, %v1692_v43  ;;  %v3126_v23 = vadd.f32 %v6295_v10, %v2991_v14  ;;  %v2794_v38 = vmul.f32 %v3813_v41, %v8066_v56  ;;  %v2255_v18 = vpop.xlane.xlu1 %2254  ;;  %v2252_v6 = vpop.xlane.xlu0 %2251  ;;  %v1695_v43 = vmul.f32 0.020833334, %v6073_v62 }
 0x28f   :  { %3255 = vst.msk [vmem:[%s7455_s5 + $0x248] sm:$0xff] %vm1246_vm1, %v3127_v3  ;;  %v2930_v61 = vmul.f32 %v6272_v40, %v2795_v35  ;;  %3826 = vrsqrt.f32 %v2543_v53  ;;  %v2479_v55 = vmul.f32 0.020833334, %v2255_v18  ;;  %v2478_v20 = vmul.f32 0.020833334, %v2252_v6 }
 0x290   :  { %v3815_v57 = vpop.eup %3814  ;;  %v1694_v25 = vmul.f32 0.020833334, %v6075_v26  ;;  %3254 = vst.msk [vmem:[%s7455_s5 + $0x240] sm:$0xff] %vm1246_vm1, %v3126_v23  ;;  %v2929_v12 = vmul.f32 %v6272_v40, %v2794_v38  ;;  %3828 = vrsqrt.f32 %v2542_v28  ;;  %v8068_v26 = vld [vmem:[#allocation3_spill] sm:$0xff]  ;;  %v1949_v51 = vmul.f32 %v6539_v2, %v6539_v2  ;;  %v8070_v23 = vld [vmem:[#allocation132_spill] sm:$0xff] }
 0x291   :  { %v3817_v60 = vpop.eup %3816  ;;  %v3065_v36 = vadd.f32 %v6295_v10, %v2930_v61  ;;  %v2859_v7 = vmul.f32 %v3815_v57, %v8067_v17  ;;  %v2607_v8 = vadd.f32 1e-05, %v2479_v55  ;;  %v2606_v37 = vadd.f32 1e-05, %v2478_v20  ;;  %2188 = vadd.xlane.f32.xlu1 %v6495_v47  ;;  %2185 = vadd.xlane.f32.xlu0 %v6498_v32  ;;  %v8071_v61 = vld [vmem:[#allocation4_spill] sm:$0xff] }
 0x292   :  { %v3064_v62 = vadd.f32 %v6295_v10, %v2929_v12  ;;  %v2858_v14 = vmul.f32 %v3817_v60, %v8068_v26  ;;  %v2069_v41 = vpop.xlane.xlu1 %2068  ;;  %v2066_v3 = vpop.xlane.xlu0 %2065  ;;  %v1948_v35 = vmul.f32 %v6542_v30, %v6542_v30  ;;  %v6574_v27 = vsub.f32 %v8069_v54, %v1695_v43  ;;  %v8075_v54 = vld [vmem:[#allocation105_spill] sm:$0xff] }
 0x293   :  { %3193 = vst.msk [vmem:[%s7455_s5 + $0x58] sm:$0xff] %vm1246_vm1, %v3065_v36  ;;  %v2994_v47 = vmul.f32 %v6272_v40, %v2859_v7  ;;  %3830 = vrsqrt.f32 %v2607_v8  ;;  %v2417_v32 = vmul.f32 0.020833334, %v2069_v41  ;;  %v2416_v53 = vmul.f32 0.020833334, %v2066_v3 }
 0x294   :  { %v3819_v28 = vpop.eup %3818  ;;  %v6577_v56 = vsub.f32 %v8070_v23, %v1694_v25  ;;  %3192 = vst.msk [vmem:[%s7455_s5 + $0x50] sm:$0xff] %vm1246_vm1, %v3064_v62  ;;  %v2993_v38 = vmul.f32 %v6272_v40, %v2858_v14  ;;  %3832 = vrsqrt.f32 %v2606_v37  ;;  %v8072_v25 = vld [vmem:[#allocation5_spill] sm:$0xff]  ;;  %v2199_v17 = vsel %vm1246_vm1, %v1949_v51, 0.0  ;;  %v8073_v51 = vld [vmem:[#allocation78_spill] sm:$0xff] }
 0x295   :  { %v3821_v18 = vpop.eup %3820  ;;  %v3129_v6 = vadd.f32 %v6295_v10, %v2994_v47  ;;  %v2797_v55 = vmul.f32 %v3819_v28, %v8071_v61  ;;  %v2545_v20 = vadd.f32 1e-05, %v2417_v32  ;;  %v2544_v57 = vadd.f32 1e-05, %v2416_v53  ;;  %2194 = vadd.xlane.f32.xlu1 %v2193_v52  ;;  %2191 = vadd.xlane.f32.xlu0 %v2190_v4  ;;  %v8074_v53 = vld [vmem:[#allocation104_spill] sm:$0xff] }
 0x296   :  { %v3128_v43 = vadd.f32 %v6295_v10, %v2993_v38  ;;  %v2796_v12 = vmul.f32 %v3821_v18, %v8072_v25  ;;  %v2261_v60 = vpop.xlane.xlu1 %2260  ;;  %v2258_v36 = vpop.xlane.xlu0 %2257  ;;  %v2196_v7 = vsel %vm1246_vm1, %v1948_v35, 0.0  ;;  %v1951_v26 = vmul.f32 %v6574_v27, %v6574_v27  ;;  %v8076_v18 = vld [vmem:[#allocation79_spill] sm:$0xff] }
 0x297   :  { %3257 = vst.msk [vmem:[%s7455_s5 + $0x258] sm:$0xff] %vm1246_vm1, %v3129_v6  ;;  %v2932_v8 = vmul.f32 %v6272_v40, %v2797_v55  ;;  %3834 = vrsqrt.f32 %v2545_v20  ;;  %v2481_v52 = vmul.f32 0.020833334, %v2261_v60  ;;  %v2480_v4 = vmul.f32 0.020833334, %v2258_v36 }
 0x298   :  { %v3823_v37 = vpop.eup %3822  ;;  %3256 = vst.msk [vmem:[%s7455_s5 + $0x250] sm:$0xff] %vm1246_vm1, %v3128_v43  ;;  %v2931_v62 = vmul.f32 %v6272_v40, %v2796_v12  ;;  %3836 = vrsqrt.f32 %v2544_v57  ;;  %v1950_v14 = vmul.f32 %v6577_v56, %v6577_v56  ;;  %v6608_v28 = vsub.f32 %v8074_v53, %v6393_v49 }
 0x299   :  { %v3825_v41 = vpop.eup %3824  ;;  %v3067_v3 = vadd.f32 %v6295_v10, %v2932_v8  ;;  %v2861_v35 = vmul.f32 %v3823_v37, %v8073_v51  ;;  %v2609_v47 = vadd.f32 1e-05, %v2481_v52  ;;  %v2608_v32 = vadd.f32 1e-05, %v2480_v4  ;;  %2200 = vadd.xlane.f32.xlu1 %v2199_v17  ;;  %2197 = vadd.xlane.f32.xlu0 %v2196_v7  ;;  %v8077_v17 = vld [vmem:[#allocation6_spill] sm:$0xff] }
 0x29a   :  { %v6612_v23 = vsub.f32 %v8075_v54, %v6396_v0  ;;  %v3066_v38 = vadd.f32 %v6295_v10, %v2931_v62  ;;  %v2860_v6 = vmul.f32 %v3825_v41, %v8076_v18  ;;  %v2075_v61 = vpop.xlane.xlu1 %2074  ;;  %v2072_v55 = vpop.xlane.xlu0 %2071  ;;  %v2205_v25 = vsel %vm1246_vm1, %v1951_v26, 0.0  ;;  %v8078_v37 = vld [vmem:[#allocation82_spill] sm:$0xff]  ;;  %v8079_v18 = vld [vmem:[#allocation7_spill] sm:$0xff] }
 0x29b   :  { %3195 = vst.msk [vmem:[%s7455_s5 + $0x68] sm:$0xff] %vm1246_vm1, %v3067_v3  ;;  %v2996_v20 = vmul.f32 %v6272_v40, %v2861_v35  ;;  %3838 = vrsqrt.f32 %v2609_v47  ;;  %v2419_v49 = vmul.f32 0.020833334, %v2075_v61  ;;  %v2418_v57 = vmul.f32 0.020833334, %v2072_v55 }
 0x29c   :  { %v3827_v43 = vpop.eup %3826  ;;  %3194 = vst.msk [vmem:[%s7455_s5 + $0x60] sm:$0xff] %vm1246_vm1, %v3066_v38  ;;  %v2995_v0 = vmul.f32 %v6272_v40, %v2860_v6  ;;  %3840 = vrsqrt.f32 %v2608_v32  ;;  %v2202_v12 = vsel %vm1246_vm1, %v1950_v14, 0.0  ;;  %v6634_v26 = vsel %vm1246_vm1, %v6366_v46, 0.0 }
 0x29d   :  { %v3829_v60 = vpop.eup %3828  ;;  %v3131_v36 = vadd.f32 %v6295_v10, %v2996_v20  ;;  %v2799_v7 = vmul.f32 %v3827_v43, %v8077_v17  ;;  %v2547_v8 = vadd.f32 1e-05, %v2419_v49  ;;  %v2546_v52 = vadd.f32 1e-05, %v2418_v57  ;;  %2206 = vadd.xlane.f32.xlu1 %v2205_v25  ;;  %2203 = vadd.xlane.f32.xlu0 %v2202_v12  ;;  %v8080_v43 = vld [vmem:[#allocation83_spill] sm:$0xff] }
 0x29e   :  { %v3130_v4 = vadd.f32 %v6295_v10, %v2995_v0  ;;  %v2798_v62 = vmul.f32 %v3829_v60, %v8078_v37  ;;  %v2267_v41 = vpop.xlane.xlu1 %2266  ;;  %v2264_v3 = vpop.xlane.xlu0 %2263  ;;  %v6638_v14 = vsel %vm1246_vm1, %v6370_v33, 0.0  ;;  %v2007_v33 = vmul.f32 %v6608_v28, %v6608_v28 }
 0x29f   :  { %3259 = vst.msk [vmem:[%s7455_s5 + $0x268] sm:$0xff] %vm1246_vm1, %v3131_v36  ;;  %v2934_v51 = vmul.f32 %v6272_v40, %v2799_v7  ;;  %3842 = vrsqrt.f32 %v2547_v8  ;;  %v2483_v35 = vmul.f32 0.020833334, %v2267_v41  ;;  %v2482_v47 = vmul.f32 0.020833334, %v2264_v3  ;;  %v8082_v41 = vld [vmem:[#allocation112_spill] sm:$0xff] }
 0x2a0   :  { %v3831_v32 = vpop.eup %3830  ;;  %3258 = vst.msk [vmem:[%s7455_s5 + $0x260] sm:$0xff] %vm1246_vm1, %v3130_v4  ;;  %v2933_v46 = vmul.f32 %v6272_v40, %v2798_v62  ;;  %3844 = vrsqrt.f32 %v2546_v52  ;;  %v2006_v53 = vmul.f32 %v6612_v23, %v6612_v23  ;;  %v1753_v20 = vmul.f32 0.020833334, %v5893_v19  ;;  %v8081_v52 = vld [vmem:[#allocation8_spill] sm:$0xff] }
 0x2a1   :  { %v3833_v54 = vpop.eup %3832  ;;  %v3069_v38 = vadd.f32 %v6295_v10, %v2934_v51  ;;  %v2863_v6 = vmul.f32 %v3831_v32, %v8079_v18  ;;  %v2611_v61 = vadd.f32 1e-05, %v2483_v35  ;;  %v2610_v55 = vadd.f32 1e-05, %v2482_v47  ;;  %2344 = vadd.xlane.f32.xlu1 %v6176_v48  ;;  %2341 = vadd.xlane.f32.xlu0 %v6179_v1  ;;  %v8083_v51 = vld [vmem:[#allocation113_spill] sm:$0xff] }
 0x2a2   :  { %v1752_v49 = vmul.f32 0.020833334, %v5895_v59  ;;  %v3068_v57 = vadd.f32 %v6295_v10, %v2933_v46  ;;  %v2862_v0 = vmul.f32 %v3833_v54, %v8080_v43  ;;  %v2081_v25 = vpop.xlane.xlu1 %2080  ;;  %v2078_v12 = vpop.xlane.xlu0 %2077  ;;  %v6673_v59 = vsel %vm1246_vm1, %v2007_v33, 0.0  ;;  %v8084_v32 = vld [vmem:[#allocation9_spill] sm:$0xff] }
 0x2a3   :  { %3197 = vst.msk [vmem:[%s7455_s5 + $0x78] sm:$0xff] %vm1246_vm1, %v3069_v38  ;;  %v2998_v60 = vmul.f32 %v6272_v40, %v2863_v6  ;;  %3846 = vrsqrt.f32 %v2611_v61  ;;  %v2421_v48 = vmul.f32 0.020833334, %v2081_v25  ;;  %v2420_v1 = vmul.f32 0.020833334, %v2078_v12 }
 0x2a4   :  { %v3835_v36 = vpop.eup %3834  ;;  %3196 = vst.msk [vmem:[%s7455_s5 + $0x70] sm:$0xff] %vm1246_vm1, %v3068_v57  ;;  %v2997_v19 = vmul.f32 %v6272_v40, %v2862_v0  ;;  %3848 = vrsqrt.f32 %v2610_v55  ;;  %v6676_v17 = vsel %vm1246_vm1, %v2006_v53, 0.0  ;;  %v6683_v3 = vsub.f32 %v8082_v41, %v1753_v20 }
 0x2a5   :  { %v3837_v7 = vpop.eup %3836  ;;  %v3133_v8 = vadd.f32 %v6295_v10, %v2998_v60  ;;  %v2801_v4 = vmul.f32 %v3835_v36, %v8081_v52  ;;  %v2549_v37 = vadd.f32 1e-05, %v2421_v48  ;;  %v2548_v62 = vadd.f32 1e-05, %v2420_v1  ;;  %2350 = vadd.xlane.f32.xlu1 %v6231_v29  ;;  %2347 = vadd.xlane.f32.xlu0 %v6234_v58  ;;  %v8088_v52 = vld [vmem:[#allocation121_spill] sm:$0xff] }
 0x2a6   :  { %v6686_v35 = vsub.f32 %v8083_v51, %v1752_v49  ;;  %v3132_v47 = vadd.f32 %v6295_v10, %v2997_v19  ;;  %v2800_v46 = vmul.f32 %v3837_v7, %v8084_v32  ;;  %v2273_v33 = vpop.xlane.xlu1 %2272  ;;  %v2270_v53 = vpop.xlane.xlu0 %2269  ;;  %v1755_v18 = vmul.f32 0.020833334, %v5960_v31  ;;  %v8085_v49 = vld [vmem:[#allocation86_spill] sm:$0xff]  ;;  %v8087_v7 = vld [vmem:[#allocation120_spill] sm:$0xff] }
 0x2a7   :  { %3261 = vst.msk [vmem:[%s7455_s5 + $0x278] sm:$0xff] %vm1246_vm1, %v3133_v8  ;;  %v2936_v29 = vmul.f32 %v6272_v40, %v2801_v4  ;;  %3850 = vrsqrt.f32 %v2549_v37  ;;  %v2485_v58 = vmul.f32 0.020833334, %v2273_v33  ;;  %v2484_v54 = vmul.f32 0.020833334, %v2270_v53  ;;  %v8089_v51 = vld [vmem:[#allocation90_spill] sm:$0xff] }
 0x2a8   :  { %v3839_v38 = vpop.eup %3838  ;;  %v1754_v6 = vmul.f32 0.020833334, %v5962_v22  ;;  %3260 = vst.msk [vmem:[%s7455_s5 + $0x270] sm:$0xff] %vm1246_vm1, %v3132_v47  ;;  %v2935_v61 = vmul.f32 %v6272_v40, %v2800_v46  ;;  %3852 = vrsqrt.f32 %v2548_v62  ;;  %v8086_v22 = vld [vmem:[#allocation87_spill] sm:$0xff]  ;;  %v2009_v48 = vmul.f32 %v6683_v3, %v6683_v3 }
 0x2a9   :  { %v3841_v55 = vpop.eup %3840  ;;  %v3071_v20 = vadd.f32 %v6295_v10, %v2936_v29  ;;  %v2865_v57 = vmul.f32 %v3839_v38, %v8085_v49  ;;  %v2613_v43 = vadd.f32 1e-05, %v2485_v58  ;;  %v2612_v0 = vadd.f32 1e-05, %v2484_v54  ;;  %2356 = vadd.xlane.f32.xlu1 %v6267_v11  ;;  %2353 = vadd.xlane.f32.xlu0 %v6281_v50  ;;  %v8090_v53 = vld [vmem:[#allocation91_spill] sm:$0xff] }
 0x2aa   :  { %v3070_v31 = vadd.f32 %v6295_v10, %v2935_v61  ;;  %v2864_v25 = vmul.f32 %v3841_v55, %v8086_v22  ;;  %v2087_v12 = vpop.xlane.xlu1 %2086  ;;  %v2084_v60 = vpop.xlane.xlu0 %2083  ;;  %v2008_v1 = vmul.f32 %v6686_v35, %v6686_v35  ;;  %v6718_v8 = vsub.f32 %v8087_v7, %v1755_v18 }
 0x2ab   :  { %3199 = vst.msk [vmem:[%s7455_s5 + $0x88] sm:$0xff] %vm1246_vm1, %v3071_v20  ;;  %v3000_v11 = vmul.f32 %v6272_v40, %v2865_v57  ;;  %3854 = vrsqrt.f32 %v2613_v43  ;;  %v2423_v50 = vmul.f32 0.020833334, %v2087_v12  ;;  %v2422_v36 = vmul.f32 0.020833334, %v2084_v60  ;;  %v8092_v60 = vld [vmem:[#allocation44_spill] sm:$0xff] }
 0x2ac   :  { %v3843_v19 = vpop.eup %3842  ;;  %v6721_v4 = vsub.f32 %v8088_v52, %v1754_v6  ;;  %3198 = vst.msk [vmem:[%s7455_s5 + $0x80] sm:$0xff] %vm1246_vm1, %v3070_v31  ;;  %v2999_v37 = vmul.f32 %v6272_v40, %v2864_v25  ;;  %3856 = vrsqrt.f32 %v2612_v0  ;;  %v6735_v38 = vsel %vm1246_vm1, %v2009_v48, 0.0  ;;  %v8091_v0 = vld [vmem:[#allocation10_spill] sm:$0xff] }
 0x2ad   :  { %v3845_v62 = vpop.eup %3844  ;;  %v3135_v41 = vadd.f32 %v6295_v10, %v3000_v11  ;;  %v2803_v47 = vmul.f32 %v3843_v19, %v8089_v51  ;;  %v2551_v32 = vadd.f32 1e-05, %v2423_v50  ;;  %v2550_v46 = vadd.f32 1e-05, %v2422_v36  ;;  %2362 = vadd.xlane.f32.xlu1 %v6299_v24  ;;  %2359 = vadd.xlane.f32.xlu0 %v6302_v16  ;;  %v8093_v11 = vld [vmem:[#allocation11_spill] sm:$0xff] }
 0x2ae   :  { %v3134_v33 = vadd.f32 %v6295_v10, %v2999_v37  ;;  %v2802_v29 = vmul.f32 %v3845_v62, %v8090_v53  ;;  %v2279_v58 = vpop.xlane.xlu1 %2278  ;;  %v2276_v54 = vpop.xlane.xlu0 %2275  ;;  %v6738_v18 = vsel %vm1246_vm1, %v2008_v1, 0.0  ;;  %v2011_v20 = vmul.f32 %v6718_v8, %v6718_v8  ;;  %v8095_v53 = vld [vmem:[#allocation128_spill] sm:$0xff] }
 0x2af   :  { %3263 = vst.msk [vmem:[%s7455_s5 + $0x288] sm:$0xff] %vm1246_vm1, %v3135_v41  ;;  %v2938_v24 = vmul.f32 %v6272_v40, %v2803_v47  ;;  %3858 = vrsqrt.f32 %v2551_v32  ;;  %v2487_v16 = vmul.f32 0.020833334, %v2279_v58  ;;  %v2486_v6 = vmul.f32 0.020833334, %v2276_v54  ;;  %v8094_v47 = vld [vmem:[#allocation12_spill] sm:$0xff] }
 0x2b0   :  { %v3847_v61 = vpop.eup %3846  ;;  %3262 = vst.msk [vmem:[%s7455_s5 + $0x280] sm:$0xff] %vm1246_vm1, %v3134_v33  ;;  %v2937_v55 = vmul.f32 %v6272_v40, %v2802_v29  ;;  %3860 = vrsqrt.f32 %v2550_v46  ;;  %v2010_v49 = vmul.f32 %v6721_v4, %v6721_v4  ;;  %v1757_v12 = vmul.f32 0.020833334, %v6039_v39  ;;  %v8096_v58 = vld [vmem:[#allocation129_spill] sm:$0xff] }
 0x2b1   :  { %v3849_v57 = vpop.eup %3848  ;;  %v3073_v43 = vadd.f32 %v6295_v10, %v2938_v24  ;;  %v2867_v31 = vmul.f32 %v3847_v61, %v8091_v0  ;;  %v2615_v22 = vadd.f32 1e-05, %v2487_v16  ;;  %v2614_v25 = vadd.f32 1e-05, %v2486_v6  ;;  %2368 = vadd.xlane.f32.xlu1 %v6634_v26  ;;  %2365 = vadd.xlane.f32.xlu0 %v6638_v14  ;;  %v8097_v16 = vld [vmem:[#allocation13_spill] sm:$0xff]  ;;  %v8099_v0 = vld [vmem:[#allocation58_spill] sm:$0xff] }
 0x2b2   :  { %v1756_v48 = vmul.f32 0.020833334, %v8092_v60  ;;  %v3072_v1 = vadd.f32 %v6295_v10, %v2937_v55  ;;  %v2866_v50 = vmul.f32 %v3849_v57, %v8093_v11  ;;  %v2093_v36 = vpop.xlane.xlu1 %2092  ;;  %v2090_v19 = vpop.xlane.xlu0 %2089  ;;  %v2385_v37 = vsel %vm1246_vm1, %v2011_v20, 0.0  ;;  %v8098_v57 = vld [vmem:[#allocation57_spill] sm:$0xff]  ;;  %v8100_v60 = vld [vmem:[#allocation95_spill] sm:$0xff] }
 0x2b3   :  { %3201 = vst.msk [vmem:[%s7455_s5 + $0x98] sm:$0xff] %vm1246_vm1, %v3073_v43  ;;  %v3002_v7 = vmul.f32 %v6272_v40, %v2867_v31  ;;  %3862 = vrsqrt.f32 %v2615_v22  ;;  %v2425_v26 = vmul.f32 0.020833334, %v2093_v36  ;;  %v2424_v14 = vmul.f32 0.020833334, %v2090_v19  ;;  %v8101_v36 = vld [vmem:[#allocation14_spill] sm:$0xff] }
 0x2b4   :  { %v3851_v52 = vpop.eup %3850  ;;  %3200 = vst.msk [vmem:[%s7455_s5 + $0x90] sm:$0xff] %vm1246_vm1, %v3072_v1  ;;  %v3001_v39 = vmul.f32 %v6272_v40, %v2866_v50  ;;  %3864 = vrsqrt.f32 %v2614_v25  ;;  %v2382_v62 = vsel %vm1246_vm1, %v2010_v49, 0.0  ;;  %v6779_v29 = vsub.f32 %v8095_v53, %v1757_v12  ;;  %v6832_v53 = vld [vmem:[%s7454_s4] ss:$0 sm:$0xff] }
 0x2b5   :  { %v3853_v41 = vpop.eup %3852  ;;  %v3137_v51 = vadd.f32 %v6295_v10, %v3002_v7  ;;  %v2805_v32 = vmul.f32 %v3851_v52, %v8094_v47  ;;  %v2553_v46 = vadd.f32 1e-05, %v2425_v26  ;;  %v2552_v33 = vadd.f32 1e-05, %v2424_v14  ;;  %2374 = vadd.xlane.f32.xlu1 %v6673_v59  ;;  %2371 = vadd.xlane.f32.xlu0 %v6676_v17  ;;  %v8103_v47 = vld [vmem:[#allocation135_spill] sm:$0xff] }
 0x2b6   :  { %v6782_v54 = vsub.f32 %v8096_v58, %v1756_v48  ;;  %v3136_v24 = vadd.f32 %v6295_v10, %v3001_v39  ;;  %v2804_v6 = vmul.f32 %v3853_v41, %v8097_v16  ;;  %v2285_v61 = vpop.xlane.xlu1 %2284  ;;  %v2282_v55 = vpop.xlane.xlu0 %2281  ;;  %v1759_v43 = vmul.f32 0.020833334, %v8098_v57  ;;  %v8102_v41 = vld [vmem:[#allocation134_spill] sm:$0xff] }
 0x2b7   :  { %3265 = vst.msk [vmem:[%s7455_s5 + $0x298] sm:$0xff] %vm1246_vm1, %v3137_v51  ;;  %v2940_v59 = vmul.f32 %v6272_v40, %v2805_v32  ;;  %3866 = vrsqrt.f32 %v2553_v46  ;;  %v2489_v17 = vmul.f32 0.020833334, %v2285_v61  ;;  %v2488_v20 = vmul.f32 0.020833334, %v2282_v55 }
 0x2b8   :  { %v3855_v49 = vpop.eup %3854  ;;  %v1758_v31 = vmul.f32 0.020833334, %v8099_v0  ;;  %3264 = vst.msk [vmem:[%s7455_s5 + $0x290] sm:$0xff] %vm1246_vm1, %v3136_v24  ;;  %v2939_v22 = vmul.f32 %v6272_v40, %v2804_v6  ;;  %3868 = vrsqrt.f32 %v2552_v33  ;;  %v2013_v40 = vmul.f32 %v6779_v29, %v6779_v29  ;;  %v8104_v24 = vld [vmem:[#allocation99_spill] sm:$0xff] }
 0x2b9   :  { %v3857_v25 = vpop.eup %3856  ;;  %v3075_v12 = vadd.f32 %v6295_v10, %v2940_v59  ;;  %v2869_v48 = vmul.f32 %v3855_v49, %v8100_v60  ;;  %v2617_v1 = vadd.f32 1e-05, %v2489_v17  ;;  %v2616_v11 = vadd.f32 1e-05, %v2488_v20  ;;  %2380 = vadd.xlane.f32.xlu1 %v6735_v38  ;;  %2377 = vadd.xlane.f32.xlu0 %v6738_v18  ;;  %v6815_v38 = vld [vmem:[%s7453_s3] ss:$0 sm:$0xff] }
 0x2ba   :  { %v3074_v50 = vadd.f32 %v6295_v10, %v2939_v22  ;;  %v2868_v19 = vmul.f32 %v3857_v25, %v8101_v36  ;;  %v2099_v7 = vpop.xlane.xlu1 %2098  ;;  %v2096_v26 = vpop.xlane.xlu0 %2095  ;;  %v2012_v14 = vmul.f32 %v6782_v54, %v6782_v54  ;;  %v6819_v51 = vsub.f32 %v8102_v41, %v1759_v43  ;;  %v8105_v59 = vld [vmem:[#allocation16_spill] sm:$0xff] }
 0x2bb   :  { %3203 = vst.msk [vmem:[%s7455_s5 + $0xa8] sm:$0xff] %vm1246_vm1, %v3075_v12  ;;  %v3004_v10 = vmul.f32 %v6815_v38, %v2869_v48  ;;  %3870 = vrsqrt.f32 %v2617_v1  ;;  %v2427_v18 = vmul.f32 0.020833334, %v2099_v7  ;;  %v2426_v52 = vmul.f32 0.020833334, %v2096_v26  ;;  %v8106_v1 = vld [vmem:[#allocation103_spill] sm:$0xff] }
 0x2bc   :  { %v3859_v39 = vpop.eup %3858  ;;  %v6822_v32 = vsub.f32 %v8103_v47, %v1758_v31  ;;  %3202 = vst.msk [vmem:[%s7455_s5 + $0xa0] sm:$0xff] %vm1246_vm1, %v3074_v50  ;;  %v3003_v46 = vmul.f32 %v6815_v38, %v2868_v19  ;;  %3872 = vrsqrt.f32 %v2616_v11  ;;  %v2391_v57 = vsel %vm1246_vm1, %v2013_v40, 0.0  ;;  %v8107_v7 = vld [vmem:[#allocation106_spill] sm:$0xff] }
 0x2bd   :  { %v3861_v33 = vpop.eup %3860  ;;  %v3139_v58 = vadd.f32 %v6832_v53, %v3004_v10  ;;  %v2807_v16 = vmul.f32 %v3859_v39, %v8104_v24  ;;  %v2555_v6 = vadd.f32 1e-05, %v2427_v18  ;;  %v2554_v61 = vadd.f32 1e-05, %v2426_v52  ;;  %2386 = vadd.xlane.f32.xlu1 %v2385_v37  ;;  %2383 = vadd.xlane.f32.xlu0 %v2382_v62  ;;  %v8108_v24 = vld [vmem:[#allocation107_spill] sm:$0xff] }
 0x2be   :  { %v3138_v55 = vadd.f32 %v6832_v53, %v3003_v46  ;;  %v2806_v17 = vmul.f32 %v3861_v33, %v8105_v59  ;;  %v2291_v20 = vpop.xlane.xlu1 %2290  ;;  %v2288_v49 = vpop.xlane.xlu0 %2287  ;;  %v2388_v43 = vsel %vm1246_vm1, %v2012_v14, 0.0  ;;  %v2015_v25 = vmul.f32 %v6819_v51, %v6819_v51  ;;  %v8109_v59 = vld [vmem:[#allocation18_spill] sm:$0xff] }
 0x2bf   :  { %3267 = vst.msk [vmem:[%s7455_s5 + $0x2a8] sm:$0xff] %vm1246_vm1, %v3139_v58  ;;  %v2942_v0 = vmul.f32 %v6815_v38, %v2807_v16  ;;  %3874 = vrsqrt.f32 %v2555_v6  ;;  %v2491_v37 = vmul.f32 0.020833334, %v2291_v20  ;;  %v2490_v62 = vmul.f32 0.020833334, %v2288_v49 }
 0x2c0   :  { %v3863_v31 = vpop.eup %3862  ;;  %3266 = vst.msk [vmem:[%s7455_s5 + $0x2a0] sm:$0xff] %vm1246_vm1, %v3138_v55  ;;  %v2941_v22 = vmul.f32 %v6815_v38, %v2806_v17  ;;  %3876 = vrsqrt.f32 %v2554_v61  ;;  %v2014_v12 = vmul.f32 %v6822_v32, %v6822_v32  ;;  %v2397_v47 = vsel %vm1246_vm1, %v2015_v25, 0.0  ;;  %v8110_v25 = vld [vmem:[#allocation19_spill] sm:$0xff] }
 0x2c1   :  { %v3865_v60 = vpop.eup %3864  ;;  %v3077_v48 = vadd.f32 %v6832_v53, %v2942_v0  ;;  %v2871_v11 = vmul.f32 %v3863_v31, %v8106_v1  ;;  %v2619_v50 = vadd.f32 1e-05, %v2491_v37  ;;  %v2618_v36 = vadd.f32 1e-05, %v2490_v62  ;;  %2392 = vadd.xlane.f32.xlu1 %v2391_v57  ;;  %2389 = vadd.xlane.f32.xlu0 %v2388_v43 }
 0x2c2   :  { %v3076_v19 = vadd.f32 %v6832_v53, %v2941_v22  ;;  %v2870_v26 = vmul.f32 %v3865_v60, %v8107_v7  ;;  %v2105_v40 = vpop.xlane.xlu1 %2104  ;;  %v2102_v14 = vpop.xlane.xlu0 %2101  ;;  %v2394_v46 = vsel %vm1246_vm1, %v2014_v12, 0.0 }
 0x2c3   :  { %3205 = vst.msk [vmem:[%s7455_s5 + $0xb8] sm:$0xff] %vm1246_vm1, %v3077_v48  ;;  %v3006_v10 = vmul.f32 %v6815_v38, %v2871_v11  ;;  %3878 = vrsqrt.f32 %v2619_v50  ;;  %v2429_v18 = vmul.f32 0.020833334, %v2105_v40  ;;  %v2428_v52 = vmul.f32 0.020833334, %v2102_v14  ;;  %v8111_v11 = vld [vmem:[#allocation21_spill] sm:$0xff] }
 0x2c4   :  { %v3867_v39 = vpop.eup %3866  ;;  %3204 = vst.msk [vmem:[%s7455_s5 + $0xb0] sm:$0xff] %vm1246_vm1, %v3076_v19  ;;  %v3005_v41 = vmul.f32 %v6815_v38, %v2870_v26  ;;  %3880 = vrsqrt.f32 %v2618_v36 }
 0x2c5   :  { %v3869_v33 = vpop.eup %3868  ;;  %v3141_v58 = vadd.f32 %v6832_v53, %v3006_v10  ;;  %v2809_v16 = vmul.f32 %v3867_v39, %v8108_v24  ;;  %v2557_v6 = vadd.f32 1e-05, %v2429_v18  ;;  %v2556_v61 = vadd.f32 1e-05, %v2428_v52  ;;  %2398 = vadd.xlane.f32.xlu1 %v2397_v47  ;;  %2395 = vadd.xlane.f32.xlu0 %v2394_v46  ;;  %v8112_v39 = vld [vmem:[#allocation110_spill] sm:$0xff] }
 0x2c6   :  { %v3140_v55 = vadd.f32 %v6832_v53, %v3005_v41  ;;  %v2808_v17 = vmul.f32 %v3869_v33, %v8109_v59  ;;  %v2297_v20 = vpop.xlane.xlu1 %2296  ;;  %v2294_v49 = vpop.xlane.xlu0 %2293 }
 0x2c7   :  { %3269 = vst.msk [vmem:[%s7455_s5 + $0x2b8] sm:$0xff] %vm1246_vm1, %v3141_v58  ;;  %v2944_v57 = vmul.f32 %v6815_v38, %v2809_v16  ;;  %3882 = vrsqrt.f32 %v2557_v6  ;;  %v2493_v43 = vmul.f32 0.020833334, %v2297_v20  ;;  %v2492_v0 = vmul.f32 0.020833334, %v2294_v49  ;;  %v8113_v58 = vld [vmem:[#allocation22_spill] sm:$0xff] }
 0x2c8   :  { %v3871_v37 = vpop.eup %3870  ;;  %3268 = vst.msk [vmem:[%s7455_s5 + $0x2b0] sm:$0xff] %vm1246_vm1, %v3140_v55  ;;  %v2943_v62 = vmul.f32 %v6815_v38, %v2808_v17  ;;  %3884 = vrsqrt.f32 %v2556_v61 }
 0x2c9   :  { %v3873_v31 = vpop.eup %3872  ;;  %v3079_v22 = vadd.f32 %v6832_v53, %v2944_v57  ;;  %v2873_v12 = vmul.f32 %v3871_v37, %v8110_v25  ;;  %v2621_v60 = vadd.f32 1e-05, %v2493_v43  ;;  %v2620_v48 = vadd.f32 1e-05, %v2492_v0  ;;  %v8114_v43 = vld [vmem:[#allocation115_spill] sm:$0xff] }
 0x2ca   :  { %v3078_v1 = vadd.f32 %v6832_v53, %v2943_v62  ;;  %v2872_v50 = vmul.f32 %v3873_v31, %v8111_v11  ;;  %v2111_v36 = vpop.xlane.xlu1 %2110  ;;  %v2108_v19 = vpop.xlane.xlu0 %2107 }
 0x2cb   :  { %3207 = vst.msk [vmem:[%s7455_s5 + $0xc8] sm:$0xff] %vm1246_vm1, %v3079_v22  ;;  %v3008_v7 = vmul.f32 %v6815_v38, %v2873_v12  ;;  %3886 = vrsqrt.f32 %v2621_v60  ;;  %v2431_v26 = vmul.f32 0.020833334, %v2111_v36  ;;  %v2430_v40 = vmul.f32 0.020833334, %v2108_v19  ;;  %v8115_v22 = vld [vmem:[#allocation24_spill] sm:$0xff] }
 0x2cc   :  { %v3875_v14 = vpop.eup %3874  ;;  %3206 = vst.msk [vmem:[%s7455_s5 + $0xc0] sm:$0xff] %vm1246_vm1, %v3078_v1  ;;  %v3007_v10 = vmul.f32 %v6815_v38, %v2872_v50  ;;  %3888 = vrsqrt.f32 %v2620_v48 }
 0x2cd   :  { %v3877_v18 = vpop.eup %3876  ;;  %v3143_v52 = vadd.f32 %v6832_v53, %v3008_v7  ;;  %v2811_v41 = vmul.f32 %v3875_v14, %v8112_v39  ;;  %v2559_v47 = vadd.f32 1e-05, %v2431_v26  ;;  %v2558_v46 = vadd.f32 1e-05, %v2430_v40  ;;  %v8116_v26 = vld [vmem:[#allocation25_spill] sm:$0xff] }
 0x2ce   :  { %v3142_v33 = vadd.f32 %v6832_v53, %v3007_v10  ;;  %v2810_v24 = vmul.f32 %v3877_v18, %v8113_v58  ;;  %v2303_v16 = vpop.xlane.xlu1 %2302  ;;  %v2300_v6 = vpop.xlane.xlu0 %2299 }
 0x2cf   :  { %3271 = vst.msk [vmem:[%s7455_s5 + $0x2c8] sm:$0xff] %vm1246_vm1, %v3143_v52  ;;  %v2946_v61 = vmul.f32 %v6815_v38, %v2811_v41  ;;  %3890 = vrsqrt.f32 %v2559_v47  ;;  %v2495_v55 = vmul.f32 0.020833334, %v2303_v16  ;;  %v2494_v59 = vmul.f32 0.020833334, %v2300_v6  ;;  %v8117_v52 = vld [vmem:[#allocation118_spill] sm:$0xff] }
 0x2d0   :  { %v3879_v17 = vpop.eup %3878  ;;  %3270 = vst.msk [vmem:[%s7455_s5 + $0x2c0] sm:$0xff] %vm1246_vm1, %v3142_v33  ;;  %v2945_v20 = vmul.f32 %v6815_v38, %v2810_v24  ;;  %3892 = vrsqrt.f32 %v2558_v46 }
 0x2d1   :  { %v3881_v49 = vpop.eup %3880  ;;  %v3081_v57 = vadd.f32 %v6832_v53, %v2946_v61  ;;  %v2875_v0 = vmul.f32 %v3879_v17, %v8114_v43  ;;  %v2623_v37 = vadd.f32 1e-05, %v2495_v55  ;;  %v2622_v62 = vadd.f32 1e-05, %v2494_v59  ;;  %v8118_v55 = vld [vmem:[#allocation119_spill] sm:$0xff] }
 0x2d2   :  { %v3080_v31 = vadd.f32 %v6832_v53, %v2945_v20  ;;  %v2874_v25 = vmul.f32 %v3881_v49, %v8115_v22  ;;  %v2117_v12 = vpop.xlane.xlu1 %2116  ;;  %v2114_v60 = vpop.xlane.xlu0 %2113 }
 0x2d3   :  { %3209 = vst.msk [vmem:[%s7455_s5 + $0xd8] sm:$0xff] %vm1246_vm1, %v3081_v57  ;;  %v3010_v48 = vmul.f32 %v6815_v38, %v2875_v0  ;;  %3894 = vrsqrt.f32 %v2623_v37  ;;  %v2433_v1 = vmul.f32 0.020833334, %v2117_v12  ;;  %v2432_v11 = vmul.f32 0.020833334, %v2114_v60  ;;  %v8119_v57 = vld [vmem:[#allocation122_spill] sm:$0xff] }
 0x2d4   :  { %v3883_v50 = vpop.eup %3882  ;;  %3208 = vst.msk [vmem:[%s7455_s5 + $0xd0] sm:$0xff] %vm1246_vm1, %v3080_v31  ;;  %v3009_v36 = vmul.f32 %v6815_v38, %v2874_v25  ;;  %3896 = vrsqrt.f32 %v2622_v62 }
 0x2d5   :  { %v3885_v19 = vpop.eup %3884  ;;  %v3145_v7 = vadd.f32 %v6832_v53, %v3010_v48  ;;  %v2813_v40 = vmul.f32 %v3883_v50, %v8116_v26  ;;  %v2561_v14 = vadd.f32 1e-05, %v2433_v1  ;;  %v2560_v10 = vadd.f32 1e-05, %v2432_v11  ;;  %v8120_v1 = vld [vmem:[#allocation123_spill] sm:$0xff] }
 0x2d6   :  { %v3144_v18 = vadd.f32 %v6832_v53, %v3009_v36  ;;  %v2812_v39 = vmul.f32 %v3885_v19, %v8117_v52  ;;  %v2309_v41 = vpop.xlane.xlu1 %2308  ;;  %v2306_v47 = vpop.xlane.xlu0 %2305 }
 0x2d7   :  { %3273 = vst.msk [vmem:[%s7455_s5 + $0x2d8] sm:$0xff] %vm1246_vm1, %v3145_v7  ;;  %v2948_v46 = vmul.f32 %v6815_v38, %v2813_v40  ;;  %3898 = vrsqrt.f32 %v2561_v14  ;;  %v2497_v33 = vmul.f32 0.020833334, %v2309_v41  ;;  %v2496_v58 = vmul.f32 0.020833334, %v2306_v47  ;;  %v8121_v7 = vld [vmem:[#allocation26_spill] sm:$0xff] }
 0x2d8   :  { %v3887_v24 = vpop.eup %3886  ;;  %3272 = vst.msk [vmem:[%s7455_s5 + $0x2d0] sm:$0xff] %vm1246_vm1, %v3144_v18  ;;  %v2947_v16 = vmul.f32 %v6815_v38, %v2812_v39  ;;  %3900 = vrsqrt.f32 %v2560_v10 }
 0x2d9   :  { %v3889_v6 = vpop.eup %3888  ;;  %v3083_v61 = vadd.f32 %v6832_v53, %v2948_v46  ;;  %v2877_v59 = vmul.f32 %v3887_v24, %v8118_v55  ;;  %v2625_v17 = vadd.f32 1e-05, %v2497_v33  ;;  %v2624_v20 = vadd.f32 1e-05, %v2496_v58  ;;  %v8122_v33 = vld [vmem:[#allocation27_spill] sm:$0xff] }
 0x2da   :  { %v3082_v49 = vadd.f32 %v6832_v53, %v2947_v16  ;;  %v2876_v43 = vmul.f32 %v3889_v6, %v8119_v57  ;;  %v2123_v0 = vpop.xlane.xlu1 %2122  ;;  %v2120_v37 = vpop.xlane.xlu0 %2119 }
 0x2db   :  { %3211 = vst.msk [vmem:[%s7455_s5 + $0xe8] sm:$0xff] %vm1246_vm1, %v3083_v61  ;;  %v3012_v62 = vmul.f32 %v6815_v38, %v2877_v59  ;;  %3902 = vrsqrt.f32 %v2625_v17  ;;  %v2435_v31 = vmul.f32 0.020833334, %v2123_v0  ;;  %v2434_v22 = vmul.f32 0.020833334, %v2120_v37  ;;  %v8123_v61 = vld [vmem:[#allocation28_spill] sm:$0xff] }
 0x2dc   :  { %v3891_v25 = vpop.eup %3890  ;;  %3210 = vst.msk [vmem:[%s7455_s5 + $0xe0] sm:$0xff] %vm1246_vm1, %v3082_v49  ;;  %v3011_v12 = vmul.f32 %v6815_v38, %v2876_v43  ;;  %3904 = vrsqrt.f32 %v2624_v20 }
 0x2dd   :  { %v3893_v60 = vpop.eup %3892  ;;  %v3147_v48 = vadd.f32 %v6832_v53, %v3012_v62  ;;  %v2815_v11 = vmul.f32 %v3891_v25, %v8120_v1  ;;  %v2563_v50 = vadd.f32 1e-05, %v2435_v31  ;;  %v2562_v36 = vadd.f32 1e-05, %v2434_v22  ;;  %v8124_v31 = vld [vmem:[#allocation29_spill] sm:$0xff] }
 0x2de   :  { %v3146_v19 = vadd.f32 %v6832_v53, %v3011_v12  ;;  %v2814_v26 = vmul.f32 %v3893_v60, %v8121_v7  ;;  %v2315_v40 = vpop.xlane.xlu1 %2314  ;;  %v2312_v14 = vpop.xlane.xlu0 %2311 }
 0x2df   :  { %3275 = vst.msk [vmem:[%s7455_s5 + $0x2e8] sm:$0xff] %vm1246_vm1, %v3147_v48  ;;  %v2950_v10 = vmul.f32 %v6815_v38, %v2815_v11  ;;  %3906 = vrsqrt.f32 %v2563_v50  ;;  %v2499_v18 = vmul.f32 0.020833334, %v2315_v40  ;;  %v2498_v52 = vmul.f32 0.020833334, %v2312_v14  ;;  %v8125_v48 = vld [vmem:[#allocation126_spill] sm:$0xff] }
 0x2e0   :  { %v3895_v39 = vpop.eup %3894  ;;  %3274 = vst.msk [vmem:[%s7455_s5 + $0x2e0] sm:$0xff] %vm1246_vm1, %v3146_v19  ;;  %v2949_v41 = vmul.f32 %v6815_v38, %v2814_v26  ;;  %3908 = vrsqrt.f32 %v2562_v36 }
 0x2e1   :  { %v3897_v47 = vpop.eup %3896  ;;  %v3085_v46 = vadd.f32 %v6832_v53, %v2950_v10  ;;  %v2879_v58 = vmul.f32 %v3895_v39, %v8122_v33  ;;  %v2627_v24 = vadd.f32 1e-05, %v2499_v18  ;;  %v2626_v16 = vadd.f32 1e-05, %v2498_v52  ;;  %v8126_v18 = vld [vmem:[#allocation127_spill] sm:$0xff] }
 0x2e2   :  { %v3084_v6 = vadd.f32 %v6832_v53, %v2949_v41  ;;  %v2878_v55 = vmul.f32 %v3897_v47, %v8123_v61  ;;  %v2129_v59 = vpop.xlane.xlu1 %2128  ;;  %v2126_v17 = vpop.xlane.xlu0 %2125 }
 0x2e3   :  { %3213 = vst.msk [vmem:[%s7455_s5 + $0xf8] sm:$0xff] %vm1246_vm1, %v3085_v46  ;;  %v3014_v20 = vmul.f32 %v6815_v38, %v2879_v58  ;;  %3910 = vrsqrt.f32 %v2627_v24  ;;  %v2437_v49 = vmul.f32 0.020833334, %v2129_v59  ;;  %v2436_v57 = vmul.f32 0.020833334, %v2126_v17  ;;  %v8127_v46 = vld [vmem:[#allocation30_spill] sm:$0xff] }
 0x2e4   :  { %v3899_v43 = vpop.eup %3898  ;;  %3212 = vst.msk [vmem:[%s7455_s5 + $0xf0] sm:$0xff] %vm1246_vm1, %v3084_v6  ;;  %v3013_v0 = vmul.f32 %v6815_v38, %v2878_v55  ;;  %3912 = vrsqrt.f32 %v2626_v16 }
 0x2e5   :  { %v3901_v37 = vpop.eup %3900  ;;  %v3149_v62 = vadd.f32 %v6832_v53, %v3014_v20  ;;  %v2817_v22 = vmul.f32 %v3899_v43, %v8124_v31  ;;  %v2565_v25 = vadd.f32 1e-05, %v2437_v49  ;;  %v2564_v12 = vadd.f32 1e-05, %v2436_v57  ;;  %v8128_v49 = vld [vmem:[#allocation130_spill] sm:$0xff] }
 0x2e6   :  { %v3148_v60 = vadd.f32 %v6832_v53, %v3013_v0  ;;  %v2816_v1 = vmul.f32 %v3901_v37, %v8125_v48  ;;  %v2321_v11 = vpop.xlane.xlu1 %2320  ;;  %v2318_v50 = vpop.xlane.xlu0 %2317 }
 0x2e7   :  { %3277 = vst.msk [vmem:[%s7455_s5 + $0x2f8] sm:$0xff] %vm1246_vm1, %v3149_v62  ;;  %v2952_v36 = vmul.f32 %v6815_v38, %v2817_v22  ;;  %3914 = vrsqrt.f32 %v2565_v25  ;;  %v2501_v19 = vmul.f32 0.020833334, %v2321_v11  ;;  %v2500_v7 = vmul.f32 0.020833334, %v2318_v50  ;;  %v8129_v62 = vld [vmem:[#allocation31_spill] sm:$0xff] }
 0x2e8   :  { %v3903_v26 = vpop.eup %3902  ;;  %3276 = vst.msk [vmem:[%s7455_s5 + $0x2f0] sm:$0xff] %vm1246_vm1, %v3148_v60  ;;  %v2951_v40 = vmul.f32 %v6815_v38, %v2816_v1  ;;  %3916 = vrsqrt.f32 %v2564_v12 }
 0x2e9   :  { %v3905_v14 = vpop.eup %3904  ;;  %v3087_v10 = vadd.f32 %v6832_v53, %v2952_v36  ;;  %v2881_v52 = vmul.f32 %v3903_v26, %v8126_v18  ;;  %v2629_v39 = vadd.f32 1e-05, %v2501_v19  ;;  %v2628_v41 = vadd.f32 1e-05, %v2500_v7  ;;  %v8130_v19 = vld [vmem:[#allocation32_spill] sm:$0xff] }
 0x2ea   :  { %v3086_v47 = vadd.f32 %v6832_v53, %v2951_v40  ;;  %v2880_v33 = vmul.f32 %v3905_v14, %v8127_v46  ;;  %v2135_v58 = vpop.xlane.xlu1 %2134  ;;  %v2132_v24 = vpop.xlane.xlu0 %2131 }
 0x2eb   :  { %3215 = vst.msk [vmem:[%s7455_s5 + $0x108] sm:$0xff] %vm1246_vm1, %v3087_v10  ;;  %v3016_v16 = vmul.f32 %v6815_v38, %v2881_v52  ;;  %3918 = vrsqrt.f32 %v2629_v39  ;;  %v2439_v6 = vmul.f32 0.020833334, %v2135_v58  ;;  %v2438_v61 = vmul.f32 0.020833334, %v2132_v24  ;;  %v8131_v10 = vld [vmem:[#allocation33_spill] sm:$0xff] }
 0x2ec   :  { %v3907_v55 = vpop.eup %3906  ;;  %3214 = vst.msk [vmem:[%s7455_s5 + $0x100] sm:$0xff] %vm1246_vm1, %v3086_v47  ;;  %v3015_v59 = vmul.f32 %v6815_v38, %v2880_v33  ;;  %3920 = vrsqrt.f32 %v2628_v41 }
 0x2ed   :  { %v3909_v17 = vpop.eup %3908  ;;  %v3151_v20 = vadd.f32 %v6832_v53, %v3016_v16  ;;  %v2819_v57 = vmul.f32 %v3907_v55, %v8128_v49  ;;  %v2567_v43 = vadd.f32 1e-05, %v2439_v6  ;;  %v2566_v0 = vadd.f32 1e-05, %v2438_v61  ;;  %v8132_v6 = vld [vmem:[#allocation34_spill] sm:$0xff] }
 0x2ee   :  { %v3150_v37 = vadd.f32 %v6832_v53, %v3015_v59  ;;  %v2818_v31 = vmul.f32 %v3909_v17, %v8129_v62  ;;  %v2327_v22 = vpop.xlane.xlu1 %2326  ;;  %v2324_v25 = vpop.xlane.xlu0 %2323 }
 0x2ef   :  { %3279 = vst.msk [vmem:[%s7455_s5 + $0x308] sm:$0xff] %vm1246_vm1, %v3151_v20  ;;  %v2954_v12 = vmul.f32 %v6815_v38, %v2819_v57  ;;  %3922 = vrsqrt.f32 %v2567_v43  ;;  %v2503_v60 = vmul.f32 0.020833334, %v2327_v22  ;;  %v2502_v48 = vmul.f32 0.020833334, %v2324_v25  ;;  %v8133_v20 = vld [vmem:[#allocation35_spill] sm:$0xff] }
 0x2f0   :  { %v3911_v1 = vpop.eup %3910  ;;  %3278 = vst.msk [vmem:[%s7455_s5 + $0x300] sm:$0xff] %vm1246_vm1, %v3150_v37  ;;  %v2953_v11 = vmul.f32 %v6815_v38, %v2818_v31  ;;  %3924 = vrsqrt.f32 %v2566_v0 }
 0x2f1   :  { %v3913_v50 = vpop.eup %3912  ;;  %v3089_v36 = vadd.f32 %v6832_v53, %v2954_v12  ;;  %v2883_v7 = vmul.f32 %v3911_v1, %v8130_v19  ;;  %v2631_v26 = vadd.f32 1e-05, %v2503_v60  ;;  %v2630_v40 = vadd.f32 1e-05, %v2502_v48  ;;  %v8134_v60 = vld [vmem:[#allocation36_spill] sm:$0xff] }
 0x2f2   :  { %v3088_v14 = vadd.f32 %v6832_v53, %v2953_v11  ;;  %v2882_v18 = vmul.f32 %v3913_v50, %v8131_v10  ;;  %v2141_v52 = vpop.xlane.xlu1 %2140  ;;  %v2138_v39 = vpop.xlane.xlu0 %2137 }
 0x2f3   :  { %3217 = vst.msk [vmem:[%s7455_s5 + $0x118] sm:$0xff] %vm1246_vm1, %v3089_v36  ;;  %v3018_v41 = vmul.f32 %v6815_v38, %v2883_v7  ;;  %3926 = vrsqrt.f32 %v2631_v26  ;;  %v2441_v47 = vmul.f32 0.020833334, %v2141_v52  ;;  %v2440_v46 = vmul.f32 0.020833334, %v2138_v39  ;;  %v8135_v36 = vld [vmem:[#allocation37_spill] sm:$0xff] }
 0x2f4   :  { %v3915_v33 = vpop.eup %3914  ;;  %3216 = vst.msk [vmem:[%s7455_s5 + $0x110] sm:$0xff] %vm1246_vm1, %v3088_v14  ;;  %v3017_v58 = vmul.f32 %v6815_v38, %v2882_v18  ;;  %3928 = vrsqrt.f32 %v2630_v40 }
 0x2f5   :  { %v3917_v24 = vpop.eup %3916  ;;  %v3153_v16 = vadd.f32 %v6832_v53, %v3018_v41  ;;  %v2821_v61 = vmul.f32 %v3915_v33, %v8132_v6  ;;  %v2569_v55 = vadd.f32 1e-05, %v2441_v47  ;;  %v2568_v59 = vadd.f32 1e-05, %v2440_v46  ;;  %v8136_v47 = vld [vmem:[#allocation38_spill] sm:$0xff] }
 0x2f6   :  { %v3152_v17 = vadd.f32 %v6832_v53, %v3017_v58  ;;  %v2820_v49 = vmul.f32 %v3917_v24, %v8133_v20  ;;  %v2333_v57 = vpop.xlane.xlu1 %2332  ;;  %v2330_v43 = vpop.xlane.xlu0 %2329 }
 0x2f7   :  { %3281 = vst.msk [vmem:[%s7455_s5 + $0x318] sm:$0xff] %vm1246_vm1, %v3153_v16  ;;  %v2956_v0 = vmul.f32 %v6815_v38, %v2821_v61  ;;  %3930 = vrsqrt.f32 %v2569_v55  ;;  %v2505_v37 = vmul.f32 0.020833334, %v2333_v57  ;;  %v2504_v62 = vmul.f32 0.020833334, %v2330_v43  ;;  %v8137_v16 = vld [vmem:[#allocation39_spill] sm:$0xff] }
 0x2f8   :  { %v3919_v31 = vpop.eup %3918  ;;  %3280 = vst.msk [vmem:[%s7455_s5 + $0x310] sm:$0xff] %vm1246_vm1, %v3152_v17  ;;  %v2955_v22 = vmul.f32 %v6815_v38, %v2820_v49  ;;  %3932 = vrsqrt.f32 %v2568_v59 }
 0x2f9   :  { %v3921_v25 = vpop.eup %3920  ;;  %v3091_v12 = vadd.f32 %v6832_v53, %v2956_v0  ;;  %v2885_v48 = vmul.f32 %v3919_v31, %v8134_v60  ;;  %v2633_v1 = vadd.f32 1e-05, %v2505_v37  ;;  %v2632_v11 = vadd.f32 1e-05, %v2504_v62  ;;  %v8138_v37 = vld [vmem:[#allocation40_spill] sm:$0xff] }
 0x2fa   :  { %v3090_v50 = vadd.f32 %v6832_v53, %v2955_v22  ;;  %v2884_v19 = vmul.f32 %v3921_v25, %v8135_v36  ;;  %v2147_v7 = vpop.xlane.xlu1 %2146  ;;  %v2144_v26 = vpop.xlane.xlu0 %2143 }
 0x2fb   :  { %3219 = vst.msk [vmem:[%s7455_s5 + $0x128] sm:$0xff] %vm1246_vm1, %v3091_v12  ;;  %v3020_v40 = vmul.f32 %v6815_v38, %v2885_v48  ;;  %3934 = vrsqrt.f32 %v2633_v1  ;;  %v2443_v14 = vmul.f32 0.020833334, %v2147_v7  ;;  %v2442_v10 = vmul.f32 0.020833334, %v2144_v26  ;;  %v8139_v12 = vld [vmem:[#allocation41_spill] sm:$0xff] }
 0x2fc   :  { %v3923_v18 = vpop.eup %3922  ;;  %3218 = vst.msk [vmem:[%s7455_s5 + $0x120] sm:$0xff] %vm1246_vm1, %v3090_v50  ;;  %v3019_v52 = vmul.f32 %v6815_v38, %v2884_v19  ;;  %3936 = vrsqrt.f32 %v2632_v11 }
 0x2fd   :  { %v3925_v39 = vpop.eup %3924  ;;  %v3155_v41 = vadd.f32 %v6832_v53, %v3020_v40  ;;  %v2823_v46 = vmul.f32 %v3923_v18, %v8136_v47  ;;  %v2571_v33 = vadd.f32 1e-05, %v2443_v14  ;;  %v2570_v58 = vadd.f32 1e-05, %v2442_v10  ;;  %v8140_v14 = vld [vmem:[#allocation42_spill] sm:$0xff] }
 0x2fe   :  { %v3154_v24 = vadd.f32 %v6832_v53, %v3019_v52  ;;  %v2822_v6 = vmul.f32 %v3925_v39, %v8137_v16  ;;  %v2339_v61 = vpop.xlane.xlu1 %2338  ;;  %v2336_v55 = vpop.xlane.xlu0 %2335 }
 0x2ff   :  { %3283 = vst.msk [vmem:[%s7455_s5 + $0x328] sm:$0xff] %vm1246_vm1, %v3155_v41  ;;  %v2958_v59 = vmul.f32 %v6815_v38, %v2823_v46  ;;  %3938 = vrsqrt.f32 %v2571_v33  ;;  %v2507_v17 = vmul.f32 0.020833334, %v2339_v61  ;;  %v2506_v20 = vmul.f32 0.020833334, %v2336_v55  ;;  %v8141_v41 = vld [vmem:[#allocation43_spill] sm:$0xff] }
 0x300   :  { %v3927_v49 = vpop.eup %3926  ;;  %3282 = vst.msk [vmem:[%s7455_s5 + $0x320] sm:$0xff] %vm1246_vm1, %v3154_v24  ;;  %v2957_v57 = vmul.f32 %v6815_v38, %v2822_v6  ;;  %3940 = vrsqrt.f32 %v2570_v58 }
 0x301   :  { %v3929_v43 = vpop.eup %3928  ;;  %v3093_v0 = vadd.f32 %v6832_v53, %v2958_v59  ;;  %v2887_v62 = vmul.f32 %v3927_v49, %v8138_v37  ;;  %v2635_v31 = vadd.f32 1e-05, %v2507_v17  ;;  %v2634_v22 = vadd.f32 1e-05, %v2506_v20  ;;  %v8142_v17 = vld [vmem:[#allocation45_spill] sm:$0xff] }
 0x302   :  { %v3092_v25 = vadd.f32 %v6832_v53, %v2957_v57  ;;  %v2886_v60 = vmul.f32 %v3929_v43, %v8139_v12  ;;  %v2153_v48 = vpop.xlane.xlu1 %2152  ;;  %v2150_v1 = vpop.xlane.xlu0 %2149 }
 0x303   :  { %3221 = vst.msk [vmem:[%s7455_s5 + $0x138] sm:$0xff] %vm1246_vm1, %v3093_v0  ;;  %v3022_v11 = vmul.f32 %v6815_v38, %v2887_v62  ;;  %3942 = vrsqrt.f32 %v2635_v31  ;;  %v2445_v50 = vmul.f32 0.020833334, %v2153_v48  ;;  %v2444_v36 = vmul.f32 0.020833334, %v2150_v1  ;;  %v8143_v0 = vld [vmem:[#allocation46_spill] sm:$0xff] }
 0x304   :  { %v3931_v19 = vpop.eup %3930  ;;  %3220 = vst.msk [vmem:[%s7455_s5 + $0x130] sm:$0xff] %vm1246_vm1, %v3092_v25  ;;  %v3021_v7 = vmul.f32 %v6815_v38, %v2886_v60  ;;  %3944 = vrsqrt.f32 %v2634_v22 }
 0x305   :  { %v3933_v26 = vpop.eup %3932  ;;  %v3157_v40 = vadd.f32 %v6832_v53, %v3022_v11  ;;  %v2825_v10 = vmul.f32 %v3931_v19, %v8140_v14  ;;  %v2573_v18 = vadd.f32 1e-05, %v2445_v50  ;;  %v2572_v52 = vadd.f32 1e-05, %v2444_v36  ;;  %v8144_v50 = vld [vmem:[#allocation47_spill] sm:$0xff] }
 0x306   :  { %v3156_v39 = vadd.f32 %v6832_v53, %v3021_v7  ;;  %v2824_v47 = vmul.f32 %v3933_v26, %v8141_v41  ;;  %v2159_v46 = vpop.xlane.xlu1 %2158  ;;  %v2156_v33 = vpop.xlane.xlu0 %2155 }
 0x307   :  { %3285 = vst.msk [vmem:[%s7455_s5 + $0x338] sm:$0xff] %vm1246_vm1, %v3157_v40  ;;  %v2960_v58 = vmul.f32 %v6815_v38, %v2825_v10  ;;  %3946 = vrsqrt.f32 %v2573_v18  ;;  %v2447_v24 = vmul.f32 0.020833334, %v2159_v46  ;;  %v2446_v16 = vmul.f32 0.020833334, %v2156_v33  ;;  %v8145_v40 = vld [vmem:[#allocation48_spill] sm:$0xff] }
 0x308   :  { %v3935_v6 = vpop.eup %3934  ;;  %3284 = vst.msk [vmem:[%s7455_s5 + $0x330] sm:$0xff] %vm1246_vm1, %v3156_v39  ;;  %v2959_v61 = vmul.f32 %v6815_v38, %v2824_v47  ;;  %3948 = vrsqrt.f32 %v2572_v52 }
 0x309   :  { %v3937_v55 = vpop.eup %3936  ;;  %v3095_v59 = vadd.f32 %v6832_v53, %v2960_v58  ;;  %v2889_v20 = vmul.f32 %v3935_v6, %v8142_v17  ;;  %v2575_v49 = vadd.f32 1e-05, %v2447_v24  ;;  %v2574_v57 = vadd.f32 1e-05, %v2446_v16  ;;  %v8146_v24 = vld [vmem:[#allocation49_spill] sm:$0xff] }
 0x30a   :  { %v3094_v43 = vadd.f32 %v6832_v53, %v2959_v61  ;;  %v2888_v37 = vmul.f32 %v3937_v55, %v8143_v0  ;;  %v2165_v62 = vpop.xlane.xlu1 %2164  ;;  %v2162_v31 = vpop.xlane.xlu0 %2161 }
 0x30b   :  { %3223 = vst.msk [vmem:[%s7455_s5 + $0x148] sm:$0xff] %vm1246_vm1, %v3095_v59  ;;  %v3024_v22 = vmul.f32 %v6815_v38, %v2889_v20  ;;  %3950 = vrsqrt.f32 %v2575_v49  ;;  %v2449_v25 = vmul.f32 0.020833334, %v2165_v62  ;;  %v2448_v12 = vmul.f32 0.020833334, %v2162_v31  ;;  %v8147_v59 = vld [vmem:[#allocation50_spill] sm:$0xff] }
 0x30c   :  { %v3939_v60 = vpop.eup %3938  ;;  %3222 = vst.msk [vmem:[%s7455_s5 + $0x140] sm:$0xff] %vm1246_vm1, %v3094_v43  ;;  %v3023_v48 = vmul.f32 %v6815_v38, %v2888_v37  ;;  %3952 = vrsqrt.f32 %v2574_v57 }
 0x30d   :  { %v3941_v1 = vpop.eup %3940  ;;  %v3159_v11 = vadd.f32 %v6832_v53, %v3024_v22  ;;  %v2827_v36 = vmul.f32 %v3939_v60, %v8144_v50  ;;  %v2577_v19 = vadd.f32 1e-05, %v2449_v25  ;;  %v2576_v7 = vadd.f32 1e-05, %v2448_v12  ;;  %v8148_v25 = vld [vmem:[#allocation51_spill] sm:$0xff] }
 0x30e   :  { %v3158_v26 = vadd.f32 %v6832_v53, %v3023_v48  ;;  %v2826_v14 = vmul.f32 %v3941_v1, %v8145_v40  ;;  %v2171_v10 = vpop.xlane.xlu1 %2170  ;;  %v2168_v18 = vpop.xlane.xlu0 %2167 }
 0x30f   :  { %3287 = vst.msk [vmem:[%s7455_s5 + $0x348] sm:$0xff] %vm1246_vm1, %v3159_v11  ;;  %v2962_v52 = vmul.f32 %v6815_v38, %v2827_v36  ;;  %3954 = vrsqrt.f32 %v2577_v19  ;;  %v2451_v39 = vmul.f32 0.020833334, %v2171_v10  ;;  %v2450_v41 = vmul.f32 0.020833334, %v2168_v18  ;;  %v8149_v11 = vld [vmem:[#allocation52_spill] sm:$0xff] }
 0x310   :  { %v3943_v47 = vpop.eup %3942  ;;  %3286 = vst.msk [vmem:[%s7455_s5 + $0x340] sm:$0xff] %vm1246_vm1, %v3158_v26  ;;  %v2961_v46 = vmul.f32 %v6815_v38, %v2826_v14  ;;  %3956 = vrsqrt.f32 %v2576_v7 }
 0x311   :  { %v3945_v33 = vpop.eup %3944  ;;  %v3097_v58 = vadd.f32 %v6832_v53, %v2962_v52  ;;  %v2891_v16 = vmul.f32 %v3943_v47, %v8146_v24  ;;  %v2579_v6 = vadd.f32 1e-05, %v2451_v39  ;;  %v2578_v61 = vadd.f32 1e-05, %v2450_v41  ;;  %v8150_v39 = vld [vmem:[#allocation55_spill] sm:$0xff] }
 0x312   :  { %v3096_v55 = vadd.f32 %v6832_v53, %v2961_v46  ;;  %v2890_v17 = vmul.f32 %v3945_v33, %v8147_v59  ;;  %v2177_v20 = vpop.xlane.xlu1 %2176  ;;  %v2174_v49 = vpop.xlane.xlu0 %2173 }
 0x313   :  { %3225 = vst.msk [vmem:[%s7455_s5 + $0x158] sm:$0xff] %vm1246_vm1, %v3097_v58  ;;  %v3026_v57 = vmul.f32 %v6815_v38, %v2891_v16  ;;  %3958 = vrsqrt.f32 %v2579_v6  ;;  %v2453_v43 = vmul.f32 0.020833334, %v2177_v20  ;;  %v2452_v0 = vmul.f32 0.020833334, %v2174_v49  ;;  %v8151_v58 = vld [vmem:[#allocation56_spill] sm:$0xff] }
 0x314   :  { %v3947_v37 = vpop.eup %3946  ;;  %3224 = vst.msk [vmem:[%s7455_s5 + $0x150] sm:$0xff] %vm1246_vm1, %v3096_v55  ;;  %v3025_v62 = vmul.f32 %v6815_v38, %v2890_v17  ;;  %3960 = vrsqrt.f32 %v2578_v61 }
 0x315   :  { %v3949_v31 = vpop.eup %3948  ;;  %v3161_v22 = vadd.f32 %v6832_v53, %v3026_v57  ;;  %v2829_v12 = vmul.f32 %v3947_v37, %v8148_v25  ;;  %v2581_v60 = vadd.f32 1e-05, %v2453_v43  ;;  %v2580_v48 = vadd.f32 1e-05, %v2452_v0  ;;  %v8152_v43 = vld [vmem:[#allocation61_spill] sm:$0xff] }
 0x316   :  { %v3160_v1 = vadd.f32 %v6832_v53, %v3025_v62  ;;  %v2828_v50 = vmul.f32 %v3949_v31, %v8149_v11  ;;  %v2183_v36 = vpop.xlane.xlu1 %2182  ;;  %v2180_v19 = vpop.xlane.xlu0 %2179 }
 0x317   :  { %3289 = vst.msk [vmem:[%s7455_s5 + $0x358] sm:$0xff] %vm1246_vm1, %v3161_v22  ;;  %v2964_v7 = vmul.f32 %v6815_v38, %v2829_v12  ;;  %3962 = vrsqrt.f32 %v2581_v60  ;;  %v2455_v26 = vmul.f32 0.020833334, %v2183_v36  ;;  %v2454_v40 = vmul.f32 0.020833334, %v2180_v19  ;;  %v8153_v22 = vld [vmem:[#allocation62_spill] sm:$0xff] }
 0x318   :  { %v3951_v14 = vpop.eup %3950  ;;  %3288 = vst.msk [vmem:[%s7455_s5 + $0x350] sm:$0xff] %vm1246_vm1, %v3160_v1  ;;  %v2963_v10 = vmul.f32 %v6815_v38, %v2828_v50  ;;  %3964 = vrsqrt.f32 %v2580_v48 }
 0x319   :  { %v3953_v18 = vpop.eup %3952  ;;  %v3099_v52 = vadd.f32 %v6832_v53, %v2964_v7  ;;  %v2831_v41 = vmul.f32 %v3951_v14, %v8150_v39  ;;  %v2583_v47 = vadd.f32 1e-05, %v2455_v26  ;;  %v2582_v46 = vadd.f32 1e-05, %v2454_v40  ;;  %v8154_v26 = vld [vmem:[#allocation65_spill] sm:$0xff] }
 0x31a   :  { %v3098_v33 = vadd.f32 %v6832_v53, %v2963_v10  ;;  %v2830_v24 = vmul.f32 %v3953_v18, %v8151_v58  ;;  %v2189_v16 = vpop.xlane.xlu1 %2188  ;;  %v2186_v6 = vpop.xlane.xlu0 %2185 }
 0x31b   :  { %3227 = vst.msk [vmem:[%s7455_s5 + $0x168] sm:$0xff] %vm1246_vm1, %v3099_v52  ;;  %v2966_v61 = vmul.f32 %v6815_v38, %v2831_v41  ;;  %3966 = vrsqrt.f32 %v2583_v47  ;;  %v2457_v55 = vmul.f32 0.020833334, %v2189_v16  ;;  %v2456_v59 = vmul.f32 0.020833334, %v2186_v6  ;;  %v8155_v52 = vld [vmem:[#allocation66_spill] sm:$0xff] }
 0x31c   :  { %v3955_v17 = vpop.eup %3954  ;;  %3226 = vst.msk [vmem:[%s7455_s5 + $0x160] sm:$0xff] %vm1246_vm1, %v3098_v33  ;;  %v2965_v20 = vmul.f32 %v6815_v38, %v2830_v24  ;;  %3968 = vrsqrt.f32 %v2582_v46 }
 0x31d   :  { %v3957_v49 = vpop.eup %3956  ;;  %v3101_v57 = vadd.f32 %v6832_v53, %v2966_v61  ;;  %v2833_v0 = vmul.f32 %v3955_v17, %v8152_v43  ;;  %v2585_v37 = vadd.f32 1e-05, %v2457_v55  ;;  %v2584_v62 = vadd.f32 1e-05, %v2456_v59 }
 0x31e   :  { %v3100_v31 = vadd.f32 %v6832_v53, %v2965_v20  ;;  %v2832_v25 = vmul.f32 %v3957_v49, %v8153_v22  ;;  %v2195_v12 = vpop.xlane.xlu1 %2194  ;;  %v2192_v60 = vpop.xlane.xlu0 %2191 }
 0x31f   :  { %3229 = vst.msk [vmem:[%s7455_s5 + $0x178] sm:$0xff] %vm1246_vm1, %v3101_v57  ;;  %v2968_v48 = vmul.f32 %v6815_v38, %v2833_v0  ;;  %3970 = vrsqrt.f32 %v2585_v37  ;;  %v2459_v1 = vmul.f32 0.020833334, %v2195_v12  ;;  %v2458_v11 = vmul.f32 0.020833334, %v2192_v60 }
 0x320   :  { %v3959_v50 = vpop.eup %3958  ;;  %3228 = vst.msk [vmem:[%s7455_s5 + $0x170] sm:$0xff] %vm1246_vm1, %v3100_v31  ;;  %v2967_v36 = vmul.f32 %v6815_v38, %v2832_v25  ;;  %3972 = vrsqrt.f32 %v2584_v62 }
 0x321   :  { %v3961_v19 = vpop.eup %3960  ;;  %v3103_v7 = vadd.f32 %v6832_v53, %v2968_v48  ;;  %v2835_v40 = vmul.f32 %v3959_v50, %v8154_v26  ;;  %v2587_v14 = vadd.f32 1e-05, %v2459_v1  ;;  %v2586_v10 = vadd.f32 1e-05, %v2458_v11  ;;  %v7242_v26 = vld [vmem:[%s7454_s4] ss:$0 sm:$0xff] }
 0x322   :  { %v3102_v18 = vadd.f32 %v6832_v53, %v2967_v36  ;;  %v2834_v39 = vmul.f32 %v3961_v19, %v8155_v52  ;;  %v2201_v41 = vpop.xlane.xlu1 %2200  ;;  %v2198_v47 = vpop.xlane.xlu0 %2197 }
 0x323   :  { %3231 = vst.msk [vmem:[%s7455_s5 + $0x188] sm:$0xff] %vm1246_vm1, %v3103_v7  ;;  %v2970_v46 = vmul.f32 %v6815_v38, %v2835_v40  ;;  %3974 = vrsqrt.f32 %v2587_v14  ;;  %v2461_v33 = vmul.f32 0.020833334, %v2201_v41  ;;  %v2460_v58 = vmul.f32 0.020833334, %v2198_v47 }
 0x324   :  { %v3963_v24 = vpop.eup %3962  ;;  %3230 = vst.msk [vmem:[%s7455_s5 + $0x180] sm:$0xff] %vm1246_vm1, %v3102_v18  ;;  %v2969_v16 = vmul.f32 %v6815_v38, %v2834_v39  ;;  %3976 = vrsqrt.f32 %v2586_v10 }
 0x325   :  { %v3965_v6 = vpop.eup %3964  ;;  %v3105_v61 = vadd.f32 %v6832_v53, %v2970_v46  ;;  %v2837_v55 = vmul.f32 %v3963_v24, %v6284_v5  ;;  %v2589_v59 = vadd.f32 1e-05, %v2461_v33  ;;  %v2588_v17 = vadd.f32 1e-05, %v2460_v58 }
 0x326   :  { %v3104_v20 = vadd.f32 %v6832_v53, %v2969_v16  ;;  %v2836_v49 = vmul.f32 %v3965_v6, %v6290_v9  ;;  %v2207_v57 = vpop.xlane.xlu1 %2206  ;;  %v2204_v43 = vpop.xlane.xlu0 %2203 }
 0x327   :  { %3233 = vst.msk [vmem:[%s7455_s5 + $0x198] sm:$0xff] %vm1246_vm1, %v3105_v61  ;;  %v2972_v0 = vmul.f32 %v6815_v38, %v2837_v55  ;;  %3978 = vrsqrt.f32 %v2589_v59  ;;  %v2463_v37 = vmul.f32 0.020833334, %v2207_v57  ;;  %v2462_v62 = vmul.f32 0.020833334, %v2204_v43 }
 0x328   :  { %v3967_v31 = vpop.eup %3966  ;;  %3232 = vst.msk [vmem:[%s7455_s5 + $0x190] sm:$0xff] %vm1246_vm1, %v3104_v20  ;;  %v2971_v5 = vmul.f32 %v6815_v38, %v2836_v49  ;;  %3980 = vrsqrt.f32 %v2588_v17  ;;  %v7231_v38 = vld [vmem:[%s7453_s3] ss:$0 sm:$0xff] }
 0x329   :  { %v3969_v9 = vpop.eup %3968  ;;  %v3107_v22 = vadd.f32 %v6832_v53, %v2972_v0  ;;  %v2839_v25 = vmul.f32 %v3967_v31, %v6378_v15  ;;  %v2591_v12 = vadd.f32 1e-05, %v2463_v37  ;;  %v2590_v60 = vadd.f32 1e-05, %v2462_v62 }
 0x32a   :  { %v3106_v48 = vadd.f32 %v6832_v53, %v2971_v5  ;;  %v2838_v1 = vmul.f32 %v3969_v9, %v6381_v13  ;;  %v2345_v11 = vpop.xlane.xlu1 %2344  ;;  %v2342_v50 = vpop.xlane.xlu0 %2341 }
 0x32b   :  { %3235 = vst.msk [vmem:[%s7455_s5 + $0x1a8] sm:$0xff] %vm1246_vm1, %v3107_v22  ;;  %v2974_v15 = vmul.f32 %v7231_v38, %v2839_v25  ;;  %3982 = vrsqrt.f32 %v2591_v12  ;;  %v2509_v36 = vmul.f32 0.020833334, %v2345_v11  ;;  %v2508_v19 = vmul.f32 0.020833334, %v2342_v50 }
 0x32c   :  { %v3971_v53 = vpop.eup %3970  ;;  %3234 = vst.msk [vmem:[%s7455_s5 + $0x1a0] sm:$0xff] %vm1246_vm1, %v3106_v48  ;;  %v2973_v13 = vmul.f32 %v7231_v38, %v2838_v1  ;;  %3984 = vrsqrt.f32 %v2590_v60 }
 0x32d   :  { %v3973_v7 = vpop.eup %3972  ;;  %v3109_v40 = vadd.f32 %v7242_v26, %v2974_v15  ;;  %v2841_v14 = vmul.f32 %v3971_v53, %v6443_v44  ;;  %v2637_v10 = vadd.f32 1e-05, %v2509_v36  ;;  %v2636_v18 = vadd.f32 1e-05, %v2508_v19 }
 0x32e   :  { %v3108_v52 = vadd.f32 %v7242_v26, %v2973_v13  ;;  %v2840_v39 = vmul.f32 %v3973_v7, %v6446_v34  ;;  %v2351_v41 = vpop.xlane.xlu1 %2350  ;;  %v2348_v47 = vpop.xlane.xlu0 %2347 }
 0x32f   :  { %3237 = vst.msk [vmem:[%s7455_s5 + $0x1b8] sm:$0xff] %vm1246_vm1, %v3109_v40  ;;  %v2976_v46 = vmul.f32 %v7231_v38, %v2841_v14  ;;  %3986 = vrsqrt.f32 %v2637_v10  ;;  %v2511_v33 = vmul.f32 0.020833334, %v2351_v41  ;;  %v2510_v58 = vmul.f32 0.020833334, %v2348_v47  ;;  %v8156_v47 = vld [vmem:[#allocation53_spill] sm:$0xff] }
 0x330   :  { %v3975_v24 = vpop.eup %3974  ;;  %3236 = vst.msk [vmem:[%s7455_s5 + $0x1b0] sm:$0xff] %vm1246_vm1, %v3108_v52  ;;  %v2975_v44 = vmul.f32 %v7231_v38, %v2840_v39  ;;  %3988 = vrsqrt.f32 %v2636_v18 }
 0x331   :  { %v3977_v34 = vpop.eup %3976  ;;  %v3111_v16 = vadd.f32 %v7242_v26, %v2976_v46  ;;  %v2843_v6 = vmul.f32 %v3975_v24, %v6478_v21  ;;  %v2639_v61 = vadd.f32 1e-05, %v2511_v33  ;;  %v2638_v55 = vadd.f32 1e-05, %v2510_v58 }
 0x332   :  { %v3110_v59 = vadd.f32 %v7242_v26, %v2975_v44  ;;  %v2842_v17 = vmul.f32 %v3977_v34, %v6481_v45  ;;  %v2357_v20 = vpop.xlane.xlu1 %2356  ;;  %v2354_v49 = vpop.xlane.xlu0 %2353  ;;  %v8157_v44 = vld [vmem:[#allocation54_spill] sm:$0xff] }
 0x333   :  { %3239 = vst.msk [vmem:[%s7455_s5 + $0x1c8] sm:$0xff] %vm1246_vm1, %v3111_v16  ;;  %v2978_v57 = vmul.f32 %v7231_v38, %v2843_v6  ;;  %3990 = vrsqrt.f32 %v2639_v61  ;;  %v2513_v43 = vmul.f32 0.020833334, %v2357_v20  ;;  %v2512_v0 = vmul.f32 0.020833334, %v2354_v49 }
 0x334   :  { %v3979_v37 = vpop.eup %3978  ;;  %3238 = vst.msk [vmem:[%s7455_s5 + $0x1c0] sm:$0xff] %vm1246_vm1, %v3110_v59  ;;  %v2977_v21 = vmul.f32 %v7231_v38, %v2842_v17  ;;  %3992 = vrsqrt.f32 %v2638_v55 }
 0x335   :  { %v3981_v45 = vpop.eup %3980  ;;  %v3113_v62 = vadd.f32 %v7242_v26, %v2978_v57  ;;  %v2845_v31 = vmul.f32 %v3979_v37, %v6539_v2  ;;  %v2641_v5 = vadd.f32 1e-05, %v2513_v43  ;;  %v2640_v9 = vadd.f32 1e-05, %v2512_v0  ;;  %v8158_v43 = vld [vmem:[#allocation59_spill] sm:$0xff] }
 0x336   :  { %v3112_v22 = vadd.f32 %v7242_v26, %v2977_v21  ;;  %v2844_v25 = vmul.f32 %v3981_v45, %v6542_v30  ;;  %v2363_v12 = vpop.xlane.xlu1 %2362  ;;  %v2360_v60 = vpop.xlane.xlu0 %2359 }
 0x337   :  { %3241 = vst.msk [vmem:[%s7455_s5 + $0x1d8] sm:$0xff] %vm1246_vm1, %v3113_v62  ;;  %v2980_v48 = vmul.f32 %v7231_v38, %v2845_v31  ;;  %3994 = vrsqrt.f32 %v2641_v5  ;;  %v2515_v1 = vmul.f32 0.020833334, %v2363_v12  ;;  %v2514_v11 = vmul.f32 0.020833334, %v2360_v60  ;;  %v8159_v62 = vld [vmem:[#allocation60_spill] sm:$0xff] }
 0x338   :  { %v3983_v50 = vpop.eup %3982  ;;  %3240 = vst.msk [vmem:[%s7455_s5 + $0x1d0] sm:$0xff] %vm1246_vm1, %v3112_v22  ;;  %v2979_v2 = vmul.f32 %v7231_v38, %v2844_v25  ;;  %3996 = vrsqrt.f32 %v2640_v9 }
 0x339   :  { %v3985_v30 = vpop.eup %3984  ;;  %v3115_v15 = vadd.f32 %v7242_v26, %v2980_v48  ;;  %v2847_v36 = vmul.f32 %v3983_v50, %v6574_v27  ;;  %v2643_v19 = vadd.f32 1e-05, %v2515_v1  ;;  %v2642_v53 = vadd.f32 1e-05, %v2514_v11  ;;  %v8160_v50 = vld [vmem:[#allocation63_spill] sm:$0xff] }
 0x33a   :  { %v3114_v13 = vadd.f32 %v7242_v26, %v2979_v2  ;;  %v2846_v7 = vmul.f32 %v3985_v30, %v6577_v56  ;;  %v2369_v40 = vpop.xlane.xlu1 %2368  ;;  %v2366_v14 = vpop.xlane.xlu0 %2365 }
 0x33b   :  { %3243 = vst.msk [vmem:[%s7455_s5 + $0x1e8] sm:$0xff] %vm1246_vm1, %v3115_v15  ;;  %v2982_v10 = vmul.f32 %v7231_v38, %v2847_v36  ;;  %3998 = vrsqrt.f32 %v2643_v19  ;;  %v2517_v18 = vmul.f32 0.020833334, %v2369_v40  ;;  %v2516_v52 = vmul.f32 0.020833334, %v2366_v14  ;;  %v8161_v19 = vld [vmem:[#allocation64_spill] sm:$0xff] }
 0x33c   :  { %v3987_v39 = vpop.eup %3986  ;;  %3242 = vst.msk [vmem:[%s7455_s5 + $0x1e0] sm:$0xff] %vm1246_vm1, %v3114_v13  ;;  %v2981_v27 = vmul.f32 %v7231_v38, %v2846_v7  ;;  %4000 = vrsqrt.f32 %v2642_v53 }
 0x33d   :  { %v3989_v56 = vpop.eup %3988  ;;  %v3117_v41 = vadd.f32 %v7242_v26, %v2982_v10  ;;  %v2893_v46 = vmul.f32 %v3987_v39, %v8156_v47  ;;  %v2645_v33 = vadd.f32 1e-05, %v2517_v18  ;;  %v2644_v58 = vadd.f32 1e-05, %v2516_v52 }
 0x33e   :  { %v3116_v24 = vadd.f32 %v7242_v26, %v2981_v27  ;;  %v2892_v34 = vmul.f32 %v3989_v56, %v8157_v44  ;;  %v2375_v16 = vpop.xlane.xlu1 %2374  ;;  %v2372_v6 = vpop.xlane.xlu0 %2371  ;;  %v8162_v56 = vld [vmem:[#allocation67_spill] sm:$0xff] }
 0x33f   :  { %3245 = vst.msk [vmem:[%s7455_s5 + $0x1f8] sm:$0xff] %vm1246_vm1, %v3117_v41  ;;  %v3028_v61 = vmul.f32 %v7231_v38, %v2893_v46  ;;  %4002 = vrsqrt.f32 %v2645_v33  ;;  %v2519_v55 = vmul.f32 0.020833334, %v2375_v16  ;;  %v2518_v59 = vmul.f32 0.020833334, %v2372_v6 }
 0x340   :  { %v3991_v17 = vpop.eup %3990  ;;  %3244 = vst.msk [vmem:[%s7455_s5 + $0x1f0] sm:$0xff] %vm1246_vm1, %v3116_v24  ;;  %v3027_v20 = vmul.f32 %v7231_v38, %v2892_v34  ;;  %4004 = vrsqrt.f32 %v2644_v58  ;;  %v8163_v58 = vld [vmem:[#allocation68_spill] sm:$0xff] }
 0x341   :  { %v3993_v49 = vpop.eup %3992  ;;  %v3163_v57 = vadd.f32 %v7242_v26, %v3028_v61  ;;  %v2895_v0 = vmul.f32 %v3991_v17, %v8158_v43  ;;  %v2647_v37 = vadd.f32 1e-05, %v2519_v55  ;;  %v2646_v21 = vadd.f32 1e-05, %v2518_v59 }
 0x342   :  { %v3162_v45 = vadd.f32 %v7242_v26, %v3027_v20  ;;  %v2894_v31 = vmul.f32 %v3993_v49, %v8159_v62  ;;  %v2381_v5 = vpop.xlane.xlu1 %2380  ;;  %v2378_v9 = vpop.xlane.xlu0 %2377 }
 0x343   :  { %3291 = vst.msk [vmem:[%s7455_s5 + $0x368] sm:$0xff] %vm1246_vm1, %v3163_v57  ;;  %v3030_v22 = vmul.f32 %v7231_v38, %v2895_v0  ;;  %4006 = vrsqrt.f32 %v2647_v37  ;;  %v2521_v25 = vmul.f32 0.020833334, %v2381_v5  ;;  %v2520_v12 = vmul.f32 0.020833334, %v2378_v9 }
 0x344   :  { %v3995_v60 = vpop.eup %3994  ;;  %3290 = vst.msk [vmem:[%s7455_s5 + $0x360] sm:$0xff] %vm1246_vm1, %v3162_v45  ;;  %v3029_v48 = vmul.f32 %v7231_v38, %v2894_v31  ;;  %4008 = vrsqrt.f32 %v2646_v21 }
 0x345   :  { %v3997_v1 = vpop.eup %3996  ;;  %v3165_v11 = vadd.f32 %v7242_v26, %v3030_v22  ;;  %v2897_v2 = vmul.f32 %v3995_v60, %v8160_v50  ;;  %v2649_v30 = vadd.f32 1e-05, %v2521_v25  ;;  %v2648_v15 = vadd.f32 1e-05, %v2520_v12 }
 0x346   :  { %v3164_v36 = vadd.f32 %v7242_v26, %v3029_v48  ;;  %v2896_v53 = vmul.f32 %v3997_v1, %v8161_v19  ;;  %v2387_v13 = vpop.xlane.xlu1 %2386  ;;  %v2384_v7 = vpop.xlane.xlu0 %2383 }
 0x347   :  { %3293 = vst.msk [vmem:[%s7455_s5 + $0x378] sm:$0xff] %vm1246_vm1, %v3165_v11  ;;  %v3032_v40 = vmul.f32 %v7231_v38, %v2897_v2  ;;  %4010 = vrsqrt.f32 %v2649_v30  ;;  %v2523_v14 = vmul.f32 0.020833334, %v2387_v13  ;;  %v2522_v10 = vmul.f32 0.020833334, %v2384_v7 }
 0x348   :  { %v3999_v18 = vpop.eup %3998  ;;  %3292 = vst.msk [vmem:[%s7455_s5 + $0x370] sm:$0xff] %vm1246_vm1, %v3164_v36  ;;  %v3031_v52 = vmul.f32 %v7231_v38, %v2896_v53  ;;  %4012 = vrsqrt.f32 %v2648_v15 }
 0x349   :  { %v4001_v39 = vpop.eup %4000  ;;  %v3167_v27 = vadd.f32 %v7242_v26, %v3032_v40  ;;  %v2899_v41 = vmul.f32 %v3999_v18, %v8162_v56  ;;  %v2651_v47 = vadd.f32 1e-05, %v2523_v14  ;;  %v2650_v46 = vadd.f32 1e-05, %v2522_v10 }
 0x34a   :  { %v3166_v33 = vadd.f32 %v7242_v26, %v3031_v52  ;;  %v2898_v24 = vmul.f32 %v4001_v39, %v8163_v58  ;;  %v2393_v44 = vpop.xlane.xlu1 %2392  ;;  %v2390_v34 = vpop.xlane.xlu0 %2389 }
 0x34b   :  { %3295 = vst.msk [vmem:[%s7455_s5 + $0x388] sm:$0xff] %vm1246_vm1, %v3167_v27  ;;  %v3034_v16 = vmul.f32 %v7231_v38, %v2899_v41  ;;  %4014 = vrsqrt.f32 %v2651_v47  ;;  %v2525_v6 = vmul.f32 0.020833334, %v2393_v44  ;;  %v2524_v61 = vmul.f32 0.020833334, %v2390_v34 }
 0x34c   :  { %v4003_v55 = vpop.eup %4002  ;;  %3294 = vst.msk [vmem:[%s7455_s5 + $0x380] sm:$0xff] %vm1246_vm1, %v3166_v33  ;;  %v3033_v59 = vmul.f32 %v7231_v38, %v2898_v24  ;;  %4016 = vrsqrt.f32 %v2650_v46 }
 0x34d   :  { %v4005_v17 = vpop.eup %4004  ;;  %v3169_v20 = vadd.f32 %v7242_v26, %v3034_v16  ;;  %v2901_v49 = vmul.f32 %v4003_v55, %v6324_v42  ;;  %v2653_v57 = vadd.f32 1e-05, %v2525_v6  ;;  %v2652_v43 = vadd.f32 1e-05, %v2524_v61 }
 0x34e   :  { %v3168_v0 = vadd.f32 %v7242_v26, %v3033_v59  ;;  %v2900_v37 = vmul.f32 %v4005_v17, %v6327_v63  ;;  %v2399_v21 = vpop.xlane.xlu1 %2398  ;;  %v2396_v45 = vpop.xlane.xlu0 %2395 }
 0x34f   :  { %3297 = vst.msk [vmem:[%s7455_s5 + $0x398] sm:$0xff] %vm1246_vm1, %v3169_v20  ;;  %v3036_v62 = vmul.f32 %v7231_v38, %v2901_v49  ;;  %4018 = vrsqrt.f32 %v2653_v57  ;;  %v2527_v31 = vmul.f32 0.020833334, %v2399_v21  ;;  %v2526_v5 = vmul.f32 0.020833334, %v2396_v45 }
 0x350   :  { %v4007_v9 = vpop.eup %4006  ;;  %3296 = vst.msk [vmem:[%s7455_s5 + $0x390] sm:$0xff] %vm1246_vm1, %v3168_v0  ;;  %v3035_v42 = vmul.f32 %v7231_v38, %v2900_v37  ;;  %4020 = vrsqrt.f32 %v2652_v43 }
 0x351   :  { %v4009_v63 = vpop.eup %4008  ;;  %v3171_v22 = vadd.f32 %v7242_v26, %v3036_v62  ;;  %v2903_v25 = vmul.f32 %v4007_v9, %v6608_v28  ;;  %v2655_v12 = vadd.f32 1e-05, %v2527_v31  ;;  %v2654_v60 = vadd.f32 1e-05, %v2526_v5 }
 0x352   :  { %v3170_v48 = vadd.f32 %v7242_v26, %v3035_v42  ;;  %v2902_v1 = vmul.f32 %v4009_v63, %v6612_v23 }
 0x353   :  { %3299 = vst.msk [vmem:[%s7455_s5 + $0x3a8] sm:$0xff] %vm1246_vm1, %v3171_v22  ;;  %v3038_v11 = vmul.f32 %v7231_v38, %v2903_v25  ;;  %4022 = vrsqrt.f32 %v2655_v12 }
 0x354   :  { %v4011_v50 = vpop.eup %4010  ;;  %3298 = vst.msk [vmem:[%s7455_s5 + $0x3a0] sm:$0xff] %vm1246_vm1, %v3170_v48  ;;  %v3037_v28 = vmul.f32 %v7231_v38, %v2902_v1  ;;  %4024 = vrsqrt.f32 %v2654_v60 }
 0x355   :  { %v4013_v2 = vpop.eup %4012  ;;  %v3173_v23 = vadd.f32 %v7242_v26, %v3038_v11  ;;  %v2905_v30 = vmul.f32 %v4011_v50, %v6683_v3 }
 0x356   :  { %v3172_v15 = vadd.f32 %v7242_v26, %v3037_v28  ;;  %v2904_v36 = vmul.f32 %v4013_v2, %v6686_v35 }
 0x357   :  { %3301 = vst.msk [vmem:[%s7455_s5 + $0x3b8] sm:$0xff] %vm1246_vm1, %v3173_v23  ;;  %v3040_v19 = vmul.f32 %v7231_v38, %v2905_v30 }
 0x358   :  { %v4015_v53 = vpop.eup %4014  ;;  %3300 = vst.msk [vmem:[%s7455_s5 + $0x3b0] sm:$0xff] %vm1246_vm1, %v3172_v15  ;;  %v3039_v13 = vmul.f32 %v7231_v38, %v2904_v36 }
 0x359   :  { %v4017_v3 = vpop.eup %4016  ;;  %v3175_v7 = vadd.f32 %v7242_v26, %v3040_v19  ;;  %v2907_v35 = vmul.f32 %v4015_v53, %v6718_v8 }
 0x35a   :  { %v3174_v40 = vadd.f32 %v7242_v26, %v3039_v13  ;;  %v2906_v14 = vmul.f32 %v4017_v3, %v6721_v4 }
 0x35b   :  { %3303 = vst.msk [vmem:[%s7455_s5 + $0x3c8] sm:$0xff] %vm1246_vm1, %v3175_v7  ;;  %v3042_v10 = vmul.f32 %v7231_v38, %v2907_v35 }
 0x35c   :  { %v4019_v18 = vpop.eup %4018  ;;  %3302 = vst.msk [vmem:[%s7455_s5 + $0x3c0] sm:$0xff] %vm1246_vm1, %v3174_v40  ;;  %v3041_v52 = vmul.f32 %v7231_v38, %v2906_v14 }
 0x35d   :  { %v4021_v8 = vpop.eup %4020  ;;  %v3177_v39 = vadd.f32 %v7242_v26, %v3042_v10  ;;  %v2909_v4 = vmul.f32 %v4019_v18, %v6779_v29 }
 0x35e   :  { %v3176_v27 = vadd.f32 %v7242_v26, %v3041_v52  ;;  %v2908_v56 = vmul.f32 %v4021_v8, %v6782_v54 }
 0x35f   :  { %3305 = vst.msk [vmem:[%s7455_s5 + $0x3d8] sm:$0xff] %vm1246_vm1, %v3177_v39  ;;  %v3044_v41 = vmul.f32 %v7231_v38, %v2909_v4 }
 0x360   :  { %v4023_v47 = vpop.eup %4022  ;;  %3304 = vst.msk [vmem:[%s7455_s5 + $0x3d0] sm:$0xff] %vm1246_vm1, %v3176_v27  ;;  %v3043_v46 = vmul.f32 %v7231_v38, %v2908_v56 }
 0x361   :  { %v4025_v29 = vpop.eup %4024  ;;  %v3179_v33 = vadd.f32 %v7242_v26, %v3044_v41  ;;  %v2911_v54 = vmul.f32 %v4023_v47, %v6819_v51 }
 0x362   :  { %v3178_v58 = vadd.f32 %v7242_v26, %v3043_v46  ;;  %v2910_v24 = vmul.f32 %v4025_v29, %v6822_v32 }
 0x363   :  { %3307 = vst.msk [vmem:[%s7455_s5 + $0x3e8] sm:$0xff] %vm1246_vm1, %v3179_v33  ;;  %v3046_v44 = vmul.f32 %v7231_v38, %v2911_v54 }
 0x364   :  { %3306 = vst.msk [vmem:[%s7455_s5 + $0x3e0] sm:$0xff] %vm1246_vm1, %v3178_v58  ;;  %v3045_v34 = vmul.f32 %v7231_v38, %v2910_v24 }
 0x365   :  { %v3181_v51 = vadd.f32 %v7242_v26, %v3046_v44 }
 0x366   :  { %v3180_v16 = vadd.f32 %v7242_v26, %v3045_v34 }
 0x367   :  { %3309 = vst.msk [vmem:[%s7455_s5 + $0x3f8] sm:$0xff] %vm1246_vm1, %v3181_v51 }
 0x368   :  { %3308 = vst.msk [vmem:[%s7455_s5 + $0x3f0] sm:$0xff] %vm1246_vm1, %v3180_v16 }

// kernel: _lambda_.11
= control target key start
LH: loop header
LB: loop body
LE: loop exit
PB: predicated region body
PF: predicated region fallthrough
CT: control target
= control target key end

     0   :  { %vm943_vm0 = vcmask 785408   ;;  %s2062_s0 = inlined_call_operand.vmem [shape: f32[128,384], index: 0, kind: input, shape index: {}]   ;;  %s2063_s3 = inlined_call_operand.vmem [shape: bf16[384,96], index: 3, kind: input, shape index: {}]   ;;  %s2064_s1 = inlined_call_operand.vmem [shape: f32[1,384], index: 1, kind: input, shape index: {}]   ;;  %s2065_s2 = inlined_call_operand.vmem [shape: f32[1,384], index: 2, kind: input, shape index: {}]   ;;  %s2066_s4 = inlined_call_operand.vmem [shape: f32[128,96], index: 4, kind: output, shape index: {}]  }
   0x1   :  { %v1184_v0 = vld [vmem:[%s2062_s0] sm:$0xff]  ;;  %v1189_v1 = vld [vmem:[%s2062_s0 + $0x8] sm:$0xff]  ;;  %v1194_v2 = vld [vmem:[%s2062_s0 + $0x10] sm:$0xff] }
   0x2   :  { %v66_v3 = vadd.f32 %v1189_v1, %v1184_v0  ;;  %v1201_v4 = vld [vmem:[%s2062_s0 + $0x30] sm:$0xff]  ;;  %v1206_v5 = vld [vmem:[%s2062_s0 + $0x38] sm:$0xff]  ;;  %v1211_v6 = vld [vmem:[%s2062_s0 + $0x40] sm:$0xff] }
   0x3   :  { %v74_v7 = vadd.f32 %v1206_v5, %v1201_v4  ;;  %v1218_v8 = vld [vmem:[%s2062_s0 + $0x18] sm:$0xff]  ;;  %v1223_v9 = vld [vmem:[%s2062_s0 + $0x20] sm:$0xff]  ;;  %v1228_v10 = vld [vmem:[%s2062_s0 + $0x28] sm:$0xff] }
   0x4   :  { %v67_v11 = vadd.f32 %v66_v3, %v1194_v2  ;;  %v70_v12 = vadd.f32 %v1223_v9, %v1218_v8  ;;  %v1236_v13 = vld [vmem:[%s2062_s0 + $0x48] sm:$0xff]  ;;  %v1241_v14 = vld [vmem:[%s2062_s0 + $0x50] sm:$0xff]  ;;  %v1246_v15 = vld [vmem:[%s2062_s0 + $0x58] sm:$0xff] }
   0x5   :  { %v75_v16 = vadd.f32 %v74_v7, %v1211_v6  ;;  %v78_v17 = vadd.f32 %v1241_v14, %v1236_v13  ;;  %v1254_v18 = vld [vmem:[%s2062_s0 + $0x60] sm:$0xff]  ;;  %v1259_v19 = vld [vmem:[%s2062_s0 + $0x68] sm:$0xff]  ;;  %v1267_v22 = vld [vmem:[%s2062_s0 + $0x78] sm:$0xff] }
   0x6   :  { %68 = vadd.xlane.f32.xlu0 %v67_v11  ;;  %v71_v20 = vadd.f32 %v70_v12, %v1228_v10  ;;  %v82_v21 = vadd.f32 %v1259_v19, %v1254_v18  ;;  %v1272_v23 = vld [vmem:[%s2062_s0 + $0x80] sm:$0xff]  ;;  %v1278_v25 = vld [vmem:[%s2062_s0 + $0x70] sm:$0xff]  ;;  %v1290_v28 = vld [vmem:[%s2062_s0 + $0x98] sm:$0xff] }
   0x7   :  { %76 = vadd.xlane.f32.xlu1 %v75_v16  ;;  %v79_v24 = vadd.f32 %v78_v17, %v1246_v15  ;;  %v86_v26 = vadd.f32 %v1272_v23, %v1267_v22  ;;  %v1285_v27 = vld [vmem:[%s2062_s0 + $0x90] sm:$0xff]  ;;  %v1295_v29 = vld [vmem:[%s2062_s0 + $0x88] sm:$0xff]  ;;  %v1314_v35 = vld [vmem:[%s2062_s0 + $0xa0] sm:$0xff] }
   0x8   :  { %v1300_v30 = vld [vmem:[%s2062_s0 + $0xa8] sm:$0xff]  ;;  %v1305_v31 = vld [vmem:[%s2062_s0 + $0xb0] sm:$0xff]  ;;  %v83_v32 = vadd.f32 %v82_v21, %v1278_v25  ;;  %v90_v33 = vadd.f32 %v1290_v28, %v1285_v27  ;;  %v1321_v37 = vld [vmem:[%s2062_s0 + $0xc0] sm:$0xff] }
   0x9   :  { %v87_v34 = vadd.f32 %v86_v26, %v1295_v29  ;;  %v94_v36 = vadd.f32 %v1305_v31, %v1300_v30  ;;  %v1326_v38 = vld [vmem:[%s2062_s0 + $0xc8] sm:$0xff]  ;;  %v1331_v39 = vld [vmem:[%s2062_s0 + $0xb8] sm:$0xff]  ;;  %v1341_v41 = vld [vmem:[%s2062_s0 + $0xe0] sm:$0xff] }
   0xa   :  { %72 = vadd.xlane.f32.xlu0 %v71_v20  ;;  %v1336_v40 = vld [vmem:[%s2062_s0 + $0xd8] sm:$0xff]  ;;  %v91_v42 = vadd.f32 %v90_v33, %v1314_v35  ;;  %v98_v43 = vadd.f32 %v1326_v38, %v1321_v37  ;;  %v1350_v45 = vld [vmem:[%s2062_s0 + $0xd0] sm:$0xff]  ;;  %v1367_v49 = vld [vmem:[%s2062_s0 + $0xe8] sm:$0xff] }
   0xb   :  { %80 = vadd.xlane.f32.xlu1 %v79_v24  ;;  %v95_v44 = vadd.f32 %v94_v36, %v1331_v39  ;;  %v102_v46 = vadd.f32 %v1341_v41, %v1336_v40  ;;  %v1357_v47 = vld [vmem:[%s2062_s0 + $0xf0] sm:$0xff]  ;;  %v1362_v48 = vld [vmem:[%s2062_s0 + $0xf8] sm:$0xff]  ;;  %v1372_v50 = vld [vmem:[%s2062_s0 + $0x108] sm:$0xff] }
   0xc   :  { %v1377_v51 = vld [vmem:[%s2062_s0 + $0x110] sm:$0xff]  ;;  %v99_v52 = vadd.f32 %v98_v43, %v1350_v45  ;;  %v106_v53 = vadd.f32 %v1362_v48, %v1357_v47  ;;  %v1386_v55 = vld [vmem:[%s2062_s0 + $0x100] sm:$0xff]  ;;  %v1398_v58 = vld [vmem:[%s2062_s0 + $0x128] sm:$0xff] }
   0xd   :  { %v103_v54 = vadd.f32 %v102_v46, %v1367_v49  ;;  %v110_v56 = vadd.f32 %v1377_v51, %v1372_v50  ;;  %v1393_v57 = vld [vmem:[%s2062_s0 + $0x120] sm:$0xff]  ;;  %v1403_v59 = vld [vmem:[%s2062_s0 + $0x118] sm:$0xff]  ;;  %v1422_v7 = vld [vmem:[%s2062_s0 + $0x130] sm:$0xff] }
   0xe   :  { %84 = vadd.xlane.f32.xlu0 %v83_v32  ;;  %v1408_v60 = vld [vmem:[%s2062_s0 + $0x138] sm:$0xff]  ;;  %v1413_v61 = vld [vmem:[%s2062_s0 + $0x140] sm:$0xff]  ;;  %v107_v62 = vadd.f32 %v106_v53, %v1386_v55  ;;  %v114_v63 = vadd.f32 %v1398_v58, %v1393_v57  ;;  %v1429_v12 = vld [vmem:[%s2062_s0 + $0x150] sm:$0xff] }
   0xf   :  { %88 = vadd.xlane.f32.xlu1 %v87_v34  ;;  %v111_v3 = vadd.f32 %v110_v56, %v1403_v59  ;;  %v118_v11 = vadd.f32 %v1413_v61, %v1408_v60  ;;  %v1434_v16 = vld [vmem:[%s2062_s0 + $0x158] sm:$0xff]  ;;  %v1439_v17 = vld [vmem:[%s2062_s0 + $0x148] sm:$0xff]  ;;  %v1449_v21 = vld [vmem:[%s2062_s0 + $0x170] sm:$0xff] }
  0x10   :  { %v1444_v20 = vld [vmem:[%s2062_s0 + $0x168] sm:$0xff]  ;;  %v115_v24 = vadd.f32 %v114_v63, %v1422_v7  ;;  %v122_v26 = vadd.f32 %v1434_v16, %v1429_v12  ;;  %v1458_v33 = vld [vmem:[%s2062_s0 + $0x160] sm:$0xff]  ;;  %v1465_v36 = vld [vmem:[%s2062_s0 + $0x178] sm:$0xff] }
  0x11   :  { %v119_v32 = vadd.f32 %v118_v11, %v1439_v17  ;;  %v126_v34 = vadd.f32 %v1449_v21, %v1444_v20 }
  0x12   :  { %92 = vadd.xlane.f32.xlu0 %v91_v42  ;;  %v123_v42 = vadd.f32 %v122_v26, %v1458_v33 }
  0x13   :  { %96 = vadd.xlane.f32.xlu1 %v95_v44  ;;  %v127_v43 = vadd.f32 %v126_v34, %v1465_v36  ;;  %v1100_v44 = vld [vmem:[%s2063_s3 + $0x78] sm:$0xff]  }
  0x14   :  { %988 = vmatprep.subr.bf16.mxu0 %v1100_v44 }
  0x16   :  { %100 = vadd.xlane.f32.xlu0 %v99_v52 }
  0x17   :  { %104 = vadd.xlane.f32.xlu1 %v103_v54 }
  0x1a   :  { %108 = vadd.xlane.f32.xlu0 %v107_v62 }
  0x1b   :  { %112 = vadd.xlane.f32.xlu1 %v111_v3 }
  0x1e   :  { %116 = vadd.xlane.f32.xlu0 %v115_v24 }
  0x1f   :  { %120 = vadd.xlane.f32.xlu1 %v119_v32 }
  0x22   :  { %124 = vadd.xlane.f32.xlu0 %v123_v42 }
  0x23   :  { %128 = vadd.xlane.f32.xlu1 %v127_v43 }
  0x8f   :  { %v69_v46 = vpop.xlane.xlu0 %68 }
  0x90   :  { %v131_v52 = vmul.f32 0.0026041667, %v69_v46  ;;  %v77_v53 = vpop.xlane.xlu1 %76 }
  0x91   :  { %v133_v54 = vmul.f32 0.0026041667, %v77_v53 }
  0x92   :  { %v1473_v56 = vsub.f32 %v1184_v0, %v131_v52  ;;  %v1476_v62 = vsub.f32 %v1189_v1, %v131_v52  ;;  %v1479_v63 = vsub.f32 %v1194_v2, %v131_v52 }
  0x93   :  { %v1482_v3 = vsub.f32 %v1201_v4, %v133_v54  ;;  %v1485_v11 = vsub.f32 %v1206_v5, %v133_v54  ;;  %v1488_v24 = vsub.f32 %v1211_v6, %v133_v54  ;;  %v73_v26 = vpop.xlane.xlu0 %72 }
  0x94   :  { %v132_v32 = vmul.f32 0.0026041667, %v73_v26  ;;  %v81_v34 = vpop.xlane.xlu1 %80  ;;  %v195_v0 = vmul.f32 %v1473_v56, %v1473_v56  ;;  %v196_v1 = vmul.f32 %v1476_v62, %v1476_v62  ;;  %v197_v2 = vmul.f32 %v1479_v63, %v1479_v63 }
  0x95   :  { %2077 = vst [vmem:[#allocation2_spill] sm:$0xff] %v1482_v3  ;;  %2078 = vst [vmem:[#allocation3_spill] sm:$0xff] %v1485_v11  ;;  %v134_v4 = vmul.f32 0.0026041667, %v81_v34  ;;  %v201_v5 = vmul.f32 %v1482_v3, %v1482_v3  ;;  %v202_v6 = vmul.f32 %v1485_v11, %v1485_v11  ;;  %v203_v42 = vmul.f32 %v1488_v24, %v1488_v24 }
  0x96   :  { %2079 = vst [vmem:[#allocation4_spill] sm:$0xff] %v1488_v24  ;;  %v1503_v43 = vsub.f32 %v1218_v8, %v132_v32  ;;  %v1506_v44 = vsub.f32 %v1223_v9, %v132_v32  ;;  %v1509_v46 = vsub.f32 %v1228_v10, %v132_v32  ;;  %v243_v52 = vadd.f32 %v196_v1, %v195_v0 }
  0x97   :  { %v1512_v53 = vsub.f32 %v1236_v13, %v134_v4  ;;  %v1515_v54 = vsub.f32 %v1241_v14, %v134_v4  ;;  %v1518_v26 = vsub.f32 %v1246_v15, %v134_v4  ;;  %v85_v34 = vpop.xlane.xlu0 %84  ;;  %v251_v3 = vadd.f32 %v202_v6, %v201_v5 }
  0x98   :  { %v135_v8 = vmul.f32 0.0026041667, %v85_v34  ;;  %v244_v24 = vadd.f32 %v243_v52, %v197_v2  ;;  %v89_v11 = vpop.xlane.xlu1 %88  ;;  %v198_v9 = vmul.f32 %v1503_v43, %v1503_v43  ;;  %v199_v10 = vmul.f32 %v1506_v44, %v1506_v44 }
  0x99   :  { %v136_v32 = vmul.f32 0.0026041667, %v89_v11  ;;  %v252_v13 = vadd.f32 %v251_v3, %v203_v42  ;;  %v200_v14 = vmul.f32 %v1509_v46, %v1509_v46  ;;  %v204_v15 = vmul.f32 %v1512_v53, %v1512_v53 }
  0x9a   :  { %v1529_v0 = vsub.f32 %v1254_v18, %v135_v8  ;;  %v1532_v1 = vsub.f32 %v1259_v19, %v135_v8  ;;  %v1535_v2 = vsub.f32 %v1278_v25, %v135_v8  ;;  %245 = vadd.xlane.f32.xlu0 %v244_v24  ;;  %v247_v4 = vadd.f32 %v199_v10, %v198_v9 }
  0x9b   :  { %v1538_v11 = vsub.f32 %v1267_v22, %v136_v32  ;;  %v1541_v3 = vsub.f32 %v1272_v23, %v136_v32  ;;  %v1544_v5 = vsub.f32 %v1295_v29, %v136_v32  ;;  %v93_v6 = vpop.xlane.xlu0 %92  ;;  %v205_v18 = vmul.f32 %v1515_v54, %v1515_v54 }
  0x9c   :  { %v137_v19 = vmul.f32 0.0026041667, %v93_v6  ;;  %v248_v42 = vadd.f32 %v247_v4, %v200_v14  ;;  %v97_v52 = vpop.xlane.xlu1 %96  ;;  %v206_v25 = vmul.f32 %v1518_v26, %v1518_v26  ;;  %v207_v22 = vmul.f32 %v1529_v0, %v1529_v0 }
  0x9d   :  { %v138_v24 = vmul.f32 0.0026041667, %v97_v52  ;;  %v255_v34 = vadd.f32 %v205_v18, %v204_v15  ;;  %v208_v23 = vmul.f32 %v1532_v1, %v1532_v1  ;;  %v209_v29 = vmul.f32 %v1535_v2, %v1535_v2 }
  0x9e   :  { %v1557_v8 = vsub.f32 %v1285_v27, %v137_v19  ;;  %v1560_v9 = vsub.f32 %v1290_v28, %v137_v19  ;;  %v1563_v10 = vsub.f32 %v1314_v35, %v137_v19  ;;  %253 = vadd.xlane.f32.xlu0 %v252_v13  ;;  %249 = vadd.xlane.f32.xlu1 %v248_v42 }
  0x9f   :  { %v1566_v32 = vsub.f32 %v1300_v30, %v138_v24  ;;  %v1569_v14 = vsub.f32 %v1305_v31, %v138_v24  ;;  %v1572_v15 = vsub.f32 %v1331_v39, %v138_v24  ;;  %v101_v4 = vpop.xlane.xlu0 %100  ;;  %v256_v27 = vadd.f32 %v255_v34, %v206_v25 }
  0xa0   :  { %v139_v6 = vmul.f32 0.0026041667, %v101_v4  ;;  %v259_v18 = vadd.f32 %v208_v23, %v207_v22  ;;  %v105_v28 = vpop.xlane.xlu1 %104  ;;  %v210_v35 = vmul.f32 %v1538_v11, %v1538_v11  ;;  %v211_v13 = vmul.f32 %v1541_v3, %v1541_v3 }
  0xa1   :  { %v140_v19 = vmul.f32 0.0026041667, %v105_v28  ;;  %v212_v30 = vmul.f32 %v1544_v5, %v1544_v5  ;;  %v213_v31 = vmul.f32 %v1557_v8, %v1557_v8  ;;  %v214_v39 = vmul.f32 %v1560_v9, %v1560_v9 }
  0xa2   :  { %v1585_v42 = vsub.f32 %v1321_v37, %v139_v6  ;;  %v1588_v52 = vsub.f32 %v1326_v38, %v139_v6  ;;  %v1591_v25 = vsub.f32 %v1350_v45, %v139_v6  ;;  %257 = vadd.xlane.f32.xlu1 %v256_v27  ;;  %v260_v22 = vadd.f32 %v259_v18, %v209_v29 }
  0xa3   :  { %v1594_v24 = vsub.f32 %v1336_v40, %v140_v19  ;;  %v1597_v34 = vsub.f32 %v1341_v41, %v140_v19  ;;  %v1600_v23 = vsub.f32 %v1367_v49, %v140_v19  ;;  %v109_v4 = vpop.xlane.xlu0 %108  ;;  %v263_v37 = vadd.f32 %v211_v13, %v210_v35 }
  0xa4   :  { %261 = vadd.xlane.f32.xlu0 %v260_v22  ;;  %v141_v28 = vmul.f32 0.0026041667, %v109_v4  ;;  %v215_v38 = vmul.f32 %v1563_v10, %v1563_v10  ;;  %v267_v45 = vadd.f32 %v214_v39, %v213_v31  ;;  %v113_v6 = vpop.xlane.xlu1 %112  ;;  %v216_v29 = vmul.f32 %v1566_v32, %v1566_v32 }
  0xa5   :  { %v264_v40 = vadd.f32 %v263_v37, %v212_v30  ;;  %v142_v27 = vmul.f32 0.0026041667, %v113_v6  ;;  %v217_v41 = vmul.f32 %v1569_v14, %v1569_v14  ;;  %v218_v49 = vmul.f32 %v1572_v15, %v1572_v15 }
  0xa6   :  { %v1611_v18 = vsub.f32 %v1357_v47, %v141_v28  ;;  %v1614_v35 = vsub.f32 %v1362_v48, %v141_v28  ;;  %v1617_v13 = vsub.f32 %v1386_v55, %v141_v28  ;;  %v268_v19 = vadd.f32 %v267_v45, %v215_v38  ;;  %v1101_v48 = vld [vmem:[%s2063_s3 + $0x38] sm:$0xff]   ;;  %v1103_v28 = vld [vmem:[%s2063_s3 + $0x70] sm:$0xff]  }
  0xa7   :  { %265 = vadd.xlane.f32.xlu1 %v264_v40  ;;  %v1620_v30 = vsub.f32 %v1372_v50, %v142_v27  ;;  %v1623_v31 = vsub.f32 %v1377_v51, %v142_v27  ;;  %v1626_v39 = vsub.f32 %v1403_v59, %v142_v27  ;;  %v117_v22 = vpop.xlane.xlu0 %116  ;;  %v271_v47 = vadd.f32 %v217_v41, %v216_v29  ;;  %v1102_v59 = vld [vmem:[%s2063_s3 + $0xb8] sm:$0xff]  }
  0xa8   :  { %269 = vadd.xlane.f32.xlu0 %v268_v19  ;;  %v143_v55 = vmul.f32 0.0026041667, %v117_v22  ;;  %v219_v4 = vmul.f32 %v1585_v42, %v1585_v42  ;;  %v220_v50 = vmul.f32 %v1588_v52, %v1588_v52  ;;  %v221_v51 = vmul.f32 %v1591_v25, %v1591_v25  ;;  %v121_v37 = vpop.xlane.xlu1 %120  ;;  %989 = vmatpush3.bf16.msra.mxu0 %v1101_v48 }
  0xa9   :  { %v272_v38 = vadd.f32 %v271_v47, %v218_v49  ;;  %v144_v45 = vmul.f32 0.0026041667, %v121_v37  ;;  %v222_v6 = vmul.f32 %v1594_v24, %v1594_v24  ;;  %v223_v29 = vmul.f32 %v1597_v34, %v1597_v34  ;;  %1068 = vmatprep.subr.bf16.mxu1 %v1102_v59  ;;  %990 = vmatprep.subr.bf16.mxu0 %v1103_v28  ;;  %v1106_v28 = vld [vmem:[%s2063_s3 + $0x68] sm:$0xff]  }
  0xaa   :  { %v1648_v40 = vsub.f32 %v1393_v57, %v143_v55  ;;  %v1651_v27 = vsub.f32 %v1398_v58, %v143_v55  ;;  %v1654_v41 = vsub.f32 %v1422_v7, %v143_v55  ;;  %v275_v19 = vadd.f32 %v220_v50, %v219_v4  ;;  %v1104_v7 = vld [vmem:[%s2063_s3 + $0x30] sm:$0xff]   ;;  %1069 = vmatpush3.bf16.msra.mxu1 %v1102_v59 }
  0xab   :  { %273 = vadd.xlane.f32.xlu1 %v272_v38  ;;  %v1657_v49 = vsub.f32 %v1408_v60, %v144_v45  ;;  %v1660_v22 = vsub.f32 %v1413_v61, %v144_v45  ;;  %v1663_v47 = vsub.f32 %v1439_v17, %v144_v45  ;;  %v125_v57 = vpop.xlane.xlu0 %124  ;;  %v224_v58 = vmul.f32 %v1600_v23, %v1600_v23 }
  0xac   :  { %2080 = vst [vmem:[#allocation5_spill] sm:$0xff] %v1648_v40  ;;  %2081 = vst [vmem:[#allocation6_spill] sm:$0xff] %v1651_v27  ;;  %v276_v48 = vadd.f32 %v275_v19, %v221_v51  ;;  %v145_v55 = vmul.f32 0.0026041667, %v125_v57  ;;  %v279_v4 = vadd.f32 %v223_v29, %v222_v6  ;;  %v225_v60 = vmul.f32 %v1611_v18, %v1611_v18  ;;  %v129_v50 = vpop.xlane.xlu1 %128  ;;  %v1105_v51 = vld [vmem:[%s2063_s3 + $0xb0] sm:$0xff]  }
  0xad   :  { %2082 = vst [vmem:[#allocation7_spill] sm:$0xff] %v1657_v49  ;;  %v226_v61 = vmul.f32 %v1614_v35, %v1614_v35  ;;  %v227_v17 = vmul.f32 %v1617_v13, %v1617_v13  ;;  %v146_v37 = vmul.f32 0.0026041667, %v129_v50  ;;  %v228_v38 = vmul.f32 %v1620_v30, %v1620_v30  ;;  %991 = vmatpush3.bf16.msra.mxu0 %v1104_v7 }
  0xae   :  { %277 = vadd.xlane.f32.xlu0 %v276_v48  ;;  %v1685_v59 = vsub.f32 %v1429_v12, %v145_v55  ;;  %v1688_v45 = vsub.f32 %v1434_v16, %v145_v55  ;;  %v1691_v6 = vsub.f32 %v1458_v33, %v145_v55  ;;  %v280_v29 = vadd.f32 %v279_v4, %v224_v58  ;;  %v1108_v4 = vld [vmem:[%s2063_s3 + $0xa8] sm:$0xff]  }
  0xaf   :  { %v283_v19 = vadd.f32 %v226_v61, %v225_v60  ;;  %v1694_v57 = vsub.f32 %v1444_v20, %v146_v37  ;;  %v1697_v7 = vsub.f32 %v1449_v21, %v146_v37  ;;  %v1700_v50 = vsub.f32 %v1465_v36, %v146_v37  ;;  %1070 = vmatprep.subr.bf16.mxu1 %v1105_v51  ;;  %v1107_v21 = vld [vmem:[%s2063_s3 + $0x28] sm:$0xff]  }
  0xb0   :  { %2083 = vst [vmem:[#allocation8_spill] sm:$0xff] %v1685_v59  ;;  %2084 = vst [vmem:[#allocation9_spill] sm:$0xff] %v1688_v45  ;;  %281 = vadd.xlane.f32.xlu1 %v280_v29  ;;  %v229_v12 = vmul.f32 %v1623_v31, %v1623_v31  ;;  %v230_v16 = vmul.f32 %v1626_v39, %v1626_v39  ;;  %v231_v33 = vmul.f32 %v1648_v40, %v1648_v40  ;;  %v1109_v29 = vld [vmem:[%s2063_s3 + $0x60] sm:$0xff]  }
  0xb1   :  { %2085 = vst [vmem:[#allocation10_spill] sm:$0xff] %v1694_v57  ;;  %2086 = vst [vmem:[#allocation11_spill] sm:$0xff] %v1697_v7  ;;  %v232_v20 = vmul.f32 %v1651_v27, %v1651_v27  ;;  %v284_v36 = vadd.f32 %v283_v19, %v227_v17  ;;  %v233_v58 = vmul.f32 %v1654_v41, %v1654_v41  ;;  %992 = vmatprep.subr.bf16.mxu0 %v1106_v28 }
  0xb2   :  { %v234_v48 = vmul.f32 %v1657_v49, %v1657_v49  ;;  %v235_v55 = vmul.f32 %v1660_v22, %v1660_v22  ;;  %v287_v60 = vadd.f32 %v229_v12, %v228_v38  ;;  %v236_v37 = vmul.f32 %v1663_v47, %v1663_v47  ;;  %1071 = vmatpush3.bf16.msra.mxu1 %v1105_v51 }
  0xb3   :  { %v291_v61 = vadd.f32 %v232_v20, %v231_v33  ;;  %v237_v17 = vmul.f32 %v1685_v59, %v1685_v59  ;;  %285 = vadd.xlane.f32.xlu0 %v284_v36  ;;  %v238_v28 = vmul.f32 %v1688_v45, %v1688_v45  ;;  %v239_v38 = vmul.f32 %v1691_v6, %v1691_v6  ;;  %v1110_v36 = vld [vmem:[%s2063_s3 + $0x20] sm:$0xff]  }
  0xb4   :  { %v295_v19 = vadd.f32 %v235_v55, %v234_v48  ;;  %v240_v12 = vmul.f32 %v1694_v57, %v1694_v57  ;;  %v288_v33 = vadd.f32 %v287_v60, %v230_v16  ;;  %v241_v51 = vmul.f32 %v1697_v7, %v1697_v7  ;;  %993 = vmatpush3.bf16.msra.mxu0 %v1107_v21  ;;  %v1111_v55 = vld [vmem:[%s2063_s3 + $0xa0] sm:$0xff]   ;;  %v1112_v21 = vld [vmem:[%s2063_s3 + $0x58] sm:$0xff]  }
  0xb5   :  { %v292_v20 = vadd.f32 %v291_v61, %v233_v58  ;;  %v299_v48 = vadd.f32 %v238_v28, %v237_v17  ;;  %1072 = vmatprep.subr.bf16.mxu1 %v1108_v4  ;;  %994 = vmatprep.subr.bf16.mxu0 %v1109_v29  ;;  %v242_v16 = vmul.f32 %v1700_v50, %v1700_v50  ;;  %v1113_v61 = vld [vmem:[%s2063_s3 + $0x18] sm:$0xff]   ;;  %v1116_v29 = vld [vmem:[%s2063_s3 + $0x10] sm:$0xff]   ;;  %v1119_v28 = vld [vmem:[%s2063_s3 + $0x8] sm:$0xff]  }
  0xb6   :  { %289 = vadd.xlane.f32.xlu1 %v288_v33  ;;  %v296_v59 = vadd.f32 %v295_v19, %v236_v37  ;;  %v303_v58 = vadd.f32 %v241_v51, %v240_v12  ;;  %1073 = vmatpush3.bf16.msra.mxu1 %v1108_v4  ;;  %v1114_v37 = vld [vmem:[%s2063_s3 + $0x98] sm:$0xff]   ;;  %v1115_v4 = vld [vmem:[%s2063_s3 + $0x50] sm:$0xff]   ;;  %v1121_v12 = vld [vmem:[%s2063_s3 + $0x40] sm:$0xff]  }
  0xb7   :  { %293 = vadd.xlane.f32.xlu0 %v292_v20  ;;  %v300_v60 = vadd.f32 %v299_v48, %v239_v38  ;;  %1074 = vmatprep.subr.bf16.mxu1 %v1111_v55  ;;  %v1117_v19 = vld [vmem:[%s2063_s3 + $0x90] sm:$0xff]   ;;  %v1120_v38 = vld [vmem:[%s2063_s3 + $0x88] sm:$0xff]   ;;  %v1122_v33 = vld [vmem:[%s2063_s3] sm:$0xff]  }
  0xb8   :  { %995 = vmatpush3.bf16.msra.mxu0 %v1110_v36  ;;  %v304_v17 = vadd.f32 %v303_v58, %v242_v16  ;;  %v1123_v20 = vld [vmem:[%s2063_s3 + $0x80] sm:$0xff]   ;;  %v405_v58 = vlaneseq }
  0xb9   :  { %996 = vmatprep.subr.bf16.mxu0 %v1112_v21 }
  0xba   :  { %297 = vadd.xlane.f32.xlu1 %v296_v59  ;;  %1075 = vmatpush3.bf16.msra.mxu1 %v1111_v55  ;;  %v1118_v59 = vld [vmem:[%s2063_s3 + $0x48] sm:$0xff]  }
  0xbb   :  { %301 = vadd.xlane.f32.xlu0 %v300_v60  ;;  %1076 = vmatprep.subr.bf16.mxu1 %v1114_v37 }
  0xbc   :  { %997 = vmatpush3.bf16.msra.mxu0 %v1113_v61 }
  0xbd   :  { %998 = vmatprep.subr.bf16.mxu0 %v1115_v4  ;;  %v406_v4 = vshrl.u32 %v405_v58, 7 }
  0xbe   :  { %305 = vadd.xlane.f32.xlu1 %v304_v17  ;;  %1077 = vmatpush3.bf16.msra.mxu1 %v1114_v37 }
  0xbf   :  { %1078 = vmatprep.subr.bf16.mxu1 %v1117_v19 }
  0xc0   :  { %999 = vmatpush3.bf16.msra.mxu0 %v1116_v29 }
  0xc1   :  { %1000 = vmatprep.subr.bf16.mxu0 %v1118_v59 }
  0xc2   :  { %1079 = vmatpush3.bf16.msra.mxu1 %v1117_v19 }
  0xc3   :  { %1080 = vmatprep.subr.bf16.mxu1 %v1120_v38 }
  0xc4   :  { %1001 = vmatpush3.bf16.msra.mxu0 %v1119_v28 }
  0xc5   :  { %1002 = vmatprep.subr.bf16.mxu0 %v1121_v12 }
  0xc6   :  { %1081 = vmatpush3.bf16.msra.mxu1 %v1120_v38  ;;  %v411_v38 = vsub.s32 1, %v406_v4 }
  0xc7   :  { %1082 = vmatprep.subr.bf16.mxu1 %v1123_v20 }
  0xc8   :  { %1003 = vmatpush3.bf16.msra.mxu0 %v1122_v33 }
  0xca   :  { %1083 = vmatpush3.bf16.msra.mxu1 %v1123_v20  ;;  %v415_v20 = vsub.s32 2, %v406_v4 }
 0x123   :  { %v246_v51 = vpop.xlane.xlu0 %245 }
 0x124   :  { %v307_v36 = vmul.f32 0.0026041667, %v246_v51  ;;  %v407_v51 = vsub.s32 0, %v406_v4 }
 0x126   :  { %v323_v48 = vadd.f32 1e-05, %v307_v36 }
 0x127   :  { %v250_v55 = vpop.xlane.xlu1 %249  ;;  %v254_v16 = vpop.xlane.xlu0 %253 }
 0x128   :  { %1124 = vrsqrt.f32 %v323_v48  ;;  %v308_v21 = vmul.f32 0.0026041667, %v250_v55  ;;  %v309_v60 = vmul.f32 0.0026041667, %v254_v16  ;;  %v403_v55 = vld [vmem:[%s2064_s1] sm:$0x7] }
 0x129   :  { %v1791_v4 = vrot.slane %v403_v55, %v407_v51 }
 0x12a   :  { %v324_v61 = vadd.f32 1e-05, %v308_v21  ;;  %v325_v37 = vadd.f32 1e-05, %v309_v60  ;;  %v468_v21 = vld [vmem:[%s2065_s2] sm:$0x7] }
 0x12b   :  { %v258_v17 = vpop.xlane.xlu1 %257  ;;  %v1800_v57 = vrot.slane %v468_v21, %v407_v51 }
 0x12c   :  { %1126 = vrsqrt.f32 %v324_v61  ;;  %v310_v29 = vmul.f32 0.0026041667, %v258_v17  ;;  %v1789_v17 = vrot.slane %v403_v55, %v415_v20 }
 0x12d   :  { %1128 = vrsqrt.f32 %v325_v37  ;;  %v262_v19 = vpop.xlane.xlu0 %261  ;;  %v1787_v37 = vrot.slane %v403_v55, %v411_v38 }
 0x12e   :  { %v326_v59 = vadd.f32 1e-05, %v310_v29  ;;  %v311_v28 = vmul.f32 0.0026041667, %v262_v19 }
 0x130   :  { %1130 = vrsqrt.f32 %v326_v59  ;;  %v327_v12 = vadd.f32 1e-05, %v311_v28  ;;  %v266_v33 = vpop.xlane.xlu1 %265  ;;  %v1794_v28 = vrot.slane %v468_v21, %v411_v38 }
 0x131   :  { %v312_v36 = vmul.f32 0.0026041667, %v266_v33  ;;  %v270_v48 = vpop.xlane.xlu0 %269 }
 0x132   :  { %v313_v16 = vmul.f32 0.0026041667, %v270_v48  ;;  %1132 = vrsqrt.f32 %v327_v12 }
 0x133   :  { %v328_v58 = vadd.f32 1e-05, %v312_v36 }
 0x134   :  { %v329_v60 = vadd.f32 1e-05, %v313_v16  ;;  %v274_v61 = vpop.xlane.xlu1 %273  ;;  %v1798_v16 = vrot.slane %v468_v21, %v415_v20 }
 0x135   :  { %v1125_v29 = vpop.eup %1124  ;;  %1134 = vrsqrt.f32 %v328_v58  ;;  %v314_v19 = vmul.f32 0.0026041667, %v274_v61 }
 0x136   :  { %v356_v59 = vmul.f32 %v1125_v29, %v1476_v62  ;;  %v357_v12 = vmul.f32 %v1125_v29, %v1479_v63  ;;  %v355_v33 = vmul.f32 %v1125_v29, %v1473_v56  ;;  %1136 = vrsqrt.f32 %v329_v60 }
 0x137   :  { %v330_v36 = vadd.f32 1e-05, %v314_v19  ;;  %v278_v48 = vpop.xlane.xlu0 %277 }
 0x138   :  { %v315_v55 = vmul.f32 0.0026041667, %v278_v48  ;;  %v421_v45 = vmul.f32 %v1787_v37, %v356_v59  ;;  %v422_v58 = vmul.f32 %v1789_v17, %v357_v12  ;;  %v420_v62 = vmul.f32 %v1791_v4, %v355_v33 }
 0x139   :  { %v1127_v38 = vpop.eup %1126  ;;  %1138 = vrsqrt.f32 %v330_v36  ;;  %v282_v61 = vpop.xlane.xlu1 %281  ;;  %v2087_v36 = vld [vmem:[#allocation3_spill] sm:$0xff] }
 0x13a   :  { %v1129_v63 = vpop.eup %1128  ;;  %v331_v40 = vadd.f32 1e-05, %v315_v55  ;;  %v316_v56 = vmul.f32 0.0026041667, %v282_v61  ;;  %v359_v60 = vmul.f32 %v1127_v38, %v1506_v44  ;;  %v486_v20 = vadd.f32 %v1794_v28, %v421_v45 }
 0x13b   :  { %v360_v51 = vmul.f32 %v1127_v38, %v1509_v46  ;;  %v487_v21 = vadd.f32 %v1798_v16, %v422_v58  ;;  %v358_v29 = vmul.f32 %v1127_v38, %v1503_v43  ;;  %v485_v19 = vadd.f32 %v1800_v57, %v420_v62  ;;  %v2088_v46 = vld [vmem:[#allocation4_spill] sm:$0xff] }
 0x13c   :  { %1140 = vrsqrt.f32 %v331_v40  ;;  %v332_v59 = vadd.f32 1e-05, %v316_v56  ;;  %v286_v12 = vpop.xlane.xlu0 %285  ;;  %v424_v33 = vmul.f32 %v1787_v37, %v359_v60  ;;  %v362_v48 = vmul.f32 %v1129_v63, %v2087_v36 }
 0x13d   :  { %v1131_v55 = vpop.eup %1130  ;;  %v317_v61 = vmul.f32 0.0026041667, %v286_v12  ;;  %v425_v44 = vmul.f32 %v1789_v17, %v360_v51  ;;  %v423_v45 = vmul.f32 %v1791_v4, %v358_v29  ;;  %v363_v7 = vmul.f32 %v1129_v63, %v2088_v46 }
 0x13e   :  { %1142 = vrsqrt.f32 %v332_v59  ;;  %v489_v43 = vadd.f32 %v1794_v28, %v424_v33  ;;  %v365_v58 = vmul.f32 %v1131_v55, %v1515_v54  ;;  %v427_v40 = vmul.f32 %v1787_v37, %v362_v48 }
 0x13f   :  { %v333_v62 = vadd.f32 1e-05, %v317_v61  ;;  %v290_v38 = vpop.xlane.xlu1 %289  ;;  %v490_v56 = vadd.f32 %v1798_v16, %v425_v44  ;;  %v488_v60 = vadd.f32 %v1800_v57, %v423_v45  ;;  %v366_v12 = vmul.f32 %v1131_v55, %v1518_v26  ;;  %v1822_v51 = vpop.eup %1132 }
 0x140   :  { %v318_v29 = vmul.f32 0.0026041667, %v290_v38  ;;  %v294_v36 = vpop.xlane.xlu0 %293  ;;  %v534_v46 = vpack.c.bf16 %v489_v43, %v486_v20  ;;  %v430_v59 = vmul.f32 %v1787_v37, %v365_v58  ;;  %v492_v33 = vadd.f32 %v1794_v28, %v427_v40 }
 0x141   :  { %1144 = vrsqrt.f32 %v333_v62  ;;  %v319_v54 = vmul.f32 0.0026041667, %v294_v36  ;;  %v535_v48 = vpack.c.bf16 %v490_v56, %v487_v21  ;;  %v533_v61 = vpack.c.bf16 %v488_v60, %v485_v19  ;;  %v2089_v19 = vld [vmem:[#allocation2_spill] sm:$0xff] }
 0x142   :  { %v1826_v49 = vpop.eup %1134  ;;  %v334_v44 = vadd.f32 1e-05, %v318_v29  ;;  %781 = vmatprep.mubr.bf16.mxu0 %v534_v46  ;;  %v495_v45 = vadd.f32 %v1794_v28, %v430_v59  ;;  %v428_v26 = vmul.f32 %v1789_v17, %v363_v7  ;;  %v431_v38 = vmul.f32 %v1789_v17, %v366_v12 }
 0x143   :  { %v335_v27 = vadd.f32 1e-05, %v319_v54  ;;  %v298_v20 = vpop.xlane.xlu1 %297  ;;  %1084 = vmatprep.mubr.bf16.mxu1 %v535_v48  ;;  %782 = vmatmul.mubr.bf16.vlgmr.msra.gmra.mxu0 %v533_v61  ;;  %v369_v43 = vmul.f32 %v1822_v51, %v1535_v2  ;;  %v372_v21 = vmul.f32 %v1826_v49, %v1544_v5  ;;  %v361_v58 = vmul.f32 %v1129_v63, %v2089_v19  ;;  %v1836_v40 = vpop.eup %1136 }
 0x144   :  { %1146 = vrsqrt.f32 %v334_v44  ;;  %v320_v62 = vmul.f32 0.0026041667, %v298_v20  ;;  %v302_v56 = vpop.xlane.xlu0 %301  ;;  %v537_v7 = vpack.c.bf16 %v495_v45, %v492_v33  ;;  %v493_v60 = vadd.f32 %v1798_v16, %v428_v26 }
 0x145   :  { %1148 = vrsqrt.f32 %v335_v27  ;;  %v321_v12 = vmul.f32 0.0026041667, %v302_v56  ;;  %v496_v29 = vadd.f32 %v1798_v16, %v431_v38  ;;  %v434_v36 = vmul.f32 %v1789_v17, %v369_v43 }
 0x146   :  { %v1841_v2 = vpop.eup %1138  ;;  %v336_v46 = vadd.f32 1e-05, %v320_v62  ;;  %789 = vmatprep.mubr.bf16.mxu0 %v537_v7  ;;  %v437_v5 = vmul.f32 %v1789_v17, %v372_v21  ;;  %v364_v63 = vmul.f32 %v1131_v55, %v1512_v53  ;;  %v426_v59 = vmul.f32 %v1791_v4, %v361_v58 }
 0x147   :  { %v337_v54 = vadd.f32 1e-05, %v321_v12  ;;  %v306_v33 = vpop.xlane.xlu1 %305  ;;  %v538_v48 = vpack.c.bf16 %v496_v29, %v493_v60  ;;  %v499_v27 = vadd.f32 %v1798_v16, %v434_v36  ;;  %v368_v61 = vmul.f32 %v1822_v51, %v1532_v1 }
 0x148   :  { %1150 = vrsqrt.f32 %v336_v46  ;;  %v322_v44 = vmul.f32 0.0026041667, %v306_v33  ;;  %v502_v45 = vadd.f32 %v1798_v16, %v437_v5  ;;  %v429_v26 = vmul.f32 %v1791_v4, %v364_v63 }
 0x149   :  { %v1851_v38 = vpop.eup %1140  ;;  %1152 = vrsqrt.f32 %v337_v54  ;;  %1085 = vmatmul.mubr.bf16.vlgmr.msra.gmra.mxu1 %v538_v48  ;;  %v491_v53 = vadd.f32 %v1800_v57, %v426_v59  ;;  %v371_v55 = vmul.f32 %v1826_v49, %v1541_v3  ;;  %v433_v20 = vmul.f32 %v1787_v37, %v368_v61 }
 0x14a   :  { %v338_v43 = vadd.f32 1e-05, %v322_v44  ;;  %v541_v21 = vpack.c.bf16 %v502_v45, %v499_v27  ;;  %v494_v1 = vadd.f32 %v1800_v57, %v429_v26  ;;  %v375_v19 = vmul.f32 %v1836_v40, %v1563_v10 }
 0x14b   :  { %v1860_v58 = vpop.eup %1142  ;;  %v436_v62 = vmul.f32 %v1787_v37, %v371_v55  ;;  %v498_v56 = vadd.f32 %v1794_v28, %v433_v20  ;;  %v378_v7 = vmul.f32 %v1841_v2, %v1572_v15  ;;  %v381_v3 = vmul.f32 %v1851_v38, %v1591_v25 }
 0x14c   :  { %1154 = vrsqrt.f32 %v338_v43  ;;  %1088 = vmatprep.mubr.bf16.mxu1 %v541_v21  ;;  %v536_v60 = vpack.c.bf16 %v494_v1, %v491_v53  ;;  %v440_v12 = vmul.f32 %v1789_v17, %v375_v19  ;;  %v384_v10 = vmul.f32 %v1860_v58, %v1600_v23 }
 0x14d   :  { %v501_v29 = vadd.f32 %v1794_v28, %v436_v62  ;;  %v443_v36 = vmul.f32 %v1789_v17, %v378_v7  ;;  %v446_v46 = vmul.f32 %v1789_v17, %v381_v3  ;;  %v367_v15 = vmul.f32 %v1822_v51, %v1529_v0 }
 0x14e   :  { %v1876_v5 = vpop.eup %1144  ;;  %790 = vmatmul.mubr.bf16.gmra.mxu0 %v536_v60  ;;  %v505_v25 = vadd.f32 %v1798_v16, %v440_v12  ;;  %v449_v63 = vmul.f32 %v1789_v17, %v384_v10  ;;  %v370_v59 = vmul.f32 %v1826_v49, %v1538_v11  ;;  %v374_v23 = vmul.f32 %v1836_v40, %v1560_v9 }
 0x14f   :  { %v540_v54 = vpack.c.bf16 %v501_v29, %v498_v56  ;;  %v508_v33 = vadd.f32 %v1798_v16, %v443_v36  ;;  %v511_v48 = vadd.f32 %v1798_v16, %v446_v46  ;;  %v432_v0 = vmul.f32 %v1791_v4, %v367_v15 }
 0x150   :  { %v514_v51 = vadd.f32 %v1798_v16, %v449_v63  ;;  %v435_v27 = vmul.f32 %v1791_v4, %v370_v59  ;;  %v377_v61 = vmul.f32 %v1841_v2, %v1569_v14  ;;  %v439_v44 = vmul.f32 %v1787_v37, %v374_v23 }
 0x151   :  { %v1892_v11 = vpop.eup %1146  ;;  %797 = vmatprep.mubr.bf16.mxu0 %v540_v54  ;;  %v544_v9 = vpack.c.bf16 %v508_v33, %v505_v25  ;;  %v497_v49 = vadd.f32 %v1800_v57, %v432_v0  ;;  %v387_v45 = vmul.f32 %v1876_v5, %v1617_v13  ;;  %v373_v26 = vmul.f32 %v1836_v40, %v1557_v8 }
 0x152   :  { %v1899_v53 = vpop.eup %1148  ;;  %v547_v55 = vpack.c.bf16 %v514_v51, %v511_v48  ;;  %v500_v20 = vadd.f32 %v1800_v57, %v435_v27  ;;  %v442_v14 = vmul.f32 %v1787_v37, %v377_v61  ;;  %v504_v43 = vadd.f32 %v1794_v28, %v439_v44 }
 0x153   :  { %1089 = vmatmul.mubr.bf16.gmra.mxu1 %v544_v9  ;;  %v390_v21 = vmul.f32 %v1892_v11, %v1626_v39  ;;  %v452_v1 = vmul.f32 %v1789_v17, %v387_v45  ;;  %v393_v13 = vmul.f32 %v1899_v53, %v1654_v41  ;;  %v376_v8 = vmul.f32 %v1841_v2, %v1566_v32 }
 0x154   :  { %1092 = vmatprep.mubr.bf16.mxu1 %v547_v55  ;;  %v539_v40 = vpack.c.bf16 %v500_v20, %v497_v49  ;;  %v507_v19 = vadd.f32 %v1794_v28, %v442_v14  ;;  %v438_v62 = vmul.f32 %v1791_v4, %v373_v26  ;;  %v380_v56 = vmul.f32 %v1851_v38, %v1588_v52 }
 0x155   :  { %v1915_v7 = vpop.eup %1150  ;;  %v455_v39 = vmul.f32 %v1789_v17, %v390_v21  ;;  %v458_v3 = vmul.f32 %v1789_v17, %v393_v13  ;;  %v441_v41 = vmul.f32 %v1791_v4, %v376_v8  ;;  %v383_v12 = vmul.f32 %v1860_v58, %v1597_v34  ;;  %v2090_v21 = vld [vmem:[#allocation6_spill] sm:$0xff] }
 0x156   :  { %v1920_v60 = vpop.eup %1152  ;;  %798 = vmatmul.mubr.bf16.gmra.mxu0 %v539_v40  ;;  %v543_v32 = vpack.c.bf16 %v507_v19, %v504_v43  ;;  %v396_v2 = vmul.f32 %v1915_v7, %v1663_v47  ;;  %v517_v52 = vadd.f32 %v1798_v16, %v452_v1  ;;  %v503_v29 = vadd.f32 %v1800_v57, %v438_v62 }
 0x157   :  { %v520_v10 = vadd.f32 %v1798_v16, %v455_v39  ;;  %v445_v36 = vmul.f32 %v1787_v37, %v380_v56  ;;  %v506_v15 = vadd.f32 %v1800_v57, %v441_v41  ;;  %v448_v25 = vmul.f32 %v1787_v37, %v383_v12  ;;  %v2092_v56 = vld [vmem:[#allocation11_spill] sm:$0xff]  ;;  %v2093_v41 = vld [vmem:[#allocation5_spill] sm:$0xff] }
 0x158   :  { %805 = vmatprep.mubr.bf16.mxu0 %v543_v32  ;;  %v461_v46 = vmul.f32 %v1789_v17, %v396_v2  ;;  %v399_v47 = vmul.f32 %v1920_v60, %v1691_v6  ;;  %v523_v59 = vadd.f32 %v1798_v16, %v458_v3  ;;  %v379_v23 = vmul.f32 %v1851_v38, %v1585_v42  ;;  %v2094_v12 = vld [vmem:[#allocation9_spill] sm:$0xff] }
 0x159   :  { %v1155_v63 = vpop.eup %1154  ;;  %v550_v34 = vpack.c.bf16 %v520_v10, %v517_v52  ;;  %v382_v54 = vmul.f32 %v1860_v58, %v1594_v24  ;;  %v513_v48 = vadd.f32 %v1794_v28, %v448_v25  ;;  %v510_v6 = vadd.f32 %v1794_v28, %v445_v36 }
 0x15a   :  { %v526_v33 = vadd.f32 %v1798_v16, %v461_v46  ;;  %v402_v0 = vmul.f32 %v1155_v63, %v1700_v50  ;;  %v464_v51 = vmul.f32 %v1789_v17, %v399_v47  ;;  %v386_v27 = vmul.f32 %v1876_v5, %v1614_v35 }
 0x15b   :  { %1093 = vmatmul.mubr.bf16.gmra.mxu1 %v550_v34  ;;  %v389_v42 = vmul.f32 %v1892_v11, %v1623_v31  ;;  %v542_v61 = vpack.c.bf16 %v506_v15, %v503_v29  ;;  %v447_v58 = vmul.f32 %v1791_v4, %v382_v54  ;;  %v546_v44 = vpack.c.bf16 %v513_v48, %v510_v6 }
 0x15c   :  { %v553_v38 = vpack.c.bf16 %v526_v33, %v523_v59  ;;  %v467_v24 = vmul.f32 %v1789_v17, %v402_v0  ;;  %v529_v9 = vadd.f32 %v1798_v16, %v464_v51  ;;  %v444_v35 = vmul.f32 %v1791_v4, %v379_v23  ;;  %v2096_v23 = vld [vmem:[#allocation8_spill] sm:$0xff] }
 0x15d   :  { %v454_v50 = vmul.f32 %v1787_v37, %v389_v42  ;;  %v451_v31 = vmul.f32 %v1787_v37, %v386_v27  ;;  %v512_v26 = vadd.f32 %v1800_v57, %v447_v58  ;;  %v388_v17 = vmul.f32 %v1892_v11, %v1620_v30 }
 0x15e   :  { %1096 = vmatprep.mubr.bf16.mxu1 %v553_v38  ;;  %806 = vmatmul.mubr.bf16.gmra.mxu0 %v542_v61  ;;  %v532_v49 = vadd.f32 %v1798_v16, %v467_v24  ;;  %v395_v20 = vmul.f32 %v1915_v7, %v1660_v22  ;;  %v509_v14 = vadd.f32 %v1800_v57, %v444_v35 }
 0x15f   :  { %813 = vmatprep.mubr.bf16.mxu0 %v546_v44  ;;  %v519_v55 = vadd.f32 %v1794_v28, %v454_v50  ;;  %v385_v16 = vmul.f32 %v1876_v5, %v1611_v18  ;;  %v516_v43 = vadd.f32 %v1794_v28, %v451_v31  ;;  %v392_v1 = vmul.f32 %v1899_v53, %v2090_v21  ;;  %v2091_v5 = vld [vmem:[#allocation7_spill] sm:$0xff] }
 0x160   :  { %v556_v45 = vpack.c.bf16 %v532_v49, %v529_v9  ;;  %v545_v13 = vpack.c.bf16 %v512_v26, %v509_v14  ;;  %v453_v8 = vmul.f32 %v1791_v4, %v388_v17  ;;  %v460_v11 = vmul.f32 %v1787_v37, %v395_v20 }
 0x161   :  { %v549_v30 = vpack.c.bf16 %v519_v55, %v516_v43  ;;  %v450_v22 = vmul.f32 %v1791_v4, %v385_v16  ;;  %v457_v40 = vmul.f32 %v1787_v37, %v392_v1  ;;  %v394_v19 = vmul.f32 %v1915_v7, %v2091_v5 }
 0x162   :  { %v518_v18 = vadd.f32 %v1800_v57, %v453_v8  ;;  %v525_v62 = vadd.f32 %v1794_v28, %v460_v11  ;;  %v401_v39 = vmul.f32 %v1155_v63, %v2092_v56  ;;  %v391_v32 = vmul.f32 %v1899_v53, %v2093_v41  ;;  %v2095_v53 = vld [vmem:[#allocation10_spill] sm:$0xff] }
 0x163   :  { %1097 = vmatmul.mubr.bf16.gmra.mxu1 %v556_v45  ;;  %v515_v3 = vadd.f32 %v1800_v57, %v450_v22  ;;  %v522_v2 = vadd.f32 %v1794_v28, %v457_v40  ;;  %v398_v52 = vmul.f32 %v1920_v60, %v2094_v12  ;;  %v459_v29 = vmul.f32 %v1791_v4, %v394_v19 }
 0x164   :  { %v466_v7 = vmul.f32 %v1787_v37, %v401_v39  ;;  %v456_v46 = vmul.f32 %v1791_v4, %v391_v32  ;;  %v400_v47 = vmul.f32 %v1155_v63, %v2095_v53  ;;  %v397_v54 = vmul.f32 %v1920_v60, %v2096_v23 }
 0x165   :  { %v548_v10 = vpack.c.bf16 %v518_v18, %v515_v3  ;;  %v552_v36 = vpack.c.bf16 %v525_v62, %v522_v2  ;;  %v463_v15 = vmul.f32 %v1787_v37, %v398_v52  ;;  %v524_v25 = vadd.f32 %v1800_v57, %v459_v29 }
 0x166   :  { %814 = vmatmul.mubr.bf16.gmra.mxu0 %v545_v13  ;;  %v531_v34 = vadd.f32 %v1794_v28, %v466_v7  ;;  %v521_v59 = vadd.f32 %v1800_v57, %v456_v46  ;;  %v465_v0 = vmul.f32 %v1791_v4, %v400_v47  ;;  %v462_v37 = vmul.f32 %v1791_v4, %v397_v54 }
 0x167   :  { %821 = vmatprep.mubr.bf16.mxu0 %v549_v30  ;;  %v528_v33 = vadd.f32 %v1794_v28, %v463_v15 }
 0x168   :  { %v551_v48 = vpack.c.bf16 %v524_v25, %v521_v59  ;;  %v530_v6 = vadd.f32 %v1800_v57, %v465_v0  ;;  %v527_v63 = vadd.f32 %v1800_v57, %v462_v37 }
 0x169   :  { %v555_v51 = vpack.c.bf16 %v531_v34, %v528_v33 }
 0x16a   :  { %v554_v27 = vpack.c.bf16 %v530_v6, %v527_v63 }
 0x16e   :  { %822 = vmatmul.mubr.bf16.gmra.mxu0 %v548_v10 }
 0x16f   :  { %829 = vmatprep.mubr.bf16.mxu0 %v552_v36 }
 0x176   :  { %830 = vmatmul.mubr.bf16.gmra.mxu0 %v551_v48 }
 0x177   :  { %837 = vmatprep.mubr.bf16.mxu0 %v555_v51 }
 0x17e   :  { %838 = vmatmul.mubr.bf16.gmra.mxu0 %v554_v27 }
 0x203   :  { %v1004_v42 = vpop.f32.mrf.mxu0 }
 0x205   :  { %v1005_v38 = vpop.f32.mrf.mxu0 }
 0x206   :  { %v1006_v60 = vadd.f32 %v1005_v38, %v1004_v42 }
 0x207   :  { %v1007_v61 = vpop.f32.mrf.mxu0 }
 0x209   :  { %v1086_v24 = vpop.f32.mrf.mxu1  ;;  %v1008_v28 = vpop.f32.mrf.mxu0 }
 0x20a   :  { %v1009_v50 = vadd.f32 %v1008_v28, %v1007_v61 }
 0x20b   :  { %v880_v58 = vpop.f32.mrf.mxu1 }
 0x20c   :  { %v881_v44 = vadd.f32 %v1006_v60, %v880_v58 }
 0x20d   :  { %v1087_v9 = vpop.f32.mrf.mxu1 }
 0x20e   :  { %944 = vst.msk [vmem:[%s2066_s4] sm:$0xff] %vm943_vm0, %v881_v44  ;;  %v1010_v4 = vpop.f32.mrf.mxu0 }
 0x20f   :  { %v883_v57 = vpop.f32.mrf.mxu1 }
 0x210   :  { %v884_v49 = vadd.f32 %v1009_v50, %v883_v57  ;;  %v1011_v35 = vpop.f32.mrf.mxu0 }
 0x211   :  { %v1012_v31 = vadd.f32 %v1011_v35, %v1010_v4 }
 0x212   :  { %945 = vst.msk [vmem:[%s2066_s4 + $0x8] sm:$0xff] %vm943_vm0, %v884_v49  ;;  %v1013_v45 = vpop.f32.mrf.mxu0 }
 0x213   :  { %v889_v26 = vadd.f32 %v1086_v24, %v1012_v31  ;;  %v1090_v17 = vpop.f32.mrf.mxu1 }
 0x214   :  { %v1014_v55 = vpop.f32.mrf.mxu0 }
 0x215   :  { %946 = vst.msk [vmem:[%s2066_s4 + $0x10] sm:$0xff] %vm943_vm0, %v889_v26  ;;  %v1015_v20 = vadd.f32 %v1014_v55, %v1013_v45  ;;  %v896_v14 = vpop.f32.mrf.mxu1 }
 0x216   :  { %v1016_v16 = vpop.f32.mrf.mxu0 }
 0x217   :  { %v892_v43 = vadd.f32 %v1087_v9, %v1015_v20  ;;  %v1091_v13 = vpop.f32.mrf.mxu1 }
 0x218   :  { %v1017_v21 = vpop.f32.mrf.mxu0 }
 0x219   :  { %947 = vst.msk [vmem:[%s2066_s4 + $0x18] sm:$0xff] %vm943_vm0, %v892_v43  ;;  %v1018_v1 = vadd.f32 %v1017_v21, %v1016_v16  ;;  %v899_v40 = vpop.f32.mrf.mxu1 }
 0x21a   :  { %v1019_v8 = vpop.f32.mrf.mxu0 }
 0x21b   :  { %v897_v30 = vadd.f32 %v1018_v1, %v896_v14  ;;  %v1094_v56 = vpop.f32.mrf.mxu1 }
 0x21c   :  { %v1020_v11 = vpop.f32.mrf.mxu0 }
 0x21d   :  { %948 = vst.msk [vmem:[%s2066_s4 + $0x20] sm:$0xff] %vm943_vm0, %v897_v30  ;;  %v1021_v22 = vadd.f32 %v1020_v11, %v1019_v8  ;;  %v912_v2 = vpop.f32.mrf.mxu1 }
 0x21e   :  { %v1022_v18 = vpop.f32.mrf.mxu0 }
 0x21f   :  { %v900_v5 = vadd.f32 %v1021_v22, %v899_v40  ;;  %v1095_v36 = vpop.f32.mrf.mxu1 }
 0x220   :  { %v1023_v19 = vpop.f32.mrf.mxu0 }
 0x221   :  { %949 = vst.msk [vmem:[%s2066_s4 + $0x28] sm:$0xff] %vm943_vm0, %v900_v5  ;;  %v1024_v62 = vadd.f32 %v1023_v19, %v1022_v18  ;;  %v915_v53 = vpop.f32.mrf.mxu1 }
 0x222   :  { %v1025_v39 = vpop.f32.mrf.mxu0 }
 0x223   :  { %v905_v3 = vadd.f32 %v1090_v17, %v1024_v62  ;;  %v1098_v54 = vpop.f32.mrf.mxu1 }
 0x224   :  { %v1026_v41 = vpop.f32.mrf.mxu0 }
 0x225   :  { %950 = vst.msk [vmem:[%s2066_s4 + $0x30] sm:$0xff] %vm943_vm0, %v905_v3  ;;  %v1027_v32 = vadd.f32 %v1026_v41, %v1025_v39  ;;  %v928_v37 = vpop.f32.mrf.mxu1 }
 0x226   :  { %v1028_v12 = vpop.f32.mrf.mxu0 }
 0x227   :  { %v908_v52 = vadd.f32 %v1091_v13, %v1027_v32  ;;  %v1099_v38 = vpop.f32.mrf.mxu1 }
 0x228   :  { %v1029_v10 = vpop.f32.mrf.mxu0 }
 0x229   :  { %951 = vst.msk [vmem:[%s2066_s4 + $0x38] sm:$0xff] %vm943_vm0, %v908_v52  ;;  %v1030_v29 = vadd.f32 %v1029_v10, %v1028_v12  ;;  %v931_v58 = vpop.f32.mrf.mxu1 }
 0x22a   :  { %v1031_v7 = vpop.f32.mrf.mxu0 }
 0x22b   :  { %v913_v46 = vadd.f32 %v1030_v29, %v912_v2 }
 0x22c   :  { %v1032_v15 = vpop.f32.mrf.mxu0 }
 0x22d   :  { %952 = vst.msk [vmem:[%s2066_s4 + $0x40] sm:$0xff] %vm943_vm0, %v913_v46  ;;  %v1033_v25 = vadd.f32 %v1032_v15, %v1031_v7 }
 0x22e   :  { %v1034_v47 = vpop.f32.mrf.mxu0 }
 0x22f   :  { %v916_v34 = vadd.f32 %v1033_v25, %v915_v53 }
 0x230   :  { %v1035_v59 = vpop.f32.mrf.mxu0 }
 0x231   :  { %953 = vst.msk [vmem:[%s2066_s4 + $0x48] sm:$0xff] %vm943_vm0, %v916_v34  ;;  %v1036_v23 = vadd.f32 %v1035_v59, %v1034_v47 }
 0x232   :  { %v1037_v33 = vpop.f32.mrf.mxu0 }
 0x233   :  { %v921_v48 = vadd.f32 %v1094_v56, %v1036_v23 }
 0x234   :  { %v1038_v0 = vpop.f32.mrf.mxu0 }
 0x235   :  { %954 = vst.msk [vmem:[%s2066_s4 + $0x50] sm:$0xff] %vm943_vm0, %v921_v48  ;;  %v1039_v51 = vadd.f32 %v1038_v0, %v1037_v33 }
 0x236   :  { %v1040_v6 = vpop.f32.mrf.mxu0 }
 0x237   :  { %v924_v63 = vadd.f32 %v1095_v36, %v1039_v51 }
 0x238   :  { %v1041_v27 = vpop.f32.mrf.mxu0 }
 0x239   :  { %955 = vst.msk [vmem:[%s2066_s4 + $0x58] sm:$0xff] %vm943_vm0, %v924_v63  ;;  %v1042_v42 = vadd.f32 %v1041_v27, %v1040_v6 }
 0x23a   :  { %v1043_v61 = vpop.f32.mrf.mxu0 }
 0x23b   :  { %v929_v60 = vadd.f32 %v1042_v42, %v928_v37 }
 0x23c   :  { %v1044_v24 = vpop.f32.mrf.mxu0 }
 0x23d   :  { %956 = vst.msk [vmem:[%s2066_s4 + $0x60] sm:$0xff] %vm943_vm0, %v929_v60  ;;  %v1045_v28 = vadd.f32 %v1044_v24, %v1043_v61 }
 0x23e   :  { %v1046_v44 = vpop.f32.mrf.mxu0 }
 0x23f   :  { %v932_v50 = vadd.f32 %v1045_v28, %v931_v58 }
 0x240   :  { %v1047_v9 = vpop.f32.mrf.mxu0 }
 0x241   :  { %957 = vst.msk [vmem:[%s2066_s4 + $0x68] sm:$0xff] %vm943_vm0, %v932_v50  ;;  %v1048_v4 = vadd.f32 %v1047_v9, %v1046_v44 }
 0x242   :  { %v1049_v57 = vpop.f32.mrf.mxu0 }
 0x243   :  { %v937_v49 = vadd.f32 %v1098_v54, %v1048_v4 }
 0x244   :  { %v1050_v35 = vpop.f32.mrf.mxu0 }
 0x245   :  { %958 = vst.msk [vmem:[%s2066_s4 + $0x70] sm:$0xff] %vm943_vm0, %v937_v49  ;;  %v1051_v31 = vadd.f32 %v1050_v35, %v1049_v57 }
 0x247   :  { %v940_v45 = vadd.f32 %v1099_v38, %v1051_v31 }
 0x249   :  { %959 = vst.msk [vmem:[%s2066_s4 + $0x78] sm:$0xff] %vm943_vm0, %v940_v45 }

// kernel: _lambda_.12
= control target key start
LH: loop header
LB: loop body
LE: loop exit
PB: predicated region body
PF: predicated region fallthrough
CT: control target
= control target key end

     0   :  { %vm902_vm0 = vcmask 523264   ;;  %s1651_s0 = inlined_call_operand.vmem [shape: f32[16,768], index: 0, kind: input, shape index: {}]   ;;  %s1652_s3 = inlined_call_operand.vmem [shape: bf16[768,192], index: 3, kind: input, shape index: {}]   ;;  %s1653_s1 = inlined_call_operand.vmem [shape: f32[1,768], index: 1, kind: input, shape index: {}]   ;;  %s1654_s2 = inlined_call_operand.vmem [shape: f32[1,768], index: 2, kind: input, shape index: {}]   ;;  %s1655_s4 = inlined_call_operand.vmem [shape: f32[16,192], index: 4, kind: output, shape index: {}]  }
   0x1   :  { %v1182_v0 = vld [vmem:[%s1651_s0] sm:$0xff]  ;;  %v1187_v1 = vld [vmem:[%s1651_s0 + $0x8] sm:$0xff]  ;;  %v1192_v2 = vld [vmem:[%s1651_s0 + $0x10] sm:$0xff] }
   0x2   :  { %v1197_v3 = vld [vmem:[%s1651_s0 + $0x18] sm:$0xff]  ;;  %v29_v4 = vadd.f32 %v1187_v1, %v1182_v0  ;;  %v1204_v5 = vld [vmem:[%s1651_s0 + $0x30] sm:$0xff]  ;;  %v1214_v7 = vld [vmem:[%s1651_s0 + $0x40] sm:$0xff] }
   0x3   :  { %v1209_v6 = vld [vmem:[%s1651_s0 + $0x38] sm:$0xff]  ;;  %v1222_v10 = vld [vmem:[%s1651_s0 + $0x20] sm:$0xff]  ;;  %v1227_v11 = vld [vmem:[%s1651_s0 + $0x48] sm:$0xff] }
   0x4   :  { %v30_v8 = vadd.f32 %v29_v4, %v1192_v2  ;;  %v36_v9 = vadd.f32 %v1209_v6, %v1204_v5  ;;  %v1234_v14 = vld [vmem:[%s1651_s0 + $0x28] sm:$0xff]  ;;  %v1239_v15 = vld [vmem:[%s1651_s0 + $0x50] sm:$0xff]  ;;  %v1246_v18 = vld [vmem:[%s1651_s0 + $0x58] sm:$0xff] }
   0x5   :  { %v1006_v22 = vld [vmem:[%s1652_s3 + $0x74] ss:$8 sps:$4 sm:$0xff]   ;;  %v1008_v23 = vld [vmem:[%s1652_s3 + $0x70] ss:$8 sps:$4 sm:$0xff]   ;;  %v1012_v26 = vld [vmem:[%s1652_s3 + $0x64] ss:$8 sps:$4 sm:$0xff]  }
   0x6   :  { %v31_v12 = vadd.f32 %v30_v8, %v1197_v3  ;;  %v37_v13 = vadd.f32 %v36_v9, %v1214_v7  ;;  %772 = vmatprep.subr.bf16.mxu0 %v1006_v22  ;;  %v1009_v24 = vld [vmem:[%s1652_s3 + $0x174] ss:$8 sps:$4 sm:$0xff]   ;;  %v1011_v25 = vld [vmem:[%s1652_s3 + $0x170] ss:$8 sps:$4 sm:$0xff]   ;;  %v1014_v27 = vld [vmem:[%s1652_s3 + $0x60] ss:$8 sps:$4 sm:$0xff]  }
   0x7   :  { %773 = vmatpush1.bf16.msra.mxu0 %v1008_v23  ;;  %815 = vmatprep.subr.bf16.mxu1 %v1009_v24  ;;  %v1015_v28 = vld [vmem:[%s1652_s3 + $0x164] ss:$8 sps:$4 sm:$0xff]   ;;  %v1017_v29 = vld [vmem:[%s1652_s3 + $0x160] ss:$8 sps:$4 sm:$0xff]   ;;  %v1018_v30 = vld [vmem:[%s1652_s3 + $0x54] ss:$8 sps:$4 sm:$0xff]  }
   0x8   :  { %v32_v16 = vadd.f32 %v31_v12, %v1222_v10  ;;  %v38_v17 = vadd.f32 %v37_v13, %v1227_v11  ;;  %816 = vmatpush1.bf16.msra.mxu1 %v1011_v25  ;;  %774 = vmatprep.subr.bf16.mxu0 %v1012_v26  ;;  %v1020_v31 = vld [vmem:[%s1652_s3 + $0x50] ss:$8 sps:$4 sm:$0xff]   ;;  %v1021_v32 = vld [vmem:[%s1652_s3 + $0x154] ss:$8 sps:$4 sm:$0xff]   ;;  %v1024_v33 = vld [vmem:[%s1652_s3 + $0x44] ss:$8 sps:$4 sm:$0xff]  }
   0x9   :  { %817 = vmatprep.subr.bf16.mxu1 %v1015_v28  ;;  %v1023_v34 = vld [vmem:[%s1652_s3 + $0x150] ss:$8 sps:$4 sm:$0xff]   ;;  %v1027_v35 = vld [vmem:[%s1652_s3 + $0x144] ss:$8 sps:$4 sm:$0xff]   ;;  %v1026_v36 = vld [vmem:[%s1652_s3 + $0x40] ss:$8 sps:$4 sm:$0xff]  }
   0xa   :  { %v33_v19 = vadd.f32 %v32_v16, %v1234_v14  ;;  %v39_v20 = vadd.f32 %v38_v17, %v1239_v15  ;;  %v1030_v37 = vld [vmem:[%s1652_s3 + $0x34] ss:$8 sps:$4 sm:$0xff]   ;;  %v1029_v38 = vld [vmem:[%s1652_s3 + $0x140] ss:$8 sps:$4 sm:$0xff]   ;;  %v1032_v40 = vld [vmem:[%s1652_s3 + $0x30] ss:$8 sps:$4 sm:$0xff]  }
   0xb   :  { %775 = vmatpush1.bf16.msra.mxu0 %v1014_v27  ;;  %v1033_v39 = vld [vmem:[%s1652_s3 + $0x134] ss:$8 sps:$4 sm:$0xff]   ;;  %v1036_v41 = vld [vmem:[%s1652_s3 + $0x24] ss:$8 sps:$4 sm:$0xff]   ;;  %v1035_v42 = vld [vmem:[%s1652_s3 + $0x130] ss:$8 sps:$4 sm:$0xff]  }
   0xc   :  { %34 = vadd.xlane.f32.xlu0 %v33_v19  ;;  %v40_v21 = vadd.f32 %v39_v20, %v1246_v18  ;;  %776 = vmatprep.subr.bf16.mxu0 %v1018_v30  ;;  %v1039_v43 = vld [vmem:[%s1652_s3 + $0x124] ss:$8 sps:$4 sm:$0xff]   ;;  %v1038_v44 = vld [vmem:[%s1652_s3 + $0x20] ss:$8 sps:$4 sm:$0xff]   ;;  %v1042_v45 = vld [vmem:[%s1652_s3 + $0x14] ss:$8 sps:$4 sm:$0xff]  }
   0xd   :  { %818 = vmatpush1.bf16.msra.mxu1 %v1017_v29  ;;  %v1041_v46 = vld [vmem:[%s1652_s3 + $0x120] ss:$8 sps:$4 sm:$0xff]   ;;  %v1044_v47 = vld [vmem:[%s1652_s3 + $0x10] ss:$8 sps:$4 sm:$0xff]   ;;  %v1045_v48 = vld [vmem:[%s1652_s3 + $0x114] ss:$8 sps:$4 sm:$0xff]  }
   0xe   :  { %819 = vmatprep.subr.bf16.mxu1 %v1021_v32  ;;  %v1047_v49 = vld [vmem:[%s1652_s3 + $0x110] ss:$8 sps:$4 sm:$0xff]   ;;  %v1048_v50 = vld [vmem:[%s1652_s3 + $0x4] ss:$8 sps:$4 sm:$0xff]   ;;  %v1050_v52 = vld [vmem:[%s1652_s3] ss:$8 sps:$4 sm:$0xff]  }
   0xf   :  { %777 = vmatpush1.bf16.msra.mxu0 %v1020_v31  ;;  %v1051_v51 = vld [vmem:[%s1652_s3 + $0x104] ss:$8 sps:$4 sm:$0xff]   ;;  %v1054_v53 = vld [vmem:[%s1652_s3 + $0xf4] ss:$8 sps:$4 sm:$0xff]   ;;  %v1053_v54 = vld [vmem:[%s1652_s3 + $0x100] ss:$8 sps:$4 sm:$0xff]  }
  0x10   :  { %41 = vadd.xlane.f32.xlu0 %v40_v21  ;;  %778 = vmatprep.subr.bf16.mxu0 %v1024_v33  ;;  %v1057_v55 = vld [vmem:[%s1652_s3 + $0x1f4] ss:$8 sps:$4 sm:$0xff]   ;;  %v1056_v56 = vld [vmem:[%s1652_s3 + $0xf0] ss:$8 sps:$4 sm:$0xff]   ;;  %v1060_v32 = vld [vmem:[%s1652_s3 + $0xe4] ss:$8 sps:$4 sm:$0xff]  }
  0x11   :  { %820 = vmatpush1.bf16.msra.mxu1 %v1023_v34  ;;  %v1062_v33 = vld [vmem:[%s1652_s3 + $0xe0] ss:$8 sps:$4 sm:$0xff]   ;;  %v1063_v34 = vld [vmem:[%s1652_s3 + $0x1e4] ss:$8 sps:$4 sm:$0xff]  }
  0x12   :  { %821 = vmatprep.subr.bf16.mxu1 %v1027_v35  ;;  %v1065_v35 = vld [vmem:[%s1652_s3 + $0x1e0] ss:$8 sps:$4 sm:$0xff]  }
  0x13   :  { %779 = vmatpush1.bf16.msra.mxu0 %v1026_v36  ;;  %v1066_v36 = vld [vmem:[%s1652_s3 + $0xd4] ss:$8 sps:$4 sm:$0xff]  }
  0x14   :  { %780 = vmatprep.subr.bf16.mxu0 %v1030_v37  ;;  %v1068_v37 = vld [vmem:[%s1652_s3 + $0xd0] ss:$8 sps:$4 sm:$0xff]  }
  0x15   :  { %822 = vmatpush1.bf16.msra.mxu1 %v1029_v38  ;;  %v1069_v38 = vld [vmem:[%s1652_s3 + $0x1d4] ss:$8 sps:$4 sm:$0xff]  }
  0x16   :  { %823 = vmatprep.subr.bf16.mxu1 %v1033_v39  ;;  %v1071_v39 = vld [vmem:[%s1652_s3 + $0x1d0] ss:$8 sps:$4 sm:$0xff]  }
  0x17   :  { %781 = vmatpush1.bf16.msra.mxu0 %v1032_v40  ;;  %v1072_v40 = vld [vmem:[%s1652_s3 + $0xc4] ss:$8 sps:$4 sm:$0xff]  }
  0x18   :  { %782 = vmatprep.subr.bf16.mxu0 %v1036_v41  ;;  %v1074_v41 = vld [vmem:[%s1652_s3 + $0xc0] ss:$8 sps:$4 sm:$0xff]  }
  0x19   :  { %824 = vmatpush1.bf16.msra.mxu1 %v1035_v42  ;;  %v1075_v42 = vld [vmem:[%s1652_s3 + $0x1c4] ss:$8 sps:$4 sm:$0xff]  }
  0x1a   :  { %825 = vmatprep.subr.bf16.mxu1 %v1039_v43  ;;  %v1077_v43 = vld [vmem:[%s1652_s3 + $0x1c0] ss:$8 sps:$4 sm:$0xff]  }
  0x1b   :  { %783 = vmatpush1.bf16.msra.mxu0 %v1038_v44  ;;  %v1078_v44 = vld [vmem:[%s1652_s3 + $0xb4] ss:$8 sps:$4 sm:$0xff]  }
  0x1c   :  { %784 = vmatprep.subr.bf16.mxu0 %v1042_v45  ;;  %v1081_v45 = vld [vmem:[%s1652_s3 + $0x1b4] ss:$8 sps:$4 sm:$0xff]  }
  0x1d   :  { %826 = vmatpush1.bf16.msra.mxu1 %v1041_v46  ;;  %v1080_v46 = vld [vmem:[%s1652_s3 + $0xb0] ss:$8 sps:$4 sm:$0xff]  }
  0x1e   :  { %827 = vmatprep.subr.bf16.mxu1 %v1045_v48  ;;  %v1084_v48 = vld [vmem:[%s1652_s3 + $0xa4] ss:$8 sps:$4 sm:$0xff]  }
  0x1f   :  { %785 = vmatpush1.bf16.msra.mxu0 %v1044_v47  ;;  %v1083_v47 = vld [vmem:[%s1652_s3 + $0x1b0] ss:$8 sps:$4 sm:$0xff]  }
  0x20   :  { %786 = vmatprep.subr.bf16.mxu0 %v1048_v50  ;;  %v1087_v50 = vld [vmem:[%s1652_s3 + $0x1a4] ss:$8 sps:$4 sm:$0xff]  }
  0x21   :  { %828 = vmatpush1.bf16.msra.mxu1 %v1047_v49  ;;  %v104_v49 = vlaneseq }
  0x22   :  { %829 = vmatprep.subr.bf16.mxu1 %v1051_v51  ;;  %v1086_v51 = vld [vmem:[%s1652_s3 + $0xa0] ss:$8 sps:$4 sm:$0xff]  }
  0x23   :  { %787 = vmatpush1.bf16.msra.mxu0 %v1050_v52  ;;  %v1476_v52 = vshrl.u32 %v104_v49, 7 }
  0x24   :  { %788 = vmatprep.subr.bf16.mxu0 %v1054_v53  ;;  %v1089_v53 = vld [vmem:[%s1652_s3 + $0x1a0] ss:$8 sps:$4 sm:$0xff]  }
  0x25   :  { %830 = vmatpush1.bf16.msra.mxu1 %v1053_v54  ;;  %v1090_v54 = vld [vmem:[%s1652_s3 + $0x94] ss:$8 sps:$4 sm:$0xff]  }
  0x26   :  { %831 = vmatprep.subr.bf16.mxu1 %v1057_v55  ;;  %v1093_v55 = vld [vmem:[%s1652_s3 + $0x194] ss:$8 sps:$4 sm:$0xff]  }
  0x27   :  { %789 = vmatpush2.bf16.msra.mxu0 %v1056_v56  ;;  %v102_v56 = vld [vmem:[%s1653_s1] sm:$0x3f] }
  0x28   :  { %790 = vmatprep.subr.bf16.mxu0 %v1060_v32 }
  0x2b   :  { %791 = vmatpush2.bf16.msra.mxu0 %v1062_v33 }
  0x2c   :  { %792 = vmatprep.subr.bf16.mxu0 %v1066_v36 }
  0x2f   :  { %793 = vmatpush2.bf16.msra.mxu0 %v1068_v37 }
  0x30   :  { %794 = vmatprep.subr.bf16.mxu0 %v1072_v40 }
  0x33   :  { %795 = vmatpush2.bf16.msra.mxu0 %v1074_v41 }
  0x34   :  { %796 = vmatprep.subr.bf16.mxu0 %v1078_v44 }
  0x37   :  { %797 = vmatpush2.bf16.msra.mxu0 %v1080_v46 }
  0x38   :  { %798 = vmatprep.subr.bf16.mxu0 %v1084_v48 }
  0x3b   :  { %799 = vmatpush2.bf16.msra.mxu0 %v1086_v51 }
  0x3c   :  { %800 = vmatprep.subr.bf16.mxu0 %v1090_v54 }
  0x95   :  { %v35_v57 = vpop.xlane.xlu0 %34 }
  0x96   :  { %v44_v58 = vmul.f32 0.0013020834, %v35_v57  ;;  %v1092_v57 = vld [vmem:[%s1652_s3 + $0x90] ss:$8 sps:$4 sm:$0xff]  }
  0x97   :  { %801 = vmatpush2.bf16.msra.mxu0 %v1092_v57 }
  0x98   :  { %v1357_v59 = vsub.f32 %v1182_v0, %v44_v58  ;;  %v1360_v60 = vsub.f32 %v1187_v1, %v44_v58  ;;  %v1363_v61 = vsub.f32 %v1192_v2, %v44_v58  ;;  %v1366_v63 = vsub.f32 %v1197_v3, %v44_v58 }
  0x99   :  { %v42_v62 = vpop.xlane.xlu0 %41  ;;  %v1373_v0 = vsub.f32 %v1222_v10, %v44_v58  ;;  %v1387_v16 = vsub.f32 %v1234_v14, %v44_v58  ;;  %v146_v58 = vld [vmem:[%s1654_s2] sm:$0x3f] }
  0x9a   :  { %v45_v4 = vmul.f32 0.0013020834, %v42_v62  ;;  %v58_v8 = vmul.f32 %v1357_v59, %v1357_v59  ;;  %v59_v9 = vmul.f32 %v1360_v60, %v1360_v60  ;;  %v60_v1 = vmul.f32 %v1363_v61, %v1363_v61 }
  0x9b   :  { %v61_v10 = vmul.f32 %v1366_v63, %v1366_v63  ;;  %v122_v62 = vsub.s32 4, %v1476_v52 }
  0x9c   :  { %v70_v12 = vadd.f32 %v59_v9, %v58_v8  ;;  %v1378_v2 = vsub.f32 %v1204_v5, %v45_v4  ;;  %v1381_v3 = vsub.f32 %v1209_v6, %v45_v4  ;;  %v1384_v13 = vsub.f32 %v1214_v7, %v45_v4  ;;  %v1096_v8 = vld [vmem:[%s1652_s3 + $0x84] ss:$8 sps:$4 sm:$0xff]  }
  0x9d   :  { %v1392_v19 = vsub.f32 %v1227_v11, %v45_v4  ;;  %v62_v7 = vmul.f32 %v1373_v0, %v1373_v0  ;;  %v1401_v14 = vsub.f32 %v1239_v15, %v45_v4  ;;  %v63_v11 = vmul.f32 %v1387_v16, %v1387_v16  ;;  %v1099_v9 = vld [vmem:[%s1652_s3 + $0x184] ss:$8 sps:$4 sm:$0xff]   ;;  %802 = vmatprep.subr.bf16.mxu0 %v1096_v8 }
  0x9e   :  { %v71_v17 = vadd.f32 %v70_v12, %v60_v1  ;;  %v64_v5 = vmul.f32 %v1378_v2, %v1378_v2  ;;  %v65_v6 = vmul.f32 %v1381_v3, %v1381_v3  ;;  %v66_v21 = vmul.f32 %v1384_v13, %v1384_v13 }
  0x9f   :  { %v1408_v24 = vsub.f32 %v1246_v18, %v45_v4  ;;  %v67_v25 = vmul.f32 %v1392_v19, %v1392_v19  ;;  %v68_v15 = vmul.f32 %v1401_v14, %v1401_v14  ;;  %v1059_v18 = vld [vmem:[%s1652_s3 + $0x1f0] ss:$8 sps:$4 sm:$0xff]   ;;  %v1506_v1 = vrot.slane %v102_v56, %v122_v62 }
  0xa0   :  { %v72_v20 = vadd.f32 %v71_v17, %v61_v10  ;;  %v77_v22 = vadd.f32 %v65_v6, %v64_v5  ;;  %832 = vmatpush2.bf16.msra.mxu1 %v1059_v18  ;;  %v1095_v4 = vld [vmem:[%s1652_s3 + $0x190] ss:$8 sps:$4 sm:$0xff]   ;;  %v1508_v12 = vrot.slane %v146_v58, %v122_v62  ;;  %v1098_v10 = vld [vmem:[%s1652_s3 + $0x80] ss:$8 sps:$4 sm:$0xff]   ;;  %v1104_v5 = vld [vmem:[%s1652_s3 + $0x274] ss:$8 sps:$4 sm:$0xff]  }
  0xa1   :  { %v69_v29 = vmul.f32 %v1408_v24, %v1408_v24  ;;  %833 = vmatprep.subr.bf16.mxu1 %v1063_v34  ;;  %v1101_v17 = vld [vmem:[%s1652_s3 + $0x180] ss:$8 sps:$4 sm:$0xff]   ;;  %803 = vmatpush2.bf16.msra.mxu0 %v1098_v10 }
  0xa2   :  { %v73_v23 = vadd.f32 %v72_v20, %v62_v7  ;;  %v78_v26 = vadd.f32 %v77_v22, %v66_v21  ;;  %858 = vmatprep.subr.bf16.mxu0 %v1104_v5 }
  0xa4   :  { %v74_v27 = vadd.f32 %v73_v23, %v63_v11  ;;  %v79_v28 = vadd.f32 %v78_v26, %v67_v25  ;;  %834 = vmatpush2.bf16.msra.mxu1 %v1065_v35  ;;  %v110_v23 = vsub.s32 1, %v1476_v52  ;;  %v118_v25 = vsub.s32 3, %v1476_v52 }
  0xa5   :  { %835 = vmatprep.subr.bf16.mxu1 %v1069_v38  ;;  %v106_v26 = vsub.s32 0, %v1476_v52 }
  0xa6   :  { %75 = vadd.xlane.f32.xlu1 %v74_v27  ;;  %v80_v30 = vadd.f32 %v79_v28, %v68_v15  ;;  %v114_v27 = vsub.s32 2, %v1476_v52  ;;  %v126_v15 = vsub.s32 5, %v1476_v52  ;;  %v111_v28 = vrot.slane %v102_v56, %v110_v23 }
  0xa7   :  { %v155_v36 = vrot.slane %v146_v58, %v110_v23  ;;  %v151_v44 = vrot.slane %v146_v58, %v106_v26  ;;  %v1113_v23 = vld [vmem:[%s1652_s3 + $0x244] ss:$8 sps:$4 sm:$0xff]  }
  0xa8   :  { %v81_v31 = vadd.f32 %v80_v30, %v69_v29  ;;  %836 = vmatpush2.bf16.msra.mxu1 %v1071_v39  ;;  %v119_v29 = vrot.slane %v102_v56, %v118_v25  ;;  %v115_v18 = vrot.slane %v102_v56, %v114_v27  ;;  %v127_v38 = vrot.slane %v102_v56, %v126_v15 }
  0xa9   :  { %837 = vmatprep.subr.bf16.mxu1 %v1075_v42  ;;  %v163_v42 = vrot.slane %v146_v58, %v118_v25  ;;  %v171_v46 = vrot.slane %v146_v58, %v126_v15  ;;  %v1111_v25 = vld [vmem:[%s1652_s3 + $0x240] ss:$8 sps:$4 sm:$0xff]   ;;  %v1119_v15 = vld [vmem:[%s1652_s3 + $0x224] ss:$8 sps:$4 sm:$0xff]  }
  0xaa   :  { %82 = vadd.xlane.f32.xlu1 %v81_v31  ;;  %v107_v31 = vrot.slane %v102_v56, %v106_v26  ;;  %v1116_v26 = vld [vmem:[%s1652_s3 + $0x234] ss:$8 sps:$4 sm:$0xff]  }
  0xac   :  { %838 = vmatpush2.bf16.msra.mxu1 %v1077_v43 }
  0xad   :  { %839 = vmatprep.subr.bf16.mxu1 %v1081_v45  ;;  %v159_v45 = vrot.slane %v146_v58, %v114_v27  ;;  %v1114_v27 = vld [vmem:[%s1652_s3 + $0x230] ss:$8 sps:$4 sm:$0xff]  }
  0xb0   :  { %840 = vmatpush2.bf16.msra.mxu1 %v1083_v47 }
  0xb1   :  { %841 = vmatprep.subr.bf16.mxu1 %v1087_v50 }
  0xb4   :  { %842 = vmatpush2.bf16.msra.mxu1 %v1089_v53 }
  0xb5   :  { %843 = vmatprep.subr.bf16.mxu1 %v1093_v55 }
  0xb8   :  { %844 = vmatpush2.bf16.msra.mxu1 %v1095_v4 }
  0xb9   :  { %845 = vmatprep.subr.bf16.mxu1 %v1099_v9 }
  0xbc   :  { %846 = vmatpush2.bf16.msra.mxu1 %v1101_v17 }
 0x12f   :  { %v76_v6 = vpop.xlane.xlu1 %75 }
 0x130   :  { %v84_v7 = vmul.f32 0.0013020834, %v76_v6 }
 0x132   :  { %v86_v20 = vadd.f32 1e-05, %v84_v7  ;;  %v1107_v7 = vld [vmem:[%s1652_s3 + $0x264] ss:$8 sps:$4 sm:$0xff]  }
 0x133   :  { %v83_v21 = vpop.xlane.xlu1 %82 }
 0x134   :  { %1150 = vrsqrt.f32 %v86_v20  ;;  %v85_v22 = vmul.f32 0.0013020834, %v83_v21 }
 0x136   :  { %v87_v11 = vadd.f32 1e-05, %v85_v22  ;;  %v1105_v22 = vld [vmem:[%s1652_s3 + $0x260] ss:$8 sps:$4 sm:$0xff]  }
 0x138   :  { %1152 = vrsqrt.f32 %v87_v11  ;;  %v1108_v11 = vld [vmem:[%s1652_s3 + $0x250] ss:$8 sps:$4 sm:$0xff]  }
 0x141   :  { %v1151_v30 = vpop.eup %1150 }
 0x142   :  { %v91_v32 = vmul.f32 %v1151_v30, %v1360_v60  ;;  %v93_v33 = vmul.f32 %v1151_v30, %v1366_v63  ;;  %v90_v34 = vmul.f32 %v1151_v30, %v1357_v59  ;;  %v92_v35 = vmul.f32 %v1151_v30, %v1363_v61 }
 0x143   :  { %v95_v37 = vmul.f32 %v1151_v30, %v1387_v16  ;;  %v94_v39 = vmul.f32 %v1151_v30, %v1373_v0  ;;  %v1120_v30 = vld [vmem:[%s1652_s3 + $0x210] ss:$8 sps:$4 sm:$0xff]  }
 0x144   :  { %v135_v40 = vmul.f32 %v111_v28, %v91_v32  ;;  %v137_v41 = vmul.f32 %v119_v29, %v93_v33  ;;  %v134_v61 = vmul.f32 %v107_v31, %v90_v34  ;;  %v136_v47 = vmul.f32 %v115_v18, %v92_v35  ;;  %v1128_v32 = vld [vmem:[%s1652_s3 + $0x2f4] ss:$8 sps:$4 sm:$0xff]   ;;  %v1126_v33 = vld [vmem:[%s1652_s3 + $0x2f0] ss:$8 sps:$4 sm:$0xff]   ;;  %v1131_v34 = vld [vmem:[%s1652_s3 + $0x2e4] ss:$8 sps:$4 sm:$0xff]  }
 0x145   :  { %v1153_v43 = vpop.eup %1152  ;;  %v138_v60 = vmul.f32 %v1506_v1, %v94_v39  ;;  %v139_v49 = vmul.f32 %v127_v38, %v95_v37  ;;  %v1129_v35 = vld [vmem:[%s1652_s3 + $0x2e0] ss:$8 sps:$4 sm:$0xff]   ;;  %v1132_v37 = vld [vmem:[%s1652_s3 + $0x2d0] ss:$8 sps:$4 sm:$0xff]  }
 0x146   :  { %v97_v63 = vmul.f32 %v1153_v43, %v1381_v3  ;;  %v99_v59 = vmul.f32 %v1153_v43, %v1392_v19  ;;  %v179_v48 = vadd.f32 %v155_v36, %v135_v40  ;;  %v96_v16 = vmul.f32 %v1153_v43, %v1378_v2  ;;  %v1135_v39 = vld [vmem:[%s1652_s3 + $0x2c0] ss:$8 sps:$4 sm:$0xff]   ;;  %v1140_v40 = vld [vmem:[%s1652_s3 + $0x2b4] ss:$8 sps:$4 sm:$0xff]  }
 0x147   :  { %v98_v0 = vmul.f32 %v1153_v43, %v1384_v13  ;;  %v181_v52 = vadd.f32 %v163_v42, %v137_v41  ;;  %v101_v53 = vmul.f32 %v1153_v43, %v1408_v24  ;;  %v100_v56 = vmul.f32 %v1153_v43, %v1401_v14  ;;  %v1102_v24 = vld [vmem:[%s1652_s3 + $0x270] ss:$8 sps:$4 sm:$0xff]   ;;  %v1141_v43 = vld [vmem:[%s1652_s3 + $0x2a0] ss:$8 sps:$4 sm:$0xff]  }
 0x148   :  { %v141_v50 = vmul.f32 %v111_v28, %v97_v63  ;;  %v143_v51 = vmul.f32 %v119_v29, %v99_v59  ;;  %v140_v54 = vmul.f32 %v107_v31, %v96_v16  ;;  %v1538_v3 = vadd.f32 %v1508_v12, %v138_v60  ;;  %v1117_v28 = vld [vmem:[%s1652_s3 + $0x220] ss:$8 sps:$4 sm:$0xff]   ;;  %v1122_v29 = vld [vmem:[%s1652_s3 + $0x214] ss:$8 sps:$4 sm:$0xff]   ;;  %v1125_v31 = vld [vmem:[%s1652_s3 + $0x204] ss:$8 sps:$4 sm:$0xff]  }
 0x149   :  { %v142_v55 = vmul.f32 %v115_v18, %v98_v0  ;;  %v178_v58 = vadd.f32 %v151_v44, %v134_v61  ;;  %v145_v62 = vmul.f32 %v127_v38, %v101_v53  ;;  %v180_v4 = vadd.f32 %v159_v45, %v136_v47  ;;  %v1123_v18 = vld [vmem:[%s1652_s3 + $0x200] ss:$8 sps:$4 sm:$0xff]   ;;  %v1137_v38 = vld [vmem:[%s1652_s3 + $0x2c4] ss:$8 sps:$4 sm:$0xff]   ;;  %v1138_v41 = vld [vmem:[%s1652_s3 + $0x2b0] ss:$8 sps:$4 sm:$0xff]  }
 0x14a   :  { %v185_v19 = vadd.f32 %v155_v36, %v141_v50  ;;  %v187_v57 = vadd.f32 %v163_v42, %v143_v51  ;;  %v184_v2 = vadd.f32 %v151_v44, %v140_v54  ;;  %v144_v8 = vmul.f32 %v1506_v1, %v100_v56  ;;  %v1134_v36 = vld [vmem:[%s1652_s3 + $0x2d4] ss:$8 sps:$4 sm:$0xff]   ;;  %v1143_v42 = vld [vmem:[%s1652_s3 + $0x2a4] ss:$8 sps:$4 sm:$0xff]   ;;  %v1147_v60 = vld [vmem:[%s1652_s3 + $0x280] ss:$8 sps:$4 sm:$0xff]  }
 0x14b   :  { %v186_v13 = vadd.f32 %v159_v45, %v142_v55  ;;  %v183_v17 = vadd.f32 %v171_v46, %v139_v49  ;;  %v189_v14 = vadd.f32 %v171_v46, %v145_v62  ;;  %v1146_v44 = vld [vmem:[%s1652_s3 + $0x294] ss:$8 sps:$4 sm:$0xff]   ;;  %v1144_v45 = vld [vmem:[%s1652_s3 + $0x290] ss:$8 sps:$4 sm:$0xff]   ;;  %v1149_v46 = vld [vmem:[%s1652_s3 + $0x284] ss:$8 sps:$4 sm:$0xff]  }
 0x14c   :  { %v191_v9 = vpack.c.bf16 %v185_v19, %v179_v48  ;;  %v193_v10 = vpack.c.bf16 %v187_v57, %v181_v52  ;;  %v190_v5 = vpack.c.bf16 %v184_v2, %v178_v58  ;;  %v1548_v20 = vadd.f32 %v1508_v12, %v144_v8  ;;  %v1110_v12 = vld [vmem:[%s1652_s3 + $0x254] ss:$8 sps:$4 sm:$0xff]  }
 0x14d   :  { %v192_v6 = vpack.c.bf16 %v186_v13, %v180_v4  ;;  %v195_v1 = vpack.c.bf16 %v189_v14, %v183_v17 }
 0x14e   :  { %804 = vmatprep.mubr.bf16.mxu0 %v191_v9  ;;  %847 = vmatprep.mubr.bf16.mxu1 %v193_v10  ;;  %v194_v21 = vpack.c.bf16 %v1548_v20, %v1538_v3 }
 0x14f   :  { %805 = vmatmul.mubr.bf16.vlgmr.msra.gmra.mxu0 %v190_v5  ;;  %848 = vmatmul.mubr.bf16.vlgmr.msra.gmra.mxu1 %v192_v6 }
 0x150   :  { %859 = vmatpush1.bf16.msra.mxu0 %v1102_v24  ;;  %890 = vmatprep.mubr.bf16.mxu0 %v195_v1 }
 0x151   :  { %860 = vmatprep.subr.bf16.mxu0 %v1107_v7 }
 0x154   :  { %861 = vmatpush1.bf16.msra.mxu0 %v1105_v22 }
 0x155   :  { %862 = vmatprep.subr.bf16.mxu0 %v1110_v12 }
 0x158   :  { %863 = vmatpush1.bf16.msra.mxu0 %v1108_v11 }
 0x159   :  { %864 = vmatprep.subr.bf16.mxu0 %v1113_v23 }
 0x15c   :  { %865 = vmatpush1.bf16.msra.mxu0 %v1111_v25 }
 0x15d   :  { %866 = vmatprep.subr.bf16.mxu0 %v1116_v26 }
 0x160   :  { %867 = vmatpush1.bf16.msra.mxu0 %v1114_v27 }
 0x161   :  { %868 = vmatprep.subr.bf16.mxu0 %v1119_v15 }
 0x164   :  { %869 = vmatpush1.bf16.msra.mxu0 %v1117_v28 }
 0x165   :  { %870 = vmatprep.subr.bf16.mxu0 %v1122_v29 }
 0x168   :  { %871 = vmatpush1.bf16.msra.mxu0 %v1120_v30 }
 0x169   :  { %872 = vmatprep.subr.bf16.mxu0 %v1125_v31 }
 0x16c   :  { %873 = vmatpush1.bf16.msra.mxu0 %v1123_v18 }
 0x16d   :  { %874 = vmatprep.subr.bf16.mxu0 %v1128_v32 }
 0x170   :  { %875 = vmatpush2.bf16.msra.mxu0 %v1126_v33 }
 0x171   :  { %876 = vmatprep.subr.bf16.mxu0 %v1131_v34 }
 0x174   :  { %877 = vmatpush2.bf16.msra.mxu0 %v1129_v35 }
 0x175   :  { %878 = vmatprep.subr.bf16.mxu0 %v1134_v36 }
 0x178   :  { %879 = vmatpush2.bf16.msra.mxu0 %v1132_v37 }
 0x179   :  { %880 = vmatprep.subr.bf16.mxu0 %v1137_v38 }
 0x17c   :  { %881 = vmatpush2.bf16.msra.mxu0 %v1135_v39 }
 0x17d   :  { %882 = vmatprep.subr.bf16.mxu0 %v1140_v40 }
 0x180   :  { %883 = vmatpush2.bf16.msra.mxu0 %v1138_v41 }
 0x181   :  { %884 = vmatprep.subr.bf16.mxu0 %v1143_v42 }
 0x184   :  { %885 = vmatpush2.bf16.msra.mxu0 %v1141_v43 }
 0x185   :  { %886 = vmatprep.subr.bf16.mxu0 %v1146_v44 }
 0x188   :  { %887 = vmatpush2.bf16.msra.mxu0 %v1144_v45 }
 0x189   :  { %888 = vmatprep.subr.bf16.mxu0 %v1149_v46 }
 0x18c   :  { %889 = vmatpush2.bf16.msra.mxu0 %v1147_v60 }
 0x18f   :  { %891 = vmatmul.mubr.bf16.vlgmr.msra.gmra.mxu0 %v194_v21 }
 0x20f   :  { %v806_v63 = vpop.f32.mrf.mxu0  ;;  %v849_v59 = vpop.f32.mrf.mxu1 }
 0x210   :  { %v850_v49 = vadd.f32 %v849_v59, %v806_v63 }
 0x211   :  { %v808_v61 = vpop.f32.mrf.mxu0  ;;  %v851_v47 = vpop.f32.mrf.mxu1 }
 0x212   :  { %v852_v51 = vadd.f32 %v851_v47, %v808_v61 }
 0x213   :  { %v810_v48 = vpop.f32.mrf.mxu0  ;;  %v853_v16 = vpop.f32.mrf.mxu1 }
 0x214   :  { %v854_v55 = vadd.f32 %v853_v16, %v810_v48 }
 0x215   :  { %v812_v0 = vpop.f32.mrf.mxu0  ;;  %v855_v53 = vpop.f32.mrf.mxu1 }
 0x216   :  { %v856_v19 = vadd.f32 %v855_v53, %v812_v0 }
 0x24f   :  { %v892_v50 = vpop.f32.mrf.mxu0 }
 0x250   :  { %v893_v52 = vadd.f32 %v892_v50, %v850_v49 }
 0x251   :  { %v894_v54 = vpop.f32.mrf.mxu0 }
 0x252   :  { %901 = vst [vmem:[%s1655_s4] sm:$0xff] %v893_v52  ;;  %v895_v56 = vadd.f32 %v894_v54, %v852_v51 }
 0x253   :  { %v896_v3 = vpop.f32.mrf.mxu0 }
 0x254   :  { %903 = vst.msk [vmem:[%s1655_s4 + $0x8] sm:$0xff] %vm902_vm0, %v895_v56  ;;  %v897_v57 = vadd.f32 %v896_v3, %v854_v55 }
 0x255   :  { %v898_v58 = vpop.f32.mrf.mxu0 }
 0x256   :  { %904 = vst [vmem:[%s1655_s4 + $0x10] sm:$0xff] %v897_v57  ;;  %v899_v62 = vadd.f32 %v898_v58, %v856_v19 }
 0x258   :  { %905 = vst.msk [vmem:[%s1655_s4 + $0x18] sm:$0xff] %vm902_vm0, %v899_v62 }

// kernel: _lambda_.13
= control target key start
LH: loop header
LB: loop body
LE: loop exit
PB: predicated region body
PF: predicated region fallthrough
CT: control target
= control target key end

     0   :  { %v28_v0 = vlaneseq  ;;  %v3774_v1 = vmov 1983009808   ;;  %vm87_vm0 = vcmask 1041408   ;;  %s4900_s0 = inlined_call_operand.vmem [shape: f32[2,1536], index: 0, kind: input, shape index: {}]   ;;  %s4901_s3 = inlined_call_operand.vmem [shape: bf16[1536,384], index: 3, kind: input, shape index: {}]   ;;  %s4902_s1 = inlined_call_operand.vmem [shape: f32[1,1536], index: 1, kind: input, shape index: {}]   ;;  %s4903_s2 = inlined_call_operand.vmem [shape: f32[1,1536], index: 2, kind: input, shape index: {}]   ;;  %s4904_s4 = inlined_call_operand.vmem [shape: f32[2,384], index: 4, kind: output, shape index: {}]  }
   0x1   :  { %v26_v2 = vunpack.c.l.s4 %v3774_v1  ;;  %v3804_v3 = vld [vmem:[%s4900_s0] sm:$0xff]  ;;  %v3816_v8 = vld [vmem:[%s4900_s0 + $0x8] sm:$0xff]  ;;  %v3833_v22 = vld [vmem:[%s4900_s0 + $0x10] sm:$0xff] }
   0x2   :  { %v3806_v4 = vshrl.u32 %v28_v0, 7  ;;  %v24_v5 = vcombine.high %v3804_v3, %v3804_v3  ;;  %v41_v13 = vcombine.high %v3816_v8, %v3816_v8  ;;  %v58_v27 = vcombine.high %v3833_v22, %v3833_v22  ;;  %v3388_v47 = vld [vmem:[%s4901_s3 + $0xac] ss:$12 sps:$4 sm:$0xff]   ;;  %v3390_v48 = vld [vmem:[%s4901_s3 + $0xa8] ss:$12 sps:$4 sm:$0xff]  }
   0x3   :  { %v27_v6 = vunpack.c.0.s8 %v26_v2  ;;  %2452 = vmatprep.subr.bf16.mxu0 %v3388_v47  ;;  %v3391_v49 = vld [vmem:[%s4901_s3 + $0x22c] ss:$12 sps:$4 sm:$0xff]   ;;  %v3393_v50 = vld [vmem:[%s4901_s3 + $0x228] ss:$12 sps:$4 sm:$0xff]   ;;  %v3396_v52 = vld [vmem:[%s4901_s3 + $0x90] ss:$12 sps:$4 sm:$0xff]  }
   0x4   :  { %2453 = vmatpush1.bf16.msra.mxu0 %v3390_v48  ;;  %v3394_v51 = vld [vmem:[%s4901_s3 + $0x94] ss:$12 sps:$4 sm:$0xff]   ;;  %2493 = vmatprep.subr.bf16.mxu1 %v3391_v49  ;;  %v3399_v54 = vld [vmem:[%s4901_s3 + $0x210] ss:$12 sps:$4 sm:$0xff]   ;;  %v3402_v56 = vld [vmem:[%s4901_s3 + $0x78] ss:$12 sps:$4 sm:$0xff]  }
   0x5   :  { %v3811_v7 = vsub.s32 %v27_v6, %v3806_v4  ;;  %v3397_v53 = vld [vmem:[%s4901_s3 + $0x214] ss:$12 sps:$4 sm:$0xff]   ;;  %2494 = vmatpush1.bf16.msra.mxu1 %v3393_v50  ;;  %2454 = vmatprep.subr.bf16.mxu0 %v3394_v51  ;;  %v3400_v55 = vld [vmem:[%s4901_s3 + $0x7c] ss:$12 sps:$4 sm:$0xff]   ;;  %v3406_v58 = vld [vmem:[%s4901_s3 + $0x64] ss:$12 sps:$4 sm:$0xff]  }
   0x6   :  { %2495 = vmatprep.subr.bf16.mxu1 %v3397_v53  ;;  %v3403_v57 = vld [vmem:[%s4901_s3 + $0x1fc] ss:$12 sps:$4 sm:$0xff]   ;;  %v3405_v59 = vld [vmem:[%s4901_s3 + $0x1f8] ss:$12 sps:$4 sm:$0xff]   ;;  %v3408_v61 = vld [vmem:[%s4901_s3 + $0x60] ss:$12 sps:$4 sm:$0xff]  }
   0x7   :  { %v31_v9 = vrot.slane %v3804_v3, %v3811_v7  ;;  %v38_v10 = vrot.slane %v24_v5, %v3811_v7  ;;  %v48_v14 = vrot.slane %v3816_v8, %v3811_v7  ;;  %v55_v19 = vrot.slane %v41_v13, %v3811_v7  ;;  %v3409_v60 = vld [vmem:[%s4901_s3 + $0x1e4] ss:$12 sps:$4 sm:$0xff]   ;;  %v3412_v62 = vld [vmem:[%s4901_s3 + $0x4c] ss:$12 sps:$4 sm:$0xff]   ;;  %v3414_v1 = vld [vmem:[%s4901_s3 + $0x48] ss:$12 sps:$4 sm:$0xff]  }
   0x8   :  { %v65_v28 = vrot.slane %v3833_v22, %v3811_v7  ;;  %v72_v33 = vrot.slane %v58_v27, %v3811_v7  ;;  %2455 = vmatpush1.bf16.msra.mxu0 %v3396_v52  ;;  %v3411_v63 = vld [vmem:[%s4901_s3 + $0x1e0] ss:$12 sps:$4 sm:$0xff]   ;;  %v3417_v5 = vld [vmem:[%s4901_s3 + $0x1c8] ss:$12 sps:$4 sm:$0xff]  }
   0x9   :  { %v39_v11 = vcombine.high %v31_v9, %v31_v9  ;;  %v40_v12 = vcombine.high %v38_v10, %v38_v10  ;;  %v88_v15 = vsel %vm87_vm0, %v31_v9, 0.0  ;;  %v91_v17 = vsel %vm87_vm0, %v38_v10, 0.0  ;;  %2456 = vmatprep.subr.bf16.mxu0 %v3400_v55  ;;  %2496 = vmatpush1.bf16.msra.mxu1 %v3399_v54  ;;  %v3415_v0 = vld [vmem:[%s4901_s3 + $0x1cc] ss:$12 sps:$4 sm:$0xff]   ;;  %v3418_v2 = vld [vmem:[%s4901_s3 + $0x34] ss:$12 sps:$4 sm:$0xff]  }
   0xa   :  { %v56_v20 = vcombine.high %v48_v14, %v48_v14  ;;  %v95_v24 = vsel %vm87_vm0, %v48_v14, 0.0  ;;  %v57_v26 = vcombine.high %v55_v19, %v55_v19  ;;  %v99_v31 = vsel %vm87_vm0, %v55_v19, 0.0  ;;  %2497 = vmatprep.subr.bf16.mxu1 %v3403_v57  ;;  %v3421_v6 = vld [vmem:[%s4901_s3 + $0x1b4] ss:$12 sps:$4 sm:$0xff]   ;;  %v3420_v9 = vld [vmem:[%s4901_s3 + $0x30] ss:$12 sps:$4 sm:$0xff]  }
   0xb   :  { %v89_v16 = vsel %vm87_vm0, %v39_v11, 0.0  ;;  %v93_v21 = vsel %vm87_vm0, %v40_v12, 0.0  ;;  %v73_v34 = vcombine.high %v65_v28, %v65_v28  ;;  %v103_v37 = vsel %vm87_vm0, %v65_v28, 0.0  ;;  %v3423_v10 = vld [vmem:[%s4901_s3 + $0x1b0] ss:$12 sps:$4 sm:$0xff]  }
   0xc   :  { %v90_v18 = vadd.f32 %v89_v16, %v88_v15  ;;  %v97_v29 = vsel %vm87_vm0, %v56_v20, 0.0  ;;  %v101_v35 = vsel %vm87_vm0, %v57_v26, 0.0  ;;  %v74_v39 = vcombine.high %v72_v33, %v72_v33  ;;  %2457 = vmatpush1.bf16.msra.mxu0 %v3402_v56  ;;  %v3424_v11 = vld [vmem:[%s4901_s3 + $0x1c] ss:$12 sps:$4 sm:$0xff]   ;;  %v3426_v12 = vld [vmem:[%s4901_s3 + $0x18] ss:$12 sps:$4 sm:$0xff]  }
   0xd   :  { %v105_v40 = vsel %vm87_vm0, %v73_v34, 0.0  ;;  %v107_v42 = vsel %vm87_vm0, %v72_v33, 0.0  ;;  %2458 = vmatprep.subr.bf16.mxu0 %v3406_v58  ;;  %2498 = vmatpush1.bf16.msra.mxu1 %v3405_v59  ;;  %v3427_v13 = vld [vmem:[%s4901_s3 + $0x19c] ss:$12 sps:$4 sm:$0xff]   ;;  %v3430_v14 = vld [vmem:[%s4901_s3 + $0x4] ss:$12 sps:$4 sm:$0xff]  }
   0xe   :  { %v92_v23 = vadd.f32 %v91_v17, %v90_v18  ;;  %v109_v44 = vsel %vm87_vm0, %v74_v39, 0.0  ;;  %2499 = vmatprep.subr.bf16.mxu1 %v3409_v60  ;;  %v3429_v15 = vld [vmem:[%s4901_s3 + $0x198] ss:$12 sps:$4 sm:$0xff]   ;;  %v3432_v17 = vld [vmem:[%s4901_s3] ss:$12 sps:$4 sm:$0xff]  }
   0xf   :  { %v3433_v16 = vld [vmem:[%s4901_s3 + $0x184] ss:$12 sps:$4 sm:$0xff]   ;;  %v3435_v18 = vld [vmem:[%s4901_s3 + $0x180] ss:$12 sps:$4 sm:$0xff]   ;;  %v3775_v19 = vmov 269488144  }
  0x10   :  { %v94_v25 = vadd.f32 %v93_v21, %v92_v23  ;;  %2459 = vmatpush1.bf16.msra.mxu0 %v3408_v61  ;;  %v117_v20 = vunpack.c.l.s4 %v3775_v19  ;;  %v3454_v19 = vld [vmem:[%s4901_s3 + $0x124] ss:$12 sps:$4 sm:$0xff]  }
  0x11   :  { %2460 = vmatprep.subr.bf16.mxu0 %v3412_v62  ;;  %2500 = vmatpush1.bf16.msra.mxu1 %v3411_v63 }
  0x12   :  { %v96_v30 = vadd.f32 %v95_v24, %v94_v25  ;;  %2501 = vmatprep.subr.bf16.mxu1 %v3415_v0  ;;  %v118_v21 = vunpack.c.0.s8 %v117_v20  ;;  %v3453_v20 = vld [vmem:[%s4901_s3 + $0x2b8] ss:$12 sps:$4 sm:$0xff]  }
  0x14   :  { %v98_v32 = vadd.f32 %v97_v29, %v96_v30  ;;  %2461 = vmatpush1.bf16.msra.mxu0 %v3414_v1  ;;  %v3945_v23 = vsub.s32 %v118_v21, %v3806_v4  ;;  %v3457_v21 = vld [vmem:[%s4901_s3 + $0x2a4] ss:$12 sps:$4 sm:$0xff]  }
  0x15   :  { %2462 = vmatprep.subr.bf16.mxu0 %v3418_v2  ;;  %2502 = vmatpush1.bf16.msra.mxu1 %v3417_v5 }
  0x16   :  { %v100_v36 = vadd.f32 %v99_v31, %v98_v32  ;;  %2503 = vmatprep.subr.bf16.mxu1 %v3421_v6  ;;  %v3436_v6 = vld [vmem:[%s4901_s3 + $0x16c] ss:$12 sps:$4 sm:$0xff]  }
  0x18   :  { %v102_v38 = vadd.f32 %v101_v35, %v100_v36  ;;  %2463 = vmatpush1.bf16.msra.mxu0 %v3420_v9  ;;  %v3438_v9 = vld [vmem:[%s4901_s3 + $0x168] ss:$12 sps:$4 sm:$0xff]  }
  0x19   :  { %2464 = vmatprep.subr.bf16.mxu0 %v3424_v11  ;;  %2504 = vmatpush1.bf16.msra.mxu1 %v3423_v10  ;;  %v3439_v10 = vld [vmem:[%s4901_s3 + $0x2ec] ss:$12 sps:$4 sm:$0xff]   ;;  %v3441_v11 = vld [vmem:[%s4901_s3 + $0x2e8] ss:$12 sps:$4 sm:$0xff]  }
  0x1a   :  { %v104_v41 = vadd.f32 %v103_v37, %v102_v38  ;;  %2505 = vmatprep.subr.bf16.mxu1 %v3427_v13  ;;  %v3444_v13 = vld [vmem:[%s4901_s3 + $0x150] ss:$12 sps:$4 sm:$0xff]  }
  0x1c   :  { %v106_v43 = vadd.f32 %v105_v40, %v104_v41  ;;  %2465 = vmatpush1.bf16.msra.mxu0 %v3426_v12  ;;  %v3442_v12 = vld [vmem:[%s4901_s3 + $0x154] ss:$12 sps:$4 sm:$0xff]  }
  0x1d   :  { %2466 = vmatprep.subr.bf16.mxu0 %v3430_v14  ;;  %2506 = vmatpush1.bf16.msra.mxu1 %v3429_v15  ;;  %v3445_v14 = vld [vmem:[%s4901_s3 + $0x2d4] ss:$12 sps:$4 sm:$0xff]   ;;  %v3448_v15 = vld [vmem:[%s4901_s3 + $0x13c] ss:$12 sps:$4 sm:$0xff]  }
  0x1e   :  { %v108_v45 = vadd.f32 %v107_v42, %v106_v43  ;;  %2507 = vmatprep.subr.bf16.mxu1 %v3433_v16  ;;  %v3447_v16 = vld [vmem:[%s4901_s3 + $0x2d0] ss:$12 sps:$4 sm:$0xff]  }
  0x20   :  { %v110_v46 = vadd.f32 %v109_v44, %v108_v45  ;;  %2467 = vmatpush1.bf16.msra.mxu0 %v3432_v17  ;;  %v3451_v17 = vld [vmem:[%s4901_s3 + $0x2bc] ss:$12 sps:$4 sm:$0xff]  }
  0x21   :  { %2508 = vmatpush1.bf16.msra.mxu1 %v3435_v18  ;;  %2468 = vmatprep.subr.bf16.mxu0 %v3436_v6  ;;  %v3450_v18 = vld [vmem:[%s4901_s3 + $0x138] ss:$12 sps:$4 sm:$0xff]  }
  0x22   :  { %111 = vadd.xlane.f32.xlu0 %v110_v46  ;;  %2509 = vmatprep.subr.bf16.mxu1 %v3439_v10  ;;  %v258_v10 = vsub.s32 4, %v3806_v4 }
  0x24   :  { %2469 = vmatpush2.bf16.msra.mxu0 %v3438_v9 }
  0x25   :  { %2470 = vmatprep.subr.bf16.mxu0 %v3442_v12  ;;  %2510 = vmatpush2.bf16.msra.mxu1 %v3441_v11  ;;  %v236_v12 = vld [vmem:[%s4902_s1] sm:$0xff] }
  0x26   :  { %2511 = vmatprep.subr.bf16.mxu1 %v3445_v14  ;;  %v266_v14 = vsub.s32 6, %v3806_v4 }
  0x28   :  { %2471 = vmatpush2.bf16.msra.mxu0 %v3444_v13  ;;  %v262_v13 = vsub.s32 5, %v3806_v4 }
  0x29   :  { %2472 = vmatprep.subr.bf16.mxu0 %v3448_v15  ;;  %2512 = vmatpush2.bf16.msra.mxu1 %v3447_v16  ;;  %v270_v15 = vsub.s32 7, %v3806_v4  ;;  %v345_v16 = vld [vmem:[%s4903_s2] sm:$0xff] }
  0x2a   :  { %2513 = vmatprep.subr.bf16.mxu1 %v3451_v17 }
  0x2c   :  { %2473 = vmatpush2.bf16.msra.mxu0 %v3450_v18 }
  0x2d   :  { %2474 = vmatprep.subr.bf16.mxu0 %v3454_v19  ;;  %2514 = vmatpush2.bf16.msra.mxu1 %v3453_v20 }
  0x2e   :  { %2515 = vmatprep.subr.bf16.mxu1 %v3457_v21  ;;  %v259_v21 = vrot.slane %v236_v12, %v258_v10 }
  0xab   :  { %v112_v24 = vpop.xlane.xlu0 %111 }
  0xac   :  { %v114_v25 = vmul.f32 0.0006510417, %v112_v24  ;;  %v3456_v24 = vld [vmem:[%s4901_s3 + $0x120] ss:$12 sps:$4 sm:$0xff]  }
  0xad   :  { %2475 = vmatpush2.bf16.msra.mxu0 %v3456_v24  ;;  %v263_v24 = vrot.slane %v236_v12, %v262_v13 }
  0xae   :  { %v122_v26 = vrot.slane %v114_v25, %v3945_v23  ;;  %v3460_v25 = vld [vmem:[%s4901_s3 + $0x10c] ss:$12 sps:$4 sm:$0xff]  }
  0xaf   :  { %2476 = vmatprep.subr.bf16.mxu0 %v3460_v25  ;;  %v267_v25 = vrot.slane %v236_v12, %v266_v14 }
  0xb0   :  { %v3949_v27 = vsub.f32 %v3804_v3, %v122_v26  ;;  %v3952_v28 = vsub.f32 %v3816_v8, %v122_v26  ;;  %v3955_v29 = vsub.f32 %v3833_v22, %v122_v26  ;;  %v3459_v26 = vld [vmem:[%s4901_s3 + $0x2a0] ss:$12 sps:$4 sm:$0xff]  }
  0xb1   :  { %2516 = vmatpush2.bf16.msra.mxu1 %v3459_v26  ;;  %v271_v26 = vrot.slane %v236_v12, %v270_v15 }
  0xb2   :  { %v127_v30 = vmul.f32 %v3949_v27, %v3949_v27  ;;  %v128_v31 = vmul.f32 %v3952_v28, %v3952_v28  ;;  %v129_v32 = vmul.f32 %v3955_v29, %v3955_v29 }
  0xb4   :  { %v133_v33 = vcombine.high %v127_v30, %v127_v30  ;;  %v140_v34 = vrot.slane %v127_v30, %v3811_v7  ;;  %v150_v3 = vcombine.high %v128_v31, %v128_v31  ;;  %v157_v35 = vrot.slane %v128_v31, %v3811_v7  ;;  %v3463_v30 = vld [vmem:[%s4901_s3 + $0x28c] ss:$12 sps:$4 sm:$0xff]   ;;  %v3462_v31 = vld [vmem:[%s4901_s3 + $0x108] ss:$12 sps:$4 sm:$0xff]  }
  0xb5   :  { %v167_v8 = vcombine.high %v129_v32, %v129_v32  ;;  %v174_v36 = vrot.slane %v129_v32, %v3811_v7  ;;  %v3466_v32 = vld [vmem:[%s4901_s3 + $0xf4] ss:$12 sps:$4 sm:$0xff]   ;;  %2517 = vmatprep.subr.bf16.mxu1 %v3463_v30  ;;  %2477 = vmatpush2.bf16.msra.mxu0 %v3462_v31 }
  0xb6   :  { %v147_v22 = vrot.slane %v133_v33, %v3811_v7  ;;  %v148_v37 = vcombine.high %v140_v34, %v140_v34  ;;  %v164_v38 = vrot.slane %v150_v3, %v3811_v7  ;;  %v165_v39 = vcombine.high %v157_v35, %v157_v35  ;;  %v3465_v33 = vld [vmem:[%s4901_s3 + $0x288] ss:$12 sps:$4 sm:$0xff]   ;;  %v3468_v3 = vld [vmem:[%s4901_s3 + $0xf0] ss:$12 sps:$4 sm:$0xff]   ;;  %2478 = vmatprep.subr.bf16.mxu0 %v3466_v32 }
  0xb7   :  { %v196_v40 = vsel %vm87_vm0, %v140_v34, 0.0  ;;  %v203_v41 = vsel %vm87_vm0, %v157_v35, 0.0  ;;  %v181_v42 = vrot.slane %v167_v8, %v3811_v7  ;;  %v182_v43 = vcombine.high %v174_v36, %v174_v36  ;;  %v3469_v34 = vld [vmem:[%s4901_s3 + $0x274] ss:$12 sps:$4 sm:$0xff]   ;;  %v3472_v35 = vld [vmem:[%s4901_s3 + $0xdc] ss:$12 sps:$4 sm:$0xff]   ;;  %2518 = vmatpush2.bf16.msra.mxu1 %v3465_v33 }
  0xb8   :  { %v149_v44 = vcombine.high %v147_v22, %v147_v22  ;;  %v197_v45 = vsel %vm87_vm0, %v148_v37, 0.0  ;;  %v199_v46 = vsel %vm87_vm0, %v147_v22, 0.0  ;;  %v166_v47 = vcombine.high %v164_v38, %v164_v38  ;;  %2519 = vmatprep.subr.bf16.mxu1 %v3469_v34 }
  0xb9   :  { %v198_v48 = vadd.f32 %v197_v45, %v196_v40  ;;  %v183_v49 = vcombine.high %v181_v42, %v181_v42  ;;  %v205_v50 = vsel %vm87_vm0, %v165_v39, 0.0  ;;  %v207_v51 = vsel %vm87_vm0, %v164_v38, 0.0  ;;  %v237_v38 = vld [vmem:[%s4902_s1 + $0x8] sm:$0xf]  ;;  %v3471_v39 = vld [vmem:[%s4901_s3 + $0x270] ss:$12 sps:$4 sm:$0xff]   ;;  %2479 = vmatpush2.bf16.msra.mxu0 %v3468_v3 }
  0xba   :  { %v201_v52 = vsel %vm87_vm0, %v149_v44, 0.0  ;;  %v209_v53 = vsel %vm87_vm0, %v166_v47, 0.0  ;;  %v211_v54 = vsel %vm87_vm0, %v174_v36, 0.0  ;;  %v213_v55 = vsel %vm87_vm0, %v182_v43, 0.0  ;;  %v3475_v40 = vld [vmem:[%s4901_s3 + $0x25c] ss:$12 sps:$4 sm:$0xff]   ;;  %2480 = vmatprep.subr.bf16.mxu0 %v3472_v35 }
  0xbb   :  { %v200_v56 = vadd.f32 %v199_v46, %v198_v48  ;;  %v215_v57 = vsel %vm87_vm0, %v181_v42, 0.0  ;;  %v217_v58 = vsel %vm87_vm0, %v183_v49, 0.0  ;;  %v4054_v8 = vsub.s32 0, %v3806_v4  ;;  %v3474_v42 = vld [vmem:[%s4901_s3 + $0xd8] ss:$12 sps:$4 sm:$0xff]   ;;  %2520 = vmatpush2.bf16.msra.mxu1 %v3471_v39 }
  0xbc   :  { %v4057_v36 = vsub.s32 1, %v3806_v4  ;;  %v4060_v22 = vsub.s32 2, %v3806_v4  ;;  %v4063_v37 = vsub.s32 3, %v3806_v4  ;;  %v3478_v44 = vld [vmem:[%s4901_s3 + $0xc4] ss:$12 sps:$4 sm:$0xff]   ;;  %2521 = vmatprep.subr.bf16.mxu1 %v3475_v40  ;;  %v368_v33 = vrot.slane %v345_v16, %v258_v10 }
  0xbd   :  { %v202_v59 = vadd.f32 %v201_v52, %v200_v56  ;;  %v275_v43 = vrot.slane %v237_v38, %v4054_v8  ;;  %v3477_v48 = vld [vmem:[%s4901_s3 + $0x258] ss:$12 sps:$4 sm:$0xff]   ;;  %2481 = vmatpush2.bf16.msra.mxu0 %v3474_v42  ;;  %v243_v17 = vrot.slane %v236_v12, %v4054_v8  ;;  %v352_v30 = vrot.slane %v345_v16, %v4054_v8 }
  0xbe   :  { %v279_v45 = vrot.slane %v237_v38, %v4057_v36  ;;  %v283_v46 = vrot.slane %v237_v38, %v4060_v22  ;;  %v287_v47 = vrot.slane %v237_v38, %v4063_v37  ;;  %2482 = vmatprep.subr.bf16.mxu0 %v3478_v44  ;;  %v247_v18 = vrot.slane %v236_v12, %v4057_v36 }
  0xbf   :  { %v204_v60 = vadd.f32 %v203_v41, %v202_v59  ;;  %v346_v41 = vld [vmem:[%s4903_s2 + $0x8] sm:$0xf]  ;;  %2522 = vmatpush2.bf16.msra.mxu1 %v3477_v48  ;;  %v251_v19 = vrot.slane %v236_v12, %v4060_v22  ;;  %v255_v20 = vrot.slane %v236_v12, %v4063_v37  ;;  %v356_v4 = vrot.slane %v345_v16, %v4057_v36 }
  0xc0   :  { %v384_v49 = vrot.slane %v346_v41, %v4054_v8  ;;  %v322_v52 = vcombine.low %v275_v43, %v279_v45  ;;  %v396_v56 = vrot.slane %v346_v41, %v4063_v37  ;;  %v360_v31 = vrot.slane %v345_v16, %v4060_v22 }
  0xc1   :  { %v206_v61 = vadd.f32 %v205_v50, %v204_v60  ;;  %v388_v50 = vrot.slane %v346_v41, %v4057_v36  ;;  %v3483_v60 = vld [vmem:[%s4901_s3 + $0x240] ss:$12 sps:$4 sm:$0xff]   ;;  %v364_v32 = vrot.slane %v345_v16, %v4063_v37  ;;  %v372_v34 = vrot.slane %v345_v16, %v262_v13 }
  0xc2   :  { %v376_v3 = vrot.slane %v345_v16, %v266_v14  ;;  %v380_v35 = vrot.slane %v345_v16, %v270_v15  ;;  %v288_v38 = vcombine.low %v243_v17, %v247_v18  ;;  %v289_v39 = vcombine.low %v251_v19, %v255_v20  ;;  %v3487_v15 = vld [vmem:[%s4901_s3 + $0x528] ss:$12 sps:$4 sm:$0xff]   ;;  %v3490_v20 = vld [vmem:[%s4901_s3 + $0x390] ss:$12 sps:$4 sm:$0xff]  }
  0xc3   :  { %v208_v62 = vadd.f32 %v207_v51, %v206_v61  ;;  %v3481_v51 = vld [vmem:[%s4901_s3 + $0x244] ss:$12 sps:$4 sm:$0xff]   ;;  %v305_v40 = vcombine.low %v259_v21, %v263_v24  ;;  %v397_v42 = vcombine.low %v352_v30, %v356_v4  ;;  %v398_v43 = vcombine.low %v360_v31, %v364_v32  ;;  %v3492_v16 = vld [vmem:[%s4901_s3 + $0x394] ss:$12 sps:$4 sm:$0xff]   ;;  %v3498_v24 = vld [vmem:[%s4901_s3 + $0x37c] ss:$12 sps:$4 sm:$0xff]  }
  0xc4   :  { %2523 = vmatprep.subr.bf16.mxu1 %v3481_v51  ;;  %v414_v44 = vcombine.low %v368_v33, %v372_v34  ;;  %v415_v45 = vcombine.low %v376_v3, %v380_v35  ;;  %v296_v8 = vrot.slane %v288_v38, %v3811_v7  ;;  %v303_v36 = vrot.slane %v289_v39, %v3811_v7  ;;  %v3495_v19 = vld [vmem:[%s4901_s3 + $0x514] ss:$12 sps:$4 sm:$0xff]   ;;  %v3496_v30 = vld [vmem:[%s4901_s3 + $0x378] ss:$12 sps:$4 sm:$0xff]  }
  0xc5   :  { %v210_v63 = vadd.f32 %v209_v53, %v208_v62  ;;  %v323_v53 = vcombine.low %v283_v46, %v287_v47  ;;  %2524 = vmatpush2.bf16.msra.mxu1 %v3483_v60  ;;  %v405_v46 = vrot.slane %v397_v42, %v3811_v7  ;;  %v412_v47 = vrot.slane %v398_v43, %v3811_v7  ;;  %v3504_v4 = vld [vmem:[%s4901_s3 + $0x364] ss:$12 sps:$4 sm:$0xff]   ;;  %v3502_v33 = vld [vmem:[%s4901_s3 + $0x360] ss:$12 sps:$4 sm:$0xff]   ;;  %v3508_v38 = vld [vmem:[%s4901_s3 + $0x348] ss:$12 sps:$4 sm:$0xff]  }
  0xc6   :  { %v422_v48 = vrot.slane %v414_v44, %v3811_v7  ;;  %v3499_v31 = vld [vmem:[%s4901_s3 + $0x4f8] ss:$12 sps:$4 sm:$0xff]   ;;  %v3505_v3 = vld [vmem:[%s4901_s3 + $0x4e0] ss:$12 sps:$4 sm:$0xff]   ;;  %v3514_v42 = vld [vmem:[%s4901_s3 + $0x330] ss:$12 sps:$4 sm:$0xff]  }
  0xc7   :  { %v212_v0 = vadd.f32 %v211_v54, %v210_v63  ;;  %v392_v54 = vrot.slane %v346_v41, %v4060_v22  ;;  %v337_v59 = vrot.slane %v323_v53, %v3811_v7  ;;  %v3486_v63 = vld [vmem:[%s4901_s3 + $0x3ac] ss:$12 sps:$4 sm:$0xff]   ;;  %v306_v41 = vcombine.low %v267_v25, %v271_v26  ;;  %v3493_v25 = vld [vmem:[%s4901_s3 + $0x510] ss:$12 sps:$4 sm:$0xff]   ;;  %v3516_v39 = vld [vmem:[%s4901_s3 + $0x334] ss:$12 sps:$4 sm:$0xff]  }
  0xc8   :  { %v313_v22 = vrot.slane %v305_v40, %v3811_v7  ;;  %v3501_v26 = vld [vmem:[%s4901_s3 + $0x4fc] ss:$12 sps:$4 sm:$0xff]   ;;  %v3507_v32 = vld [vmem:[%s4901_s3 + $0x4e4] ss:$12 sps:$4 sm:$0xff]   ;;  %v3510_v34 = vld [vmem:[%s4901_s3 + $0x34c] ss:$12 sps:$4 sm:$0xff]  }
  0xc9   :  { %v214_v1 = vadd.f32 %v213_v55, %v212_v0  ;;  %v3480_v55 = vld [vmem:[%s4901_s3 + $0xc0] ss:$12 sps:$4 sm:$0xff]   ;;  %v432_v61 = vcombine.low %v392_v54, %v396_v56  ;;  %v320_v37 = vrot.slane %v306_v41, %v3811_v7  ;;  %v413_v54 = vcombine.low %v405_v46, %v412_v47  ;;  %v3511_v40 = vld [vmem:[%s4901_s3 + $0x4c8] ss:$12 sps:$4 sm:$0xff]   ;;  %v3517_v44 = vld [vmem:[%s4901_s3 + $0x4b0] ss:$12 sps:$4 sm:$0xff]  }
  0xca   :  { %2483 = vmatpush2.bf16.msra.mxu0 %v3480_v55  ;;  %v3513_v35 = vld [vmem:[%s4901_s3 + $0x4cc] ss:$12 sps:$4 sm:$0xff]   ;;  %v3519_v41 = vld [vmem:[%s4901_s3 + $0x4b4] ss:$12 sps:$4 sm:$0xff]   ;;  %v3522_v43 = vld [vmem:[%s4901_s3 + $0x31c] ss:$12 sps:$4 sm:$0xff]  }
  0xcb   :  { %v216_v2 = vadd.f32 %v215_v57, %v214_v1  ;;  %v431_v57 = vcombine.low %v384_v49, %v388_v50  ;;  %v446_v1 = vrot.slane %v432_v61, %v3811_v7  ;;  %2534 = vmatprep.subr.bf16.mxu0 %v3486_v63  ;;  %v429_v49 = vrot.slane %v415_v45, %v3811_v7  ;;  %v3525_v45 = vld [vmem:[%s4901_s3 + $0x49c] ss:$12 sps:$4 sm:$0xff]   ;;  %v3526_v46 = vld [vmem:[%s4901_s3 + $0x300] ss:$12 sps:$4 sm:$0xff]  }
  0xcc   :  { %v321_v53 = vcombine.low %v313_v22, %v320_v37  ;;  %v3523_v22 = vld [vmem:[%s4901_s3 + $0x498] ss:$12 sps:$4 sm:$0xff]  }
  0xcd   :  { %v218_v5 = vadd.f32 %v217_v58, %v216_v2  ;;  %v330_v58 = vrot.slane %v322_v52, %v3811_v7  ;;  %v439_v62 = vrot.slane %v431_v57, %v3811_v7  ;;  %v3489_v2 = vld [vmem:[%s4901_s3 + $0x52c] ss:$12 sps:$4 sm:$0xff]   ;;  %v304_v52 = vcombine.low %v296_v8, %v303_v36  ;;  %v3528_v36 = vld [vmem:[%s4901_s3 + $0x304] ss:$12 sps:$4 sm:$0xff]  }
  0xce   :  { %2575 = vmatprep.subr.bf16.mxu1 %v3489_v2  ;;  %v430_v57 = vcombine.low %v422_v48, %v429_v49  ;;  %v3520_v8 = vld [vmem:[%s4901_s3 + $0x318] ss:$12 sps:$4 sm:$0xff]   ;;  %v3529_v48 = vld [vmem:[%s4901_s3 + $0x480] ss:$12 sps:$4 sm:$0xff]  }
  0xcf   :  { %219 = vadd.xlane.f32.xlu0 %v218_v5  ;;  %v338_v0 = vcombine.low %v330_v58, %v337_v59  ;;  %v447_v5 = vcombine.low %v439_v62, %v446_v1  ;;  %v3531_v37 = vld [vmem:[%s4901_s3 + $0x484] ss:$12 sps:$4 sm:$0xff]   ;;  %v3534_v47 = vld [vmem:[%s4901_s3 + $0x46c] ss:$12 sps:$4 sm:$0xff]  }
  0xd0   :  { %v3537_v49 = vld [vmem:[%s4901_s3 + $0x5ec] ss:$12 sps:$4 sm:$0xff]  }
 0x158   :  { %v220_v6 = vpop.xlane.xlu0 %219 }
 0x159   :  { %v221_v9 = vmul.f32 0.0006510417, %v220_v6 }
 0x15b   :  { %v222_v11 = vadd.f32 1e-05, %v221_v9 }
 0x15d   :  { %3772 = vrsqrt.f32 %v222_v11 }
 0x16a   :  { %v3773_v50 = vpop.eup %3772 }
 0x16b   :  { %v231_v51 = vrot.slane %v3773_v50, %v3945_v23  ;;  %v3532_v50 = vld [vmem:[%s4901_s3 + $0x468] ss:$12 sps:$4 sm:$0xff]  }
 0x16d   :  { %v233_v55 = vmul.f32 %v231_v51, %v3949_v27  ;;  %v234_v56 = vmul.f32 %v231_v51, %v3952_v28  ;;  %v235_v58 = vmul.f32 %v231_v51, %v3955_v29  ;;  %v3540_v51 = vld [vmem:[%s4901_s3 + $0x454] ss:$12 sps:$4 sm:$0xff]  }
 0x16f   :  { %v342_v59 = vmul.f32 %v304_v52, %v233_v55  ;;  %v343_v60 = vmul.f32 %v321_v53, %v234_v56  ;;  %v344_v61 = vmul.f32 %v338_v0, %v235_v58  ;;  %v3535_v52 = vld [vmem:[%s4901_s3 + $0x5e8] ss:$12 sps:$4 sm:$0xff]   ;;  %v3541_v56 = vld [vmem:[%s4901_s3 + $0x5d0] ss:$12 sps:$4 sm:$0xff]   ;;  %v3544_v58 = vld [vmem:[%s4901_s3 + $0x438] ss:$12 sps:$4 sm:$0xff]  }
 0x170   :  { %v3543_v53 = vld [vmem:[%s4901_s3 + $0x5d4] ss:$12 sps:$4 sm:$0xff]   ;;  %v3546_v55 = vld [vmem:[%s4901_s3 + $0x43c] ss:$12 sps:$4 sm:$0xff]  }
 0x171   :  { %v451_v62 = vadd.f32 %v413_v54, %v342_v59  ;;  %v452_v63 = vadd.f32 %v430_v57, %v343_v60  ;;  %v4143_v1 = vadd.f32 %v447_v5, %v344_v61  ;;  %v3484_v5 = vld [vmem:[%s4901_s3 + $0x3a8] ss:$12 sps:$4 sm:$0xff]   ;;  %v3538_v54 = vld [vmem:[%s4901_s3 + $0x450] ss:$12 sps:$4 sm:$0xff]   ;;  %v3547_v60 = vld [vmem:[%s4901_s3 + $0x5b8] ss:$12 sps:$4 sm:$0xff]  }
 0x172   :  { %v3549_v57 = vld [vmem:[%s4901_s3 + $0x5bc] ss:$12 sps:$4 sm:$0xff]   ;;  %v3552_v59 = vld [vmem:[%s4901_s3 + $0x424] ss:$12 sps:$4 sm:$0xff]  }
 0x173   :  { %v464_v2 = vrot.slane %v451_v62, %v3811_v7  ;;  %v457_v23 = vcombine.high %v451_v62, %v451_v62  ;;  %v4147_v6 = vrot.slane %v452_v63, %v3811_v7  ;;  %v474_v9 = vcombine.high %v452_v63, %v452_v63  ;;  %v3555_v61 = vld [vmem:[%s4901_s3 + $0x5a4] ss:$12 sps:$4 sm:$0xff]   ;;  %v3550_v62 = vld [vmem:[%s4901_s3 + $0x420] ss:$12 sps:$4 sm:$0xff]  }
 0x174   :  { %v3558_v63 = vld [vmem:[%s4901_s3 + $0x40c] ss:$12 sps:$4 sm:$0xff]  }
 0x175   :  { %v472_v27 = vcombine.high %v464_v2, %v464_v2  ;;  %v471_v28 = vrot.slane %v457_v23, %v3811_v7  ;;  %v489_v29 = vcombine.high %v4147_v6, %v4147_v6  ;;  %v4153_v10 = vrot.slane %v474_v9, %v3811_v7  ;;  %v3561_v23 = vld [vmem:[%s4901_s3 + $0x58c] ss:$12 sps:$4 sm:$0xff]   ;;  %v3556_v9 = vld [vmem:[%s4901_s3 + $0x408] ss:$12 sps:$4 sm:$0xff]  }
 0x176   :  { %v4160_v12 = vpack.c.bf16 %v464_v2, %v464_v2  ;;  %v3553_v2 = vld [vmem:[%s4901_s3 + $0x5a0] ss:$12 sps:$4 sm:$0xff]  }
 0x177   :  { %v4155_v0 = vpack.c.bf16 %v472_v27, %v472_v27  ;;  %v473_v11 = vcombine.high %v471_v28, %v471_v28  ;;  %v490_v13 = vcombine.high %v4153_v10, %v4153_v10  ;;  %v4174_v17 = vpack.c.bf16 %v489_v29, %v489_v29  ;;  %v3564_v27 = vld [vmem:[%s4901_s3 + $0x3f4] ss:$12 sps:$4 sm:$0xff]  }
 0x178   :  { %v4176_v18 = vpack.c.bf16 %v471_v28, %v471_v28  ;;  %v3559_v28 = vld [vmem:[%s4901_s3 + $0x588] ss:$12 sps:$4 sm:$0xff]  }
 0x179   :  { %2484 = vmatprep.mubr.bf16.mxu0 %v4155_v0  ;;  %v4165_v14 = vpack.c.bf16 %v473_v11, %v473_v11  ;;  %v4187_v21 = vpack.c.bf16 %v490_v13, %v490_v13  ;;  %v3567_v29 = vld [vmem:[%s4901_s3 + $0x574] ss:$12 sps:$4 sm:$0xff]   ;;  %v3570_v11 = vld [vmem:[%s4901_s3 + $0x3dc] ss:$12 sps:$4 sm:$0xff]  }
 0x17a   :  { %2485 = vmatmul.mubr.bf16.vlgmr.msra.gmra.mxu0 %v4160_v12  ;;  %v3565_v13 = vld [vmem:[%s4901_s3 + $0x570] ss:$12 sps:$4 sm:$0xff]  }
 0x17b   :  { %2535 = vmatpush1.bf16.msra.mxu0 %v3484_v5  ;;  %2525 = vmatprep.mubr.bf16.mxu1 %v4165_v14  ;;  %v3562_v5 = vld [vmem:[%s4901_s3 + $0x3f0] ss:$12 sps:$4 sm:$0xff]  }
 0x17c   :  { %2566 = vmatprep.mubr.bf16.mxu0 %v4174_v17  ;;  %2526 = vmatmul.mubr.bf16.vlgmr.msra.gmra.mxu1 %v4176_v18 }
 0x17d   :  { %2576 = vmatpush1.bf16.msra.mxu1 %v3487_v15  ;;  %2536 = vmatprep.subr.bf16.mxu0 %v3492_v16  ;;  %v3573_v15 = vld [vmem:[%s4901_s3 + $0x55c] ss:$12 sps:$4 sm:$0xff]   ;;  %v3568_v16 = vld [vmem:[%s4901_s3 + $0x3d8] ss:$12 sps:$4 sm:$0xff]  }
 0x17e   :  { %2607 = vmatprep.mubr.bf16.mxu1 %v4187_v21  ;;  %2577 = vmatprep.subr.bf16.mxu1 %v3495_v19  ;;  %v491_v19 = vcombine.high %v4143_v1, %v4143_v1 }
 0x17f   :  { %2537 = vmatpush1.bf16.msra.mxu0 %v3490_v20  ;;  %v3576_v20 = vld [vmem:[%s4901_s3 + $0x3c4] ss:$12 sps:$4 sm:$0xff]  }
 0x180   :  { %2538 = vmatprep.subr.bf16.mxu0 %v3498_v24  ;;  %v3571_v24 = vld [vmem:[%s4901_s3 + $0x558] ss:$12 sps:$4 sm:$0xff]  }
 0x181   :  { %2578 = vmatpush1.bf16.msra.mxu1 %v3493_v25  ;;  %v4356_v25 = vrot.slane %v4143_v1, %v3811_v7  ;;  %v3577_v1 = vld [vmem:[%s4901_s3 + $0x540] ss:$12 sps:$4 sm:$0xff]  }
 0x182   :  { %2579 = vmatprep.subr.bf16.mxu1 %v3501_v26  ;;  %v3579_v26 = vld [vmem:[%s4901_s3 + $0x544] ss:$12 sps:$4 sm:$0xff]  }
 0x183   :  { %2539 = vmatpush1.bf16.msra.mxu0 %v3496_v30  ;;  %v3574_v30 = vld [vmem:[%s4901_s3 + $0x3c0] ss:$12 sps:$4 sm:$0xff]  }
 0x184   :  { %2540 = vmatprep.subr.bf16.mxu0 %v3504_v4  ;;  %v4365_v4 = vrot.slane %v491_v19, %v3811_v7  ;;  %v3648_v19 = vld [vmem:[%s4901_s3 + $0x724] ss:$12 sps:$4 sm:$0xff]  }
 0x185   :  { %2580 = vmatpush1.bf16.msra.mxu1 %v3499_v31  ;;  %v3582_v31 = vld [vmem:[%s4901_s3 + $0x6ac] ss:$12 sps:$4 sm:$0xff]  }
 0x186   :  { %2581 = vmatprep.subr.bf16.mxu1 %v3507_v32  ;;  %v506_v32 = vcombine.high %v4356_v25, %v4356_v25 }
 0x187   :  { %2541 = vmatpush1.bf16.msra.mxu0 %v3502_v33  ;;  %v3585_v33 = vld [vmem:[%s4901_s3 + $0x82c] ss:$12 sps:$4 sm:$0xff]  }
 0x188   :  { %2542 = vmatprep.subr.bf16.mxu0 %v3510_v34  ;;  %v3580_v34 = vld [vmem:[%s4901_s3 + $0x6a8] ss:$12 sps:$4 sm:$0xff]  }
 0x189   :  { %2582 = vmatpush1.bf16.msra.mxu1 %v3505_v3  ;;  %v507_v3 = vcombine.high %v4365_v4, %v4365_v4 }
 0x18a   :  { %2583 = vmatprep.subr.bf16.mxu1 %v3513_v35  ;;  %v4385_v35 = vpack.c.bf16 %v4147_v6, %v4147_v6  ;;  %v3591_v6 = vld [vmem:[%s4901_s3 + $0x814] ss:$12 sps:$4 sm:$0xff]  }
 0x18b   :  { %2543 = vmatpush1.bf16.msra.mxu0 %v3508_v38  ;;  %v3588_v38 = vld [vmem:[%s4901_s3 + $0x694] ss:$12 sps:$4 sm:$0xff]  }
 0x18c   :  { %2544 = vmatprep.subr.bf16.mxu0 %v3516_v39  ;;  %v4390_v39 = vpack.c.bf16 %v506_v32, %v506_v32  ;;  %v3652_v32 = vld [vmem:[%s4901_s3 + $0x708] ss:$12 sps:$4 sm:$0xff]  }
 0x18d   :  { %2584 = vmatpush1.bf16.msra.mxu1 %v3511_v40  ;;  %v3583_v40 = vld [vmem:[%s4901_s3 + $0x828] ss:$12 sps:$4 sm:$0xff]  }
 0x18e   :  { %2585 = vmatprep.subr.bf16.mxu1 %v3519_v41  ;;  %v4398_v41 = vpack.c.bf16 %v4153_v10, %v4153_v10  ;;  %v3594_v10 = vld [vmem:[%s4901_s3 + $0x67c] ss:$12 sps:$4 sm:$0xff]  }
 0x18f   :  { %2545 = vmatpush1.bf16.msra.mxu0 %v3514_v42  ;;  %v4404_v42 = vpack.c.bf16 %v507_v3, %v507_v3  ;;  %v3663_v3 = vld [vmem:[%s4901_s3 + $0x874] ss:$12 sps:$4 sm:$0xff]  }
 0x190   :  { %2546 = vmatprep.subr.bf16.mxu0 %v3522_v43  ;;  %v3586_v43 = vld [vmem:[%s4901_s3 + $0x690] ss:$12 sps:$4 sm:$0xff]  }
 0x191   :  { %2586 = vmatpush1.bf16.msra.mxu1 %v3517_v44  ;;  %v3589_v44 = vld [vmem:[%s4901_s3 + $0x810] ss:$12 sps:$4 sm:$0xff]  }
 0x192   :  { %2587 = vmatprep.subr.bf16.mxu1 %v3525_v45  ;;  %v3597_v45 = vld [vmem:[%s4901_s3 + $0x7fc] ss:$12 sps:$4 sm:$0xff]  }
 0x193   :  { %2547 = vmatpush1.bf16.msra.mxu0 %v3520_v8  ;;  %v3592_v8 = vld [vmem:[%s4901_s3 + $0x678] ss:$12 sps:$4 sm:$0xff]  }
 0x194   :  { %2548 = vmatprep.subr.bf16.mxu0 %v3528_v36  ;;  %v3600_v36 = vld [vmem:[%s4901_s3 + $0x664] ss:$12 sps:$4 sm:$0xff]  }
 0x195   :  { %2588 = vmatpush1.bf16.msra.mxu1 %v3523_v22  ;;  %v3595_v22 = vld [vmem:[%s4901_s3 + $0x7f8] ss:$12 sps:$4 sm:$0xff]  }
 0x196   :  { %2589 = vmatprep.subr.bf16.mxu1 %v3531_v37  ;;  %v3603_v37 = vld [vmem:[%s4901_s3 + $0x7e4] ss:$12 sps:$4 sm:$0xff]  }
 0x197   :  { %2549 = vmatpush1.bf16.msra.mxu0 %v3526_v46  ;;  %v3598_v46 = vld [vmem:[%s4901_s3 + $0x660] ss:$12 sps:$4 sm:$0xff]  }
 0x198   :  { %2550 = vmatprep.subr.bf16.mxu0 %v3534_v47  ;;  %v3606_v47 = vld [vmem:[%s4901_s3 + $0x64c] ss:$12 sps:$4 sm:$0xff]  }
 0x199   :  { %2590 = vmatpush1.bf16.msra.mxu1 %v3529_v48  ;;  %v3601_v48 = vld [vmem:[%s4901_s3 + $0x7e0] ss:$12 sps:$4 sm:$0xff]  }
 0x19a   :  { %2591 = vmatprep.subr.bf16.mxu1 %v3537_v49  ;;  %v3609_v49 = vld [vmem:[%s4901_s3 + $0x7cc] ss:$12 sps:$4 sm:$0xff]  }
 0x19b   :  { %2551 = vmatpush2.bf16.msra.mxu0 %v3532_v50  ;;  %v3604_v50 = vld [vmem:[%s4901_s3 + $0x648] ss:$12 sps:$4 sm:$0xff]  }
 0x19c   :  { %2552 = vmatprep.subr.bf16.mxu0 %v3540_v51  ;;  %v3612_v51 = vld [vmem:[%s4901_s3 + $0x634] ss:$12 sps:$4 sm:$0xff]  }
 0x19d   :  { %2592 = vmatpush2.bf16.msra.mxu1 %v3535_v52  ;;  %v3607_v52 = vld [vmem:[%s4901_s3 + $0x7c8] ss:$12 sps:$4 sm:$0xff]  }
 0x19e   :  { %2593 = vmatprep.subr.bf16.mxu1 %v3543_v53  ;;  %v3615_v53 = vld [vmem:[%s4901_s3 + $0x7b4] ss:$12 sps:$4 sm:$0xff]  }
 0x19f   :  { %2553 = vmatpush2.bf16.msra.mxu0 %v3538_v54  ;;  %v3610_v54 = vld [vmem:[%s4901_s3 + $0x630] ss:$12 sps:$4 sm:$0xff]  }
 0x1a0   :  { %2554 = vmatprep.subr.bf16.mxu0 %v3546_v55  ;;  %v3618_v55 = vld [vmem:[%s4901_s3 + $0x61c] ss:$12 sps:$4 sm:$0xff]  }
 0x1a1   :  { %2594 = vmatpush2.bf16.msra.mxu1 %v3541_v56  ;;  %v3613_v56 = vld [vmem:[%s4901_s3 + $0x7b0] ss:$12 sps:$4 sm:$0xff]  }
 0x1a2   :  { %2595 = vmatprep.subr.bf16.mxu1 %v3549_v57  ;;  %v3621_v57 = vld [vmem:[%s4901_s3 + $0x79c] ss:$12 sps:$4 sm:$0xff]  }
 0x1a3   :  { %2555 = vmatpush2.bf16.msra.mxu0 %v3544_v58  ;;  %v3616_v58 = vld [vmem:[%s4901_s3 + $0x618] ss:$12 sps:$4 sm:$0xff]  }
 0x1a4   :  { %2556 = vmatprep.subr.bf16.mxu0 %v3552_v59  ;;  %v3624_v59 = vld [vmem:[%s4901_s3 + $0x604] ss:$12 sps:$4 sm:$0xff]  }
 0x1a5   :  { %2596 = vmatpush2.bf16.msra.mxu1 %v3547_v60  ;;  %v3619_v60 = vld [vmem:[%s4901_s3 + $0x798] ss:$12 sps:$4 sm:$0xff]  }
 0x1a6   :  { %2597 = vmatprep.subr.bf16.mxu1 %v3555_v61  ;;  %v3627_v61 = vld [vmem:[%s4901_s3 + $0x784] ss:$12 sps:$4 sm:$0xff]  }
 0x1a7   :  { %2557 = vmatpush2.bf16.msra.mxu0 %v3550_v62  ;;  %v3622_v62 = vld [vmem:[%s4901_s3 + $0x600] ss:$12 sps:$4 sm:$0xff]  }
 0x1a8   :  { %2558 = vmatprep.subr.bf16.mxu0 %v3558_v63  ;;  %v3630_v63 = vld [vmem:[%s4901_s3 + $0x76c] ss:$12 sps:$4 sm:$0xff]  }
 0x1a9   :  { %2598 = vmatpush2.bf16.msra.mxu1 %v3553_v2  ;;  %v3625_v2 = vld [vmem:[%s4901_s3 + $0x780] ss:$12 sps:$4 sm:$0xff]  }
 0x1aa   :  { %2599 = vmatprep.subr.bf16.mxu1 %v3561_v23  ;;  %v3633_v23 = vld [vmem:[%s4901_s3 + $0x8ec] ss:$12 sps:$4 sm:$0xff]  }
 0x1ab   :  { %2559 = vmatpush2.bf16.msra.mxu0 %v3556_v9  ;;  %v3628_v9 = vld [vmem:[%s4901_s3 + $0x768] ss:$12 sps:$4 sm:$0xff]  }
 0x1ac   :  { %2560 = vmatprep.subr.bf16.mxu0 %v3564_v27  ;;  %v3636_v27 = vld [vmem:[%s4901_s3 + $0x754] ss:$12 sps:$4 sm:$0xff]  }
 0x1ad   :  { %2600 = vmatpush2.bf16.msra.mxu1 %v3559_v28  ;;  %v3631_v28 = vld [vmem:[%s4901_s3 + $0x8e8] ss:$12 sps:$4 sm:$0xff]  }
 0x1ae   :  { %2601 = vmatprep.subr.bf16.mxu1 %v3567_v29  ;;  %v3639_v29 = vld [vmem:[%s4901_s3 + $0x8d4] ss:$12 sps:$4 sm:$0xff]  }
 0x1af   :  { %2561 = vmatpush2.bf16.msra.mxu0 %v3562_v5  ;;  %v3634_v5 = vld [vmem:[%s4901_s3 + $0x750] ss:$12 sps:$4 sm:$0xff]  }
 0x1b0   :  { %2562 = vmatprep.subr.bf16.mxu0 %v3570_v11  ;;  %v3642_v11 = vld [vmem:[%s4901_s3 + $0x73c] ss:$12 sps:$4 sm:$0xff]  }
 0x1b1   :  { %2602 = vmatpush2.bf16.msra.mxu1 %v3565_v13  ;;  %v3637_v13 = vld [vmem:[%s4901_s3 + $0x8d0] ss:$12 sps:$4 sm:$0xff]  }
 0x1b2   :  { %2603 = vmatprep.subr.bf16.mxu1 %v3573_v15  ;;  %v3645_v15 = vld [vmem:[%s4901_s3 + $0x8bc] ss:$12 sps:$4 sm:$0xff]  }
 0x1b3   :  { %2563 = vmatpush2.bf16.msra.mxu0 %v3568_v16  ;;  %v3640_v16 = vld [vmem:[%s4901_s3 + $0x738] ss:$12 sps:$4 sm:$0xff]  }
 0x1b4   :  { %2564 = vmatprep.subr.bf16.mxu0 %v3576_v20  ;;  %v3643_v20 = vld [vmem:[%s4901_s3 + $0x8b8] ss:$12 sps:$4 sm:$0xff]  }
 0x1b5   :  { %2604 = vmatpush2.bf16.msra.mxu1 %v3571_v24  ;;  %v3651_v24 = vld [vmem:[%s4901_s3 + $0x8a4] ss:$12 sps:$4 sm:$0xff]  }
 0x1b6   :  { %2605 = vmatprep.subr.bf16.mxu1 %v3579_v26  ;;  %v3646_v26 = vld [vmem:[%s4901_s3 + $0x720] ss:$12 sps:$4 sm:$0xff]  }
 0x1b7   :  { %2565 = vmatpush2.bf16.msra.mxu0 %v3574_v30  ;;  %v3654_v30 = vld [vmem:[%s4901_s3 + $0x70c] ss:$12 sps:$4 sm:$0xff]  }
 0x1b8   :  { %2616 = vmatprep.subr.bf16.mxu0 %v3582_v31  ;;  %v3649_v31 = vld [vmem:[%s4901_s3 + $0x8a0] ss:$12 sps:$4 sm:$0xff]  }
 0x1b9   :  { %2606 = vmatpush2.bf16.msra.mxu1 %v3577_v1  ;;  %v3657_v1 = vld [vmem:[%s4901_s3 + $0x88c] ss:$12 sps:$4 sm:$0xff]  }
 0x1ba   :  { %2567 = vmatmul.mubr.bf16.vlgmr.msra.gmra.mxu0 %v4385_v35  ;;  %2657 = vmatprep.subr.bf16.mxu1 %v3585_v33  ;;  %v3660_v33 = vld [vmem:[%s4901_s3 + $0x6f4] ss:$12 sps:$4 sm:$0xff]  }
 0x1bb   :  { %2617 = vmatpush1.bf16.msra.mxu0 %v3580_v34  ;;  %2648 = vmatprep.mubr.bf16.mxu0 %v4390_v39  ;;  %v3655_v34 = vld [vmem:[%s4901_s3 + $0x888] ss:$12 sps:$4 sm:$0xff]  }
 0x1bc   :  { %2608 = vmatmul.mubr.bf16.vlgmr.msra.gmra.mxu1 %v4398_v41  ;;  %2618 = vmatprep.subr.bf16.mxu0 %v3588_v38  ;;  %v3658_v38 = vld [vmem:[%s4901_s3 + $0x6f0] ss:$12 sps:$4 sm:$0xff]  }
 0x1bd   :  { %2658 = vmatpush1.bf16.msra.mxu1 %v3583_v40  ;;  %2689 = vmatprep.mubr.bf16.mxu1 %v4404_v42  ;;  %v3666_v40 = vld [vmem:[%s4901_s3 + $0x6dc] ss:$12 sps:$4 sm:$0xff]  }
 0x1be   :  { %2659 = vmatprep.subr.bf16.mxu1 %v3591_v6  ;;  %v3661_v6 = vld [vmem:[%s4901_s3 + $0x870] ss:$12 sps:$4 sm:$0xff]  }
 0x1bf   :  { %2619 = vmatpush1.bf16.msra.mxu0 %v3586_v43  ;;  %v3669_v43 = vld [vmem:[%s4901_s3 + $0x85c] ss:$12 sps:$4 sm:$0xff]  }
 0x1c0   :  { %2620 = vmatprep.subr.bf16.mxu0 %v3594_v10  ;;  %v3664_v10 = vld [vmem:[%s4901_s3 + $0x6d8] ss:$12 sps:$4 sm:$0xff]  }
 0x1c1   :  { %2660 = vmatpush1.bf16.msra.mxu1 %v3589_v44  ;;  %v3672_v44 = vld [vmem:[%s4901_s3 + $0x6c4] ss:$12 sps:$4 sm:$0xff]  }
 0x1c2   :  { %2661 = vmatprep.subr.bf16.mxu1 %v3597_v45  ;;  %v3667_v45 = vld [vmem:[%s4901_s3 + $0x858] ss:$12 sps:$4 sm:$0xff]  }
 0x1c3   :  { %2621 = vmatpush1.bf16.msra.mxu0 %v3592_v8  ;;  %v3675_v8 = vld [vmem:[%s4901_s3 + $0x844] ss:$12 sps:$4 sm:$0xff]  }
 0x1c4   :  { %2622 = vmatprep.subr.bf16.mxu0 %v3600_v36  ;;  %v3670_v36 = vld [vmem:[%s4901_s3 + $0x6c0] ss:$12 sps:$4 sm:$0xff]  }
 0x1c5   :  { %2662 = vmatpush1.bf16.msra.mxu1 %v3595_v22  ;;  %v3676_v22 = vld [vmem:[%s4901_s3 + $0x170] ss:$12 sps:$4 sm:$0xff]  }
 0x1c6   :  { %2663 = vmatprep.subr.bf16.mxu1 %v3603_v37  ;;  %v3673_v37 = vld [vmem:[%s4901_s3 + $0x840] ss:$12 sps:$4 sm:$0xff]  }
 0x1c7   :  { %2623 = vmatpush1.bf16.msra.mxu0 %v3598_v46  ;;  %v3678_v46 = vld [vmem:[%s4901_s3 + $0x2f0] ss:$12 sps:$4 sm:$0xff]  }
 0x1c8   :  { %2624 = vmatprep.subr.bf16.mxu0 %v3606_v47  ;;  %v3677_v47 = vld [vmem:[%s4901_s3 + $0xb0] ss:$12 sps:$4 sm:$0xff]  }
 0x1c9   :  { %2664 = vmatpush1.bf16.msra.mxu1 %v3601_v48  ;;  %v4593_v48 = vpack.c.bf16 %v4356_v25, %v4356_v25  ;;  %v3682_v25 = vld [vmem:[%s4901_s3 + $0x2d8] ss:$12 sps:$4 sm:$0xff]  }
 0x1ca   :  { %2665 = vmatprep.subr.bf16.mxu1 %v3609_v49  ;;  %v3680_v49 = vld [vmem:[%s4901_s3 + $0x158] ss:$12 sps:$4 sm:$0xff]  }
 0x1cb   :  { %2625 = vmatpush1.bf16.msra.mxu0 %v3604_v50  ;;  %v3679_v50 = vld [vmem:[%s4901_s3 + $0x230] ss:$12 sps:$4 sm:$0xff]  }
 0x1cc   :  { %2626 = vmatprep.subr.bf16.mxu0 %v3612_v51  ;;  %v4604_v51 = vpack.c.bf16 %v4365_v4, %v4365_v4  ;;  %v3684_v4 = vld [vmem:[%s4901_s3 + $0x140] ss:$12 sps:$4 sm:$0xff]  }
 0x1cd   :  { %2666 = vmatpush1.bf16.msra.mxu1 %v3607_v52  ;;  %v3681_v52 = vld [vmem:[%s4901_s3 + $0x98] ss:$12 sps:$4 sm:$0xff]  }
 0x1ce   :  { %2667 = vmatprep.subr.bf16.mxu1 %v3615_v53  ;;  %v3683_v53 = vld [vmem:[%s4901_s3 + $0x218] ss:$12 sps:$4 sm:$0xff]  }
 0x1cf   :  { %2627 = vmatpush1.bf16.msra.mxu0 %v3610_v54  ;;  %v3685_v54 = vld [vmem:[%s4901_s3 + $0x80] ss:$12 sps:$4 sm:$0xff]  }
 0x1d0   :  { %2628 = vmatprep.subr.bf16.mxu0 %v3618_v55  ;;  %v3688_v55 = vld [vmem:[%s4901_s3 + $0x128] ss:$12 sps:$4 sm:$0xff]  }
 0x1d1   :  { %2668 = vmatpush1.bf16.msra.mxu1 %v3613_v56  ;;  %v3690_v56 = vld [vmem:[%s4901_s3 + $0x2a8] ss:$12 sps:$4 sm:$0xff]  }
 0x1d2   :  { %2669 = vmatprep.subr.bf16.mxu1 %v3621_v57  ;;  %v3689_v57 = vld [vmem:[%s4901_s3 + $0x68] ss:$12 sps:$4 sm:$0xff]  }
 0x1d3   :  { %2629 = vmatpush1.bf16.msra.mxu0 %v3616_v58  ;;  %v3692_v58 = vld [vmem:[%s4901_s3 + $0x110] ss:$12 sps:$4 sm:$0xff]  }
 0x1d4   :  { %2630 = vmatprep.subr.bf16.mxu0 %v3624_v59  ;;  %v3691_v59 = vld [vmem:[%s4901_s3 + $0x1e8] ss:$12 sps:$4 sm:$0xff]  }
 0x1d5   :  { %2670 = vmatpush1.bf16.msra.mxu1 %v3619_v60  ;;  %v3694_v60 = vld [vmem:[%s4901_s3 + $0x290] ss:$12 sps:$4 sm:$0xff]  }
 0x1d6   :  { %2671 = vmatprep.subr.bf16.mxu1 %v3627_v61  ;;  %v3693_v61 = vld [vmem:[%s4901_s3 + $0x50] ss:$12 sps:$4 sm:$0xff]  }
 0x1d7   :  { %2631 = vmatpush1.bf16.msra.mxu0 %v3622_v62  ;;  %v3696_v62 = vld [vmem:[%s4901_s3 + $0xf8] ss:$12 sps:$4 sm:$0xff]  }
 0x1d8   :  { %2632 = vmatprep.subr.bf16.mxu0 %v3630_v63  ;;  %v3695_v63 = vld [vmem:[%s4901_s3 + $0x1d0] ss:$12 sps:$4 sm:$0xff]  }
 0x1d9   :  { %2672 = vmatpush1.bf16.msra.mxu1 %v3625_v2  ;;  %v3698_v2 = vld [vmem:[%s4901_s3 + $0x278] ss:$12 sps:$4 sm:$0xff]  }
 0x1da   :  { %2673 = vmatprep.subr.bf16.mxu1 %v3633_v23  ;;  %v3697_v23 = vld [vmem:[%s4901_s3 + $0x38] ss:$12 sps:$4 sm:$0xff]  }
 0x1db   :  { %2633 = vmatpush2.bf16.msra.mxu0 %v3628_v9  ;;  %v3700_v9 = vld [vmem:[%s4901_s3 + $0xe0] ss:$12 sps:$4 sm:$0xff]  }
 0x1dc   :  { %2634 = vmatprep.subr.bf16.mxu0 %v3636_v27  ;;  %v3699_v27 = vld [vmem:[%s4901_s3 + $0x1b8] ss:$12 sps:$4 sm:$0xff]  }
 0x1dd   :  { %2674 = vmatpush2.bf16.msra.mxu1 %v3631_v28  ;;  %v3702_v28 = vld [vmem:[%s4901_s3 + $0x260] ss:$12 sps:$4 sm:$0xff]  }
 0x1de   :  { %2675 = vmatprep.subr.bf16.mxu1 %v3639_v29  ;;  %v3701_v29 = vld [vmem:[%s4901_s3 + $0x20] ss:$12 sps:$4 sm:$0xff]  }
 0x1df   :  { %2635 = vmatpush2.bf16.msra.mxu0 %v3634_v5  ;;  %v3704_v5 = vld [vmem:[%s4901_s3 + $0xc8] ss:$12 sps:$4 sm:$0xff]  }
 0x1e0   :  { %2636 = vmatprep.subr.bf16.mxu0 %v3642_v11  ;;  %v3703_v11 = vld [vmem:[%s4901_s3 + $0x1a0] ss:$12 sps:$4 sm:$0xff]  }
 0x1e1   :  { %2676 = vmatpush2.bf16.msra.mxu1 %v3637_v13  ;;  %v3706_v13 = vld [vmem:[%s4901_s3 + $0x248] ss:$12 sps:$4 sm:$0xff]  }
 0x1e2   :  { %2677 = vmatprep.subr.bf16.mxu1 %v3645_v15  ;;  %v3705_v15 = vld [vmem:[%s4901_s3 + $0x8] ss:$12 sps:$4 sm:$0xff]  }
 0x1e3   :  { %2637 = vmatpush2.bf16.msra.mxu0 %v3640_v16  ;;  %v3708_v16 = vld [vmem:[%s4901_s3 + $0x470] ss:$12 sps:$4 sm:$0xff]  }
 0x1e4   :  { %2638 = vmatprep.subr.bf16.mxu0 %v3648_v19  ;;  %v3707_v19 = vld [vmem:[%s4901_s3 + $0x188] ss:$12 sps:$4 sm:$0xff]  }
 0x1e5   :  { %2678 = vmatpush2.bf16.msra.mxu1 %v3643_v20  ;;  %v3710_v20 = vld [vmem:[%s4901_s3 + $0x5f0] ss:$12 sps:$4 sm:$0xff]  }
 0x1e6   :  { %2679 = vmatprep.subr.bf16.mxu1 %v3651_v24  ;;  %v3709_v24 = vld [vmem:[%s4901_s3 + $0x3b0] ss:$12 sps:$4 sm:$0xff]  }
 0x1e7   :  { %2639 = vmatpush2.bf16.msra.mxu0 %v3646_v26  ;;  %v3712_v26 = vld [vmem:[%s4901_s3 + $0x458] ss:$12 sps:$4 sm:$0xff]  }
 0x1e8   :  { %2640 = vmatprep.subr.bf16.mxu0 %v3654_v30  ;;  %v3711_v30 = vld [vmem:[%s4901_s3 + $0x530] ss:$12 sps:$4 sm:$0xff]  }
 0x1e9   :  { %2680 = vmatpush2.bf16.msra.mxu1 %v3649_v31  ;;  %v3714_v31 = vld [vmem:[%s4901_s3 + $0x5d8] ss:$12 sps:$4 sm:$0xff]  }
 0x1ea   :  { %2681 = vmatprep.subr.bf16.mxu1 %v3657_v1  ;;  %v3713_v1 = vld [vmem:[%s4901_s3 + $0x398] ss:$12 sps:$4 sm:$0xff]  }
 0x1eb   :  { %2641 = vmatpush2.bf16.msra.mxu0 %v3652_v32  ;;  %v3716_v32 = vld [vmem:[%s4901_s3 + $0x440] ss:$12 sps:$4 sm:$0xff]  }
 0x1ec   :  { %2642 = vmatprep.subr.bf16.mxu0 %v3660_v33  ;;  %v3720_v33 = vld [vmem:[%s4901_s3 + $0x428] ss:$12 sps:$4 sm:$0xff]  }
 0x1ed   :  { %2682 = vmatpush2.bf16.msra.mxu1 %v3655_v34  ;;  %v3722_v34 = vld [vmem:[%s4901_s3 + $0x5a8] ss:$12 sps:$4 sm:$0xff]  }
 0x1ee   :  { %2683 = vmatprep.subr.bf16.mxu1 %v3663_v3  ;;  %v3721_v3 = vld [vmem:[%s4901_s3 + $0x368] ss:$12 sps:$4 sm:$0xff]  }
 0x1ef   :  { %2643 = vmatpush2.bf16.msra.mxu0 %v3658_v38  ;;  %v3724_v38 = vld [vmem:[%s4901_s3 + $0x410] ss:$12 sps:$4 sm:$0xff]  }
 0x1f0   :  { %2644 = vmatprep.subr.bf16.mxu0 %v3666_v40  ;;  %v3723_v40 = vld [vmem:[%s4901_s3 + $0x4e8] ss:$12 sps:$4 sm:$0xff]  }
 0x1f1   :  { %2684 = vmatpush2.bf16.msra.mxu1 %v3661_v6  ;;  %v3726_v6 = vld [vmem:[%s4901_s3 + $0x590] ss:$12 sps:$4 sm:$0xff]  }
 0x1f2   :  { %2685 = vmatprep.subr.bf16.mxu1 %v3669_v43  ;;  %v3725_v43 = vld [vmem:[%s4901_s3 + $0x350] ss:$12 sps:$4 sm:$0xff]  }
 0x1f3   :  { %2645 = vmatpush2.bf16.msra.mxu0 %v3664_v10  ;;  %v3728_v10 = vld [vmem:[%s4901_s3 + $0x3f8] ss:$12 sps:$4 sm:$0xff]  }
 0x1f4   :  { %2646 = vmatprep.subr.bf16.mxu0 %v3672_v44  ;;  %v3727_v44 = vld [vmem:[%s4901_s3 + $0x4d0] ss:$12 sps:$4 sm:$0xff]  }
 0x1f5   :  { %2686 = vmatpush2.bf16.msra.mxu1 %v3667_v45  ;;  %v3730_v45 = vld [vmem:[%s4901_s3 + $0x578] ss:$12 sps:$4 sm:$0xff]  }
 0x1f6   :  { %2687 = vmatprep.subr.bf16.mxu1 %v3675_v8  ;;  %v3729_v8 = vld [vmem:[%s4901_s3 + $0x338] ss:$12 sps:$4 sm:$0xff]  }
 0x1f7   :  { %2647 = vmatpush2.bf16.msra.mxu0 %v3670_v36  ;;  %v3732_v36 = vld [vmem:[%s4901_s3 + $0x3e0] ss:$12 sps:$4 sm:$0xff]  }
 0x1f8   :  { %3251 = vmatprep.subr.bf16.mxu0 %v3676_v22  ;;  %v3731_v22 = vld [vmem:[%s4901_s3 + $0x4b8] ss:$12 sps:$4 sm:$0xff]  }
 0x1f9   :  { %2688 = vmatpush2.bf16.msra.mxu1 %v3673_v37  ;;  %v3734_v37 = vld [vmem:[%s4901_s3 + $0x560] ss:$12 sps:$4 sm:$0xff]  }
 0x1fa   :  { %2649 = vmatmul.mubr.bf16.vlgmr.msra.gmra.mxu0 %v4593_v48  ;;  %3273 = vmatprep.subr.bf16.mxu1 %v3678_v46  ;;  %v3733_v46 = vld [vmem:[%s4901_s3 + $0x320] ss:$12 sps:$4 sm:$0xff]  }
 0x1fb   :  { %3252 = vmatpush3.bf16.msra.mxu0 %v3677_v47  ;;  %2730 = vmatprep.mubr.bf16.mxu0 %v4155_v0  ;;  %v3686_v0 = vld [vmem:[%s4901_s3 + $0x2c0] ss:$12 sps:$4 sm:$0xff]   ;;  %v3736_v47 = vld [vmem:[%s4901_s3 + $0x3c8] ss:$12 sps:$4 sm:$0xff]  }
 0x1fc   :  { %2690 = vmatmul.mubr.bf16.vlgmr.msra.gmra.mxu1 %v4604_v51  ;;  %3253 = vmatprep.subr.bf16.mxu0 %v3680_v49  ;;  %v3735_v49 = vld [vmem:[%s4901_s3 + $0x4a0] ss:$12 sps:$4 sm:$0xff]  }
 0x1fd   :  { %3274 = vmatpush3.bf16.msra.mxu1 %v3679_v50  ;;  %2770 = vmatprep.mubr.bf16.mxu1 %v4165_v14  ;;  %v3687_v14 = vld [vmem:[%s4901_s3 + $0x200] ss:$12 sps:$4 sm:$0xff]   ;;  %v3738_v50 = vld [vmem:[%s4901_s3 + $0x548] ss:$12 sps:$4 sm:$0xff]  }
 0x1fe   :  { %3275 = vmatprep.subr.bf16.mxu1 %v3682_v25  ;;  %v3737_v25 = vld [vmem:[%s4901_s3 + $0x308] ss:$12 sps:$4 sm:$0xff]  }
 0x1ff   :  { %3254 = vmatpush3.bf16.msra.mxu0 %v3681_v52  ;;  %v3740_v52 = vld [vmem:[%s4901_s3 + $0x770] ss:$12 sps:$4 sm:$0xff]  }
 0x200   :  { %3255 = vmatprep.subr.bf16.mxu0 %v3684_v4  ;;  %v3739_v4 = vld [vmem:[%s4901_s3 + $0x488] ss:$12 sps:$4 sm:$0xff]  }
 0x201   :  { %3276 = vmatpush3.bf16.msra.mxu1 %v3683_v53  ;;  %v3742_v53 = vld [vmem:[%s4901_s3 + $0x8f0] ss:$12 sps:$4 sm:$0xff]  }
 0x202   :  { %3277 = vmatprep.subr.bf16.mxu1 %v3686_v0  ;;  %v3741_v0 = vld [vmem:[%s4901_s3 + $0x6b0] ss:$12 sps:$4 sm:$0xff]  }
 0x203   :  { %3256 = vmatpush3.bf16.msra.mxu0 %v3685_v54  ;;  %v3744_v54 = vld [vmem:[%s4901_s3 + $0x758] ss:$12 sps:$4 sm:$0xff]  }
 0x204   :  { %3257 = vmatprep.subr.bf16.mxu0 %v3688_v55  ;;  %v3743_v55 = vld [vmem:[%s4901_s3 + $0x830] ss:$12 sps:$4 sm:$0xff]  }
 0x205   :  { %3278 = vmatpush3.bf16.msra.mxu1 %v3687_v14 }
 0x206   :  { %3279 = vmatprep.subr.bf16.mxu1 %v3690_v56  ;;  %v3746_v56 = vld [vmem:[%s4901_s3 + $0x8d8] ss:$12 sps:$4 sm:$0xff]  }
 0x207   :  { %3258 = vmatpush3.bf16.msra.mxu0 %v3689_v57  ;;  %v3745_v57 = vld [vmem:[%s4901_s3 + $0x698] ss:$12 sps:$4 sm:$0xff]  }
 0x208   :  { %3259 = vmatprep.subr.bf16.mxu0 %v3692_v58 }
 0x209   :  { %3280 = vmatpush3.bf16.msra.mxu1 %v3691_v59 }
 0x20a   :  { %3281 = vmatprep.subr.bf16.mxu1 %v3694_v60 }
 0x20b   :  { %3260 = vmatpush3.bf16.msra.mxu0 %v3693_v61 }
 0x20c   :  { %3261 = vmatprep.subr.bf16.mxu0 %v3696_v62 }
 0x20d   :  { %3282 = vmatpush3.bf16.msra.mxu1 %v3695_v63 }
 0x20e   :  { %3283 = vmatprep.subr.bf16.mxu1 %v3698_v2  ;;  %v3749_v2 = vld [vmem:[%s4901_s3 + $0x680] ss:$12 sps:$4 sm:$0xff]  }
 0x20f   :  { %3262 = vmatpush3.bf16.msra.mxu0 %v3697_v23 }
 0x210   :  { %3263 = vmatprep.subr.bf16.mxu0 %v3700_v9 }
 0x211   :  { %3284 = vmatpush3.bf16.msra.mxu1 %v3699_v27  ;;  %v3751_v27 = vld [vmem:[%s4901_s3 + $0x800] ss:$12 sps:$4 sm:$0xff]  }
 0x212   :  { %3285 = vmatprep.subr.bf16.mxu1 %v3702_v28 }
 0x213   :  { %3264 = vmatpush3.bf16.msra.mxu0 %v3701_v29  ;;  %v3754_v29 = vld [vmem:[%s4901_s3 + $0x8a8] ss:$12 sps:$4 sm:$0xff]  }
 0x214   :  { %3265 = vmatprep.subr.bf16.mxu0 %v3704_v5  ;;  %v3753_v5 = vld [vmem:[%s4901_s3 + $0x668] ss:$12 sps:$4 sm:$0xff]  }
 0x215   :  { %3286 = vmatpush3.bf16.msra.mxu1 %v3703_v11  ;;  %v3756_v11 = vld [vmem:[%s4901_s3 + $0x710] ss:$12 sps:$4 sm:$0xff]  }
 0x216   :  { %3287 = vmatprep.subr.bf16.mxu1 %v3706_v13  ;;  %v3755_v13 = vld [vmem:[%s4901_s3 + $0x7e8] ss:$12 sps:$4 sm:$0xff]  }
 0x217   :  { %3266 = vmatpush3.bf16.msra.mxu0 %v3705_v15  ;;  %v3758_v15 = vld [vmem:[%s4901_s3 + $0x890] ss:$12 sps:$4 sm:$0xff]  }
 0x218   :  { %3295 = vmatprep.subr.bf16.mxu0 %v3708_v16  ;;  %v3757_v16 = vld [vmem:[%s4901_s3 + $0x650] ss:$12 sps:$4 sm:$0xff]  }
 0x219   :  { %3288 = vmatpush3.bf16.msra.mxu1 %v3707_v19  ;;  %v3760_v19 = vld [vmem:[%s4901_s3 + $0x6f8] ss:$12 sps:$4 sm:$0xff]  }
 0x21a   :  { %2731 = vmatmul.mubr.bf16.vlgmr.msra.gmra.mxu0 %v4160_v12  ;;  %3317 = vmatprep.subr.bf16.mxu1 %v3710_v20  ;;  %v3715_v12 = vld [vmem:[%s4901_s3 + $0x518] ss:$12 sps:$4 sm:$0xff]   ;;  %v3759_v20 = vld [vmem:[%s4901_s3 + $0x7d0] ss:$12 sps:$4 sm:$0xff]  }
 0x21b   :  { %3296 = vmatpush3.bf16.msra.mxu0 %v3709_v24  ;;  %2810 = vmatprep.mubr.bf16.mxu0 %v4174_v17  ;;  %v3718_v17 = vld [vmem:[%s4901_s3 + $0x5c0] ss:$12 sps:$4 sm:$0xff]   ;;  %v3762_v24 = vld [vmem:[%s4901_s3 + $0x878] ss:$12 sps:$4 sm:$0xff]  }
 0x21c   :  { %2771 = vmatmul.mubr.bf16.vlgmr.msra.gmra.mxu1 %v4176_v18  ;;  %3297 = vmatprep.subr.bf16.mxu0 %v3712_v26  ;;  %v3717_v18 = vld [vmem:[%s4901_s3 + $0x380] ss:$12 sps:$4 sm:$0xff]   ;;  %v3761_v26 = vld [vmem:[%s4901_s3 + $0x638] ss:$12 sps:$4 sm:$0xff]  }
 0x21d   :  { %3318 = vmatpush3.bf16.msra.mxu1 %v3711_v30  ;;  %2850 = vmatprep.mubr.bf16.mxu1 %v4187_v21  ;;  %v3719_v21 = vld [vmem:[%s4901_s3 + $0x500] ss:$12 sps:$4 sm:$0xff]  }
 0x21e   :  { %3319 = vmatprep.subr.bf16.mxu1 %v3714_v31  ;;  %v3764_v30 = vld [vmem:[%s4901_s3 + $0x6e0] ss:$12 sps:$4 sm:$0xff]   ;;  %v3763_v31 = vld [vmem:[%s4901_s3 + $0x7b8] ss:$12 sps:$4 sm:$0xff]  }
 0x21f   :  { %3298 = vmatpush3.bf16.msra.mxu0 %v3713_v1  ;;  %v3766_v1 = vld [vmem:[%s4901_s3 + $0x860] ss:$12 sps:$4 sm:$0xff]  }
 0x220   :  { %3299 = vmatprep.subr.bf16.mxu0 %v3716_v32  ;;  %v3765_v32 = vld [vmem:[%s4901_s3 + $0x620] ss:$12 sps:$4 sm:$0xff]  }
 0x221   :  { %3320 = vmatpush3.bf16.msra.mxu1 %v3715_v12  ;;  %v3768_v12 = vld [vmem:[%s4901_s3 + $0x6c8] ss:$12 sps:$4 sm:$0xff]  }
 0x222   :  { %3321 = vmatprep.subr.bf16.mxu1 %v3718_v17  ;;  %v3767_v17 = vld [vmem:[%s4901_s3 + $0x7a0] ss:$12 sps:$4 sm:$0xff]  }
 0x223   :  { %3300 = vmatpush3.bf16.msra.mxu0 %v3717_v18  ;;  %v3770_v18 = vld [vmem:[%s4901_s3 + $0x848] ss:$12 sps:$4 sm:$0xff]  }
 0x224   :  { %3301 = vmatprep.subr.bf16.mxu0 %v3720_v33  ;;  %v3769_v33 = vld [vmem:[%s4901_s3 + $0x608] ss:$12 sps:$4 sm:$0xff]  }
 0x225   :  { %3322 = vmatpush3.bf16.msra.mxu1 %v3719_v21  ;;  %v3771_v21 = vld [vmem:[%s4901_s3 + $0x788] ss:$12 sps:$4 sm:$0xff]  }
 0x226   :  { %3323 = vmatprep.subr.bf16.mxu1 %v3722_v34 }
 0x227   :  { %3302 = vmatpush3.bf16.msra.mxu0 %v3721_v3 }
 0x228   :  { %3303 = vmatprep.subr.bf16.mxu0 %v3724_v38 }
 0x229   :  { %3324 = vmatpush3.bf16.msra.mxu1 %v3723_v40 }
 0x22a   :  { %3325 = vmatprep.subr.bf16.mxu1 %v3726_v6 }
 0x22b   :  { %3304 = vmatpush3.bf16.msra.mxu0 %v3725_v43 }
 0x22c   :  { %3305 = vmatprep.subr.bf16.mxu0 %v3728_v10 }
 0x22d   :  { %3326 = vmatpush3.bf16.msra.mxu1 %v3727_v44 }
 0x22e   :  { %3327 = vmatprep.subr.bf16.mxu1 %v3730_v45 }
 0x22f   :  { %3306 = vmatpush3.bf16.msra.mxu0 %v3729_v8 }
 0x230   :  { %3307 = vmatprep.subr.bf16.mxu0 %v3732_v36 }
 0x231   :  { %3328 = vmatpush3.bf16.msra.mxu1 %v3731_v22 }
 0x232   :  { %3329 = vmatprep.subr.bf16.mxu1 %v3734_v37 }
 0x233   :  { %3308 = vmatpush3.bf16.msra.mxu0 %v3733_v46 }
 0x234   :  { %3309 = vmatprep.subr.bf16.mxu0 %v3736_v47 }
 0x235   :  { %3330 = vmatpush3.bf16.msra.mxu1 %v3735_v49 }
 0x236   :  { %3331 = vmatprep.subr.bf16.mxu1 %v3738_v50 }
 0x237   :  { %3310 = vmatpush3.bf16.msra.mxu0 %v3737_v25 }
 0x238   :  { %3339 = vmatprep.subr.bf16.mxu0 %v3740_v52 }
 0x239   :  { %3332 = vmatpush3.bf16.msra.mxu1 %v3739_v4 }
 0x23a   :  { %2811 = vmatmul.mubr.bf16.vlgmr.msra.gmra.mxu0 %v4385_v35  ;;  %v2486_v14 = vpop.f32.mrf.mxu0  ;;  %3361 = vmatprep.subr.bf16.mxu1 %v3742_v53  ;;  %v3748_v35 = vld [vmem:[%s4901_s3 + $0x740] ss:$12 sps:$4 sm:$0xff]  }
 0x23b   :  { %3340 = vmatpush3.bf16.msra.mxu0 %v3741_v0  ;;  %2890 = vmatprep.mubr.bf16.mxu0 %v4390_v39  ;;  %v3747_v39 = vld [vmem:[%s4901_s3 + $0x818] ss:$12 sps:$4 sm:$0xff]  }
 0x23c   :  { %2851 = vmatmul.mubr.bf16.vlgmr.msra.gmra.mxu1 %v4398_v41  ;;  %v2488_v58 = vpop.f32.mrf.mxu0  ;;  %v2527_v59 = vpop.f32.mrf.mxu1  ;;  %3341 = vmatprep.subr.bf16.mxu0 %v3744_v54  ;;  %v3750_v41 = vld [vmem:[%s4901_s3 + $0x8c0] ss:$12 sps:$4 sm:$0xff]  }
 0x23d   :  { %v4817_v60 = vadd.f32 %v2527_v59, %v2486_v14  ;;  %3362 = vmatpush3.bf16.msra.mxu1 %v3743_v55  ;;  %2930 = vmatprep.mubr.bf16.mxu1 %v4404_v42  ;;  %v3752_v42 = vld [vmem:[%s4901_s3 + $0x728] ss:$12 sps:$4 sm:$0xff]  }
 0x23e   :  { %v2490_v61 = vpop.f32.mrf.mxu0  ;;  %v2529_v62 = vpop.f32.mrf.mxu1  ;;  %3363 = vmatprep.subr.bf16.mxu1 %v3746_v56 }
 0x23f   :  { %v2530_v63 = vadd.f32 %v2529_v62, %v2488_v58  ;;  %3342 = vmatpush3.bf16.msra.mxu0 %v3745_v57 }
 0x240   :  { %v2491_v23 = vpop.f32.mrf.mxu0  ;;  %v2531_v9 = vpop.f32.mrf.mxu1  ;;  %3343 = vmatprep.subr.bf16.mxu0 %v3748_v35 }
 0x241   :  { %3364 = vmatpush3.bf16.msra.mxu1 %v3747_v39 }
 0x242   :  { %v2532_v28 = vpop.f32.mrf.mxu1  ;;  %3365 = vmatprep.subr.bf16.mxu1 %v3750_v41 }
 0x243   :  { %3344 = vmatpush3.bf16.msra.mxu0 %v3749_v2 }
 0x244   :  { %3345 = vmatprep.subr.bf16.mxu0 %v3752_v42 }
 0x245   :  { %3366 = vmatpush3.bf16.msra.mxu1 %v3751_v27 }
 0x246   :  { %3367 = vmatprep.subr.bf16.mxu1 %v3754_v29 }
 0x247   :  { %3346 = vmatpush3.bf16.msra.mxu0 %v3753_v5 }
 0x248   :  { %3347 = vmatprep.subr.bf16.mxu0 %v3756_v11 }
 0x249   :  { %3368 = vmatpush3.bf16.msra.mxu1 %v3755_v13 }
 0x24a   :  { %3369 = vmatprep.subr.bf16.mxu1 %v3758_v15 }
 0x24b   :  { %3348 = vmatpush3.bf16.msra.mxu0 %v3757_v16 }
 0x24c   :  { %3349 = vmatprep.subr.bf16.mxu0 %v3760_v19 }
 0x24d   :  { %3370 = vmatpush3.bf16.msra.mxu1 %v3759_v20 }
 0x24e   :  { %3371 = vmatprep.subr.bf16.mxu1 %v3762_v24 }
 0x24f   :  { %3350 = vmatpush3.bf16.msra.mxu0 %v3761_v26 }
 0x250   :  { %3351 = vmatprep.subr.bf16.mxu0 %v3764_v30 }
 0x251   :  { %3372 = vmatpush3.bf16.msra.mxu1 %v3763_v31 }
 0x252   :  { %3373 = vmatprep.subr.bf16.mxu1 %v3766_v1 }
 0x253   :  { %3352 = vmatpush3.bf16.msra.mxu0 %v3765_v32 }
 0x254   :  { %3353 = vmatprep.subr.bf16.mxu0 %v3768_v12 }
 0x255   :  { %3374 = vmatpush3.bf16.msra.mxu1 %v3767_v17 }
 0x256   :  { %3375 = vmatprep.subr.bf16.mxu1 %v3770_v18 }
 0x257   :  { %3354 = vmatpush3.bf16.msra.mxu0 %v3769_v33 }
 0x259   :  { %3376 = vmatpush3.bf16.msra.mxu1 %v3771_v21 }
 0x25a   :  { %2891 = vmatmul.mubr.bf16.vlgmr.msra.gmra.mxu0 %v4593_v48 }
 0x25c   :  { %2931 = vmatmul.mubr.bf16.vlgmr.msra.gmra.mxu1 %v4604_v51 }
 0x27a   :  { %v2568_v34 = vpop.f32.mrf.mxu0 }
 0x27b   :  { %v2569_v3 = vadd.f32 %v2568_v34, %v4817_v60 }
 0x27c   :  { %v2570_v38 = vpop.f32.mrf.mxu0  ;;  %v2609_v40 = vpop.f32.mrf.mxu1 }
 0x27d   :  { %v2571_v6 = vadd.f32 %v2570_v38, %v2530_v63  ;;  %v2610_v43 = vadd.f32 %v2609_v40, %v2569_v3 }
 0x27e   :  { %v2572_v10 = vpop.f32.mrf.mxu0  ;;  %v2611_v44 = vpop.f32.mrf.mxu1 }
 0x27f   :  { %v2612_v45 = vadd.f32 %v2611_v44, %v2571_v6 }
 0x280   :  { %v2573_v8 = vpop.f32.mrf.mxu0  ;;  %v2613_v36 = vpop.f32.mrf.mxu1 }
 0x282   :  { %v2614_v22 = vpop.f32.mrf.mxu1 }
 0x2ba   :  { %v2650_v37 = vpop.f32.mrf.mxu0 }
 0x2bb   :  { %v2651_v46 = vadd.f32 %v2650_v37, %v2610_v43 }
 0x2bc   :  { %v2652_v47 = vpop.f32.mrf.mxu0  ;;  %v2691_v49 = vpop.f32.mrf.mxu1 }
 0x2bd   :  { %v2653_v48 = vadd.f32 %v2652_v47, %v2612_v45  ;;  %v2692_v50 = vadd.f32 %v2691_v49, %v2651_v46 }
 0x2be   :  { %v2654_v51 = vpop.f32.mrf.mxu0  ;;  %v2693_v25 = vpop.f32.mrf.mxu1 }
 0x2bf   :  { %v2694_v52 = vadd.f32 %v2693_v25, %v2653_v48 }
 0x2c0   :  { %v2655_v4 = vpop.f32.mrf.mxu0  ;;  %v2695_v53 = vpop.f32.mrf.mxu1 }
 0x2c1   :  { %v2941_v0 = vcombine.low %v2692_v50, %v2694_v52 }
 0x2c2   :  { %v2696_v54 = vpop.f32.mrf.mxu1 }
 0x2c3   :  { %v2948_v18 = vrot.slane %v2941_v0, %v3811_v7 }
 0x2da   :  { %v3267_v55 = vpop.f32.mrf.mxu0 }
 0x2dc   :  { %v3268_v14 = vpop.f32.mrf.mxu0  ;;  %v3289_v56 = vpop.f32.mrf.mxu1 }
 0x2dd   :  { %v3269_v27 = vadd.f32 %v3268_v14, %v3267_v55 }
 0x2de   :  { %v3270_v57 = vpop.f32.mrf.mxu0  ;;  %v3290_v58 = vpop.f32.mrf.mxu1 }
 0x2df   :  { %v3291_v42 = vadd.f32 %v3290_v58, %v3289_v56 }
 0x2e0   :  { %v3271_v59 = vpop.f32.mrf.mxu0  ;;  %v3292_v35 = vpop.f32.mrf.mxu1 }
 0x2e1   :  { %v2773_v29 = vadd.f32 %v3291_v42, %v3269_v27 }
 0x2e2   :  { %v3293_v60 = vpop.f32.mrf.mxu1 }
 0x2fa   :  { %v3311_v39 = vpop.f32.mrf.mxu0 }
 0x2fc   :  { %v3312_v61 = vpop.f32.mrf.mxu0  ;;  %v3333_v62 = vpop.f32.mrf.mxu1 }
 0x2fd   :  { %v3313_v28 = vadd.f32 %v3312_v61, %v3311_v39 }
 0x2fe   :  { %v3314_v41 = vpop.f32.mrf.mxu0  ;;  %v3334_v63 = vpop.f32.mrf.mxu1 }
 0x2ff   :  { %v2813_v5 = vadd.f32 %v3313_v28, %v2773_v29  ;;  %v3335_v11 = vadd.f32 %v3334_v63, %v3333_v62 }
 0x300   :  { %v3315_v2 = vpop.f32.mrf.mxu0  ;;  %v3336_v23 = vpop.f32.mrf.mxu1 }
 0x301   :  { %v2853_v19 = vadd.f32 %v3335_v11, %v2813_v5 }
 0x302   :  { %v3337_v9 = vpop.f32.mrf.mxu1 }
 0x31a   :  { %v3355_v13 = vpop.f32.mrf.mxu0 }
 0x31c   :  { %v3356_v15 = vpop.f32.mrf.mxu0  ;;  %v3377_v16 = vpop.f32.mrf.mxu1 }
 0x31d   :  { %v3357_v20 = vadd.f32 %v3356_v15, %v3355_v13 }
 0x31e   :  { %v3358_v24 = vpop.f32.mrf.mxu0  ;;  %v3378_v26 = vpop.f32.mrf.mxu1 }
 0x31f   :  { %v2893_v30 = vadd.f32 %v3357_v20, %v2853_v19  ;;  %v3379_v31 = vadd.f32 %v3378_v26, %v3377_v16 }
 0x320   :  { %v3359_v1 = vpop.f32.mrf.mxu0  ;;  %v3380_v32 = vpop.f32.mrf.mxu1 }
 0x321   :  { %v2933_v12 = vadd.f32 %v3379_v31, %v2893_v30 }
 0x322   :  { %v3381_v17 = vpop.f32.mrf.mxu1 }
 0x323   :  { %v2955_v33 = vrot.slane %v2933_v12, %v3811_v7 }
 0x325   :  { %v2956_v21 = vcombine.low %v2948_v18, %v2955_v33 }
 0x327   :  { %2958 = vst [vmem:[%s4904_s4] sm:$0x3f] %v2956_v21 }

</bundles_post_ra>
